<compile_context>
chip_gen: v5e
topology: v5e:2x2
jax: 0.10.0
libtpu: 0.0.40
codegen_flags: <defaults>
</compile_context>

<pallas_src>
import functools

import jax
import jax.numpy as jnp
import numpy as np
from jax import lax
from jax.experimental import pallas as pl
from jax.experimental.pallas import tpu as pltpu


def _round_up(v, m):
    return (v + m - 1) // m * m


# ----------------------------------------------------------------------------
# Kernel A: 3x3 conv (stride 1, pad K//2) + per-tile BN partial stats.
# Optionally applies a fused "previous BN affine + ReLU" to the input tile
# before convolving (used so ConvBnReLU's activation never round-trips HBM).
# ----------------------------------------------------------------------------
def _conv_stats_kernel(x_ref, w_ref, *rest, H, W, K, apply_pre_act):
    if apply_pre_act:
        scale_ref, shift_ref, y_ref, s_ref, ss_ref, xp_scr = rest
    else:
        y_ref, s_ref, ss_ref, xp_scr = rest

    pad = (K - 1) // 2
    Cin = x_ref.shape[-1]
    Cout = y_ref.shape[-1]
    cdtype = xp_scr.dtype

    # Load this batch element's tile; optionally apply BN1 affine + ReLU (f32).
    tile = x_ref[0]                                        # (H, W, Cin)
    if apply_pre_act:
        t = tile.astype(jnp.float32) * scale_ref[0] + shift_ref[0]
        tile = jnp.maximum(t, 0.0)

    # In-kernel spatial zero padding into a VMEM scratch slab.
    xp_scr[...] = jnp.zeros_like(xp_scr)
    xp_scr[pad:pad + H, pad:pad + W, :] = tile.astype(cdtype)
    xp = xp_scr[...]                                       # (H+K-1, W+K-1, Cin)

    # im2col: one (H*W, K*K*Cin) slab -> single MXU matmul.
    cols = []
    for kh in range(K):
        for kw in range(K):
            cols.append(xp[kh:kh + H, kw:kw + W, :].reshape(H * W, Cin))
    lhs = jnp.concatenate(cols, axis=1)                    # (H*W, K*K*Cin)

    acc = jnp.dot(lhs, w_ref[...],
                  preferred_element_type=jnp.float32)      # (H*W, Cout) f32

    y_ref[0] = acc.reshape(H, W, Cout).astype(y_ref.dtype)
    # Per-tile BN partial statistics (per output channel).
    s_ref[0] = jnp.sum(acc, axis=0, keepdims=True)
    ss_ref[0] = jnp.sum(acc * acc, axis=0, keepdims=True)


def _conv_bn_stats_call(x_nhwc, w_flat, pre_scale=None, pre_shift=None, *,
                        K, compute_dtype):
    """Runs kernel A over a (N,) grid. Returns (y_f32, sums, sumsq)."""
    N, H, W, Cin = x_nhwc.shape
    KK_Cin, Cout = w_flat.shape
    assert KK_Cin == K * K * Cin
    Hp, Wp = H + K - 1, W + K - 1
    apply_pre = pre_scale is not None

    kernel = functools.partial(_conv_stats_kernel, H=H, W=W, K=K,
                               apply_pre_act=apply_pre)

    in_specs = [
        pl.BlockSpec((1, H, W, Cin), lambda n: (n, 0, 0, 0)),
        pl.BlockSpec((KK_Cin, Cout), lambda n: (0, 0)),
    ]
    args = [x_nhwc, w_flat]
    if apply_pre:
        in_specs += [
            pl.BlockSpec((1, Cin), lambda n: (0, 0)),
            pl.BlockSpec((1, Cin), lambda n: (0, 0)),
        ]
        args += [pre_scale, pre_shift]

    y, s, ss = pl.pallas_call(
        kernel,
        out_shape=(
            jax.ShapeDtypeStruct((N, H, W, Cout), jnp.float32),
            jax.ShapeDtypeStruct((N, 1, Cout), jnp.float32),
            jax.ShapeDtypeStruct((N, 1, Cout), jnp.float32),
        ),
        grid=(N,),
        in_specs=in_specs,
        out_specs=(
            pl.BlockSpec((1, H, W, Cout), lambda n: (n, 0, 0, 0)),
            pl.BlockSpec((1, 1, Cout), lambda n: (n, 0, 0)),
            pl.BlockSpec((1, 1, Cout), lambda n: (n, 0, 0)),
        ),
        scratch_shapes=[pltpu.VMEM((Hp, Wp, Cin), compute_dtype)],
        compiler_params=pltpu.CompilerParams(
            dimension_semantics=("parallel",)),
    )(*args)
    return y, s, ss


# ----------------------------------------------------------------------------
# Kernel B: BN2 affine + residual add + ReLU, tiled over (N, H-tiles).
# ----------------------------------------------------------------------------
def _bn_add_relu_kernel(y_ref, res_ref, scale_ref, shift_ref, o_ref):
    y = y_ref[...]                                          # (1, th, W, P) f32
    z = y * scale_ref[0] + shift_ref[0] + res_ref[...]
    o_ref[...] = jnp.maximum(z, 0.0).astype(o_ref.dtype)


def _bn_scale_shift(sums, sumsq, gamma, beta, count, eps):
    """Fold training-mode batch-stat BN into a per-channel scale/shift."""
    s = jnp.sum(sums, axis=(0, 1))                          # (P,)
    ss = jnp.sum(sumsq, axis=(0, 1))
    mean = s / count
    var = jnp.maximum(ss / count - mean * mean, 0.0)        # biased, torch-style
    inv = lax.rsqrt(var + eps)
    scale = gamma * inv
    shift = beta - mean * scale
    return scale.reshape(1, -1), shift.reshape(1, -1)


# ----------------------------------------------------------------------------
# ResidualBlock forward (stride=1):
#   out = relu( x + BN2(conv2( relu(BN1(conv1(x))) )) )
# ----------------------------------------------------------------------------
def residual_block(x_nchw, w1, g1, b1, w2, g2, b2, *,
                   eps=1e-5, compute_dtype=jnp.bfloat16):
    N, Cin, H, W = x_nchw.shape
    P1, Cin_w, K, K2 = w1.shape
    P2, P1_w, K3, K4 = w2.shape
    assert Cin == Cin_w and P1 == P1_w and P2 == P1 and K == K2 == K3 == K4
    assert K % 2 == 1
    assert Cin == P1, "stride=1 residual add requires in_planes == planes"

    LANE = 128
    Cp = _round_up(Cin, LANE)
    Pp = _round_up(P1, LANE)   # == Cp here

    # NCHW -> NHWC, channel-pad to lane multiple (lane-dense everywhere).
    x = jnp.transpose(x_nchw, (0, 2, 3, 1)).astype(jnp.float32)
    x_pad = jnp.pad(x, ((0, 0), (0, 0), (0, 0), (0, Cp - Cin)))   # f32 residual
    x_c = x_pad.astype(compute_dtype)                             # bf16 conv input

    def prep_w(w, cin_pad, cout_pad):
        w_hwio = jnp.transpose(w, (2, 3, 1, 0))                   # (K,K,Cin,Cout)
        w_hwio = jnp.pad(w_hwio, ((0, 0), (0, 0),
                                  (0, cin_pad - w_hwio.shape[2]),
                                  (0, cout_pad - w_hwio.shape[3])))
        return w_hwio.reshape(K * K * cin_pad, cout_pad).astype(compute_dtype)

    w1f = prep_w(w1, Cp, Pp)
    w2f = prep_w(w2, Pp, Pp)

    def pad_vec(v, p):
        return jnp.pad(v.astype(jnp.float32), (0, p - v.shape[0]))

    g1p, b1p = pad_vec(g1, Pp), pad_vec(b1, Pp)
    g2p, b2p = pad_vec(g2, Pp), pad_vec(b2, Pp)

    count = N * H * W

    # conv1 + BN1 batch statistics (stats fused into conv epilogue).
    y1, s1, ss1 = _conv_bn_stats_call(x_c, w1f, K=K, compute_dtype=compute_dtype)
    scale1, shift1 = _bn_scale_shift(s1, ss1, g1p, b1p, count, eps)

    # conv2 with BN1-affine + ReLU fused into its input path, + BN2 stats.
    y2, s2, ss2 = _conv_bn_stats_call(y1, w2f, scale1, shift1,
                                      K=K, compute_dtype=compute_dtype)
    scale2, shift2 = _bn_scale_shift(s2, ss2, g2p, b2p, count, eps)

    # BN2 affine + residual + ReLU, tiled over (N, H-tiles), lane-dense output.
    th = 8 if H % 8 == 0 else H
    out_pad = pl.pallas_call(
        _bn_add_relu_kernel,
        out_shape=jax.ShapeDtypeStruct((N, H, W, Pp), jnp.float32),
        grid=(N, H // th),
        in_specs=[
            pl.BlockSpec((1, th, W, Pp), lambda n, h: (n, h, 0, 0)),
            pl.BlockSpec((1, th, W, Pp), lambda n, h: (n, h, 0, 0)),
            pl.BlockSpec((1, Pp), lambda n, h: (0, 0)),
            pl.BlockSpec((1, Pp), lambda n, h: (0, 0)),
        ],
        out_specs=pl.BlockSpec((1, th, W, Pp), lambda n, h: (n, h, 0, 0)),
        compiler_params=pltpu.CompilerParams(
            dimension_semantics=("parallel", "parallel")),
    )(y2, x_pad, scale2, shift2)

    out = out_pad[:, :, :, :P1]
    return jnp.transpose(out, (0, 3, 1, 2))                      # back to NCHW


# ----------------------------------------------------------------------------
# Pure-JAX reference (mirrors the kernel's bf16 rounding points).
# ----------------------------------------------------------------------------
def _reference(x, w1, g1, b1, w2, g2, b2, eps, compute_dtype):
    f32 = jnp.float32

    def q(a):
        return a.astype(compute_dtype).astype(f32)

    def conv(inp, w):
        return lax.conv_general_dilated(
            inp, w, (1, 1), ((1, 1), (1, 1)),
            dimension_numbers=("NCHW", "OIHW", "NCHW"))

    def bn(y, g, b):
        mean = jnp.mean(y, axis=(0, 2, 3), keepdims=True)
        var = jnp.mean((y - mean) ** 2, axis=(0, 2, 3), keepdims=True)
        return ((y - mean) * lax.rsqrt(var + eps) * g.reshape(1, -1, 1, 1)
                + b.reshape(1, -1, 1, 1))

    y1 = conv(q(x), q(w1))
    a1 = q(jax.nn.relu(bn(y1, g1, b1)))
    y2 = conv(a1, q(w2))
    return jax.nn.relu(x + bn(y2, g2, b2))


if __name__ == "__main__":
    N, C, H, W, K = 2, 8, 16, 16, 3     # in_planes == planes (stride=1 block)

    key = jax.random.PRNGKey(0)
    ks = jax.random.split(key, 7)
    x = jax.random.normal(ks[0], (N, C, H, W), jnp.float32)
    w1 = jax.random.normal(ks[1], (C, C, K, K), jnp.float32) * 0.1
    g1 = 1.0 + 0.1 * jax.random.normal(ks[2], (C,), jnp.float32)
    b1 = 0.1 * jax.random.normal(ks[3], (C,), jnp.float32)
    w2 = jax.random.normal(ks[4], (C, C, K, K), jnp.float32) * 0.1
    g2 = 1.0 + 0.1 * jax.random.normal(ks[5], (C,), jnp.float32)
    b2 = 0.1 * jax.random.normal(ks[6], (C,), jnp.float32)

    fwd = jax.jit(functools.partial(residual_block, eps=1e-5,
                                    compute_dtype=jnp.bfloat16))
    out = fwd(x, w1, g1, b1, w2, g2, b2)
    out = jax.block_until_ready(out)

    ref = _reference(x, w1, g1, b1, w2, g2, b2, 1e-5, jnp.bfloat16)
    np.testing.assert_allclose(np.asarray(out), np.asarray(ref),
                               atol=3e-3, rtol=3e-3)

    print("KERNEL_OK")
</pallas_src>

<mosaic_0001>
module attributes {stable_mosaic.version = 11 : i64} {
  func.func @_conv_stats_kernel(%arg0: i32, %arg1: memref<1x16x16x128xbf16, #tpu.memory_space<vmem>>, %arg2: memref<1152x128xbf16, #tpu.memory_space<vmem>>, %arg3: memref<1x16x16x128xf32, #tpu.memory_space<vmem>>, %arg4: memref<1x1x128xf32, #tpu.memory_space<vmem>>, %arg5: memref<1x1x128xf32, #tpu.memory_space<vmem>>, %arg6: memref<18x18x128xbf16, #tpu.memory_space<vmem>>) attributes {dimension_semantics = [#tpu.dimension_semantics<parallel>], iteration_bounds = array<i64: 2>, scalar_prefetch = 0 : i64, scratch_operands = 1 : i64, tpu.core_type = #tpu.core_type<tc>, window_params = [{transform_indices = @transform_0, window_bounds = array<i64: 1, 16, 16, 128>}, {pipeline_mode = #tpu.pipeline_mode<synchronous>, transform_indices = @transform_1, window_bounds = array<i64: 1152, 128>}, {transform_indices = @transform_2, window_bounds = array<i64: 1, 16, 16, 128>}, {transform_indices = @transform_3, window_bounds = array<i64: 1, 1, 128>}, {transform_indices = @transform_4, window_bounds = array<i64: 1, 1, 128>}]} {
    %c0 = arith.constant 0 : index
    %c0_0 = arith.constant 0 : index
    %c0_1 = arith.constant 0 : index
    %c0_2 = arith.constant 0 : index
    %0 = vector.load %arg1[%c0, %c0_0, %c0_1, %c0_2] : memref<1x16x16x128xbf16, #tpu.memory_space<vmem>>, vector<1x16x16x128xbf16>
    %1 = vector.shape_cast %0 : vector<1x16x16x128xbf16> to vector<16x16x128xbf16>
    %cst = arith.constant 0.000000e+00 : bf16
    %2 = vector.broadcast %cst : bf16 to vector<18x18x128xbf16>
    %c0_3 = arith.constant 0 : index
    %c0_4 = arith.constant 0 : index
    %c0_5 = arith.constant 0 : index
    %3 = vector.load %arg6[%c0_3, %c0_4, %c0_5] : memref<18x18x128xbf16, #tpu.memory_space<vmem>>, vector<18x18x128xbf16>
    tpu.vector_store %arg6[%c0_3, %c0_4, %c0_5], %2 {strides = array<i32>} : memref<18x18x128xbf16, #tpu.memory_space<vmem>>, vector<18x18x128xbf16>,
    %c1 = arith.constant 1 : index
    %c1_6 = arith.constant 1 : index
    %c0_7 = arith.constant 0 : index
    %4 = vector.load %arg6[%c1, %c1_6, %c0_7] : memref<18x18x128xbf16, #tpu.memory_space<vmem>>, vector<16x16x128xbf16>
    tpu.vector_store %arg6[%c1, %c1_6, %c0_7], %1 {strides = array<i32>} : memref<18x18x128xbf16, #tpu.memory_space<vmem>>, vector<16x16x128xbf16>,
    %c0_8 = arith.constant 0 : index
    %c0_9 = arith.constant 0 : index
    %c0_10 = arith.constant 0 : index
    %5 = vector.load %arg6[%c0_8, %c0_9, %c0_10] : memref<18x18x128xbf16, #tpu.memory_space<vmem>>, vector<18x18x128xbf16>
    %6 = vector.extract_strided_slice %5 {offsets = [0, 0, 0], sizes = [16, 16, 128], strides = [1, 1, 1]} : vector<18x18x128xbf16> to vector<16x16x128xbf16>
    %7 = vector.shape_cast %6 : vector<16x16x128xbf16> to vector<256x128xbf16>
    %8 = vector.extract_strided_slice %5 {offsets = [0, 1, 0], sizes = [16, 16, 128], strides = [1, 1, 1]} : vector<18x18x128xbf16> to vector<16x16x128xbf16>
    %9 = vector.shape_cast %8 : vector<16x16x128xbf16> to vector<256x128xbf16>
    %10 = vector.extract_strided_slice %5 {offsets = [0, 2, 0], sizes = [16, 16, 128], strides = [1, 1, 1]} : vector<18x18x128xbf16> to vector<16x16x128xbf16>
    %11 = vector.shape_cast %10 : vector<16x16x128xbf16> to vector<256x128xbf16>
    %12 = vector.extract_strided_slice %5 {offsets = [1, 0, 0], sizes = [16, 16, 128], strides = [1, 1, 1]} : vector<18x18x128xbf16> to vector<16x16x128xbf16>
    %13 = vector.shape_cast %12 : vector<16x16x128xbf16> to vector<256x128xbf16>
    %14 = vector.extract_strided_slice %5 {offsets = [1, 1, 0], sizes = [16, 16, 128], strides = [1, 1, 1]} : vector<18x18x128xbf16> to vector<16x16x128xbf16>
    %15 = vector.shape_cast %14 : vector<16x16x128xbf16> to vector<256x128xbf16>
    %16 = vector.extract_strided_slice %5 {offsets = [1, 2, 0], sizes = [16, 16, 128], strides = [1, 1, 1]} : vector<18x18x128xbf16> to vector<16x16x128xbf16>
    %17 = vector.shape_cast %16 : vector<16x16x128xbf16> to vector<256x128xbf16>
    %18 = vector.extract_strided_slice %5 {offsets = [2, 0, 0], sizes = [16, 16, 128], strides = [1, 1, 1]} : vector<18x18x128xbf16> to vector<16x16x128xbf16>
    %19 = vector.shape_cast %18 : vector<16x16x128xbf16> to vector<256x128xbf16>
    %20 = vector.extract_strided_slice %5 {offsets = [2, 1, 0], sizes = [16, 16, 128], strides = [1, 1, 1]} : vector<18x18x128xbf16> to vector<16x16x128xbf16>
    %21 = vector.shape_cast %20 : vector<16x16x128xbf16> to vector<256x128xbf16>
    %22 = vector.extract_strided_slice %5 {offsets = [2, 2, 0], sizes = [16, 16, 128], strides = [1, 1, 1]} : vector<18x18x128xbf16> to vector<16x16x128xbf16>
    %23 = vector.shape_cast %22 : vector<16x16x128xbf16> to vector<256x128xbf16>
    %24 = tpu.concatenate %7, %9, %11, %13, %15, %17, %19, %21, %23 in 1 : vector<256x128xbf16>, vector<256x128xbf16>, vector<256x128xbf16>, vector<256x128xbf16>, vector<256x128xbf16>, vector<256x128xbf16>, vector<256x128xbf16>, vector<256x128xbf16>, vector<256x128xbf16> -> vector<256x1152xbf16>
    %c0_11 = arith.constant 0 : index
    %c0_12 = arith.constant 0 : index
    %25 = vector.load %arg2[%c0_11, %c0_12] : memref<1152x128xbf16, #tpu.memory_space<vmem>>, vector<1152x128xbf16>
    %cst_13 = arith.constant dense<0.000000e+00> : vector<256x128xf32>
    %26 = tpu.matmul %24, %25, %cst_13 {dimension_numbers = #tpu.dot_dimension_numbers<[1], [0], [0], [1], [0, 0, 1, 1], [], []>} : vector<256x1152xbf16>, vector<1152x128xbf16>, vector<256x128xf32> -> vector<256x128xf32>
    %27 = vector.shape_cast %26 : vector<256x128xf32> to vector<16x16x128xf32>
    %c0_14 = arith.constant 0 : index
    %c0_15 = arith.constant 0 : index
    %c0_16 = arith.constant 0 : index
    %c0_17 = arith.constant 0 : index
    %28 = vector.load %arg3[%c0_14, %c0_15, %c0_16, %c0_17] : memref<1x16x16x128xf32, #tpu.memory_space<vmem>>, vector<1x16x16x128xf32>
    %29 = vector.shape_cast %28 : vector<1x16x16x128xf32> to vector<16x16x128xf32>
    %30 = vector.shape_cast %27 : vector<16x16x128xf32> to vector<1x16x16x128xf32>
    tpu.vector_store %arg3[%c0_14, %c0_15, %c0_16, %c0_17], %30 {strides = array<i32>} : memref<1x16x16x128xf32, #tpu.memory_space<vmem>>, vector<1x16x16x128xf32>,
    %cst_18 = arith.constant dense<0.000000e+00> : vector<128xf32>
    %31 = vector.multi_reduction <add>, %26, %cst_18 [0] : vector<256x128xf32> to vector<128xf32>
    %32 = vector.shape_cast %31 : vector<128xf32> to vector<1x128xf32>
    %c0_19 = arith.constant 0 : index
    %c0_20 = arith.constant 0 : index
    %c0_21 = arith.constant 0 : index
    %33 = vector.load %arg4[%c0_19, %c0_20, %c0_21] : memref<1x1x128xf32, #tpu.memory_space<vmem>>, vector<1x1x128xf32>
    %34 = vector.shape_cast %33 : vector<1x1x128xf32> to vector<1x128xf32>
    %35 = vector.shape_cast %32 : vector<1x128xf32> to vector<1x1x128xf32>
    tpu.vector_store %arg4[%c0_19, %c0_20, %c0_21], %35 {strides = array<i32>} : memref<1x1x128xf32, #tpu.memory_space<vmem>>, vector<1x1x128xf32>,
    %36 = arith.mulf %26, %26 : vector<256x128xf32>
    %cst_22 = arith.constant dense<0.000000e+00> : vector<128xf32>
    %37 = vector.multi_reduction <add>, %36, %cst_22 [0] : vector<256x128xf32> to vector<128xf32>
    %38 = vector.shape_cast %37 : vector<128xf32> to vector<1x128xf32>
    %c0_23 = arith.constant 0 : index
    %c0_24 = arith.constant 0 : index
    %c0_25 = arith.constant 0 : index
    %39 = vector.load %arg5[%c0_23, %c0_24, %c0_25] : memref<1x1x128xf32, #tpu.memory_space<vmem>>, vector<1x1x128xf32>
    %40 = vector.shape_cast %39 : vector<1x1x128xf32> to vector<1x128xf32>
    %41 = vector.shape_cast %38 : vector<1x128xf32> to vector<1x1x128xf32>
    tpu.vector_store %arg5[%c0_23, %c0_24, %c0_25], %41 {strides = array<i32>} : memref<1x1x128xf32, #tpu.memory_space<vmem>>, vector<1x1x128xf32>,
    return
  }
  func.func @transform_0(%arg0: i32) -> (i32, i32, i32, i32) {
    %c0_i32 = arith.constant 0 : i32
    %c0_i32_0 = arith.constant 0 : i32
    %c0_i32_1 = arith.constant 0 : i32
    %c0_i32_2 = arith.constant 0 : i32
    return %arg0, %c0_i32, %c0_i32_0, %c0_i32_1 : i32, i32, i32, i32
  }
  func.func @transform_1(%arg0: i32) -> (i32, i32) {
    %c0_i32 = arith.constant 0 : i32
    %c0_i32_0 = arith.constant 0 : i32
    %c0_i32_1 = arith.constant 0 : i32
    return %c0_i32, %c0_i32_0 : i32, i32
  }
  func.func @transform_2(%arg0: i32) -> (i32, i32, i32, i32) {
    %c0_i32 = arith.constant 0 : i32
    %c0_i32_0 = arith.constant 0 : i32
    %c0_i32_1 = arith.constant 0 : i32
    %c0_i32_2 = arith.constant 0 : i32
    return %arg0, %c0_i32, %c0_i32_0, %c0_i32_1 : i32, i32, i32, i32
  }
  func.func @transform_3(%arg0: i32) -> (i32, i32, i32) {
    %c0_i32 = arith.constant 0 : i32
    %c0_i32_0 = arith.constant 0 : i32
    %c0_i32_1 = arith.constant 0 : i32
    return %arg0, %c0_i32, %c0_i32_0 : i32, i32, i32
  }
  func.func @transform_4(%arg0: i32) -> (i32, i32, i32) {
    %c0_i32 = arith.constant 0 : i32
    %c0_i32_0 = arith.constant 0 : i32
    %c0_i32_1 = arith.constant 0 : i32
    return %arg0, %c0_i32, %c0_i32_0 : i32, i32, i32
  }
}

module attributes {stable_mosaic.version = 11 : i64} {
  func.func @_bn_add_relu_kernel(%arg0: i32, %arg1: i32, %arg2: memref<1x8x16x128xf32, #tpu.memory_space<vmem>>, %arg3: memref<1x8x16x128xf32, #tpu.memory_space<vmem>>, %arg4: memref<1x128xf32, #tpu.memory_space<vmem>>, %arg5: memref<1x128xf32, #tpu.memory_space<vmem>>, %arg6: memref<1x8x16x128xf32, #tpu.memory_space<vmem>>) attributes {dimension_semantics = [#tpu.dimension_semantics<parallel>, #tpu.dimension_semantics<parallel>], iteration_bounds = array<i64: 2, 2>, scalar_prefetch = 0 : i64, scratch_operands = 0 : i64, tpu.core_type = #tpu.core_type<tc>, window_params = [{transform_indices = @transform_0, window_bounds = array<i64: 1, 8, 16, 128>}, {transform_indices = @transform_1, window_bounds = array<i64: 1, 8, 16, 128>}, {pipeline_mode = #tpu.pipeline_mode<synchronous>, transform_indices = @transform_2, window_bounds = array<i64: 1, 128>}, {pipeline_mode = #tpu.pipeline_mode<synchronous>, transform_indices = @transform_3, window_bounds = array<i64: 1, 128>}, {transform_indices = @transform_4, window_bounds = array<i64: 1, 8, 16, 128>}]} {
    %c0 = arith.constant 0 : index
    %c0_0 = arith.constant 0 : index
    %c0_1 = arith.constant 0 : index
    %c0_2 = arith.constant 0 : index
    %0 = vector.load %arg2[%c0, %c0_0, %c0_1, %c0_2] : memref<1x8x16x128xf32, #tpu.memory_space<vmem>>, vector<1x8x16x128xf32>
    %c0_3 = arith.constant 0 : index
    %c0_4 = arith.constant 0 : index
    %1 = vector.load %arg4[%c0_3, %c0_4] : memref<1x128xf32, #tpu.memory_space<vmem>>, vector<1x128xf32>
    %2 = vector.shape_cast %1 : vector<1x128xf32> to vector<128xf32>
    %3 = vector.shape_cast %2 : vector<128xf32> to vector<1x1x1x128xf32>
    %4 = vector.broadcast %3 : vector<1x1x1x128xf32> to vector<1x8x16x128xf32>
    %5 = arith.mulf %0, %4 : vector<1x8x16x128xf32>
    %c0_5 = arith.constant 0 : index
    %c0_6 = arith.constant 0 : index
    %6 = vector.load %arg5[%c0_5, %c0_6] : memref<1x128xf32, #tpu.memory_space<vmem>>, vector<1x128xf32>
    %7 = vector.shape_cast %6 : vector<1x128xf32> to vector<128xf32>
    %8 = vector.shape_cast %7 : vector<128xf32> to vector<1x1x1x128xf32>
    %9 = vector.broadcast %8 : vector<1x1x1x128xf32> to vector<1x8x16x128xf32>
    %10 = arith.addf %5, %9 : vector<1x8x16x128xf32>
    %c0_7 = arith.constant 0 : index
    %c0_8 = arith.constant 0 : index
    %c0_9 = arith.constant 0 : index
    %c0_10 = arith.constant 0 : index
    %11 = vector.load %arg3[%c0_7, %c0_8, %c0_9, %c0_10] : memref<1x8x16x128xf32, #tpu.memory_space<vmem>>, vector<1x8x16x128xf32>
    %12 = arith.addf %10, %11 : vector<1x8x16x128xf32>
    %cst = arith.constant 0.000000e+00 : f32
    %13 = vector.broadcast %cst : f32 to vector<1x8x16x128xf32>
    %14 = arith.maximumf %12, %13 : vector<1x8x16x128xf32>
    %c0_11 = arith.constant 0 : index
    %c0_12 = arith.constant 0 : index
    %c0_13 = arith.constant 0 : index
    %c0_14 = arith.constant 0 : index
    %15 = vector.load %arg6[%c0_11, %c0_12, %c0_13, %c0_14] : memref<1x8x16x128xf32, #tpu.memory_space<vmem>>, vector<1x8x16x128xf32>
    tpu.vector_store %arg6[%c0_11, %c0_12, %c0_13, %c0_14], %14 {strides = array<i32>} : memref<1x8x16x128xf32, #tpu.memory_space<vmem>>, vector<1x8x16x128xf32>,
    return
  }
  func.func @transform_0(%arg0: i32, %arg1: i32) -> (i32, i32, i32, i32) {
    %c0_i32 = arith.constant 0 : i32
    %c0_i32_0 = arith.constant 0 : i32
    %c0_i32_1 = arith.constant 0 : i32
    return %arg0, %arg1, %c0_i32, %c0_i32_0 : i32, i32, i32, i32
  }
  func.func @transform_1(%arg0: i32, %arg1: i32) -> (i32, i32, i32, i32) {
    %c0_i32 = arith.constant 0 : i32
    %c0_i32_0 = arith.constant 0 : i32
    %c0_i32_1 = arith.constant 0 : i32
    return %arg0, %arg1, %c0_i32, %c0_i32_0 : i32, i32, i32, i32
  }
  func.func @transform_2(%arg0: i32, %arg1: i32) -> (i32, i32) {
    %c0_i32 = arith.constant 0 : i32
    %c0_i32_0 = arith.constant 0 : i32
    %c0_i32_1 = arith.constant 0 : i32
    return %c0_i32, %c0_i32_0 : i32, i32
  }
  func.func @transform_3(%arg0: i32, %arg1: i32) -> (i32, i32) {
    %c0_i32 = arith.constant 0 : i32
    %c0_i32_0 = arith.constant 0 : i32
    %c0_i32_1 = arith.constant 0 : i32
    return %c0_i32, %c0_i32_0 : i32, i32
  }
  func.func @transform_4(%arg0: i32, %arg1: i32) -> (i32, i32, i32, i32) {
    %c0_i32 = arith.constant 0 : i32
    %c0_i32_0 = arith.constant 0 : i32
    %c0_i32_1 = arith.constant 0 : i32
    return %arg0, %arg1, %c0_i32, %c0_i32_0 : i32, i32, i32, i32
  }
}

module attributes {stable_mosaic.version = 11 : i64} {
  func.func @_conv_stats_kernel(%arg0: i32, %arg1: memref<1x16x16x128xf32, #tpu.memory_space<vmem>>, %arg2: memref<1152x128xbf16, #tpu.memory_space<vmem>>, %arg3: memref<1x128xf32, #tpu.memory_space<vmem>>, %arg4: memref<1x128xf32, #tpu.memory_space<vmem>>, %arg5: memref<1x16x16x128xf32, #tpu.memory_space<vmem>>, %arg6: memref<1x1x128xf32, #tpu.memory_space<vmem>>, %arg7: memref<1x1x128xf32, #tpu.memory_space<vmem>>, %arg8: memref<18x18x128xbf16, #tpu.memory_space<vmem>>) attributes {dimension_semantics = [#tpu.dimension_semantics<parallel>], iteration_bounds = array<i64: 2>, scalar_prefetch = 0 : i64, scratch_operands = 1 : i64, tpu.core_type = #tpu.core_type<tc>, window_params = [{transform_indices = @transform_0, window_bounds = array<i64: 1, 16, 16, 128>}, {pipeline_mode = #tpu.pipeline_mode<synchronous>, transform_indices = @transform_1, window_bounds = array<i64: 1152, 128>}, {pipeline_mode = #tpu.pipeline_mode<synchronous>, transform_indices = @transform_2, window_bounds = array<i64: 1, 128>}, {pipeline_mode = #tpu.pipeline_mode<synchronous>, transform_indices = @transform_3, window_bounds = array<i64: 1, 128>}, {transform_indices = @transform_4, window_bounds = array<i64: 1, 16, 16, 128>}, {transform_indices = @transform_5, window_bounds = array<i64: 1, 1, 128>}, {transform_indices = @transform_6, window_bounds = array<i64: 1, 1, 128>}]} {
    %c0 = arith.constant 0 : index
    %c0_0 = arith.constant 0 : index
    %c0_1 = arith.constant 0 : index
    %c0_2 = arith.constant 0 : index
    %0 = vector.load %arg1[%c0, %c0_0, %c0_1, %c0_2] : memref<1x16x16x128xf32, #tpu.memory_space<vmem>>, vector<1x16x16x128xf32>
    %1 = vector.shape_cast %0 : vector<1x16x16x128xf32> to vector<16x16x128xf32>
    %c0_3 = arith.constant 0 : index
    %c0_4 = arith.constant 0 : index
    %2 = vector.load %arg3[%c0_3, %c0_4] : memref<1x128xf32, #tpu.memory_space<vmem>>, vector<1x128xf32>
    %3 = vector.shape_cast %2 : vector<1x128xf32> to vector<128xf32>
    %4 = vector.shape_cast %3 : vector<128xf32> to vector<1x1x128xf32>
    %5 = vector.broadcast %4 : vector<1x1x128xf32> to vector<16x16x128xf32>
    %6 = arith.mulf %1, %5 : vector<16x16x128xf32>
    %c0_5 = arith.constant 0 : index
    %c0_6 = arith.constant 0 : index
    %7 = vector.load %arg4[%c0_5, %c0_6] : memref<1x128xf32, #tpu.memory_space<vmem>>, vector<1x128xf32>
    %8 = vector.shape_cast %7 : vector<1x128xf32> to vector<128xf32>
    %9 = vector.shape_cast %8 : vector<128xf32> to vector<1x1x128xf32>
    %10 = vector.broadcast %9 : vector<1x1x128xf32> to vector<16x16x128xf32>
    %11 = arith.addf %6, %10 : vector<16x16x128xf32>
    %cst = arith.constant 0.000000e+00 : f32
    %12 = vector.broadcast %cst : f32 to vector<16x16x128xf32>
    %13 = arith.maximumf %11, %12 : vector<16x16x128xf32>
    %cst_7 = arith.constant 0.000000e+00 : bf16
    %14 = vector.broadcast %cst_7 : bf16 to vector<18x18x128xbf16>
    %c0_8 = arith.constant 0 : index
    %c0_9 = arith.constant 0 : index
    %c0_10 = arith.constant 0 : index
    %15 = vector.load %arg8[%c0_8, %c0_9, %c0_10] : memref<18x18x128xbf16, #tpu.memory_space<vmem>>, vector<18x18x128xbf16>
    tpu.vector_store %arg8[%c0_8, %c0_9, %c0_10], %14 {strides = array<i32>} : memref<18x18x128xbf16, #tpu.memory_space<vmem>>, vector<18x18x128xbf16>,
    %16 = arith.truncf %13 : vector<16x16x128xf32> to vector<16x16x128xbf16>
    %c1 = arith.constant 1 : index
    %c1_11 = arith.constant 1 : index
    %c0_12 = arith.constant 0 : index
    %17 = vector.load %arg8[%c1, %c1_11, %c0_12] : memref<18x18x128xbf16, #tpu.memory_space<vmem>>, vector<16x16x128xbf16>
    tpu.vector_store %arg8[%c1, %c1_11, %c0_12], %16 {strides = array<i32>} : memref<18x18x128xbf16, #tpu.memory_space<vmem>>, vector<16x16x128xbf16>,
    %c0_13 = arith.constant 0 : index
    %c0_14 = arith.constant 0 : index
    %c0_15 = arith.constant 0 : index
    %18 = vector.load %arg8[%c0_13, %c0_14, %c0_15] : memref<18x18x128xbf16, #tpu.memory_space<vmem>>, vector<18x18x128xbf16>
    %19 = vector.extract_strided_slice %18 {offsets = [0, 0, 0], sizes = [16, 16, 128], strides = [1, 1, 1]} : vector<18x18x128xbf16> to vector<16x16x128xbf16>
    %20 = vector.shape_cast %19 : vector<16x16x128xbf16> to vector<256x128xbf16>
    %21 = vector.extract_strided_slice %18 {offsets = [0, 1, 0], sizes = [16, 16, 128], strides = [1, 1, 1]} : vector<18x18x128xbf16> to vector<16x16x128xbf16>
    %22 = vector.shape_cast %21 : vector<16x16x128xbf16> to vector<256x128xbf16>
    %23 = vector.extract_strided_slice %18 {offsets = [0, 2, 0], sizes = [16, 16, 128], strides = [1, 1, 1]} : vector<18x18x128xbf16> to vector<16x16x128xbf16>
    %24 = vector.shape_cast %23 : vector<16x16x128xbf16> to vector<256x128xbf16>
    %25 = vector.extract_strided_slice %18 {offsets = [1, 0, 0], sizes = [16, 16, 128], strides = [1, 1, 1]} : vector<18x18x128xbf16> to vector<16x16x128xbf16>
    %26 = vector.shape_cast %25 : vector<16x16x128xbf16> to vector<256x128xbf16>
    %27 = vector.extract_strided_slice %18 {offsets = [1, 1, 0], sizes = [16, 16, 128], strides = [1, 1, 1]} : vector<18x18x128xbf16> to vector<16x16x128xbf16>
    %28 = vector.shape_cast %27 : vector<16x16x128xbf16> to vector<256x128xbf16>
    %29 = vector.extract_strided_slice %18 {offsets = [1, 2, 0], sizes = [16, 16, 128], strides = [1, 1, 1]} : vector<18x18x128xbf16> to vector<16x16x128xbf16>
    %30 = vector.shape_cast %29 : vector<16x16x128xbf16> to vector<256x128xbf16>
    %31 = vector.extract_strided_slice %18 {offsets = [2, 0, 0], sizes = [16, 16, 128], strides = [1, 1, 1]} : vector<18x18x128xbf16> to vector<16x16x128xbf16>
    %32 = vector.shape_cast %31 : vector<16x16x128xbf16> to vector<256x128xbf16>
    %33 = vector.extract_strided_slice %18 {offsets = [2, 1, 0], sizes = [16, 16, 128], strides = [1, 1, 1]} : vector<18x18x128xbf16> to vector<16x16x128xbf16>
    %34 = vector.shape_cast %33 : vector<16x16x128xbf16> to vector<256x128xbf16>
    %35 = vector.extract_strided_slice %18 {offsets = [2, 2, 0], sizes = [16, 16, 128], strides = [1, 1, 1]} : vector<18x18x128xbf16> to vector<16x16x128xbf16>
    %36 = vector.shape_cast %35 : vector<16x16x128xbf16> to vector<256x128xbf16>
    %37 = tpu.concatenate %20, %22, %24, %26, %28, %30, %32, %34, %36 in 1 : vector<256x128xbf16>, vector<256x128xbf16>, vector<256x128xbf16>, vector<256x128xbf16>, vector<256x128xbf16>, vector<256x128xbf16>, vector<256x128xbf16>, vector<256x128xbf16>, vector<256x128xbf16> -> vector<256x1152xbf16>
    %c0_16 = arith.constant 0 : index
    %c0_17 = arith.constant 0 : index
    %38 = vector.load %arg2[%c0_16, %c0_17] : memref<1152x128xbf16, #tpu.memory_space<vmem>>, vector<1152x128xbf16>
    %cst_18 = arith.constant dense<0.000000e+00> : vector<256x128xf32>
    %39 = tpu.matmul %37, %38, %cst_18 {dimension_numbers = #tpu.dot_dimension_numbers<[1], [0], [0], [1], [0, 0, 1, 1], [], []>} : vector<256x1152xbf16>, vector<1152x128xbf16>, vector<256x128xf32> -> vector<256x128xf32>
    %40 = vector.shape_cast %39 : vector<256x128xf32> to vector<16x16x128xf32>
    %c0_19 = arith.constant 0 : index
    %c0_20 = arith.constant 0 : index
    %c0_21 = arith.constant 0 : index
    %c0_22 = arith.constant 0 : index
    %41 = vector.load %arg5[%c0_19, %c0_20, %c0_21, %c0_22] : memref<1x16x16x128xf32, #tpu.memory_space<vmem>>, vector<1x16x16x128xf32>
    %42 = vector.shape_cast %41 : vector<1x16x16x128xf32> to vector<16x16x128xf32>
    %43 = vector.shape_cast %40 : vector<16x16x128xf32> to vector<1x16x16x128xf32>
    tpu.vector_store %arg5[%c0_19, %c0_20, %c0_21, %c0_22], %43 {strides = array<i32>} : memref<1x16x16x128xf32, #tpu.memory_space<vmem>>, vector<1x16x16x128xf32>,
    %cst_23 = arith.constant dense<0.000000e+00> : vector<128xf32>
    %44 = vector.multi_reduction <add>, %39, %cst_23 [0] : vector<256x128xf32> to vector<128xf32>
    %45 = vector.shape_cast %44 : vector<128xf32> to vector<1x128xf32>
    %c0_24 = arith.constant 0 : index
    %c0_25 = arith.constant 0 : index
    %c0_26 = arith.constant 0 : index
    %46 = vector.load %arg6[%c0_24, %c0_25, %c0_26] : memref<1x1x128xf32, #tpu.memory_space<vmem>>, vector<1x1x128xf32>
    %47 = vector.shape_cast %46 : vector<1x1x128xf32> to vector<1x128xf32>
    %48 = vector.shape_cast %45 : vector<1x128xf32> to vector<1x1x128xf32>
    tpu.vector_store %arg6[%c0_24, %c0_25, %c0_26], %48 {strides = array<i32>} : memref<1x1x128xf32, #tpu.memory_space<vmem>>, vector<1x1x128xf32>,
    %49 = arith.mulf %39, %39 : vector<256x128xf32>
    %cst_27 = arith.constant dense<0.000000e+00> : vector<128xf32>
    %50 = vector.multi_reduction <add>, %49, %cst_27 [0] : vector<256x128xf32> to vector<128xf32>
    %51 = vector.shape_cast %50 : vector<128xf32> to vector<1x128xf32>
    %c0_28 = arith.constant 0 : index
    %c0_29 = arith.constant 0 : index
    %c0_30 = arith.constant 0 : index
    %52 = vector.load %arg7[%c0_28, %c0_29, %c0_30] : memref<1x1x128xf32, #tpu.memory_space<vmem>>, vector<1x1x128xf32>
    %53 = vector.shape_cast %52 : vector<1x1x128xf32> to vector<1x128xf32>
    %54 = vector.shape_cast %51 : vector<1x128xf32> to vector<1x1x128xf32>
    tpu.vector_store %arg7[%c0_28, %c0_29, %c0_30], %54 {strides = array<i32>} : memref<1x1x128xf32, #tpu.memory_space<vmem>>, vector<1x1x128xf32>,
    return
  }
  func.func @transform_0(%arg0: i32) -> (i32, i32, i32, i32) {
    %c0_i32 = arith.constant 0 : i32
    %c0_i32_0 = arith.constant 0 : i32
    %c0_i32_1 = arith.constant 0 : i32
    %c0_i32_2 = arith.constant 0 : i32
    return %arg0, %c0_i32, %c0_i32_0, %c0_i32_1 : i32, i32, i32, i32
  }
  func.func @transform_1(%arg0: i32) -> (i32, i32) {
    %c0_i32 = arith.constant 0 : i32
    %c0_i32_0 = arith.constant 0 : i32
    %c0_i32_1 = arith.constant 0 : i32
    return %c0_i32, %c0_i32_0 : i32, i32
  }
  func.func @transform_2(%arg0: i32) -> (i32, i32) {
    %c0_i32 = arith.constant 0 : i32
    %c0_i32_0 = arith.constant 0 : i32
    %c0_i32_1 = arith.constant 0 : i32
    return %c0_i32, %c0_i32_0 : i32, i32
  }
  func.func @transform_3(%arg0: i32) -> (i32, i32) {
    %c0_i32 = arith.constant 0 : i32
    %c0_i32_0 = arith.constant 0 : i32
    %c0_i32_1 = arith.constant 0 : i32
    return %c0_i32, %c0_i32_0 : i32, i32
  }
  func.func @transform_4(%arg0: i32) -> (i32, i32, i32, i32) {
    %c0_i32 = arith.constant 0 : i32
    %c0_i32_0 = arith.constant 0 : i32
    %c0_i32_1 = arith.constant 0 : i32
    %c0_i32_2 = arith.constant 0 : i32
    return %arg0, %c0_i32, %c0_i32_0, %c0_i32_1 : i32, i32, i32, i32
  }
  func.func @transform_5(%arg0: i32) -> (i32, i32, i32) {
    %c0_i32 = arith.constant 0 : i32
    %c0_i32_0 = arith.constant 0 : i32
    %c0_i32_1 = arith.constant 0 : i32
    return %arg0, %c0_i32, %c0_i32_0 : i32, i32, i32
  }
  func.func @transform_6(%arg0: i32) -> (i32, i32, i32) {
    %c0_i32 = arith.constant 0 : i32
    %c0_i32_0 = arith.constant 0 : i32
    %c0_i32_1 = arith.constant 0 : i32
    return %arg0, %c0_i32, %c0_i32_0 : i32, i32, i32
  }
}

</mosaic_0001>

<bundles_post_ra>
// kernel: residual_block.5
= control target key start
LH: loop header
LB: loop body
LE: loop exit
PB: predicated region body
PF: predicated region fallthrough
CT: control target
= control target key end

     0   :  { %s647_s15 = smov 0   ;;  %s649_s16 = smov 0   ;;  %s802_s0 = inlined_call_operand.vmem [shape: f32[2,16,16,128], index: 0, kind: input, shape index: {}]   ;;  %s803_s1 = inlined_call_operand.vmem [shape: f32[2,16,16,128], index: 1, kind: input, shape index: {}]   ;;  %s804_s2 = inlined_call_operand.vmem [shape: f32[1,128], index: 2, kind: input, shape index: {}]   ;;  %s805_s3 = inlined_call_operand.vmem [shape: f32[1,128], index: 3, kind: input, shape index: {}]   ;;  %s806_s4 = inlined_call_operand.vmem [shape: f32[2,16,16,128], index: 4, kind: output, shape index: {}]  }
   0x1   :  { %s651_s17 = smov 0   ;;  %s653_s18 = smov 0  }
   0x2   :  { %s655_s19 = smov 0  }
   0x3 LB: > { %s23_s20 = sadd.s32 1, %s612_s17  ;;  %s26_s21 = sadd.s32 1, %s616_s18  ;;  %s620_s19 = sphi %s655_s19, %s14_s19   ;;  %s616_s18 = sphi %s653_s18, %s810_s18   ;;  %s612_s17 = sphi %s651_s17, %s809_s17   ;;  %s608_s16 = sphi %s649_s16, %s808_s16   ;;  %s604_s15 = sphi %s647_s15, %s807_s15  }
   0x4   : > { %p24_p0 = scmp.ge.s32.totalorder %s23_s20, 2  ;;  %p525_p1 = scmp.ge.s32.totalorder %s620_s19, 1 }
   0x5   : > { %p202_p2 = scmp.lt.s32.totalorder %s620_s19, 5 }
   0x6   : > { %s812_s20 = smov (%p24_p0, %s23_s20), 0  ;;  %s814_s21 = smov (!%p24_p0, %s26_s21), %s616_s18 }
   0x7   : > { %p203_p3 = pnand %p525_p1, %p202_p2  ;;  %p28_p4 = scmp.ge.s32.totalorder %s814_s21, 2 }
   0x8   : > { %s526_s22 = sshll.u32 (!%p203_p3), %s604_s15, 3  ;;  %p249_p5 = scmp.lt.s32.totalorder (!%p203_p3), %s608_s16, 1 }
   0x9   : > { %s816_s21 = smov (%p28_p4, %s814_s21), 0  ;;  %206 = sbr.rel (%p203_p3) target bundleno = 44 (0x2c), region = 36 }
   0xa   : > { %p251_p6 = scmp.lt.s32.totalorder (!%p203_p3), %s526_s22, 15 }
   0xe   : > { %s818_s16 = smov (!%p249_p5, %s608_s16), 1  ;;  %s820_s22 = smov (!%p251_p6, %s526_s22), 15  ;;  %v680_v0 = vld [vmem:[%s804_s2] ss:$0 sm:$0xff] }
   0xf   : > { %s528_s23 = sshll.u32 %s818_s16, 5  ;;  %s527_s24 = sshll.u32 %s820_s22, 1  ;;  %v699_v1 = vld [vmem:[%s805_s3] ss:$0 sm:$0xff] }
  0x10   : > { %s255_s25 = sadd.s32 %s528_s23, %s527_s24 }
  0x11   : > { %s682_s28 = sshll.u32 %s255_s25, 3 }
  0x12   : > { %s688_s5 = scalar_lea.vmem %s802_s0, %s682_s28  ;;  %s694_s8 = scalar_lea.vmem %s803_s1, %s682_s28 }
  0x13   : > { %v281_v2 = vld [vmem:[%s688_s5] sm:$0xff]  ;;  %v282_v3 = vld [vmem:[%s688_s5 + $0x8] sm:$0xff]  ;;  %v283_v7 = vld [vmem:[%s688_s5 + $0x10] sm:$0xff]  ;;  %s730_s13 = scalar_lea.vmem %s806_s4, %s682_s28 }
  0x14   : > { %v301_v4 = vmul.f32 %v680_v0, %v281_v2  ;;  %v337_v5 = vld [vmem:[%s694_s8] sm:$0xff]  ;;  %v302_v6 = vmul.f32 %v680_v0, %v282_v3  ;;  %v338_v8 = vld [vmem:[%s694_s8 + $0x8] sm:$0xff]  ;;  %v303_v9 = vmul.f32 %v680_v0, %v283_v7  ;;  %v284_v10 = vld [vmem:[%s688_s5 + $0x18] sm:$0xff] }
  0x15   : > { %v285_v11 = vld [vmem:[%s688_s5 + $0x20] sm:$0xff]  ;;  %v339_v14 = vld [vmem:[%s694_s8 + $0x10] sm:$0xff]  ;;  %v304_v15 = vmul.f32 %v680_v0, %v284_v10  ;;  %v340_v16 = vld [vmem:[%s694_s8 + $0x18] sm:$0xff] }
  0x16   : > { %v321_v12 = vadd.f32 %v699_v1, %v301_v4  ;;  %v322_v13 = vadd.f32 %v699_v1, %v302_v6  ;;  %v305_v17 = vmul.f32 %v680_v0, %v285_v11  ;;  %v286_v18 = vld [vmem:[%s688_s5 + $0x28] sm:$0xff]  ;;  %v323_v19 = vadd.f32 %v699_v1, %v303_v9  ;;  %v341_v20 = vld [vmem:[%s694_s8 + $0x20] sm:$0xff]  ;;  %v287_v22 = vld [vmem:[%s688_s5 + $0x30] sm:$0xff] }
  0x17   : > { %v306_v21 = vmul.f32 %v680_v0, %v286_v18  ;;  %v288_v23 = vld [vmem:[%s688_s5 + $0x38] sm:$0xff]  ;;  %v324_v26 = vadd.f32 %v699_v1, %v304_v15  ;;  %v342_v28 = vld [vmem:[%s694_s8 + $0x28] sm:$0xff]  ;;  %v307_v31 = vmul.f32 %v680_v0, %v287_v22  ;;  %v289_v33 = vld [vmem:[%s688_s5 + $0x40] sm:$0xff] }
  0x18   : > { %v353_v24 = vadd.f32 %v337_v5, %v321_v12  ;;  %v354_v25 = vadd.f32 %v338_v8, %v322_v13  ;;  %v325_v27 = vadd.f32 %v699_v1, %v305_v17  ;;  %v355_v29 = vadd.f32 %v339_v14, %v323_v19  ;;  %v290_v34 = vld [vmem:[%s688_s5 + $0x48] sm:$0xff]  ;;  %v343_v39 = vld [vmem:[%s694_s8 + $0x30] sm:$0xff]  ;;  %v344_v40 = vld [vmem:[%s694_s8 + $0x38] sm:$0xff] }
  0x19   : > { %v326_v30 = vadd.f32 %v699_v1, %v306_v21  ;;  %v308_v32 = vmul.f32 %v680_v0, %v288_v23  ;;  %v356_v37 = vadd.f32 %v340_v16, %v324_v26  ;;  %v291_v41 = vld [vmem:[%s688_s5 + $0x50] sm:$0xff]  ;;  %v327_v44 = vadd.f32 %v699_v1, %v307_v31  ;;  %v292_v46 = vld [vmem:[%s688_s5 + $0x58] sm:$0xff]  ;;  %v293_v47 = vld [vmem:[%s688_s5 + $0x60] sm:$0xff] }
  0x1a   : > { %v369_v35 = vmax.f32 %v353_v24, 0.0  ;;  %v370_v36 = vmax.f32 %v354_v25, 0.0  ;;  %v357_v38 = vadd.f32 %v341_v20, %v325_v27  ;;  %v371_v42 = vmax.f32 %v355_v29, 0.0  ;;  %v294_v52 = vld [vmem:[%s688_s5 + $0x68] sm:$0xff]  ;;  %v345_v56 = vld [vmem:[%s694_s8 + $0x40] sm:$0xff]  ;;  %v347_v61 = vld [vmem:[%s694_s8 + $0x50] sm:$0xff] }
  0x1b   : > { %v358_v43 = vadd.f32 %v342_v28, %v326_v30  ;;  %v328_v45 = vadd.f32 %v699_v1, %v308_v32  ;;  %v372_v48 = vmax.f32 %v356_v37, 0.0  ;;  %v309_v50 = vmul.f32 %v680_v0, %v289_v33  ;;  %v346_v57 = vld [vmem:[%s694_s8 + $0x48] sm:$0xff]  ;;  %v295_v2 = vld [vmem:[%s688_s5 + $0x70] sm:$0xff]  ;;  %v296_v3 = vld [vmem:[%s688_s5 + $0x78] sm:$0xff] }
  0x1c   : > { %385 = vst [vmem:[%s730_s13] sm:$0xff] %v369_v35  ;;  %v373_v49 = vmax.f32 %v357_v38, 0.0  ;;  %v310_v51 = vmul.f32 %v680_v0, %v290_v34  ;;  %v359_v54 = vadd.f32 %v343_v39, %v327_v44  ;;  %v311_v58 = vmul.f32 %v680_v0, %v291_v41  ;;  %v348_v7 = vld [vmem:[%s694_s8 + $0x58] sm:$0xff]  ;;  %v349_v8 = vld [vmem:[%s694_s8 + $0x60] sm:$0xff]  ;;  %v350_v14 = vld [vmem:[%s694_s8 + $0x68] sm:$0xff] }
  0x1d   : > { %386 = vst [vmem:[%s730_s13 + $0x8] sm:$0xff] %v370_v36  ;;  %v374_v53 = vmax.f32 %v358_v43, 0.0  ;;  %v360_v55 = vadd.f32 %v344_v40, %v328_v45  ;;  %v329_v59 = vadd.f32 %v699_v1, %v309_v50  ;;  %v312_v62 = vmul.f32 %v680_v0, %v292_v46  ;;  %v351_v23 = vld [vmem:[%s694_s8 + $0x70] sm:$0xff]  ;;  %v352_v24 = vld [vmem:[%s694_s8 + $0x78] sm:$0xff] }
  0x1e   : > { %387 = vst [vmem:[%s730_s13 + $0x10] sm:$0xff] %v371_v42  ;;  %v330_v60 = vadd.f32 %v699_v1, %v310_v51  ;;  %v313_v63 = vmul.f32 %v680_v0, %v293_v47  ;;  %v375_v4 = vmax.f32 %v359_v54, 0.0  ;;  %v331_v6 = vadd.f32 %v699_v1, %v311_v58 }
  0x1f   : > { %388 = vst [vmem:[%s730_s13 + $0x18] sm:$0xff] %v372_v48  ;;  %v376_v5 = vmax.f32 %v360_v55, 0.0  ;;  %v314_v9 = vmul.f32 %v680_v0, %v294_v52  ;;  %v361_v10 = vadd.f32 %v345_v56, %v329_v59  ;;  %v332_v12 = vadd.f32 %v699_v1, %v312_v62 }
  0x20   : > { %389 = vst [vmem:[%s730_s13 + $0x20] sm:$0xff] %v373_v49  ;;  %v362_v11 = vadd.f32 %v346_v57, %v330_v60  ;;  %v333_v13 = vadd.f32 %v699_v1, %v313_v63  ;;  %v363_v15 = vadd.f32 %v347_v61, %v331_v6  ;;  %v315_v17 = vmul.f32 %v680_v0, %v295_v2 }
  0x21   : > { %390 = vst [vmem:[%s730_s13 + $0x28] sm:$0xff] %v374_v53  ;;  %v334_v16 = vadd.f32 %v699_v1, %v314_v9  ;;  %v316_v18 = vmul.f32 %v680_v0, %v296_v3  ;;  %v377_v19 = vmax.f32 %v361_v10, 0.0  ;;  %v364_v21 = vadd.f32 %v348_v7, %v332_v12 }
  0x22   : > { %391 = vst [vmem:[%s730_s13 + $0x30] sm:$0xff] %v375_v4  ;;  %v378_v20 = vmax.f32 %v362_v11, 0.0  ;;  %v365_v22 = vadd.f32 %v349_v8, %v333_v13  ;;  %v379_v25 = vmax.f32 %v363_v15, 0.0  ;;  %v335_v27 = vadd.f32 %v699_v1, %v315_v17 }
  0x23   : > { %392 = vst [vmem:[%s730_s13 + $0x38] sm:$0xff] %v376_v5  ;;  %v366_v26 = vadd.f32 %v350_v14, %v334_v16  ;;  %v336_v0 = vadd.f32 %v699_v1, %v316_v18  ;;  %v380_v28 = vmax.f32 %v364_v21, 0.0 }
  0x24   : > { %393 = vst [vmem:[%s730_s13 + $0x40] sm:$0xff] %v377_v19  ;;  %v381_v29 = vmax.f32 %v365_v22, 0.0  ;;  %v367_v31 = vadd.f32 %v351_v23, %v335_v27 }
  0x25   : > { %394 = vst [vmem:[%s730_s13 + $0x48] sm:$0xff] %v378_v20  ;;  %v382_v30 = vmax.f32 %v366_v26, 0.0  ;;  %v368_v32 = vadd.f32 %v352_v24, %v336_v0 }
  0x26   : > { %395 = vst [vmem:[%s730_s13 + $0x50] sm:$0xff] %v379_v25  ;;  %v383_v33 = vmax.f32 %v367_v31, 0.0 }
  0x27   : > { %396 = vst [vmem:[%s730_s13 + $0x58] sm:$0xff] %v380_v28  ;;  %v384_v34 = vmax.f32 %v368_v32, 0.0 }
  0x28   : > { %397 = vst [vmem:[%s730_s13 + $0x60] sm:$0xff] %v381_v29 }
  0x29   : > { %398 = vst [vmem:[%s730_s13 + $0x68] sm:$0xff] %v382_v30 }
  0x2a   : > { %399 = vst [vmem:[%s730_s13 + $0x70] sm:$0xff] %v383_v33 }
  0x2b   : > { %400 = vst [vmem:[%s730_s13 + $0x78] sm:$0xff] %v384_v34 }
  0x2c PF: > { %s14_s19 = sadd.s32 1, %s620_s19   ;;  %s807_s15 = smov %s612_s17 }
  0x2d   : > { %p11_p7 = scmp.ge.s32.totalorder %s14_s19, 6   ;;  %s808_s16 = smov %s616_s18 }
  0x2e   : > { %s809_s17 = smov %s812_s20  ;;  %s810_s18 = smov %s816_s21 }
  0x2f   :  { %13 = sbr.rel (!%p11_p7) target bundleno = 3 (0x3), region = 69 }

// kernel: residual_block.3
= control target key start
LH: loop header
LB: loop body
LE: loop exit
PB: predicated region body
PF: predicated region fallthrough
CT: control target
= control target key end

     0   :  { %s3818_s15 = smov 0   ;;  %s5266_s0 = inlined_call_operand.vmem [shape: bf16[2,16,16,128], index: 0, kind: input, shape index: {}]   ;;  %s5267_s1 = inlined_call_operand.vmem [shape: bf16[1152,128], index: 1, kind: input, shape index: {}]   ;;  %s5268_s2 = inlined_call_operand.vmem [shape: f32[2,16,16,128], index: 2, kind: output, shape index: {0}]   ;;  %s5269_s3 = inlined_call_operand.vmem [shape: f32[2,1,128], index: 3, kind: output, shape index: {1}]   ;;  %s5270_s4 = inlined_call_operand.vmem [shape: f32[2,1,128], index: 4, kind: output, shape index: {2}]  }
   0x1 LB: > { %s3253_s16 = sadd.s32 4294967295, %s3790_s15   ;;  %p3257_p0 = scmp.ge.s32.totalorder %s3790_s15, 1  ;;  %s3790_s15 = sphi %s3818_s15, %s15_s15  }
   0x2   : > { %p167_p1 = scmp.lt.s32.totalorder %s3790_s15, 3 }
   0x4   : > { %p168_p2 = pnand %p3257_p0, %p167_p1 }
   0x6   : > { %171 = sbr.rel (%p168_p2) target bundleno = 800 (0x320), region = 28 }
   0xb   : > { %v3669_v0 = vld [vmem:[%s5267_s1 + $0x38] sm:$0xff]  ;;  %p199_p3 = scmp.lt.s32.totalorder %s3253_s16, 1  ;;  %v3792_v1 = vmov 0   ;;  %v3668_v2 = vld [vmem:[%s5267_s1 + $0x30] sm:$0xff]  ;;  %v3667_v3 = vld [vmem:[%s5267_s1 + $0x28] sm:$0xff]  ;;  %vm626_vm1 = vcmask 1043456  }
   0xc   : > { %260 = vst [vmem:[#allocation2 + $0x30] sm:$0xf] %v3792_v1  ;;  %3734 = vmatpush.bf16.msra.mxu1 %v3669_v0  ;;  %3735 = vmatpush.bf16.msra.mxu2 %v3669_v0  ;;  %vm302_vm0 = vsmask.f32 256  ;;  %vm303_vm2 = vsmask.f32 4368 }
   0xd   : > { %s5383_s16 = smov (!%p199_p3, %s3253_s16), 1  ;;  %261 = vst [vmem:[#allocation2 + $0x34] sm:$0xf] %v3792_v1  ;;  %3736 = vmatpush.bf16.msra.mxu3 %v3669_v0  ;;  %2207 = vmatpush.bf16.msra.mxu0 %v3669_v0  ;;  %vm627_vm3 = vsmask.f32 7938  ;;  %vm3854_vm4 = vmor %vm302_vm0, %vm303_vm2  ;;  %v3666_v13 = vld [vmem:[%s5267_s1 + $0x20] sm:$0xff] }
   0xe   : > { %s3642_s23 = sshll.u32 %s5383_s16, 7  ;;  %248 = vst [vmem:[#allocation2] sm:$0xf] %v3792_v1  ;;  %vm3866_vm5 = vmand %vm626_vm1, %vm627_vm3  ;;  %v3665_v21 = vld [vmem:[%s5267_s1 + $0x18] sm:$0xff]  ;;  %v3664_v22 = vld [vmem:[%s5267_s1 + $0x10] sm:$0xff]  ;;  %vm633_vm6 = vcmask 1040384   ;;  %s211_s6 = scalar_lea.vmem %s5269_s3, %s5383_s16 }
   0xf   : > { %s3844_s26 = scalar_lea.vmem %s5266_s0, %s3642_s23  ;;  %249 = vst [vmem:[#allocation2 + $0x4] sm:$0xf] %v3792_v1  ;;  %v3663_v23 = vld [vmem:[%s5267_s1 + $0x8] sm:$0xff]  ;;  %v3662_v24 = vld [vmem:[%s5267_s1] sm:$0xff]  ;;  %v3685_v31 = vld [vmem:[%s5267_s1 + $0xb8] sm:$0xff]  ;;  %vm1232_vm11 = vcmask 1042432   ;;  %s214_s9 = scalar_lea.vmem %s5270_s4, %s5383_s16 }
  0x10   : > { %3737 = vmatpush.bf16.msra.mxu1 %v3668_v2  ;;  %3738 = vmatpush.bf16.msra.mxu2 %v3668_v2  ;;  %v222_v4 = vld [vmem:[%s3844_s26 + $0x18] sm:$0xf]  ;;  %v223_v5 = vld [vmem:[%s3844_s26 + $0x1c] sm:$0xf]  ;;  %250 = vst [vmem:[#allocation2 + $0x8] sm:$0x1] %v3792_v1  ;;  %vm4248_vm7 = vmand %vm633_vm6, %vm302_vm0 }
  0x11   : > { %3739 = vmatpush.bf16.msra.mxu3 %v3668_v2  ;;  %2208 = vmatpush.bf16.msra.mxu0 %v3668_v2  ;;  %v357_v6 = vshrl.u32 %v222_v4, 16  ;;  %v360_v7 = vshll.u32 %v222_v4, 16  ;;  %v365_v8 = vshrl.u32 %v223_v5, 16  ;;  %v368_v9 = vshll.u32 %v223_v5, 16  ;;  %251 = vst [vmem:[#allocation2 + $0xc] sm:$0xf] %v3792_v1 }
  0x12   : > { %252 = vst [vmem:[#allocation2 + $0x10] sm:$0xf] %v3792_v1  ;;  %v230_v26 = vld [vmem:[%s3844_s26 + $0x38] sm:$0xf]  ;;  %v231_v27 = vld [vmem:[%s3844_s26 + $0x3c] sm:$0xf] }
  0x13   : > { %v359_v11 = vrot.slane %v357_v6, 7  ;;  %v3858_v12 = vrot.slane %v365_v8, 7  ;;  %253 = vst [vmem:[#allocation2 + $0x14] sm:$0x1] %v3792_v1  ;;  %v652_v15 = vld [vmem:[#allocation2 + $0x30] sm:$0xf] }
  0x14   : > { %3740 = vmatpush.bf16.msra.mxu1 %v3667_v3  ;;  %3741 = vmatpush.bf16.msra.mxu2 %v3667_v3  ;;  %254 = vst [vmem:[#allocation2 + $0x18] sm:$0xf] %v3792_v1  ;;  %v425_v28 = vshrl.u32 %v230_v26, 16  ;;  %v3916_v29 = vld [vmem:[%s3844_s26 + $0x58] sm:$0xf]  ;;  %v433_v34 = vshrl.u32 %v231_v27, 16 }
  0x15   : > { %3742 = vmatpush.bf16.msra.mxu3 %v3667_v3  ;;  %2209 = vmatpush.bf16.msra.mxu0 %v3667_v3  ;;  %v362_v16 = vor.u32 %v360_v7, %v359_v11  ;;  %v363_v17 = vrot.slane %v359_v11, 4  ;;  %v370_v18 = vor.u32 %v368_v9, %v3858_v12  ;;  %255 = vst [vmem:[#allocation2 + $0x1c] sm:$0xf] %v3792_v1  ;;  %v239_v30 = vld [vmem:[%s3844_s26 + $0x5c] sm:$0xf]  ;;  %v493_v37 = vshrl.u32 %v3916_v29, 16 }
  0x16   : > { %256 = vst [vmem:[#allocation2 + $0x20] sm:$0x1] %v3792_v1  ;;  %v3644_v32 = vld [vmem:[#allocation2] sm:$0xff]  ;;  %v3693_v33 = vld [vmem:[%s5267_s1 + $0xf8] sm:$0xff]  ;;  %v3684_v38 = vld [vmem:[%s5267_s1 + $0xb0] sm:$0xff]  ;;  %v3942_v40 = vrot.slane %v425_v28, 7 }
  0x17   : > { %v371_v19 = vsel %vm3854_vm4, %v363_v17, %v370_v18  ;;  %v653_v20 = vsel %vm3866_vm5, %v362_v16, %v652_v15  ;;  %257 = vst [vmem:[#allocation2 + $0x24] sm:$0xf] %v3792_v1  ;;  %v3677_v35 = vld [vmem:[%s5267_s1 + $0x78] sm:$0xff]  ;;  %v3931_v36 = vld [vmem:[%s3844_s26 + $0x20] sm:$0xf]  ;;  %v501_v41 = vshrl.u32 %v239_v30, 16 }
  0x18   : > { %3743 = vmatpush.bf16.msra.mxu1 %v3666_v13  ;;  %3744 = vmatpush.bf16.msra.mxu2 %v3666_v13  ;;  %654 = vst [vmem:[#allocation2 + $0x30] sm:$0xf] %v653_v20  ;;  %v3701_v39 = vld [vmem:[%s5267_s1 + $0x138] sm:$0xff]  ;;  %v3692_v42 = vld [vmem:[%s5267_s1 + $0xf0] sm:$0xff]  ;;  %v428_v44 = vshll.u32 %v230_v26, 16  ;;  %v374_v45 = vshrl.u32 %v3931_v36, 16 }
  0x19   : > { %3745 = vmatpush.bf16.msra.mxu3 %v3666_v13  ;;  %2210 = vmatpush.bf16.msra.mxu0 %v3666_v13  ;;  %655 = vst [vmem:[#allocation2 + $0x34] sm:$0xf] %v371_v19  ;;  %v3676_v43 = vld [vmem:[%s5267_s1 + $0x70] sm:$0xff]  ;;  %v3953_v46 = vld [vmem:[%s3844_s26 + $0x40] sm:$0xf]  ;;  %v3956_v47 = vrot.slane %v433_v34, 7 }
  0x1a   : > { %258 = vst [vmem:[#allocation2 + $0x28] sm:$0xf] %v3792_v1  ;;  %v436_v48 = vshll.u32 %v231_v27, 16  ;;  %v225_v49 = vld [vmem:[%s3844_s26 + $0x24] sm:$0xf]  ;;  %v3960_v50 = vrot.slane %v493_v37, 7  ;;  %v3984_v62 = vor.u32 %v428_v44, %v3942_v40 }
  0x1b   : > { %259 = vst [vmem:[#allocation2 + $0x2c] sm:$0x1] %v3792_v1  ;;  %v3963_v51 = vld [vmem:[%s3844_s26 + $0x44] sm:$0xf]  ;;  %v442_v52 = vshrl.u32 %v3953_v46, 16  ;;  %v3967_v53 = vrot.slane %v501_v41, 7 }
  0x1c   : > { %3746 = vmatpush.bf16.msra.mxu1 %v3665_v21  ;;  %3747 = vmatpush.bf16.msra.mxu2 %v3665_v21  ;;  %262 = vst [vmem:[#allocation2 + $0x38] sm:$0x1] %v3792_v1  ;;  %v504_v54 = vshll.u32 %v239_v30, 16  ;;  %v3970_v55 = vld [vmem:[%s3844_s26 + $0x60] sm:$0xf]  ;;  %v3973_v56 = vrot.slane %v374_v45, 7  ;;  %v438_v3 = vor.u32 %v436_v48, %v3956_v47 }
  0x1d   : > { %3748 = vmatpush.bf16.msra.mxu3 %v3665_v21  ;;  %2211 = vmatpush.bf16.msra.mxu0 %v3665_v21  ;;  %263 = vst [vmem:[#allocation2 + $0x3c] sm:$0xf] %v3792_v1  ;;  %v382_v57 = vshrl.u32 %v225_v49, 16  ;;  %v3976_v58 = vld [vmem:[%s3844_s26 + $0x64] sm:$0xf]  ;;  %v431_v59 = vrot.slane %v3942_v40, 4 }
  0x1e   : > { %264 = vst [vmem:[#allocation2 + $0x40] sm:$0xf] %v3792_v1  ;;  %v496_v60 = vshll.u32 %v3916_v29, 16  ;;  %v450_v61 = vshrl.u32 %v3963_v51, 16  ;;  %v3986_v63 = vrot.slane %v442_v52, 7  ;;  %v510_v0 = vshrl.u32 %v3970_v55, 16 }
  0x1f   : > { %265 = vst [vmem:[#allocation2 + $0x44] sm:$0x1] %v3792_v1  ;;  %v3990_v2 = vld [vmem:[%s3844_s26] sm:$0xf]  ;;  %v499_v4 = vrot.slane %v3960_v50, 4  ;;  %v506_v5 = vor.u32 %v504_v54, %v3967_v53  ;;  %v518_v6 = vshrl.u32 %v3976_v58, 16 }
  0x20   : > { %3749 = vmatpush.bf16.msra.mxu1 %v3664_v22  ;;  %3750 = vmatpush.bf16.msra.mxu2 %v3664_v22  ;;  %266 = vst [vmem:[#allocation2 + $0x48] sm:$0xf] %v3792_v1  ;;  %v3648_v25 = vld [vmem:[#allocation2 + $0x30] sm:$0xff]  ;;  %v3998_v7 = vld [vmem:[%s3844_s26 + $0x4] sm:$0xf]  ;;  %v377_v9 = vshll.u32 %v3931_v36, 16 }
  0x21   : > { %3751 = vmatpush.bf16.msra.mxu3 %v3664_v22  ;;  %2212 = vmatpush.bf16.msra.mxu0 %v3664_v22  ;;  %267 = vst [vmem:[#allocation2 + $0x4c] sm:$0xf] %v3792_v1  ;;  %v380_v11 = vrot.slane %v3973_v56, 4  ;;  %v4003_v13 = vrot.slane %v382_v57, 7  ;;  %v385_v15 = vshll.u32 %v225_v49, 16  ;;  %v445_v16 = vshll.u32 %v3953_v46, 16 }
  0x22   : > { %268 = vst [vmem:[#allocation2 + $0x50] sm:$0x1] %v3792_v1  ;;  %v453_v17 = vshll.u32 %v3963_v51, 16  ;;  %v306_v18 = vshrl.u32 %v3990_v2, 16  ;;  %v314_v19 = vshrl.u32 %v3998_v7, 16  ;;  %v448_v21 = vrot.slane %v3986_v63, 4 }
  0x23   : > { %269 = vst [vmem:[#allocation2 + $0x54] sm:$0xf] %v3792_v1  ;;  %v4012_v22 = vrot.slane %v450_v61, 7  ;;  %v4021_v27 = vrot.slane %v518_v6, 7  ;;  %v521_v28 = vshll.u32 %v3976_v58, 16  ;;  %v379_v30 = vor.u32 %v377_v9, %v3973_v56  ;;  %v3691_v34 = vld [vmem:[%s5267_s1 + $0xe8] sm:$0xff] }
  0x24   : > { %3752 = vmatpush.bf16.msra.mxu1 %v3663_v23  ;;  %3753 = vmatpush.bf16.msra.mxu2 %v3663_v23  ;;  %270 = vst [vmem:[#allocation2 + $0x58] sm:$0xf] %v3792_v1  ;;  %v4019_v26 = vld [vmem:[#allocation2 + $0x3c] sm:$0xf]  ;;  %v4025_v29 = vld [vmem:[%s3844_s26 + $0x28] sm:$0xf]  ;;  %v447_v44 = vor.u32 %v445_v16, %v3986_v63 }
  0x25   : > { %3754 = vmatpush.bf16.msra.mxu3 %v3663_v23  ;;  %2213 = vmatpush.bf16.msra.mxu0 %v3663_v23  ;;  %271 = vst [vmem:[#allocation2 + $0x5c] sm:$0x1] %v3792_v1  ;;  %v4014_v23 = vrot.slane %v510_v0, 7  ;;  %v317_v40 = vshll.u32 %v3998_v7, 16  ;;  %v3675_v41 = vld [vmem:[%s5267_s1 + $0x68] sm:$0xff]  ;;  %v3682_v45 = vld [vmem:[%s5267_s1 + $0xa0] sm:$0xff]  ;;  %v660_v56 = vsel %vm3866_vm5, %v379_v30, %v4019_v26  ;;  %v523_v61 = vor.u32 %v521_v28, %v4021_v27 }
  0x26   : > { %272 = vst [vmem:[#allocation2 + $0x60] sm:$0xf] %v3792_v1  ;;  %v3690_v46 = vld [vmem:[%s5267_s1 + $0xe0] sm:$0xff]  ;;  %v227_v48 = vld [vmem:[%s3844_s26 + $0x2c] sm:$0xf]  ;;  %v391_v54 = vshrl.u32 %v4025_v29, 16 }
  0x27   : > { %273 = vst [vmem:[#allocation2 + $0x64] sm:$0xf] %v3792_v1  ;;  %v3699_v51 = vld [vmem:[%s5267_s1 + $0x128] sm:$0xff]  ;;  %v3674_v52 = vld [vmem:[%s5267_s1 + $0x60] sm:$0xff]  ;;  %v516_v57 = vrot.slane %v4014_v23, 4  ;;  %v402_v0 = vshll.u32 %v227_v48, 16 }
  0x28   : > { %3755 = vmatpush.bf16.msra.mxu1 %v3662_v24  ;;  %3756 = vmatpush.bf16.msra.mxu2 %v3662_v24  ;;  %274 = vst [vmem:[#allocation2 + $0x68] sm:$0x1] %v3792_v1  ;;  %v235_v6 = vld [vmem:[%s3844_s26 + $0x4c] sm:$0xf]  ;;  %vm797_vm8 = vsmask.f32 3328 }
  0x29   : > { %3757 = vmatpush.bf16.msra.mxu3 %v3662_v24  ;;  %2214 = vmatpush.bf16.msra.mxu0 %v3662_v24  ;;  %275 = vst [vmem:[#allocation2 + $0x6c] sm:$0xf] %v3792_v1  ;;  %v513_v24 = vshll.u32 %v3970_v55, 16  ;;  %v399_v55 = vshrl.u32 %v227_v48, 16  ;;  %v524_v63 = vsel %vm3854_vm4, %v516_v57, %v523_v61  ;;  %v243_v26 = vld [vmem:[%s3844_s26 + $0x6c] sm:$0xf] }
  0x2a   : > { %276 = vst [vmem:[#allocation2 + $0x70] sm:$0xf] %v3792_v1  ;;  %vm798_vm9 = vsmask.f32 7440  ;;  %vm1233_vm12 = vcmask 1046532   ;;  %v3710_v14 = vld [vmem:[%s5267_s1 + $0x180] sm:$0xff] }
  0x2b   : > { %2235 = vmatmul.bf16.vlgmr.msra.gmra.mxu1 %v3648_v25  ;;  %277 = vst [vmem:[#allocation2 + $0x74] sm:$0x1] %v3792_v1  ;;  %v498_v25 = vor.u32 %v496_v60, %v3960_v50  ;;  %v455_v50 = vor.u32 %v453_v17, %v4012_v22  ;;  %v515_v60 = vor.u32 %v513_v24, %v4014_v23  ;;  %v470_v23 = vshll.u32 %v235_v6, 16  ;;  %vm4290_vm10 = vmor %vm797_vm8, %vm798_vm9  ;;  %s3643_s25 = sshll.u32 %s5383_s16, 8 }
  0x2c   : > { %278 = vst [vmem:[#allocation2 + $0x78] sm:$0xf] %v3792_v1  ;;  %2385 = vmatpush.bf16.msrb.mxu2 %v3685_v31  ;;  %2215 = vmatmul.bf16.vlgmr.msra.gmra.mxu0 %v3644_v32  ;;  %v387_v31 = vor.u32 %v385_v15, %v4003_v13  ;;  %v3683_v32 = vld [vmem:[%s5267_s1 + $0xa8] sm:$0xff]  ;;  %vm4317_vm13 = vmor %vm1232_vm11, %vm1233_vm12  ;;  %s5153_s29 = scalar_lea.vmem %s5268_s2, %s3643_s25 }
  0x2d   : > { %279 = vst [vmem:[#allocation2 + $0x7c] sm:$0xf] %v3792_v1  ;;  %2474 = vmatpush.bf16.msrb.mxu3 %v3693_v33  ;;  %2296 = vmatpush.bf16.msrb.mxu1 %v3677_v35  ;;  %v680_v8 = vld [vmem:[#allocation2 + $0x60] sm:$0xf]  ;;  %v309_v33 = vshll.u32 %v3990_v2, 16  ;;  %v3700_v35 = vld [vmem:[%s5267_s1 + $0x130] sm:$0xff] }
  0x2e   : > { %280 = vst [vmem:[#allocation2 + $0x80] sm:$0x1] %v3792_v1  ;;  %2563 = vmatpush.bf16.msrb.mxu0 %v3701_v39  ;;  %v681_v36 = vsel %vm3866_vm5, %v3984_v62, %v680_v8  ;;  %v4048_v39 = vrot.slane %v314_v19, 7  ;;  %v393_v62 = vrot.slane %v391_v54, 7  ;;  %v234_v2 = vld [vmem:[%s3844_s26 + $0x48] sm:$0xf]  ;;  %v456_v8 = vsel %vm3854_vm4, %v448_v21, %v455_v50 }
  0x2f   : > { %281 = vst [vmem:[#allocation2 + $0x84] sm:$0xf] %v3792_v1  ;;  %v459_v7 = vshrl.u32 %v234_v2, 16  ;;  %v629_v15 = vld [vmem:[#allocation2 + $0xc] sm:$0xf]  ;;  %v462_v16 = vshll.u32 %v234_v2, 16 }
  0x30   : > { %282 = vst [vmem:[#allocation2 + $0x88] sm:$0xf] %v3792_v1  ;;  %2386 = vmatpush.bf16.msrb.mxu2 %v3684_v38  ;;  %v4044_v37 = vld [vmem:[#allocation2 + $0x6c] sm:$0xf]  ;;  %v4046_v38 = vrot.slane %v306_v18, 7  ;;  %v397_v17 = vrot.slane %v393_v62, 4 }
  0x31   : > { %283 = vst [vmem:[#allocation2 + $0x8c] sm:$0x1] %v3792_v1  ;;  %2475 = vmatpush.bf16.msrb.mxu3 %v3692_v42  ;;  %2297 = vmatpush.bf16.msrb.mxu1 %v3676_v43  ;;  %v439_v42 = vsel %vm3854_vm4, %v431_v59, %v438_v3  ;;  %v507_v43 = vsel %vm3854_vm4, %v499_v4, %v506_v5  ;;  %v394_v59 = vshll.u32 %v4025_v29, 16  ;;  %v4092_v5 = vrot.slane %v399_v55, 7  ;;  %v666_v18 = vld [vmem:[#allocation2 + $0x48] sm:$0xf] }
  0x32   : > { %284 = vst [vmem:[#allocation2 + $0x90] sm:$0xf] %v3792_v1  ;;  %2564 = vmatpush.bf16.msrb.mxu0 %v3700_v35  ;;  %v688_v3 = vsel %vm3866_vm5, %v447_v44, %v4044_v37  ;;  %v311_v4 = vor.u32 %v309_v33, %v4046_v38  ;;  %v312_v9 = vrot.slane %v4046_v38, 4  ;;  %v461_v19 = vrot.slane %v459_v7, 7  ;;  %v219_v55 = vld [vmem:[%s3844_s26 + $0xc] sm:$0xf] }
  0x33   : > { %285 = vst [vmem:[#allocation2 + $0x94] sm:$0xf] %v3792_v1  ;;  %v396_v24 = vor.u32 %v394_v59, %v393_v62  ;;  %v404_v29 = vor.u32 %v402_v0, %v4092_v5  ;;  %v535_v35 = vshrl.u32 %v243_v26, 16  ;;  %v334_v0 = vshll.u32 %v219_v55, 16  ;;  %v638_v2 = vld [vmem:[#allocation2 + $0x18] sm:$0xf] }
  0x34   : > { %286 = vst [vmem:[#allocation2 + $0x98] sm:$0x1] %v3792_v1  ;;  %2387 = vmatpush.bf16.msrb.mxu2 %v3683_v32  ;;  %v630_v28 = vsel %vm3866_vm5, %v311_v4, %v629_v15  ;;  %v464_v33 = vor.u32 %v462_v16, %v461_v19  ;;  %v3698_v7 = vld [vmem:[%s5267_s1 + $0x120] sm:$0xff]  ;;  %v3680_v15 = vld [vmem:[%s5267_s1 + $0x90] sm:$0xff] }
  0x35   : > { %287 = vst [vmem:[#allocation2 + $0x9c] sm:$0xf] %v3792_v1  ;;  %2476 = vmatpush.bf16.msrb.mxu3 %v3691_v34  ;;  %2298 = vmatpush.bf16.msrb.mxu1 %v3675_v41  ;;  %v4117_v44 = vrot.slane %v535_v35, 7  ;;  %v405_v48 = vsel %vm3854_vm4, %v397_v17, %v404_v29  ;;  %v3688_v17 = vld [vmem:[%s5267_s1 + $0xd0] sm:$0xff] }
  0x36   : > { %288 = vst [vmem:[#allocation2 + $0xa0] sm:$0xf] %v3792_v1  ;;  %2565 = vmatpush.bf16.msrb.mxu0 %v3699_v51  ;;  %v218_v51 = vld [vmem:[%s3844_s26 + $0x8] sm:$0xf]  ;;  %v237_v35 = vld [vmem:[%s3844_s26 + $0x54] sm:$0xf] }
  0x37   : > { %289 = vst [vmem:[#allocation2 + $0xa4] sm:$0x1] %v3792_v1  ;;  %v326_v59 = vshll.u32 %v218_v51, 16 }
  0x38   : > { %290 = vst [vmem:[#allocation2 + $0xa8] sm:$0xf] %v3792_v1  ;;  %2388 = vmatpush.bf16.msrb.mxu2 %v3682_v45 }
  0x39   : > { %291 = vst [vmem:[#allocation2 + $0xac] sm:$0xf] %v3792_v1  ;;  %v708_v20 = vld [vmem:[#allocation2 + $0x90] sm:$0xf]  ;;  %2477 = vmatpush.bf16.msrb.mxu3 %v3690_v46  ;;  %2299 = vmatpush.bf16.msrb.mxu1 %v3674_v52 }
  0x3a   : > { %292 = vst [vmem:[#allocation2 + $0xb0] sm:$0x1] %v3792_v1  ;;  %v709_v49 = vsel %vm3866_vm5, %v498_v25, %v708_v20  ;;  %v467_v20 = vshrl.u32 %v235_v6, 16  ;;  %v242_v25 = vld [vmem:[%s3844_s26 + $0x68] sm:$0xf]  ;;  %v3689_v6 = vld [vmem:[%s5267_s1 + $0xd8] sm:$0xff]  ;;  %2566 = vmatpush.bf16.msrb.mxu0 %v3698_v7 }
  0x3b   : > { %293 = vst [vmem:[#allocation2 + $0xb4] sm:$0xf] %v3792_v1  ;;  %v527_v32 = vshrl.u32 %v242_v25, 16  ;;  %v530_v34 = vshll.u32 %v242_v25, 16 }
  0x3c   : > { %294 = vst [vmem:[#allocation2 + $0xb8] sm:$0xf] %v3792_v1  ;;  %v715_v58 = vld [vmem:[#allocation2 + $0x9c] sm:$0xf]  ;;  %v4110_v30 = vrot.slane %v467_v20, 7 }
  0x3d   : > { %295 = vst [vmem:[#allocation2 + $0xbc] sm:$0x1] %v3792_v1  ;;  %v716_v21 = vsel %vm3866_vm5, %v515_v60, %v715_v58  ;;  %v3681_v58 = vld [vmem:[%s5267_s1 + $0x98] sm:$0xff]  ;;  %v331_v60 = vshrl.u32 %v219_v55, 16  ;;  %2478 = vmatpush.bf16.msrb.mxu3 %v3689_v6  ;;  %v701_v55 = vld [vmem:[#allocation2 + $0x84] sm:$0xf] }
  0x3e   : > { %296 = vst [vmem:[#allocation2 + $0xc0] sm:$0xf] %v3792_v1  ;;  %v472_v41 = vor.u32 %v470_v23, %v4110_v30  ;;  %2389 = vmatpush.bf16.msrb.mxu2 %v3681_v58  ;;  %v228_v23 = vld [vmem:[%s3844_s26 + $0x30] sm:$0xf] }
  0x3f   : > { %297 = vst [vmem:[#allocation2 + $0xc4] sm:$0xf] %v3792_v1  ;;  %v722_v45 = vld [vmem:[#allocation2 + $0xa8] sm:$0xf]  ;;  %v4138_v4 = vrot.slane %v331_v60, 7  ;;  %v408_v25 = vshrl.u32 %v228_v23, 16 }
  0x40   : > { %298 = vst [vmem:[#allocation2 + $0xc8] sm:$0x1] %v3792_v1 }
  0x41   : > { %299 = vst [vmem:[#allocation2 + $0xcc] sm:$0xf] %v3792_v1  ;;  %v336_v16 = vor.u32 %v334_v0, %v4138_v4  ;;  %2479 = vmatpush.bf16.msrb.mxu3 %v3688_v17  ;;  %v3679_v17 = vld [vmem:[%s5267_s1 + $0x88] sm:$0xff] }
  0x42   : > { %300 = vst [vmem:[#allocation2 + $0xd0] sm:$0xf] %v3792_v1  ;;  %2390 = vmatpush.bf16.msrb.mxu2 %v3680_v15 }
  0x43   : > { %301 = vst [vmem:[#allocation2 + $0xd4] sm:$0x1] %v3792_v1  ;;  %v388_v1 = vsel %vm3854_vm4, %v380_v11, %v387_v31  ;;  %v319_v11 = vor.u32 %v317_v40, %v4048_v39  ;;  %v694_v31 = vld [vmem:[#allocation2 + $0x78] sm:$0xf]  ;;  %v465_v40 = vrot.slane %v461_v19, 4  ;;  %v3672_v19 = vld [vmem:[%s5267_s1 + $0x50] sm:$0xff] }
  0x44   : > { %682 = vst [vmem:[#allocation2 + $0x60] sm:$0xf] %v681_v36  ;;  %v538_v36 = vshll.u32 %v243_v26, 16  ;;  %v695_v52 = vsel %vm3866_vm5, %v464_v33, %v694_v31  ;;  %v411_v26 = vshll.u32 %v228_v23, 16  ;;  %v410_v31 = vrot.slane %v408_v25, 7  ;;  %v3687_v25 = vld [vmem:[%s5267_s1 + $0xc8] sm:$0xff] }
  0x45   : > { %683 = vst [vmem:[#allocation2 + $0x64] sm:$0xf] %v439_v42  ;;  %v320_v38 = vsel %vm3854_vm4, %v312_v9, %v319_v11  ;;  %v529_v42 = vrot.slane %v527_v32, 7  ;;  %v473_v57 = vsel %vm3854_vm4, %v465_v40, %v472_v41  ;;  %v3673_v11 = vld [vmem:[%s5267_s1 + $0x58] sm:$0xff]  ;;  %v236_v33 = vld [vmem:[%s3844_s26 + $0x50] sm:$0xf]  ;;  %2480 = vmatpush.bf16.msrb.mxu3 %v3687_v25 }
  0x46   : > { %710 = vst [vmem:[#allocation2 + $0x90] sm:$0xf] %v709_v49  ;;  %v540_v54 = vor.u32 %v538_v36, %v4117_v44  ;;  %2300 = vmatpush.bf16.msrb.mxu1 %v3673_v11  ;;  %v476_v36 = vshrl.u32 %v236_v33, 16  ;;  %v413_v40 = vor.u32 %v411_v26, %v410_v31  ;;  %v414_v41 = vrot.slane %v410_v31, 4  ;;  %v221_v11 = vld [vmem:[%s3844_s26 + $0x14] sm:$0xf]  ;;  %2391 = vmatpush.bf16.msrb.mxu2 %v3679_v17 }
  0x47   : > { %711 = vst [vmem:[#allocation2 + $0x94] sm:$0xf] %v507_v43  ;;  %v667_v43 = vsel %vm3866_vm5, %v396_v24, %v666_v18  ;;  %v532_v49 = vor.u32 %v530_v34, %v529_v42  ;;  %v533_v50 = vrot.slane %v529_v42, 4  ;;  %v3697_v18 = vld [vmem:[%s5267_s1 + $0x118] sm:$0xff]  ;;  %v673_v34 = vld [vmem:[#allocation2 + $0x54] sm:$0xf] }
  0x48   : > { %661 = vst [vmem:[#allocation2 + $0x3c] sm:$0xf] %v660_v56  ;;  %2567 = vmatpush.bf16.msrb.mxu0 %v3697_v18  ;;  %v3696_v26 = vld [vmem:[%s5267_s1 + $0x110] sm:$0xff]  ;;  %v351_v31 = vshll.u32 %v221_v11, 16  ;;  %v338_v17 = vrot.slane %v4138_v4, 4 }
  0x49   : > { %662 = vst [vmem:[#allocation2 + $0x40] sm:$0xf] %v388_v1  ;;  %v323_v1 = vshrl.u32 %v218_v51, 16  ;;  %v723_v61 = vsel %vm3866_vm5, %v532_v49, %v722_v45  ;;  %v478_v45 = vrot.slane %v476_v36, 7  ;;  %v245_v49 = vld [vmem:[%s3844_s26 + $0x74] sm:$0xf] }
  0x4a   : > { %689 = vst [vmem:[#allocation2 + $0x6c] sm:$0xf] %v688_v3  ;;  %v541_v3 = vsel %vm3854_vm4, %v533_v50, %v540_v54  ;;  %2301 = vmatpush.bf16.msrb.mxu1 %v3672_v19  ;;  %v674_v54 = vsel %vm3866_vm5, %v413_v40, %v673_v34  ;;  %v3678_v34 = vld [vmem:[%s5267_s1 + $0x80] sm:$0xff] }
  0x4b   : > { %690 = vst [vmem:[#allocation2 + $0x70] sm:$0xf] %v456_v8  ;;  %v325_v62 = vrot.slane %v323_v1, 7  ;;  %v482_v60 = vrot.slane %v478_v45, 4  ;;  %2392 = vmatpush.bf16.msrb.mxu2 %v3678_v34  ;;  %v642_v25 = vld [vmem:[#allocation2 + $0x20] sm:$0x1] }
  0x4c   : > { %v3652_v37 = vld [vmem:[#allocation2 + $0x60] sm:$0xff]  ;;  %717 = vst [vmem:[#allocation2 + $0x9c] sm:$0xf] %v716_v21  ;;  %2568 = vmatpush.bf16.msrb.mxu0 %v3696_v26  ;;  %v3717_v26 = vld [vmem:[%s5267_s1 + $0x1b8] sm:$0xff] }
  0x4d   : > { %718 = vst [vmem:[#allocation2 + $0xa0] sm:$0xf] %v524_v63  ;;  %2255 = vmatmul.bf16.vlgmr.msra.gmra.mxu2 %v3652_v37  ;;  %v328_v8 = vor.u32 %v326_v59, %v325_v62  ;;  %v329_v9 = vrot.slane %v325_v62, 4  ;;  %v229_v63 = vld [vmem:[%s3844_s26 + $0x34] sm:$0xf]  ;;  %v479_v37 = vshll.u32 %v236_v33, 16 }
  0x4e   : > { %v3656_v46 = vld [vmem:[#allocation2 + $0x90] sm:$0xff]  ;;  %631 = vst [vmem:[#allocation2 + $0xc] sm:$0xf] %v630_v28  ;;  %v416_v28 = vshrl.u32 %v229_v63, 16  ;;  %v419_v29 = vshll.u32 %v229_v63, 16  ;;  %v348_v63 = vshrl.u32 %v221_v11, 16 }
  0x4f   : > { %632 = vst [vmem:[#allocation2 + $0x10] sm:$0xf] %v320_v38  ;;  %2275 = vmatmul.bf16.vlgmr.msra.gmra.mxu3 %v3656_v46  ;;  %v639_v20 = vsel %vm3866_vm5, %v328_v8, %v638_v2  ;;  %v337_v24 = vsel %vm3854_vm4, %v329_v9, %v336_v16  ;;  %v484_v46 = vshrl.u32 %v237_v35, 16  ;;  %v481_v59 = vor.u32 %v479_v37, %v478_v45  ;;  %v220_v9 = vld [vmem:[%s3844_s26 + $0x10] sm:$0xf]  ;;  %v3671_v33 = vld [vmem:[%s5267_s1 + $0x48] sm:$0xff] }
  0x50   : > { %v4126_v56 = vld [vmem:[#allocation2 + $0x3c] sm:$0xff]  ;;  %668 = vst [vmem:[#allocation2 + $0x48] sm:$0xf] %v667_v43  ;;  %v4171_v32 = vrot.slane %v416_v28, 7  ;;  %v244_v43 = vld [vmem:[%s3844_s26 + $0x70] sm:$0xf]  ;;  %2302 = vmatpush.bf16.msrb.mxu1 %v3671_v33  ;;  %2741 = vmatpush.bf16.msra.mxu2 %v3717_v26 }
  0x51   : > { %669 = vst [vmem:[#allocation2 + $0x4c] sm:$0xf] %v405_v48  ;;  %2240 = vmatmul.bf16.gmra.mxu1 %v4126_v56  ;;  %v487_v48 = vshll.u32 %v237_v35, 16  ;;  %v544_v50 = vshrl.u32 %v244_v43, 16  ;;  %v547_v1 = vshll.u32 %v244_v43, 16  ;;  %v555_v2 = vshll.u32 %v245_v49, 16 }
  0x52   : > { %696 = vst [vmem:[#allocation2 + $0x78] sm:$0xf] %v695_v52  ;;  %v3653_v38 = vld [vmem:[#allocation2 + $0x6c] sm:$0xff]  ;;  %v421_v42 = vor.u32 %v419_v29, %v4171_v32  ;;  %v702_v7 = vsel %vm3866_vm5, %v481_v59, %v701_v55  ;;  %v340_v18 = vshrl.u32 %v220_v9, 16  ;;  %v343_v23 = vshll.u32 %v220_v9, 16  ;;  %v3686_v37 = vld [vmem:[%s5267_s1 + $0xc0] sm:$0xff] }
  0x53   : > { %697 = vst [vmem:[#allocation2 + $0x7c] sm:$0xf] %v473_v57  ;;  %v552_v57 = vshrl.u32 %v245_v49, 16  ;;  %v546_v62 = vrot.slane %v544_v50, 7  ;;  %v4218_v36 = vrot.slane %v348_v63, 7  ;;  %2481 = vmatpush.bf16.msrb.mxu3 %v3686_v37  ;;  %v3733_v37 = vld [vmem:[%s5267_s1 + $0x238] sm:$0xff] }
  0x54   : > { %724 = vst [vmem:[#allocation2 + $0xa8] sm:$0xf] %v723_v61  ;;  %v3657_v51 = vld [vmem:[#allocation2 + $0x9c] sm:$0xff]  ;;  %v422_v52 = vsel %vm3854_vm4, %v414_v41, %v421_v42  ;;  %v4184_v61 = vrot.slane %v484_v46, 7  ;;  %v342_v29 = vrot.slane %v340_v18, 7 }
  0x55   : > { %725 = vst [vmem:[#allocation2 + $0xac] sm:$0xf] %v541_v3  ;;  %v4186_v0 = vrot.slane %v552_v57, 7  ;;  %v729_v3 = vld [vmem:[#allocation2 + $0xb4] sm:$0xf]  ;;  %v549_v8 = vor.u32 %v547_v1, %v546_v62  ;;  %v550_v15 = vrot.slane %v546_v62, 4  ;;  %v353_v45 = vor.u32 %v351_v31, %v4218_v36 }
  0x56   : > { %v4166_v21 = vld [vmem:[#allocation2 + $0xc] sm:$0xff]  ;;  %640 = vst [vmem:[#allocation2 + $0x18] sm:$0xf] %v639_v20  ;;  %v489_v6 = vor.u32 %v487_v48, %v4184_v61  ;;  %v345_v40 = vor.u32 %v343_v23, %v342_v29  ;;  %v346_v41 = vrot.slane %v342_v29, 4  ;;  %v3670_v42 = vld [vmem:[%s5267_s1 + $0x40] sm:$0xff]  ;;  %v321_v48 = vrot.slane %v4048_v39, 4 }
  0x57   : > { %641 = vst [vmem:[#allocation2 + $0x1c] sm:$0xf] %v337_v24  ;;  %2220 = vmatmul.bf16.gmra.mxu0 %v4166_v21  ;;  %v557_v16 = vor.u32 %v555_v2, %v4186_v0  ;;  %v730_v20 = vsel %vm3866_vm5, %v549_v8, %v729_v3  ;;  %v645_v24 = vld [vmem:[#allocation2 + $0x24] sm:$0xf]  ;;  %v4229_v43 = vld [vmem:[#allocation2] sm:$0xf]  ;;  %2303 = vmatpush.bf16.msrb.mxu1 %v3670_v42 }
  0x58   : > { %v4182_v58 = vld [vmem:[#allocation2 + $0x48] sm:$0xff]  ;;  %675 = vst [vmem:[#allocation2 + $0x54] sm:$0xf] %v674_v54  ;;  %v490_v19 = vsel %vm3854_vm4, %v482_v60, %v489_v6  ;;  %v4232_v46 = vld [vmem:[#allocation2 + $0x4] sm:$0xf]  ;;  %v646_v49 = vsel %vm3866_vm5, %v345_v40, %v645_v24  ;;  %v801_v50 = vshrl.u32 %v4229_v43, 16 }
  0x59   : > { %676 = vst [vmem:[#allocation2 + $0x58] sm:$0xf] %v422_v52  ;;  %v558_v28 = vsel %vm3854_vm4, %v550_v15, %v557_v16  ;;  %v3694_v52 = vld [vmem:[%s5267_s1 + $0x100] sm:$0xff]  ;;  %v804_v54 = vshll.u32 %v4229_v43, 16  ;;  %v810_v39 = vshll.u32 %v4232_v46, 16  ;;  %v814_v55 = vshrl.u32 %v4232_v46, 16 }
  0x5a   : > { %703 = vst [vmem:[#allocation2 + $0x84] sm:$0xf] %v702_v7  ;;  %v3654_v57 = vld [vmem:[#allocation2 + $0x78] sm:$0xff]  ;;  %v803_v60 = vrot.slane %v801_v50, 4  ;;  %v635_v2 = vld [vmem:[#allocation2 + $0x14] sm:$0x1] }
  0x5b   : > { %704 = vst [vmem:[#allocation2 + $0x88] sm:$0xf] %v490_v19  ;;  %v806_v62 = vrot.slane %v804_v54, 5  ;;  %v812_v3 = vrot.slane %v810_v39, 5  ;;  %v816_v6 = vrot.slane %v814_v55, 4  ;;  %v636_v7 = vsel %vm4248_vm7, %v321_v48, %v635_v2  ;;  %v3725_v29 = vld [vmem:[%s5267_s1 + $0x1f8] sm:$0xff] }
  0x5c   : > { %731 = vst [vmem:[#allocation2 + $0xb4] sm:$0xf] %v730_v20  ;;  %v3658_v59 = vld [vmem:[#allocation2 + $0xa8] sm:$0xff]  ;;  %v4257_v9 = vld [vmem:[#allocation2 + $0x10] sm:$0xf]  ;;  %v3709_v31 = vld [vmem:[%s5267_s1 + $0x178] sm:$0xff]  ;;  %2830 = vmatpush.bf16.msra.mxu3 %v3725_v29 }
  0x5d   : > { %2260 = vmatmul.bf16.gmra.mxu2 %v3653_v38  ;;  %v3695_v38 = vld [vmem:[%s5267_s1 + $0x108] sm:$0xff]  ;;  %732 = vst [vmem:[#allocation2 + $0xb8] sm:$0xf] %v558_v28  ;;  %v834_v18 = vshll.u32 %v4257_v9, 16  ;;  %v838_v20 = vshrl.u32 %v4257_v9, 16  ;;  %v807_v23 = vor.u32 %v806_v62, %v803_v60  ;;  %v817_v63 = vor.u32 %v816_v6, %v812_v3  ;;  %2652 = vmatpush.bf16.msra.mxu1 %v3709_v31 }
  0x5e   : > { %v4216_v35 = vld [vmem:[#allocation2 + $0x18] sm:$0xff]  ;;  %647 = vst [vmem:[#allocation2 + $0x24] sm:$0xf] %v646_v49  ;;  %2569 = vmatpush.bf16.msrb.mxu0 %v3695_v38  ;;  %v4255_v8 = vld [vmem:[#allocation2 + $0xc] sm:$0xf]  ;;  %v643_v38 = vsel %vm4248_vm7, %v338_v17, %v642_v25 }
  0x5f   : > { %2280 = vmatmul.bf16.gmra.mxu3 %v3657_v51  ;;  %v354_v51 = vsel %vm3854_vm4, %v346_v41, %v353_v45  ;;  %v4259_v11 = vld [vmem:[#allocation2 + $0x8] sm:$0x1]  ;;  %637 = vst [vmem:[#allocation2 + $0x14] sm:$0x1] %v636_v7  ;;  %v825_v15 = vshrl.u32 %v4255_v8, 16  ;;  %v828_v16 = vshll.u32 %v4255_v8, 16 }
  0x60   : > { %648 = vst [vmem:[#allocation2 + $0x28] sm:$0xf] %v354_v51  ;;  %v4265_v19 = vld [vmem:[#allocation2 + $0x54] sm:$0xff]  ;;  %v820_v24 = vshll.u32 %v4259_v11, 16  ;;  %v836_v33 = vrot.slane %v834_v18, 5  ;;  %v840_v34 = vrot.slane %v838_v20, 4 }
  0x61   : > { %2245 = vmatmul.bf16.gmra.mxu1 %v4182_v58  ;;  %v827_v28 = vrot.slane %v825_v15, 4  ;;  %v830_v4 = vrot.slane %v828_v16, 5  ;;  %644 = vst [vmem:[#allocation2 + $0x20] sm:$0x1] %v643_v38  ;;  %v808_v40 = vrot.slane %v807_v23, 4  ;;  %v818_v41 = vrot.slane %v817_v63, 4 }
  0x62   : > { %2570 = vmatpush.bf16.msrb.mxu0 %v3694_v52  ;;  %v822_v42 = vrot.slane %v820_v24, 5  ;;  %v841_v51 = vor.u32 %v840_v34, %v836_v33  ;;  %v4300_v60 = vld [vmem:[#allocation2 + $0x18] sm:$0xf]  ;;  %v3655_v62 = vld [vmem:[#allocation2 + $0x84] sm:$0xff]  ;;  %v4302_v7 = vld [vmem:[#allocation2 + $0x1c] sm:$0xf] }
  0x63   : > { %v831_v50 = vor.u32 %v830_v4, %v827_v28  ;;  %v813_v54 = vsel %vm4290_vm10, %v808_v40, %v812_v3  ;;  %v355_v15 = vrot.slane %v4218_v36, 4  ;;  %v1237_v16 = vrot.slane %v4232_v46, 5  ;;  %v649_v4 = vld [vmem:[#allocation2 + $0x2c] sm:$0x1] }
  0x64   : > { %v823_v39 = vsel %vm4290_vm10, %v818_v41, %v822_v42  ;;  %v1479_v2 = vunpack.c.l.b16 %v813_v54  ;;  %v3659_v3 = vld [vmem:[#allocation2 + $0xb4] sm:$0xff]  ;;  %v849_v18 = vshrl.u32 %v4300_v60, 16  ;;  %v852_v20 = vshll.u32 %v4300_v60, 16 }
  0x65   : > { %v832_v55 = vrot.slane %v831_v50, 4  ;;  %v1480_v6 = vunpack.c.l.b16 %v823_v39  ;;  %v858_v63 = vshll.u32 %v4302_v7, 16  ;;  %v862_v24 = vshrl.u32 %v4302_v7, 16 }
  0x66   : > { %v4284_v45 = vld [vmem:[#allocation2 + $0x14] sm:$0x1]  ;;  %2919 = vmatpush.bf16.msra.mxu0 %v3733_v37  ;;  %v3262_v46 = vrot.slane %v4229_v43, 9  ;;  %v1239_v25 = vrot.slane %v1237_v16, 4  ;;  %v1240_v26 = vrot.slane %v4259_v11, 5  ;;  %v854_v34 = vrot.slane %v852_v20, 5 }
  0x67   : > { %2225 = vmatmul.bf16.gmra.mxu0 %v4216_v35  ;;  %v4286_v48 = vld [vmem:[#allocation2 + $0x24] sm:$0xff]  ;;  %v844_v52 = vshll.u32 %v4284_v45, 16  ;;  %v837_v17 = vsel %vm4290_vm10, %v832_v55, %v836_v33  ;;  %v1511_v36 = vpack.c.b16 %v1480_v6, %v1479_v2  ;;  %v851_v33 = vrot.slane %v849_v18, 4 }
  0x68   : > { %v1481_v28 = vunpack.c.l.b16 %v837_v17  ;;  %v650_v37 = vsel %vm4248_vm7, %v355_v15, %v649_v4  ;;  %v860_v38 = vrot.slane %v858_v63, 5  ;;  %v864_v40 = vrot.slane %v862_v24, 4  ;;  %v4323_v43 = vld [vmem:[#allocation2 + $0x20] sm:$0x1]  ;;  %v4332_v6 = vld [vmem:[#allocation2 + $0x28] sm:$0xf] }
  0x69   : > { %651 = vst [vmem:[#allocation2 + $0x2c] sm:$0x1] %v650_v37  ;;  %v1238_v11 = vsel %vm4317_vm13, %v3262_v46, %v1237_v16  ;;  %v1241_v41 = vsel %vm4317_vm13, %v1239_v25, %v1240_v26  ;;  %v855_v50 = vor.u32 %v854_v34, %v851_v33  ;;  %v1244_v15 = vrot.slane %v4257_v9, 5  ;;  %v656_v46 = vld [vmem:[#allocation2 + $0x38] sm:$0x1]  ;;  %v3716_v26 = vld [vmem:[%s5267_s1 + $0x1b0] sm:$0xff] }
  0x6a   : > { %v1543_v54 = vunpack.c.l.b16 %v1238_v11  ;;  %v1544_v39 = vunpack.c.l.b16 %v1241_v41  ;;  %v372_v16 = vrot.slane %v3858_v12, 4  ;;  %v886_v63 = vshrl.u32 %v4332_v6, 16  ;;  %v3732_v34 = vld [vmem:[%s5267_s1 + $0x230] sm:$0xff]  ;;  %2742 = vmatpush.bf16.msra.mxu2 %v3716_v26 }
  0x6b   : > { %v856_v55 = vrot.slane %v855_v50, 4  ;;  %v3263_v24 = vrot.slane %v4255_v8, 9  ;;  %v1246_v9 = vrot.slane %v1244_v15, 4  ;;  %v1247_v12 = vrot.slane %v4284_v45, 5  ;;  %v3708_v8 = vld [vmem:[%s5267_s1 + $0x170] sm:$0xff]  ;;  %2920 = vmatpush.bf16.msra.mxu0 %v3732_v34 }
  0x6c   : > { %v1575_v2 = vpack.c.b16 %v1544_v39, %v1543_v54  ;;  %v657_v45 = vsel %vm4248_vm7, %v372_v16, %v656_v46  ;;  %2653 = vmatpush.bf16.msra.mxu1 %v3708_v8  ;;  %v389_v16 = vrot.slane %v4003_v13, 4  ;;  %v1254_v13 = vrot.slane %v4323_v43, 5 }
  0x6d   : > { %2265 = vmatmul.bf16.gmra.mxu2 %v3654_v57  ;;  %v842_v57 = vrot.slane %v841_v51, 4  ;;  %v865_v51 = vor.u32 %v864_v40, %v860_v38  ;;  %658 = vst [vmem:[#allocation2 + $0x38] sm:$0x1] %v657_v45  ;;  %v1248_v40 = vsel %vm4317_vm13, %v1246_v9, %v1247_v12  ;;  %v663_v12 = vld [vmem:[#allocation2 + $0x44] sm:$0x1] }
  0x6e   : > { %v664_v26 = vsel %vm4248_vm7, %v389_v16, %v663_v12 }
  0x6f   : > { %2285 = vmatmul.bf16.gmra.mxu3 %v3658_v59  ;;  %v846_v59 = vrot.slane %v844_v52, 5  ;;  %v868_v52 = vshll.u32 %v4323_v43, 16  ;;  %665 = vst [vmem:[#allocation2 + $0x44] sm:$0x1] %v664_v26  ;;  %v3731_v26 = vld [vmem:[%s5267_s1 + $0x228] sm:$0xff] }
  0x70   : > { %v4361_v37 = vld [vmem:[#allocation2 + $0x2c] sm:$0x1]  ;;  %2921 = vmatpush.bf16.msra.mxu0 %v3731_v26 }
  0x71   : > { %2250 = vmatmul.bf16.gmra.mxu1 %v4265_v19  ;;  %v847_v23 = vsel %vm4290_vm10, %v842_v57, %v846_v59  ;;  %v866_v57 = vrot.slane %v865_v51, 4  ;;  %v870_v59 = vrot.slane %v868_v52, 5  ;;  %v892_v51 = vshll.u32 %v4361_v37, 16 }
  0x72   : > { %v1482_v31 = vunpack.c.l.b16 %v847_v23  ;;  %v882_v23 = vshll.u32 %v4332_v6, 16 }
  0x73   : > { %v871_v20 = vsel %vm4290_vm10, %v866_v57, %v870_v59  ;;  %v4371_v57 = vld [vmem:[#allocation2 + $0x30] sm:$0xf] }
  0x74   : > { %v1512_v42 = vpack.c.b16 %v1482_v31, %v1481_v28  ;;  %v1484_v25 = vunpack.c.l.b16 %v871_v20  ;;  %v3724_v31 = vld [vmem:[%s5267_s1 + $0x1f0] sm:$0xff]  ;;  %v884_v33 = vrot.slane %v882_v23, 5 }
  0x75   : > { %2831 = vmatpush.bf16.msra.mxu3 %v3724_v31  ;;  %v4394_v31 = vld [vmem:[#allocation2 + $0x38] sm:$0x1] }
  0x77   : > { %2230 = vmatmul.bf16.gmra.mxu0 %v4286_v48 }
  0x7d   : > { %2270 = vmatmul.bf16.gmra.mxu2 %v3655_v62  ;;  %v4330_v62 = vld [vmem:[#allocation2 + $0x24] sm:$0xf] }
  0x7e   : > { %v873_v17 = vshrl.u32 %v4330_v62, 16  ;;  %v876_v18 = vshll.u32 %v4330_v62, 16 }
  0x7f   : > { %2290 = vmatmul.bf16.gmra.mxu3 %v3659_v3  ;;  %v861_v3 = vsel %vm4290_vm10, %v856_v55, %v860_v38  ;;  %v1245_v38 = vsel %vm4317_vm13, %v3263_v24, %v1244_v15  ;;  %v894_v55 = vrot.slane %v892_v51, 5  ;;  %v1251_v15 = vrot.slane %v4302_v7, 5 }
  0x80   : > { %v875_v28 = vrot.slane %v873_v17, 4  ;;  %v878_v4 = vrot.slane %v876_v18, 5  ;;  %v1545_v52 = vunpack.c.l.b16 %v1245_v38  ;;  %v897_v17 = vshrl.u32 %v4371_v57, 16 }
  0x81   : > { %2304 = vmatmul.bf16.vlgmr.msrb.gmra.mxu1 %v1511_v36  ;;  %v1483_v36 = vunpack.c.l.b16 %v861_v3  ;;  %v900_v18 = vshll.u32 %v4371_v57, 16  ;;  %v3264_v7 = vrot.slane %v4300_v60, 9  ;;  %v1253_v24 = vrot.slane %v1251_v15, 4 }
  0x82   : > { %v879_v41 = vor.u32 %v878_v4, %v875_v28  ;;  %v899_v46 = vrot.slane %v897_v17, 4 }
  0x83   : > { %v4367_v11 = vpack.c.b16 %v1484_v25, %v1483_v36  ;;  %v902_v25 = vrot.slane %v900_v18, 5  ;;  %v1252_v60 = vsel %vm4317_vm13, %v3264_v7, %v1251_v15  ;;  %v1255_v43 = vsel %vm4317_vm13, %v1253_v24, %v1254_v13  ;;  %v3715_v7 = vld [vmem:[%s5267_s1 + $0x1a8] sm:$0xff] }
  0x84   : > { %v880_v54 = vrot.slane %v879_v41, 4  ;;  %v1548_v34 = vunpack.c.l.b16 %v1255_v43  ;;  %2743 = vmatpush.bf16.msra.mxu2 %v3715_v7 }
  0x85   : > { %v903_v8 = vor.u32 %v902_v25, %v899_v46  ;;  %v3707_v25 = vld [vmem:[%s5267_s1 + $0x168] sm:$0xff] }
  0x86   : > { %v885_v3 = vsel %vm4290_vm10, %v880_v54, %v884_v33  ;;  %v406_v54 = vrot.slane %v4092_v5, 4  ;;  %v1261_v5 = vrot.slane %v4361_v37, 5  ;;  %2654 = vmatpush.bf16.msra.mxu1 %v3707_v25 }
  0x87   : > { %2571 = vmatmul.bf16.vlgmr.msrb.gmra.mxu0 %v1512_v42  ;;  %v1485_v9 = vunpack.c.l.b16 %v885_v3  ;;  %v904_v38 = vrot.slane %v903_v8, 4 }
  0x8d   : > { %2393 = vmatmul.bf16.vlgmr.msrb.gmra.mxu2 %v1575_v2  ;;  %v4375_v2 = vld [vmem:[#allocation2 + $0x34] sm:$0xf] }
  0x8e   : > { %v906_v23 = vshll.u32 %v4375_v2, 16 }
  0x8f   : > { %2482 = vmatmul.bf16.vlgmr.msrb.gmra.mxu3 %v4166_v21  ;;  %v888_v21 = vrot.slane %v886_v63, 4  ;;  %v910_v63 = vshrl.u32 %v4375_v2, 16 }
  0x90   : > { %v908_v28 = vrot.slane %v906_v23, 5  ;;  %v670_v23 = vld [vmem:[#allocation2 + $0x50] sm:$0x1] }
  0x91   : > { %2309 = vmatmul.bf16.gmra.mxu1 %v1512_v42  ;;  %v889_v50 = vor.u32 %v888_v21, %v884_v33  ;;  %v1546_v42 = vunpack.c.l.b16 %v1248_v40  ;;  %v912_v4 = vrot.slane %v910_v63, 4  ;;  %v916_v33 = vshll.u32 %v4394_v31, 16 }
  0x92   : > { %v1547_v21 = vunpack.c.l.b16 %v1252_v60 }
  0x93   : > { %v890_v39 = vrot.slane %v889_v50, 4  ;;  %v4373_v59 = vpack.c.b16 %v1546_v42, %v1545_v52  ;;  %v913_v45 = vor.u32 %v912_v4, %v908_v28  ;;  %v918_v41 = vrot.slane %v916_v33, 5  ;;  %v4404_v50 = vld [vmem:[#allocation2 + $0x3c] sm:$0xf]  ;;  %v4408_v52 = vld [vmem:[#allocation2 + $0x40] sm:$0xf] }
  0x94   : > { %v4406_v51 = vpack.c.b16 %v1548_v34, %v1547_v21  ;;  %v1258_v42 = vrot.slane %v4332_v6, 5  ;;  %v924_v15 = vshll.u32 %v4404_v50, 16  ;;  %v930_v3 = vshll.u32 %v4408_v52, 16 }
  0x95   : > { %v895_v20 = vsel %vm4290_vm10, %v890_v39, %v894_v55  ;;  %v914_v40 = vrot.slane %v913_v45, 4  ;;  %v909_v39 = vsel %vm4290_vm10, %v904_v38, %v908_v28  ;;  %v921_v55 = vshrl.u32 %v4404_v50, 16  ;;  %v4449_v38 = vld [vmem:[#allocation2 + $0x48] sm:$0xf] }
  0x96   : > { %v1486_v36 = vunpack.c.l.b16 %v895_v20  ;;  %v934_v17 = vshrl.u32 %v4408_v52, 16  ;;  %v3265_v6 = vrot.slane %v4330_v62, 9  ;;  %v1260_v18 = vrot.slane %v1258_v42, 4 }
  0x97   : > { %2576 = vmatmul.bf16.gmra.mxu0 %v4367_v11  ;;  %v919_v16 = vsel %vm4290_vm10, %v914_v40, %v918_v41  ;;  %v1487_v20 = vunpack.c.l.b16 %v909_v39  ;;  %v923_v24 = vrot.slane %v921_v55, 4  ;;  %v926_v13 = vrot.slane %v924_v15, 5  ;;  %v4453_v41 = vld [vmem:[#allocation2 + $0x4c] sm:$0xf] }
  0x98   : > { %v1488_v63 = vunpack.c.l.b16 %v919_v16  ;;  %v671_v62 = vsel %vm4248_vm7, %v406_v54, %v670_v23  ;;  %v932_v12 = vrot.slane %v930_v3, 5  ;;  %v936_v37 = vrot.slane %v934_v17, 4  ;;  %v3767_v23 = vld [vmem:[#allocation2 + $0x30] sm:$0xff] }
  0x99   : > { %672 = vst [vmem:[#allocation2 + $0x50] sm:$0x1] %v671_v62  ;;  %v1262_v46 = vsel %vm4317_vm13, %v1260_v18, %v1261_v5  ;;  %v927_v4 = vor.u32 %v926_v13, %v923_v24  ;;  %v1265_v54 = vrot.slane %v4375_v2, 5  ;;  %v423_v39 = vrot.slane %v4171_v32, 4 }
  0x9a   : > { %v4445_v28 = vpack.c.b16 %v1488_v63, %v1487_v20  ;;  %v937_v60 = vor.u32 %v936_v37, %v932_v12  ;;  %v1550_v45 = vunpack.c.l.b16 %v1262_v46  ;;  %v945_v15 = vshrl.u32 %v4449_v38, 16  ;;  %v677_v20 = vld [vmem:[#allocation2 + $0x5c] sm:$0x1] }
  0x9b   : > { %v928_v33 = vrot.slane %v927_v4, 4  ;;  %v948_v16 = vshll.u32 %v4449_v38, 16  ;;  %v954_v17 = vshll.u32 %v4453_v41, 16  ;;  %v3266_v2 = vrot.slane %v4371_v57, 9 }
  0x9c   : > { %5305 = vst [vmem:[#allocation4_spill] sm:$0xff] %v4445_v28  ;;  %v938_v21 = vrot.slane %v937_v60, 4  ;;  %v1267_v18 = vrot.slane %v1265_v54, 4  ;;  %v1268_v32 = vrot.slane %v4394_v31, 5  ;;  %v947_v7 = vrot.slane %v945_v15, 4 }
  0x9d   : > { %2398 = vmatmul.bf16.gmra.mxu2 %v4373_v59  ;;  %v933_v55 = vsel %vm4290_vm10, %v928_v33, %v932_v12  ;;  %v950_v24 = vrot.slane %v948_v16, 5  ;;  %v678_v13 = vsel %vm4248_vm7, %v423_v39, %v677_v20  ;;  %v956_v62 = vrot.slane %v954_v17, 5 }
  0x9e   : > { %v1489_v5 = vunpack.c.l.b16 %v933_v55  ;;  %679 = vst [vmem:[#allocation2 + $0x5c] sm:$0x1] %v678_v13  ;;  %v1266_v31 = vsel %vm4317_vm13, %v3266_v2, %v1265_v54  ;;  %v1269_v37 = vsel %vm4317_vm13, %v1267_v18, %v1268_v32  ;;  %v4491_v54 = vld [vmem:[#allocation2 + $0x58] sm:$0xf]  ;;  %v1272_v55 = vrot.slane %v4408_v52, 5 }
  0x9f   : > { %2487 = vmatmul.bf16.gmra.mxu3 %v4216_v35  ;;  %v4400_v35 = vpack.c.b16 %v1486_v36, %v1485_v9  ;;  %v3723_v9 = vld [vmem:[%s5267_s1 + $0x1e8] sm:$0xff]  ;;  %v1259_v36 = vsel %vm4317_vm13, %v3265_v6, %v1258_v42  ;;  %v958_v6 = vshrl.u32 %v4453_v41, 16  ;;  %v951_v46 = vor.u32 %v950_v24, %v947_v7  ;;  %v3714_v7 = vld [vmem:[%s5267_s1 + $0x1a0] sm:$0xff] }
  0xa0   : > { %2832 = vmatpush.bf16.msra.mxu3 %v3723_v9  ;;  %v1549_v8 = vunpack.c.l.b16 %v1259_v36  ;;  %v4475_v57 = vld [vmem:[#allocation2 + $0x50] sm:$0x1]  ;;  %v1551_v60 = vunpack.c.l.b16 %v1266_v31  ;;  %v440_v15 = vrot.slane %v3956_v47, 4  ;;  %v978_v2 = vshll.u32 %v4491_v54, 16  ;;  %2744 = vmatpush.bf16.msra.mxu2 %v3714_v7 }
  0xa1   : > { %2314 = vmatmul.bf16.gmra.mxu1 %v4367_v11  ;;  %5304 = vst [vmem:[#allocation3_spill] sm:$0xff] %v4400_v35  ;;  %v960_v12 = vrot.slane %v958_v6, 4  ;;  %v964_v4 = vshll.u32 %v4475_v57, 16  ;;  %v982_v18 = vshrl.u32 %v4491_v54, 16  ;;  %v3267_v47 = vrot.slane %v4404_v50, 9 }
  0xa2   : > { %v4451_v40 = vpack.c.b16 %v1550_v45, %v1549_v8  ;;  %v952_v8 = vrot.slane %v951_v46, 4  ;;  %v1274_v52 = vrot.slane %v1272_v55, 4 }
  0xa3   : > { %v961_v26 = vor.u32 %v960_v12, %v956_v62  ;;  %v966_v33 = vrot.slane %v964_v4, 5  ;;  %v984_v31 = vrot.slane %v982_v18, 4  ;;  %v1273_v46 = vsel %vm4317_vm13, %v3267_v47, %v1272_v55  ;;  %v3706_v4 = vld [vmem:[%s5267_s1 + $0x160] sm:$0xff] }
  0xa4   : > { %v957_v16 = vsel %vm4290_vm10, %v952_v8, %v956_v62  ;;  %v3722_v62 = vld [vmem:[%s5267_s1 + $0x1e0] sm:$0xff]  ;;  %2655 = vmatpush.bf16.msra.mxu1 %v3706_v4 }
  0xa5   : > { %v962_v45 = vrot.slane %v961_v26, 4  ;;  %v1491_v20 = vunpack.c.l.b16 %v957_v16  ;;  %2833 = vmatpush.bf16.msra.mxu3 %v3722_v62  ;;  %v4546_v47 = vld [vmem:[#allocation2 + $0x60] sm:$0xf] }
  0xa7   : > { %2581 = vmatmul.bf16.gmra.mxu0 %v4400_v35  ;;  %v967_v6 = vsel %vm4290_vm10, %v962_v45, %v966_v33 }
  0xa8   : > { %v4455_v42 = vpop.f32.mrf.mxu1 }
  0xa9   : > { %v4472_v9 = vpop.f32.mrf.mxu0 }
  0xad   : > { %2403 = vmatmul.bf16.gmra.mxu2 %v4406_v51 }
  0xaf   : > { %2492 = vmatmul.bf16.gmra.mxu3 %v4286_v48  ;;  %v4433_v48 = vld [vmem:[#allocation2 + $0x44] sm:$0x1] }
  0xb0   : > { %v940_v43 = vshll.u32 %v4433_v48, 16  ;;  %v4483_v25 = vpop.f32.mrf.mxu1 }
  0xb1   : > { %2319 = vmatmul.bf16.gmra.mxu1 %v4400_v35  ;;  %v4493_v39 = vpop.f32.mrf.mxu0 }
  0xb2   : > { %v942_v34 = vrot.slane %v940_v43, 5  ;;  %v1552_v43 = vunpack.c.l.b16 %v1269_v37 }
  0xb4   : > { %v943_v3 = vsel %vm4290_vm10, %v938_v21, %v942_v34  ;;  %v4487_v21 = vld [vmem:[#allocation2 + $0x54] sm:$0xf]  ;;  %v4489_v34 = vpack.c.b16 %v1552_v43, %v1551_v60  ;;  %v3730_v60 = vld [vmem:[%s5267_s1 + $0x220] sm:$0xff] }
  0xb5   : > { %v1490_v63 = vunpack.c.l.b16 %v943_v3  ;;  %v969_v3 = vshrl.u32 %v4487_v21, 16  ;;  %v972_v17 = vshll.u32 %v4487_v21, 16  ;;  %2922 = vmatpush.bf16.msra.mxu0 %v3730_v60  ;;  %v691_v60 = vld [vmem:[#allocation2 + $0x74] sm:$0x1] }
  0xb6   : > { %5307 = vst [vmem:[#allocation6_spill] sm:$0xff] %v4489_v34 }
  0xb7   : > { %2586 = vmatmul.bf16.gmra.mxu0 %v4445_v28  ;;  %v4481_v36 = vpack.c.b16 %v1490_v63, %v1489_v5  ;;  %v1275_v5 = vrot.slane %v4433_v48, 5  ;;  %v1492_v63 = vunpack.c.l.b16 %v967_v6  ;;  %v971_v24 = vrot.slane %v969_v3, 4 }
  0xb8   : > { %v974_v13 = vrot.slane %v972_v17, 5  ;;  %v980_v48 = vrot.slane %v978_v2, 5 }
  0xb9   : > { %5306 = vst [vmem:[#allocation5_spill] sm:$0xff] %v4481_v36  ;;  %v1276_v26 = vsel %vm4317_vm13, %v1274_v52, %v1275_v5  ;;  %v4536_v43 = vpack.c.b16 %v1492_v63, %v1491_v20  ;;  %v4550_v5 = vld [vmem:[#allocation2 + $0x64] sm:$0xf]  ;;  %v457_v63 = vrot.slane %v4012_v22, 4  ;;  %v3268_v22 = vrot.slane %v4449_v38, 9 }
  0xba   : > { %v975_v8 = vor.u32 %v974_v13, %v971_v24  ;;  %v985_v33 = vor.u32 %v984_v31, %v980_v48  ;;  %v1554_v16 = vunpack.c.l.b16 %v1276_v26  ;;  %v993_v24 = vshrl.u32 %v4546_v47, 16 }
  0xbb   : > { %5309 = vst [vmem:[#allocation8_spill] sm:$0xff] %v4536_v43  ;;  %v996_v13 = vshll.u32 %v4546_v47, 16  ;;  %v1002_v31 = vshll.u32 %v4550_v5, 16  ;;  %v1282_v26 = vrot.slane %v4475_v57, 5 }
  0xbc   : > { %v976_v17 = vrot.slane %v975_v8, 4  ;;  %v986_v2 = vrot.slane %v985_v33, 4  ;;  %v995_v33 = vrot.slane %v993_v24, 4 }
  0xbd   : > { %2408 = vmatmul.bf16.gmra.mxu2 %v4451_v40 }
  0xbe   : > { %v981_v7 = vsel %vm4290_vm10, %v976_v17, %v980_v48  ;;  %v1004_v17 = vrot.slane %v1002_v31, 5 }
  0xbf   : > { %2497 = vmatmul.bf16.gmra.mxu3 %v3767_v23  ;;  %v684_v23 = vld [vmem:[#allocation2 + $0x68] sm:$0x1]  ;;  %v1493_v4 = vunpack.c.l.b16 %v981_v7 }
  0xc0   : > { %v685_v50 = vsel %vm4248_vm7, %v440_v15, %v684_v23  ;;  %v1553_v15 = vunpack.c.l.b16 %v1273_v46  ;;  %v1279_v23 = vrot.slane %v4453_v41, 5  ;;  %v1006_v46 = vshrl.u32 %v4550_v5, 16 }
  0xc1   : > { %2324 = vmatmul.bf16.gmra.mxu1 %v4445_v28  ;;  %686 = vst [vmem:[#allocation2 + $0x68] sm:$0x1] %v685_v50  ;;  %v3768_v28 = vld [vmem:[#allocation2 + $0x60] sm:$0xff] }
  0xc2   : > { %v4548_v52 = vpack.c.b16 %v1554_v16, %v1553_v15  ;;  %v1281_v48 = vrot.slane %v1279_v23, 4  ;;  %v692_v15 = vsel %vm4248_vm7, %v457_v63, %v691_v60 }
  0xc3   : > { %693 = vst [vmem:[#allocation2 + $0x74] sm:$0x1] %v692_v15 }
  0xc4   : > { %5310 = vst [vmem:[#allocation9_spill] sm:$0xff] %v4548_v52 }
  0xc7   : > { %2591 = vmatmul.bf16.gmra.mxu0 %v4481_v36 }
  0xc8   : > { %v4577_v38 = vld [vmem:[#allocation2 + $0x68] sm:$0x1] }
  0xcd   : > { %2413 = vmatmul.bf16.gmra.mxu2 %v4489_v34 }
  0xce   : > { %v4506_v32 = vpop.f32.mrf.mxu1 }
  0xcf   : > { %2502 = vmatmul.bf16.gmra.mxu3 %v4126_v56  ;;  %v4522_v56 = vld [vmem:[#allocation2 + $0x5c] sm:$0x1] }
  0xd0   : > { %v4519_v12 = vpop.f32.mrf.mxu2  ;;  %v988_v55 = vshll.u32 %v4522_v56, 16 }
  0xd1   : > { %2329 = vmatmul.bf16.gmra.mxu1 %v4481_v36 }
  0xd2   : > { %v4524_v37 = vpop.f32.mrf.mxu3  ;;  %v990_v18 = vrot.slane %v988_v55, 5  ;;  %v998_v55 = vrot.slane %v996_v13, 5 }
  0xd3   : > { %5308 = vst [vmem:[#allocation7_spill] sm:$0xff] %v4524_v37  ;;  %v3721_v37 = vld [vmem:[%s5267_s1 + $0x1d8] sm:$0xff] }
  0xd4   : > { %v4538_v45 = vpop.f32.mrf.mxu0  ;;  %v991_v50 = vsel %vm4290_vm10, %v986_v2, %v990_v18  ;;  %v1008_v2 = vrot.slane %v1006_v46, 4  ;;  %v1283_v18 = vsel %vm4317_vm13, %v1281_v48, %v1282_v26  ;;  %v999_v63 = vor.u32 %v998_v55, %v995_v33  ;;  %v4595_v48 = vld [vmem:[#allocation2 + $0x6c] sm:$0xf]  ;;  %2834 = vmatpush.bf16.msra.mxu3 %v3721_v37 }
  0xd5   : > { %v1494_v8 = vunpack.c.l.b16 %v991_v50  ;;  %v1012_v50 = vshll.u32 %v4577_v38, 16  ;;  %v1556_v46 = vunpack.c.l.b16 %v1283_v18  ;;  %v1286_v33 = vrot.slane %v4491_v54, 5 }
  0xd6   : > { %v4541_v3 = vpop.f32.mrf.mxu1  ;;  %v1009_v13 = vor.u32 %v1008_v2, %v1004_v17  ;;  %v1000_v15 = vrot.slane %v999_v63, 4  ;;  %v474_v55 = vrot.slane %v4110_v30, 4  ;;  %v1020_v18 = vshll.u32 %v4595_v48, 16 }
  0xd7   : > { %2596 = vmatmul.bf16.gmra.mxu0 %v4536_v43  ;;  %v4585_v7 = vpack.c.b16 %v1494_v8, %v1493_v4  ;;  %v4599_v4 = vld [vmem:[#allocation2 + $0x70] sm:$0xf]  ;;  %v3269_v30 = vrot.slane %v4487_v21, 9 }
  0xd8   : > { %v4544_v6 = vpop.f32.mrf.mxu2  ;;  %v1005_v2 = vsel %vm4290_vm10, %v1000_v15, %v1004_v17  ;;  %v1288_v17 = vrot.slane %v1286_v33, 4 }
  0xd9   : > { %5313 = vst [vmem:[#allocation12_spill] sm:$0xff] %v4585_v7  ;;  %v1495_v15 = vunpack.c.l.b16 %v1005_v2 }
  0xda   : > { %v4552_v20 = vpop.f32.mrf.mxu3 }
  0xdb   : > { %5311 = vst [vmem:[#allocation10_spill] sm:$0xff] %v4552_v20 }
  0xdc   : > { %v4560_v62 = vpop.f32.mrf.mxu0 }
  0xdd   : > { %2418 = vmatmul.bf16.gmra.mxu2 %v4548_v52 }
  0xde   : > { %v4567_v41 = vpop.f32.mrf.mxu1 }
  0xdf   : > { %2507 = vmatmul.bf16.gmra.mxu3 %v4182_v58  ;;  %v1280_v58 = vsel %vm4317_vm13, %v3268_v22, %v1279_v23  ;;  %v1010_v23 = vrot.slane %v1009_v13, 4  ;;  %v1014_v22 = vrot.slane %v1012_v50, 5  ;;  %v1026_v50 = vshll.u32 %v4599_v4, 16 }
  0xe0   : > { %v4574_v16 = vpop.f32.mrf.mxu2  ;;  %v1555_v31 = vunpack.c.l.b16 %v1280_v58  ;;  %v1017_v58 = vshrl.u32 %v4595_v48, 16 }
  0xe1   : > { %2334 = vmatmul.bf16.gmra.mxu1 %v4536_v43  ;;  %v1015_v13 = vsel %vm4290_vm10, %v1010_v23, %v1014_v22  ;;  %v3713_v23 = vld [vmem:[%s5267_s1 + $0x198] sm:$0xff]  ;;  %v1022_v43 = vrot.slane %v1020_v18, 5 }
  0xe2   : > { %v4579_v57 = vpop.f32.mrf.mxu3  ;;  %v4597_v26 = vpack.c.b16 %v1556_v46, %v1555_v31  ;;  %v1030_v31 = vshrl.u32 %v4599_v4, 16  ;;  %v1289_v46 = vrot.slane %v4522_v56, 5  ;;  %v1496_v20 = vunpack.c.l.b16 %v1015_v13  ;;  %2745 = vmatpush.bf16.msra.mxu2 %v3713_v23 }
  0xe3   : > { %5312 = vst [vmem:[#allocation11_spill] sm:$0xff] %v4579_v57  ;;  %v1019_v22 = vrot.slane %v1017_v58, 4  ;;  %v1028_v56 = vrot.slane %v1026_v50, 5  ;;  %v1287_v58 = vsel %vm4317_vm13, %v3269_v30, %v1286_v33  ;;  %v3705_v50 = vld [vmem:[%s5267_s1 + $0x158] sm:$0xff] }
  0xe4   : > { %v4587_v24 = vpop.f32.mrf.mxu0  ;;  %5315 = vst [vmem:[#allocation14_spill] sm:$0xff] %v4597_v26  ;;  %v1032_v2 = vrot.slane %v1030_v31, 4  ;;  %v1290_v18 = vsel %vm4317_vm13, %v1288_v17, %v1289_v46  ;;  %v3729_v31 = vld [vmem:[%s5267_s1 + $0x218] sm:$0xff]  ;;  %v1557_v30 = vunpack.c.l.b16 %v1287_v58  ;;  %2656 = vmatpush.bf16.msra.mxu1 %v3705_v50  ;;  %v1293_v58 = vrot.slane %v4550_v5, 5 }
  0xe5   : > { %2923 = vmatpush.bf16.msra.mxu0 %v3729_v31 }
  0xe6   : > { %v4590_v60 = vpop.f32.mrf.mxu1 }
  0xe7   : > { %2601 = vmatmul.bf16.gmra.mxu0 %v4585_v7 }
  0xe8   : > { %v4593_v57 = vpop.f32.mrf.mxu2 }
  0xe9   : > { %5314 = vst [vmem:[#allocation13_spill] sm:$0xff] %v4593_v57 }
  0xea   : > { %v4601_v8 = vpop.f32.mrf.mxu3 }
  0xeb   : > { %5316 = vst [vmem:[#allocation15_spill] sm:$0xff] %v4601_v8  ;;  %v698_v8 = vld [vmem:[#allocation2 + $0x80] sm:$0x1] }
  0xec   : > { %v4609_v63 = vpop.f32.mrf.mxu0  ;;  %v699_v21 = vsel %vm4248_vm7, %v474_v55, %v698_v8  ;;  %v4640_v8 = vpack.c.b16 %v1496_v20, %v1495_v15  ;;  %v1023_v55 = vor.u32 %v1022_v43, %v1019_v22  ;;  %v4654_v20 = vld [vmem:[#allocation2 + $0x78] sm:$0xf]  ;;  %v4658_v22 = vld [vmem:[#allocation2 + $0x7c] sm:$0xf] }
  0xed   : > { %2423 = vmatmul.bf16.gmra.mxu2 %v4597_v26  ;;  %700 = vst [vmem:[#allocation2 + $0x80] sm:$0x1] %v699_v21  ;;  %v1033_v21 = vor.u32 %v1032_v2, %v1028_v56  ;;  %v1041_v50 = vshrl.u32 %v4654_v20, 16  ;;  %v1044_v31 = vshll.u32 %v4654_v20, 16 }
  0xee   : > { %v4616_v54 = vpop.f32.mrf.mxu1  ;;  %5319 = vst [vmem:[#allocation18_spill] sm:$0xff] %v4640_v8  ;;  %v1024_v43 = vrot.slane %v1023_v55, 4  ;;  %v491_v55 = vrot.slane %v4184_v61, 4  ;;  %v1296_v61 = vrot.slane %v4577_v38, 5 }
  0xef   : > { %2512 = vmatmul.bf16.gmra.mxu3 %v4265_v19  ;;  %v4632_v19 = vld [vmem:[#allocation2 + $0x74] sm:$0x1]  ;;  %v1034_v46 = vrot.slane %v1033_v21, 4  ;;  %v1050_v21 = vshll.u32 %v4658_v22, 16 }
  0xf0   : > { %v4629_v26 = vpop.f32.mrf.mxu2  ;;  %v1036_v33 = vshll.u32 %v4632_v19, 16 }
  0xf1   : > { %5317 = vst [vmem:[#allocation16_spill] sm:$0xff] %v4629_v26  ;;  %2339 = vmatmul.bf16.gmra.mxu1 %v4585_v7  ;;  %v1029_v7 = vsel %vm4290_vm10, %v1024_v43, %v1028_v56  ;;  %v1046_v56 = vrot.slane %v1044_v31, 5  ;;  %v705_v43 = vld [vmem:[#allocation2 + $0x8c] sm:$0x1]  ;;  %v1052_v34 = vrot.slane %v1050_v21, 5 }
  0xf2   : > { %v4634_v13 = vpop.f32.mrf.mxu3  ;;  %v1038_v15 = vrot.slane %v1036_v33, 5  ;;  %v1054_v33 = vshrl.u32 %v4658_v22, 16  ;;  %v1497_v52 = vunpack.c.l.b16 %v1029_v7 }
  0xf3   : > { %5318 = vst [vmem:[#allocation17_spill] sm:$0xff] %v4634_v13  ;;  %v1558_v13 = vunpack.c.l.b16 %v1290_v18 }
  0xf4   : > { %v4648_v23 = vpop.f32.mrf.mxu0  ;;  %v1039_v5 = vsel %vm4290_vm10, %v1034_v46, %v1038_v15  ;;  %v1056_v57 = vrot.slane %v1054_v33, 4  ;;  %v706_v46 = vsel %vm4248_vm7, %v491_v55, %v705_v43 }
  0xf5   : > { %v4660_v2 = vpack.c.b16 %v1558_v13, %v1557_v30  ;;  %v3270_v13 = vrot.slane %v4546_v47, 9  ;;  %v1295_v30 = vrot.slane %v1293_v58, 4  ;;  %v1498_v26 = vunpack.c.l.b16 %v1039_v5  ;;  %707 = vst [vmem:[#allocation2 + $0x8c] sm:$0x1] %v706_v46 }
  0xf6   : > { %v4651_v37 = vpop.f32.mrf.mxu1  ;;  %v1057_v31 = vor.u32 %v1056_v57, %v1052_v34  ;;  %v4705_v57 = vld [vmem:[#allocation2 + $0x88] sm:$0xf] }
  0xf7   : > { %2606 = vmatmul.bf16.gmra.mxu0 %v4640_v8  ;;  %5321 = vst [vmem:[#allocation20_spill] sm:$0xff] %v4660_v2  ;;  %v1294_v38 = vsel %vm4317_vm13, %v3270_v13, %v1293_v58 }
  0xf8   : > { %v4656_v17 = vpop.f32.mrf.mxu2  ;;  %v1559_v33 = vunpack.c.l.b16 %v1294_v38  ;;  %v1058_v58 = vrot.slane %v1057_v31, 4  ;;  %v1074_v31 = vshll.u32 %v4705_v57, 16 }
  0xf9   : > { %5320 = vst [vmem:[#allocation19_spill] sm:$0xff] %v4656_v17  ;;  %v1043_v17 = vrot.slane %v1041_v50, 4  ;;  %v4692_v50 = vpack.c.b16 %v1498_v26, %v1497_v52 }
  0xfa   : > { %v4663_v18 = vpop.f32.mrf.mxu3 }
  0xfb   : > { %5322 = vst [vmem:[#allocation21_spill] sm:$0xff] %v4663_v18  ;;  %v1047_v7 = vor.u32 %v1046_v56, %v1043_v17  ;;  %v1300_v17 = vrot.slane %v4599_v4, 5  ;;  %v3271_v4 = vrot.slane %v4595_v48, 9  ;;  %v3712_v48 = vld [vmem:[%s5267_s1 + $0x190] sm:$0xff] }
  0xfc   : > { %v4672_v36 = vpop.f32.mrf.mxu0  ;;  %2746 = vmatpush.bf16.msra.mxu2 %v3712_v48 }
  0xfd   : > { %2428 = vmatmul.bf16.gmra.mxu2 %v4660_v2  ;;  %v4683_v2 = vld [vmem:[#allocation2 + $0x80] sm:$0x1]  ;;  %v1048_v46 = vrot.slane %v1047_v7, 4 }
  0xfe   : > { %v2305_v18 = vpop.f32.mrf.mxu1  ;;  %v1060_v55 = vshll.u32 %v4683_v2, 16 }
  0xff   : > { %2517 = vmatmul.bf16.gmra.mxu3 %v3768_v28  ;;  %v1297_v28 = vsel %vm4317_vm13, %v1295_v30, %v1296_v61  ;;  %v4701_v30 = vld [vmem:[#allocation2 + $0x84] sm:$0xf]  ;;  %v1053_v56 = vsel %vm4290_vm10, %v1048_v46, %v1052_v34  ;;  %v1302_v34 = vrot.slane %v1300_v17, 4  ;;  %v2306_v46 = vadd.f32 %v2305_v18, %v4472_v9  ;;  %v3720_v9 = vld [vmem:[%s5267_s1 + $0x1d0] sm:$0xff] }
 0x100   : > { %v4681_v15 = vpop.f32.mrf.mxu2  ;;  %v1560_v5 = vunpack.c.l.b16 %v1297_v28  ;;  %v1062_v13 = vrot.slane %v1060_v55, 5  ;;  %v1068_v38 = vshll.u32 %v4701_v30, 16  ;;  %v508_v28 = vrot.slane %v3967_v53, 4  ;;  %2835 = vmatpush.bf16.msra.mxu3 %v3720_v9 }
 0x101   : > { %5323 = vst [vmem:[#allocation22_spill] sm:$0xff] %v4681_v15  ;;  %2344 = vmatmul.bf16.gmra.mxu1 %v4640_v8  ;;  %v1078_v55 = vshrl.u32 %v4705_v57, 16 }
 0x102   : > { %v4686_v47 = vpop.f32.mrf.mxu3  ;;  %v4707_v26 = vpack.c.b16 %v1560_v5, %v1559_v33  ;;  %v1063_v7 = vsel %vm4290_vm10, %v1058_v58, %v1062_v13  ;;  %v1303_v5 = vrot.slane %v4632_v19, 5  ;;  %v1070_v58 = vrot.slane %v1068_v38, 5  ;;  %v712_v13 = vld [vmem:[#allocation2 + $0x98] sm:$0x1] }
 0x103   : > { %5324 = vst [vmem:[#allocation23_spill] sm:$0xff] %v4686_v47  ;;  %v1080_v35 = vrot.slane %v1078_v55, 4  ;;  %v713_v19 = vsel %vm4248_vm7, %v508_v28, %v712_v13  ;;  %v3728_v13 = vld [vmem:[%s5267_s1 + $0x210] sm:$0xff] }
 0x104   : > { %v4695_v21 = vpop.f32.mrf.mxu0  ;;  %5326 = vst [vmem:[#allocation25_spill] sm:$0xff] %v4707_v26  ;;  %v1304_v38 = vsel %vm4317_vm13, %v1302_v34, %v1303_v5  ;;  %2924 = vmatpush.bf16.msra.mxu0 %v3728_v13 }
 0x105   : > { %714 = vst [vmem:[#allocation2 + $0x98] sm:$0x1] %v713_v19  ;;  %v1562_v48 = vunpack.c.l.b16 %v1304_v38  ;;  %v4761_v19 = vld [vmem:[#allocation2 + $0x94] sm:$0xf] }
 0x106   : > { %v2307_v43 = vpop.f32.mrf.mxu1 }
 0x107   : > { %2611 = vmatmul.bf16.gmra.mxu0 %v4692_v50  ;;  %v4699_v47 = vadd.f32 %v2307_v43, %v4493_v39  ;;  %v1065_v39 = vshrl.u32 %v4701_v30, 16  ;;  %v1499_v43 = vunpack.c.l.b16 %v1053_v56  ;;  %v4738_v56 = vld [vmem:[#allocation2 + $0x8c] sm:$0x1] }
 0x108   : > { %v4703_v52 = vpop.f32.mrf.mxu2 }
 0x109   : > { %5325 = vst [vmem:[#allocation24_spill] sm:$0xff] %v4703_v52  ;;  %v1067_v8 = vrot.slane %v1065_v39, 4  ;;  %v3769_v52 = vld [vmem:[#allocation2 + $0x6c] sm:$0xff]  ;;  %v1301_v39 = vsel %vm4317_vm13, %v3271_v4, %v1300_v17 }
 0x10a   : > { %v4710_v61 = vpop.f32.mrf.mxu3  ;;  %v1561_v4 = vunpack.c.l.b16 %v1301_v39 }
 0x10b   : > { %5327 = vst [vmem:[#allocation26_spill] sm:$0xff] %v4710_v61  ;;  %v1500_v61 = vunpack.c.l.b16 %v1063_v7  ;;  %v1071_v7 = vor.u32 %v1070_v58, %v1067_v8  ;;  %v4759_v58 = vld [vmem:[#allocation2 + $0x90] sm:$0xf] }
 0x10c   : > { %v4721_v33 = vpop.f32.mrf.mxu0 }
 0x10d   : > { %2433 = vmatmul.bf16.gmra.mxu2 %v4707_v26  ;;  %v1076_v26 = vrot.slane %v1074_v31, 5  ;;  %v4745_v55 = vpack.c.b16 %v1500_v61, %v1499_v43 }
 0x10e   : > { %v2310_v53 = vpop.f32.mrf.mxu1 }
 0x10f   : > { %2522 = vmatmul.bf16.gmra.mxu3 %v3769_v52  ;;  %v4728_v15 = vadd.f32 %v2310_v53, %v4538_v45  ;;  %5328 = vst [vmem:[#allocation27_spill] sm:$0xff] %v4745_v55  ;;  %v1081_v28 = vor.u32 %v1080_v35, %v1076_v26  ;;  %v1084_v53 = vshll.u32 %v4738_v56, 16  ;;  %v1072_v35 = vrot.slane %v1071_v7, 4 }
 0x110   : > { %v2394_v18 = vpop.f32.mrf.mxu2  ;;  %v1092_v7 = vshll.u32 %v4759_v58, 16 }
 0x111   : > { %v2395_v52 = vadd.f32 %v2394_v18, %v2306_v46  ;;  %2349 = vmatmul.bf16.gmra.mxu1 %v4692_v50  ;;  %v3704_v46 = vld [vmem:[%s5267_s1 + $0x150] sm:$0xff]  ;;  %v1082_v5 = vrot.slane %v1081_v28, 4  ;;  %v1086_v43 = vrot.slane %v1084_v53, 5  ;;  %v1077_v38 = vsel %vm4290_vm10, %v1072_v35, %v1076_v26 }
 0x112   : > { %v2483_v45 = vpop.f32.mrf.mxu3  ;;  %2657 = vmatpush.bf16.msra.mxu1 %v3704_v46  ;;  %v1102_v53 = vshrl.u32 %v4761_v19, 16  ;;  %v1310_v26 = vrot.slane %v4683_v2, 5 }
 0x113   : > { %v2484_v31 = vadd.f32 %v2483_v45, %v2395_v52  ;;  %v4764_v52 = vpack.c.b16 %v1562_v48, %v1561_v4  ;;  %v525_v45 = vrot.slane %v4021_v27, 4  ;;  %v1087_v28 = vsel %vm4290_vm10, %v1082_v5, %v1086_v43  ;;  %v719_v43 = vld [vmem:[#allocation2 + $0xa4] sm:$0x1] }
 0x114   : > { %v2577_v17 = vpop.f32.mrf.mxu0  ;;  %v3272_v27 = vrot.slane %v4654_v20, 9  ;;  %v1501_v48 = vunpack.c.l.b16 %v1077_v38  ;;  %v1094_v5 = vrot.slane %v1092_v7, 5 }
 0x115   : > { %v4755_v8 = vadd.f32 %v4695_v21, %v2484_v31  ;;  %v1307_v21 = vrot.slane %v4658_v22, 5  ;;  %v720_v2 = vsel %vm4248_vm7, %v525_v45, %v719_v43 }
 0x116   : > { %v2312_v61 = vpop.f32.mrf.mxu1  ;;  %721 = vst [vmem:[#allocation2 + $0xa4] sm:$0x1] %v720_v2 }
 0x117   : > { %2616 = vmatmul.bf16.gmra.mxu0 %v4745_v55  ;;  %v2313_v34 = vadd.f32 %v2312_v61, %v4560_v62  ;;  %v1089_v62 = vshrl.u32 %v4759_v58, 16  ;;  %v1309_v22 = vrot.slane %v1307_v21, 4  ;;  %v1502_v61 = vunpack.c.l.b16 %v1087_v28 }
 0x118   : > { %v2396_v9 = vpop.f32.mrf.mxu2  ;;  %v1308_v7 = vsel %vm4317_vm13, %v3272_v27, %v1307_v21 }
 0x119   : > { %v2397_v18 = vadd.f32 %v2396_v9, %v4699_v47  ;;  %v1098_v47 = vshll.u32 %v4761_v19, 16  ;;  %v1091_v35 = vrot.slane %v1089_v62, 4  ;;  %v4782_v9 = vld [vmem:[#allocation2 + $0x78] sm:$0xff]  ;;  %v4798_v28 = vpack.c.b16 %v1502_v61, %v1501_v48 }
 0x11a   : > { %v2485_v39 = vpop.f32.mrf.mxu3  ;;  %v1563_v2 = vunpack.c.l.b16 %v1308_v7 }
 0x11b   : > { %v2486_v31 = vadd.f32 %v2485_v39, %v2397_v18  ;;  %v1100_v20 = vrot.slane %v1098_v47, 5  ;;  %v1104_v39 = vrot.slane %v1102_v53, 4  ;;  %5330 = vst [vmem:[#allocation29_spill] sm:$0xff] %v4798_v28  ;;  %v1095_v53 = vor.u32 %v1094_v5, %v1091_v35  ;;  %v4811_v5 = vld [vmem:[#allocation2 + $0x9c] sm:$0xf] }
 0x11c   : > { %v2579_v46 = vpop.f32.mrf.mxu0 }
 0x11d   : > { %2438 = vmatmul.bf16.gmra.mxu2 %v4764_v52  ;;  %v4780_v13 = vadd.f32 %v4721_v33, %v2486_v31  ;;  %v4790_v31 = vld [vmem:[#allocation2 + $0x98] sm:$0x1]  ;;  %v1105_v45 = vor.u32 %v1104_v39, %v1100_v20  ;;  %v1096_v27 = vrot.slane %v1095_v53, 4  ;;  %v4813_v39 = vld [vmem:[#allocation2 + $0xa0] sm:$0xf] }
 0x11e   : > { %v2315_v4 = vpop.f32.mrf.mxu1  ;;  %v1122_v53 = vshll.u32 %v4813_v39, 16 }
 0x11f   : > { %5329 = vst [vmem:[#allocation28_spill] sm:$0xff] %v4780_v13  ;;  %2527 = vmatmul.bf16.gmra.mxu3 %v4782_v9  ;;  %v4786_v18 = vadd.f32 %v2315_v4, %v4587_v24  ;;  %v1311_v24 = vsel %vm4317_vm13, %v1309_v22, %v1310_v26  ;;  %v1108_v4 = vshll.u32 %v4790_v31, 16  ;;  %v1106_v22 = vrot.slane %v1105_v45, 4 }
 0x120   : > { %v2399_v33 = vpop.f32.mrf.mxu2  ;;  %v1126_v45 = vshrl.u32 %v4813_v39, 16 }
 0x121   : > { %v2400_v38 = vadd.f32 %v2399_v33, %v4728_v15  ;;  %2354 = vmatmul.bf16.gmra.mxu1 %v4745_v55  ;;  %v1564_v15 = vunpack.c.l.b16 %v1311_v24  ;;  %v1110_v26 = vrot.slane %v1108_v4, 5 }
 0x122   : > { %v2488_v62 = vpop.f32.mrf.mxu3 }
 0x123   : > { %v2489_v47 = vadd.f32 %v2488_v62, %v2400_v38  ;;  %v4809_v35 = vpack.c.b16 %v1564_v15, %v1563_v2  ;;  %v542_v62 = vrot.slane %v4117_v44, 4  ;;  %v1317_v2 = vrot.slane %v4738_v56, 5  ;;  %v726_v15 = vld [vmem:[#allocation2 + $0xb0] sm:$0x1] }
 0x124   : > { %v4801_v43 = vpop.f32.mrf.mxu0 }
 0x125   : > { %v4803_v33 = vadd.f32 %v2577_v17, %v2489_v47  ;;  %v1314_v17 = vrot.slane %v4705_v57, 5  ;;  %v1116_v47 = vshll.u32 %v4811_v5, 16  ;;  %v727_v56 = vsel %vm4248_vm7, %v542_v62, %v726_v15 }
 0x126   : > { %v2317_v13 = vpop.f32.mrf.mxu1  ;;  %728 = vst [vmem:[#allocation2 + $0xb0] sm:$0x1] %v727_v56  ;;  %v4874_v56 = vld [vmem:[#allocation2 + $0xac] sm:$0xf] }
 0x127   : > { %5331 = vst [vmem:[#allocation30_spill] sm:$0xff] %v4803_v33  ;;  %2621 = vmatmul.bf16.gmra.mxu0 %v4798_v28  ;;  %v4807_v21 = vadd.f32 %v2317_v13, %v4609_v63  ;;  %v1101_v63 = vsel %vm4290_vm10, %v1096_v27, %v1100_v20  ;;  %v1111_v13 = vsel %vm4290_vm10, %v1106_v22, %v1110_v26  ;;  %v3273_v20 = vrot.slane %v4701_v30, 9  ;;  %v4832_v27 = vld [vmem:[#allocation2 + $0x84] sm:$0xff] }
 0x128   : > { %v2401_v48 = vpop.f32.mrf.mxu2  ;;  %v1316_v4 = vrot.slane %v1314_v17, 4  ;;  %5333 = vst [vmem:[#allocation32_spill] sm:$0xff] %v4832_v27  ;;  %v1503_v26 = vunpack.c.l.b16 %v1101_v63  ;;  %v3719_v30 = vld [vmem:[%s5267_s1 + $0x1c8] sm:$0xff]  ;;  %v1128_v33 = vrot.slane %v1126_v45, 4  ;;  %v4848_v63 = vld [vmem:[#allocation2 + $0xa4] sm:$0x1] }
 0x129   : > { %v2402_v61 = vadd.f32 %v2401_v48, %v2313_v34  ;;  %v1113_v34 = vshrl.u32 %v4811_v5, 16  ;;  %v1504_v48 = vunpack.c.l.b16 %v1111_v13  ;;  %2836 = vmatpush.bf16.msra.mxu3 %v3719_v30  ;;  %v4872_v30 = vld [vmem:[#allocation2 + $0xa8] sm:$0xf] }
 0x12a   : > { %v2490_v38 = vpop.f32.mrf.mxu3  ;;  %v1318_v62 = vsel %vm4317_vm13, %v1316_v4, %v1317_v2 }
 0x12b   : > { %v2491_v7 = vadd.f32 %v2490_v38, %v2402_v61  ;;  %v1115_v38 = vrot.slane %v1113_v34, 4  ;;  %v1566_v4 = vunpack.c.l.b16 %v1318_v62  ;;  %v1137_v62 = vshrl.u32 %v4872_v30, 16 }
 0x12c   : > { %v4821_v24 = vpop.f32.mrf.mxu0 }
 0x12d   : > { %2443 = vmatmul.bf16.gmra.mxu2 %v4809_v35  ;;  %v4828_v44 = vadd.f32 %v2579_v46, %v2491_v7  ;;  %v3711_v46 = vld [vmem:[%s5267_s1 + $0x188] sm:$0xff]  ;;  %v1118_v7 = vrot.slane %v1116_v47, 5  ;;  %v4854_v47 = vpack.c.b16 %v1504_v48, %v1503_v26 }
 0x12e   : > { %v2320_v57 = vpop.f32.mrf.mxu1  ;;  %2747 = vmatpush.bf16.msra.mxu2 %v3711_v46 }
 0x12f   : > { %5332 = vst [vmem:[#allocation31_spill] sm:$0xff] %v4828_v44  ;;  %2532 = vmatmul.bf16.gmra.mxu3 %v4832_v27  ;;  %v4836_v22 = vadd.f32 %v2320_v57, %v4648_v23  ;;  %v1124_v44 = vrot.slane %v1122_v53, 5  ;;  %v1315_v57 = vsel %vm4317_vm13, %v3273_v20, %v1314_v17  ;;  %v3727_v53 = vld [vmem:[%s5267_s1 + $0x208] sm:$0xff]  ;;  %v1119_v15 = vor.u32 %v1118_v7, %v1115_v38 }
 0x130   : > { %v2404_v61 = vpop.f32.mrf.mxu2  ;;  %5334 = vst [vmem:[#allocation33_spill] sm:$0xff] %v4854_v47  ;;  %v1132_v17 = vshll.u32 %v4848_v63, 16  ;;  %v1565_v20 = vunpack.c.l.b16 %v1315_v57  ;;  %2925 = vmatpush.bf16.msra.mxu0 %v3727_v53  ;;  %v559_v53 = vrot.slane %v4186_v0, 4 }
 0x131   : > { %v2405_v23 = vadd.f32 %v2404_v61, %v4786_v18  ;;  %2359 = vmatmul.bf16.gmra.mxu1 %v4798_v28  ;;  %v3703_v18 = vld [vmem:[%s5267_s1 + $0x148] sm:$0xff]  ;;  %v1129_v46 = vor.u32 %v1128_v33, %v1124_v44  ;;  %v1120_v61 = vrot.slane %v1119_v15, 4 }
 0x132   : > { %v2493_v13 = vpop.f32.mrf.mxu3  ;;  %2658 = vmatpush.bf16.msra.mxu1 %v3703_v18  ;;  %v1134_v7 = vrot.slane %v1132_v17, 5  ;;  %v1150_v18 = vshrl.u32 %v4874_v56, 16  ;;  %v3274_v17 = vrot.slane %v4759_v58, 9  ;;  %v4902_v58 = vld [vmem:[#allocation2 + $0xb0] sm:$0x1]  ;;  %2748 = vmatpush.bf16.msra.mxu2 %v3710_v14 }
 0x133   : > { %v2494_v34 = vadd.f32 %v2493_v13, %v2405_v23  ;;  %v1130_v38 = vrot.slane %v1129_v46, 4  ;;  %v4877_v13 = vpack.c.b16 %v1566_v4, %v1565_v20  ;;  %v1324_v4 = vrot.slane %v4790_v31, 5 }
 0x134   : > { %v4862_v45 = vpop.f32.mrf.mxu0 }
 0x135   : > { %v4866_v2 = vadd.f32 %v4801_v43, %v2494_v34  ;;  %5336 = vst [vmem:[#allocation35_spill] sm:$0xff] %v4877_v13  ;;  %v1321_v43 = vrot.slane %v4761_v19, 5  ;;  %v1146_v34 = vshll.u32 %v4874_v56, 16  ;;  %v1135_v19 = vsel %vm4290_vm10, %v1130_v38, %v1134_v7 }
 0x136   : > { %v2322_v26 = vpop.f32.mrf.mxu1  ;;  %v1506_v7 = vunpack.c.l.b16 %v1135_v19  ;;  %v1156_v19 = vshll.u32 %v4902_v58, 16 }
 0x137   : > { %5335 = vst [vmem:[#allocation34_spill] sm:$0xff] %v4866_v2  ;;  %2626 = vmatmul.bf16.gmra.mxu0 %v4854_v47  ;;  %v4870_v48 = vadd.f32 %v2322_v26, %v4672_v36  ;;  %v1140_v36 = vshll.u32 %v4872_v30, 16  ;;  %v1323_v20 = vrot.slane %v1321_v43, 4  ;;  %v1152_v2 = vrot.slane %v1150_v18, 4 }
 0x138   : > { %v2406_v33 = vpop.f32.mrf.mxu2 }
 0x139   : > { %v2407_v23 = vadd.f32 %v2406_v33, %v4807_v21  ;;  %v1125_v21 = vsel %vm4290_vm10, %v1120_v61, %v1124_v44  ;;  %v1139_v33 = vrot.slane %v1137_v62, 4  ;;  %v733_v44 = vld [vmem:[#allocation2 + $0xbc] sm:$0x1]  ;;  %v4899_v61 = vld [vmem:[#allocation2 + $0x90] sm:$0xff]  ;;  %v1325_v18 = vsel %vm4317_vm13, %v1323_v20, %v1324_v4 }
 0x13a   : > { %v2495_v57 = vpop.f32.mrf.mxu3  ;;  %5338 = vst [vmem:[#allocation37_spill] sm:$0xff] %v4899_v61  ;;  %v1505_v38 = vunpack.c.l.b16 %v1125_v21  ;;  %v734_v31 = vsel %vm4248_vm7, %v559_v53, %v733_v44  ;;  %v246_v44 = vld [vmem:[%s3844_s26 + $0x78] sm:$0xf] }
 0x13b   : > { %v2496_v15 = vadd.f32 %v2495_v57, %v2407_v23  ;;  %v1142_v23 = vrot.slane %v1140_v36, 5  ;;  %v1148_v57 = vrot.slane %v1146_v34, 5  ;;  %735 = vst [vmem:[#allocation2 + $0xbc] sm:$0x1] %v734_v31  ;;  %v1322_v36 = vsel %vm4317_vm13, %v3274_v17, %v1321_v43 }
 0x13c   : > { %v4885_v46 = vpop.f32.mrf.mxu0  ;;  %v1568_v31 = vunpack.c.l.b16 %v1325_v18 }
 0x13d   : > { %2448 = vmatmul.bf16.gmra.mxu2 %v4877_v13  ;;  %v4895_v26 = vadd.f32 %v4821_v24, %v2496_v15  ;;  %v1143_v15 = vor.u32 %v1142_v23, %v1139_v33  ;;  %v1153_v21 = vor.u32 %v1152_v2, %v1148_v57  ;;  %v1158_v2 = vrot.slane %v1156_v19, 5  ;;  %v4924_v33 = vld [vmem:[#allocation2 + $0xb4] sm:$0xf] }
 0x13e   : > { %v4897_v0 = vpop.f32.mrf.mxu1 }
 0x13f   : > { %5337 = vst [vmem:[#allocation36_spill] sm:$0xff] %v4895_v26  ;;  %2537 = vmatmul.bf16.gmra.mxu3 %v4899_v61  ;;  %v4913_v61 = vpack.c.b16 %v1506_v7, %v1505_v38  ;;  %v1144_v20 = vrot.slane %v1143_v15, 4  ;;  %v1154_v4 = vrot.slane %v1153_v21, 4  ;;  %v564_v38 = vshll.u32 %v246_v44, 16 }
 0x140   : > { %v2409_v24 = vpop.f32.mrf.mxu2 }
 0x141   : > { %v2410_v62 = vadd.f32 %v2409_v24, %v4836_v22  ;;  %2364 = vmatmul.bf16.gmra.mxu1 %v4854_v47  ;;  %v1567_v22 = vunpack.c.l.b16 %v1322_v36  ;;  %v561_v24 = vshrl.u32 %v246_v44, 16  ;;  %v4927_v36 = vld [vmem:[#allocation2 + $0xb8] sm:$0xf]  ;;  %v1149_v21 = vsel %vm4290_vm10, %v1144_v20, %v1148_v57 }
 0x142   : > { %v2498_v34 = vpop.f32.mrf.mxu3  ;;  %v1159_v19 = vsel %vm4290_vm10, %v1154_v4, %v1158_v2  ;;  %v1161_v44 = vshrl.u32 %v4924_v33, 16  ;;  %v3275_v47 = vrot.slane %v4811_v5, 9  ;;  %v1331_v57 = vrot.slane %v4848_v63, 5 }
 0x143   : > { %v2499_v26 = vadd.f32 %v2498_v34, %v2410_v62  ;;  %v563_v23 = vrot.slane %v561_v24, 7  ;;  %v1328_v62 = vrot.slane %v4813_v39, 5  ;;  %v1164_v24 = vshll.u32 %v4924_v33, 16  ;;  %v736_v39 = vld [vmem:[#allocation2 + $0xc0] sm:$0xf] }
 0x144   : > { %v4915_v53 = vpop.f32.mrf.mxu0  ;;  %v1507_v4 = vunpack.c.l.b16 %v1149_v21  ;;  %v1508_v2 = vunpack.c.l.b16 %v1159_v19  ;;  %v1163_v28 = vrot.slane %v1161_v44, 4  ;;  %v2326_v63 = vadd.f32 %v4897_v0, %v4455_v42  ;;  %v4964_v19 = vld [vmem:[#allocation2 + $0xbc] sm:$0x1] }
 0x145   : > { %v4919_v43 = vadd.f32 %v4862_v45, %v2499_v26  ;;  %v4930_v45 = vpack.c.b16 %v1568_v31, %v1567_v22  ;;  %v247_v26 = vld [vmem:[%s3844_s26 + $0x7c] sm:$0xf]  ;;  %v566_v18 = vor.u32 %v564_v38, %v563_v23  ;;  %v1174_v22 = vshrl.u32 %v4927_v36, 16 }
 0x146   : > { %v4921_v17 = vpop.f32.mrf.mxu1  ;;  %v1330_v38 = vrot.slane %v1328_v62, 4  ;;  %v569_v20 = vshrl.u32 %v247_v26, 16  ;;  %v1166_v27 = vrot.slane %v1164_v24, 5  ;;  %v567_v13 = vrot.slane %v563_v23, 4  ;;  %v740_v23 = vld [vmem:[#allocation2 + $0xc8] sm:$0x1] }
 0x147   : > { %5339 = vst [vmem:[#allocation38_spill] sm:$0xff] %v4919_v43  ;;  %2631 = vmatmul.bf16.gmra.mxu0 %v4913_v61  ;;  %v1329_v24 = vsel %vm4317_vm13, %v3275_v47, %v1328_v62  ;;  %v3702_v47 = vld [vmem:[%s5267_s1 + $0x140] sm:$0xff] }
 0x148   : > { %v2411_v7 = vpop.f32.mrf.mxu2  ;;  %v571_v55 = vrot.slane %v569_v20, 7  ;;  %v3726_v62 = vld [vmem:[%s5267_s1 + $0x200] sm:$0xff]  ;;  %v1569_v10 = vunpack.c.l.b16 %v1329_v24  ;;  %2659 = vmatpush.bf16.msra.mxu1 %v3702_v47  ;;  %v5013_v47 = vld [vmem:[#allocation2 + $0xa8] sm:$0xff] }
 0x149   : > { %v2412_v34 = vadd.f32 %v2411_v7, %v4870_v48  ;;  %v1170_v48 = vshll.u32 %v4927_v36, 16  ;;  %v572_v7 = vshll.u32 %v247_v26, 16  ;;  %v4955_v26 = vld [vmem:[#allocation2 + $0x9c] sm:$0xff]  ;;  %2926 = vmatpush.bf16.msra.mxu0 %v3726_v62 }
 0x14a   : > { %v2500_v15 = vpop.f32.mrf.mxu3  ;;  %v576_v42 = vrot.slane %v571_v55, 4 }
 0x14b   : > { %v2501_v43 = vadd.f32 %v2500_v15, %v2412_v34  ;;  %v737_v34 = vsel %vm3866_vm5, %v566_v18, %v736_v39  ;;  %v3718_v18 = vld [vmem:[%s5267_s1 + $0x1c0] sm:$0xff]  ;;  %v574_v44 = vor.u32 %v572_v7, %v571_v55 }
 0x14c   : > { %v4942_v31 = vpop.f32.mrf.mxu0  ;;  %738 = vst [vmem:[#allocation2 + $0xc0] sm:$0xf] %v737_v34  ;;  %2837 = vmatpush.bf16.msra.mxu3 %v3718_v18  ;;  %v741_v55 = vsel %vm4248_vm7, %v576_v42, %v740_v23  ;;  %v1167_v34 = vor.u32 %v1166_v27, %v1163_v28  ;;  %v2328_v27 = vadd.f32 %v4921_v17, %v4483_v25  ;;  %v1335_v42 = vrot.slane %v4874_v56, 5 }
 0x14d   : > { %2453 = vmatmul.bf16.gmra.mxu2 %v4930_v45  ;;  %v4949_v5 = vadd.f32 %v4885_v46, %v2501_v43  ;;  %v1172_v46 = vrot.slane %v1170_v48, 5  ;;  %v1176_v43 = vrot.slane %v1174_v22, 4  ;;  %v1332_v48 = vsel %vm4317_vm13, %v1330_v38, %v1331_v57  ;;  %742 = vst [vmem:[#allocation2 + $0xc8] sm:$0x1] %v741_v55 }
 0x14e   : > { %v4951_v15 = vpop.f32.mrf.mxu1  ;;  %v4971_v22 = vpack.c.b16 %v1508_v2, %v1507_v4  ;;  %v575_v20 = vsel %vm3854_vm4, %v567_v13, %v574_v44  ;;  %v1570_v13 = vunpack.c.l.b16 %v1332_v48  ;;  %v1168_v57 = vrot.slane %v1167_v34, 4 }
 0x14f   : > { %2542 = vmatmul.bf16.gmra.mxu3 %v4955_v26  ;;  %739 = vst [vmem:[#allocation2 + $0xc4] sm:$0xf] %v575_v20  ;;  %v1337_v34 = vrot.slane %v1335_v42, 4 }
 0x150   : > { %v2414_v21 = vpop.f32.mrf.mxu2  ;;  %v4990_v18 = vpack.c.b16 %v1570_v13, %v1569_v10  ;;  %v1173_v25 = vsel %vm4290_vm10, %v1168_v57, %v1172_v46 }
 0x151   : > { %v2415_v0 = vadd.f32 %v2414_v21, %v2326_v63  ;;  %2369 = vmatmul.bf16.gmra.mxu1 %v4913_v61  ;;  %v1177_v63 = vor.u32 %v1176_v43, %v1172_v46  ;;  %v1180_v21 = vshll.u32 %v4964_v19, 16  ;;  %v3276_v46 = vrot.slane %v4872_v30, 9 }
 0x152   : > { %v2503_v39 = vpop.f32.mrf.mxu3  ;;  %v1509_v62 = vunpack.c.l.b16 %v1173_v25 }
 0x153   : > { %v2504_v7 = vadd.f32 %v2503_v39, %v2415_v0  ;;  %v1178_v4 = vrot.slane %v1177_v63, 4  ;;  %v1182_v2 = vrot.slane %v1180_v21, 5  ;;  %v4992_v23 = vld [vmem:[#allocation2 + $0xc0] sm:$0xf]  ;;  %v1338_v63 = vrot.slane %v4902_v58, 5 }
 0x154   : > { %v2597_v38 = vpop.f32.mrf.mxu0  ;;  %v1348_v39 = vshrl.u32 %v4992_v23, 16  ;;  %v1351_v48 = vshll.u32 %v4992_v23, 16  ;;  %v2331_v21 = vadd.f32 %v4951_v15, %v4506_v32  ;;  %v5017_v30 = vld [vmem:[#allocation2 + $0xc8] sm:$0x1]  ;;  %v1336_v32 = vsel %vm4317_vm13, %v3276_v46, %v1335_v42 }
 0x155   : > { %v4985_v1 = vadd.f32 %v4915_v53, %v2504_v7  ;;  %v1183_v17 = vsel %vm4290_vm10, %v1178_v4, %v1182_v2  ;;  %v1339_v15 = vsel %vm4317_vm13, %v1337_v34, %v1338_v63 }
 0x156   : > { %v2332_v28 = vpop.f32.mrf.mxu1  ;;  %v4995_v53 = vld [vmem:[#allocation2 + $0xc4] sm:$0xf]  ;;  %v1510_v10 = vunpack.c.l.b16 %v1183_v17  ;;  %v1353_v57 = vrot.slane %v1351_v48, 5  ;;  %v1367_v17 = vshll.u32 %v5017_v30, 16  ;;  %v1572_v48 = vunpack.c.l.b16 %v1339_v15 }
 0x157   : > { %2636 = vmatmul.bf16.gmra.mxu0 %v4971_v22  ;;  %v1357_v20 = vshll.u32 %v4995_v53, 16  ;;  %v1361_v55 = vshrl.u32 %v4995_v53, 16  ;;  %v1345_v15 = vrot.slane %v4964_v19, 5 }
 0x158   : > { %v2416_v14 = vpop.f32.mrf.mxu2  ;;  %v1369_v63 = vrot.slane %v1367_v17, 5 }
 0x159   : > { %v2417_v43 = vadd.f32 %v2416_v14, %v2328_v27  ;;  %v1350_v27 = vrot.slane %v1348_v39, 4  ;;  %v1363_v4 = vrot.slane %v1361_v55, 4  ;;  %v1571_v39 = vunpack.c.l.b16 %v1336_v32 }
 0x15a   : > { %v2505_v44 = vpop.f32.mrf.mxu3 }
 0x15b   : > { %v2506_v0 = vadd.f32 %v2505_v44, %v2417_v43  ;;  %v5023_v43 = vpack.c.b16 %v1510_v10, %v1509_v62  ;;  %v5030_v10 = vpack.c.b16 %v1572_v48, %v1571_v39 }
 0x15c   : > { %v2599_v24 = vpop.f32.mrf.mxu0 }
 0x15d   : > { %2458 = vmatmul.bf16.gmra.mxu2 %v4990_v18  ;;  %v5007_v56 = vadd.f32 %v4942_v31, %v2506_v0  ;;  %v1359_v31 = vrot.slane %v1357_v20, 5  ;;  %v1354_v0 = vor.u32 %v1353_v57, %v1350_v27  ;;  %v1342_v27 = vrot.slane %v4927_v36, 5 }
 0x15e   : > { %v2335_v7 = vpop.f32.mrf.mxu1 }
 0x15f   : > { %2547 = vmatmul.bf16.gmra.mxu3 %v5013_v47  ;;  %v1364_v25 = vor.u32 %v1363_v4, %v1359_v31  ;;  %v1355_v46 = vrot.slane %v1354_v0, 4  ;;  %v1344_v32 = vrot.slane %v1342_v27, 4  ;;  %v2336_v36 = vadd.f32 %v2335_v7, %v4567_v41 }
 0x160   : > { %v2419_v13 = vpop.f32.mrf.mxu2 }
 0x161   : > { %v2420_v2 = vadd.f32 %v2419_v13, %v2331_v21  ;;  %2374 = vmatmul.bf16.gmra.mxu1 %v4971_v22  ;;  %v2333_v21 = vadd.f32 %v2332_v28, %v4541_v3  ;;  %v1365_v34 = vrot.slane %v1364_v25, 4 }
 0x162   : > { %v2508_v58 = vpop.f32.mrf.mxu3 }
 0x163   : > { %v2509_v14 = vadd.f32 %v2508_v58, %v2420_v2  ;;  %v1370_v3 = vsel %vm4290_vm10, %v1365_v34, %v1369_v63  ;;  %v3277_v58 = vrot.slane %v4924_v33, 9  ;;  %v1346_v33 = vsel %vm4317_vm13, %v1344_v32, %v1345_v15 }
 0x164   : > { %v2602_v44 = vpop.f32.mrf.mxu0  ;;  %v1612_v0 = vunpack.c.l.b16 %v1370_v3 }
 0x165   : > { %v5026_v20 = vadd.f32 %v2597_v38, %v2509_v14  ;;  %v1360_v38 = vsel %vm4290_vm10, %v1355_v46, %v1359_v31  ;;  %v5043_v14 = vld [vmem:[#allocation2 + $0xb4] sm:$0xff]  ;;  %v1343_v39 = vsel %vm4317_vm13, %v3277_v58, %v1342_v27 }
 0x166   : > { %v2337_v55 = vpop.f32.mrf.mxu1  ;;  %v1611_v31 = vunpack.c.l.b16 %v1360_v38  ;;  %v1573_v7 = vunpack.c.l.b16 %v1343_v39  ;;  %v5059_v38 = vld [vmem:[#allocation2 + $0xc0] sm:$0xff] }
 0x167   : > { %2641 = vmatmul.bf16.gmra.mxu0 %v5023_v43  ;;  %v2338_v34 = vadd.f32 %v2337_v55, %v4590_v60 }
 0x168   : > { %v2421_v42 = vpop.f32.mrf.mxu2  ;;  %v5051_v48 = vpack.c.b16 %v1612_v0, %v1611_v31 }
 0x169   : > { %v2422_v62 = vadd.f32 %v2421_v42, %v2333_v21  ;;  %v1574_v21 = vunpack.c.l.b16 %v1346_v33  ;;  %v3776_v33 = vld [vmem:[#allocation2 + $0x18] sm:$0xff] }
 0x16a   : > { %v2510_v13 = vpop.f32.mrf.mxu3 }
 0x16b   : > { %v2511_v57 = vadd.f32 %v2510_v13, %v2422_v62  ;;  %v5057_v13 = vpack.c.b16 %v1574_v21, %v1573_v7 }
 0x16c   : > { %v2604_v4 = vpop.f32.mrf.mxu0 }
 0x16d   : > { %2463 = vmatmul.bf16.gmra.mxu2 %v5030_v10  ;;  %v5038_v28 = vadd.f32 %v2599_v24, %v2511_v57 }
 0x16e   : > { %v2340_v2 = vpop.f32.mrf.mxu1 }
 0x16f   : > { %2552 = vmatmul.bf16.gmra.mxu3 %v5043_v14  ;;  %v2341_v32 = vadd.f32 %v2340_v2, %v4616_v54 }
 0x170   : > { %v2424_v25 = vpop.f32.mrf.mxu2 }
 0x171   : > { %v2425_v17 = vadd.f32 %v2424_v25, %v2336_v36  ;;  %2379 = vmatmul.bf16.gmra.mxu1 %v5023_v43 }
 0x172   : > { %v2513_v24 = vpop.f32.mrf.mxu3 }
 0x173   : > { %v2514_v19 = vadd.f32 %v2513_v24, %v2425_v17 }
 0x174   : > { %v2607_v41 = vpop.f32.mrf.mxu0 }
 0x175   : > { %v5053_v42 = vadd.f32 %v2602_v44, %v2514_v19 }
 0x176   : > { %v2342_v46 = vpop.f32.mrf.mxu1 }
 0x177   : > { %2646 = vmatmul.bf16.gmra.mxu0 %v5051_v48  ;;  %v2343_v17 = vadd.f32 %v2342_v46, %v4651_v37 }
 0x178   : > { %v2426_v63 = vpop.f32.mrf.mxu2 }
 0x179   : > { %v2427_v62 = vadd.f32 %v2426_v63, %v2338_v34 }
 0x17a   : > { %v2515_v27 = vpop.f32.mrf.mxu3 }
 0x17b   : > { %v2516_v57 = vadd.f32 %v2515_v27, %v2427_v62 }
 0x17c   : > { %v2609_v3 = vpop.f32.mrf.mxu0 }
 0x17d   : > { %2468 = vmatmul.bf16.gmra.mxu2 %v5057_v13  ;;  %v5062_v58 = vadd.f32 %v2604_v4, %v2516_v57 }
 0x17e   : > { %v2345_v44 = vpop.f32.mrf.mxu1 }
 0x17f   : > { %2557 = vmatmul.bf16.gmra.mxu3 %v5059_v38  ;;  %v2346_v7 = vadd.f32 %v2345_v44, %v4519_v12 }
 0x180   : > { %v2429_v60 = vpop.f32.mrf.mxu2 }
 0x181   : > { %v2430_v55 = vadd.f32 %v2429_v60, %v2341_v32  ;;  %2660 = vmatmul.bf16.vlgmr.msra.gmra.mxu1 %v4373_v59 }
 0x182   : > { %v2518_v15 = vpop.f32.mrf.mxu3 }
 0x183   : > { %v2519_v36 = vadd.f32 %v2518_v15, %v2430_v55  ;;  %v5340_v15 = vld [vmem:[#allocation3_spill] sm:$0xff] }
 0x184   : > { %v2612_v31 = vpop.f32.mrf.mxu0 }
 0x185   : > { %v5067_v0 = vadd.f32 %v2607_v41, %v2519_v36 }
 0x186   : > { %v2347_v25 = vpop.f32.mrf.mxu1 }
 0x187   : > { %2927 = vmatmul.bf16.vlgmr.msra.gmra.mxu0 %v4406_v51  ;;  %v2348_v27 = vadd.f32 %v2347_v25, %v4544_v6 }
 0x188   : > { %v2431_v4 = vpop.f32.mrf.mxu2 }
 0x189   : > { %v2432_v24 = vadd.f32 %v2431_v4, %v2343_v17 }
 0x18a   : > { %v2520_v39 = vpop.f32.mrf.mxu3 }
 0x18b   : > { %v2521_v54 = vadd.f32 %v2520_v39, %v2432_v24  ;;  %v5341_v39 = vld [vmem:[#allocation13_spill] sm:$0xff] }
 0x18c   : > { %v2614_v2 = vpop.f32.mrf.mxu0 }
 0x18d   : > { %2749 = vmatmul.bf16.vlgmr.msra.gmra.mxu2 %v3776_v33  ;;  %v5071_v19 = vadd.f32 %v2609_v3, %v2521_v54  ;;  %v5342_v33 = vld [vmem:[#allocation6_spill] sm:$0xff] }
 0x18e   : > { %v2350_v59 = vpop.f32.mrf.mxu1 }
 0x18f   : > { %2838 = vmatmul.bf16.vlgmr.msra.gmra.mxu3 %v4367_v11  ;;  %v3777_v11 = vld [vmem:[#allocation2 + $0x24] sm:$0xff]  ;;  %v2351_v55 = vadd.f32 %v2350_v59, %v4574_v16 }
 0x190   : > { %v2434_v41 = vpop.f32.mrf.mxu2 }
 0x191   : > { %v2435_v21 = vadd.f32 %v2434_v41, %v2346_v7  ;;  %2665 = vmatmul.bf16.gmra.mxu1 %v4406_v51 }
 0x192   : > { %v2523_v37 = vpop.f32.mrf.mxu3 }
 0x193   : > { %v2524_v46 = vadd.f32 %v2523_v37, %v2435_v21  ;;  %v3778_v21 = vld [vmem:[#allocation2 + $0x30] sm:$0xff] }
 0x194   : > { %v2617_v34 = vpop.f32.mrf.mxu0 }
 0x195   : > { %v5076_v63 = vadd.f32 %v2612_v31, %v2524_v46  ;;  %v5343_v46 = vld [vmem:[#allocation16_spill] sm:$0xff] }
 0x196   : > { %v2352_v62 = vpop.f32.mrf.mxu1 }
 0x197   : > { %2932 = vmatmul.bf16.gmra.mxu0 %v4451_v40  ;;  %v2353_v54 = vadd.f32 %v2352_v62, %v5341_v39 }
 0x198   : > { %v2436_v57 = vpop.f32.mrf.mxu2 }
 0x199   : > { %v2437_v3 = vadd.f32 %v2436_v57, %v2348_v27  ;;  %v5344_v57 = vld [vmem:[#allocation4_spill] sm:$0xff] }
 0x19a   : > { %v2525_v32 = vpop.f32.mrf.mxu3 }
 0x19b   : > { %v2526_v12 = vadd.f32 %v2525_v32, %v2437_v3 }
 0x19c   : > { %v2619_v44 = vpop.f32.mrf.mxu0 }
 0x19d   : > { %2754 = vmatmul.bf16.gmra.mxu2 %v3777_v11  ;;  %v5080_v60 = vadd.f32 %v2614_v2, %v2526_v12 }
 0x19e   : > { %v2355_v51 = vpop.f32.mrf.mxu1 }
 0x19f   : > { %2843 = vmatmul.bf16.gmra.mxu3 %v5340_v15  ;;  %v2356_v27 = vadd.f32 %v2355_v51, %v5343_v46  ;;  %v5345_v15 = vld [vmem:[#allocation19_spill] sm:$0xff] }
 0x1a0   : > { %v2439_v36 = vpop.f32.mrf.mxu2 }
 0x1a1   : > { %v2440_v31 = vadd.f32 %v2439_v36, %v2351_v55  ;;  %2670 = vmatmul.bf16.gmra.mxu1 %v4451_v40 }
 0x1a2   : > { %v2528_v6 = vpop.f32.mrf.mxu3 }
 0x1a3   : > { %v2529_v25 = vadd.f32 %v2528_v6, %v2440_v31  ;;  %v5346_v31 = vld [vmem:[#allocation9_spill] sm:$0xff] }
 0x1a4   : > { %v2622_v17 = vpop.f32.mrf.mxu0 }
 0x1a5   : > { %v5085_v4 = vadd.f32 %v2617_v34, %v2529_v25 }
 0x1a6   : > { %v2357_v24 = vpop.f32.mrf.mxu1 }
 0x1a7   : > { %2937 = vmatmul.bf16.gmra.mxu0 %v5342_v33  ;;  %v2358_v36 = vadd.f32 %v2357_v24, %v5345_v15 }
 0x1a8   : > { %v2441_v2 = vpop.f32.mrf.mxu2 }
 0x1a9   : > { %v2442_v7 = vadd.f32 %v2441_v2, %v2353_v54  ;;  %v3779_v54 = vld [vmem:[#allocation2 + $0x3c] sm:$0xff] }
 0x1aa   : > { %v2530_v41 = vpop.f32.mrf.mxu3 }
 0x1ab   : > { %v2531_v16 = vadd.f32 %v2530_v41, %v2442_v7  ;;  %v5347_v7 = vld [vmem:[#allocation22_spill] sm:$0xff] }
 0x1ac   : > { %v2624_v59 = vpop.f32.mrf.mxu0 }
 0x1ad   : > { %2759 = vmatmul.bf16.gmra.mxu2 %v3778_v21  ;;  %v5089_v37 = vadd.f32 %v2619_v44, %v2531_v16  ;;  %v5348_v16 = vld [vmem:[#allocation5_spill] sm:$0xff] }
 0x1ae   : > { %v2360_v40 = vpop.f32.mrf.mxu1 }
 0x1af   : > { %2848 = vmatmul.bf16.gmra.mxu3 %v5344_v57  ;;  %v2361_v41 = vadd.f32 %v2360_v40, %v5347_v7  ;;  %v5352_v7 = vld [vmem:[#allocation8_spill] sm:$0xff] }
 0x1b0   : > { %v2444_v34 = vpop.f32.mrf.mxu2 }
 0x1b1   : > { %v2445_v3 = vadd.f32 %v2444_v34, %v2356_v27  ;;  %2675 = vmatmul.bf16.gmra.mxu1 %v5342_v33 }
 0x1b2   : > { %v2533_v62 = vpop.f32.mrf.mxu3 }
 0x1b3   : > { %v2534_v32 = vadd.f32 %v2533_v62, %v2445_v3  ;;  %v5349_v3 = vld [vmem:[#allocation24_spill] sm:$0xff] }
 0x1b4   : > { %v2627_v12 = vpop.f32.mrf.mxu0 }
 0x1b5   : > { %v5094_v11 = vadd.f32 %v2622_v17, %v2534_v32  ;;  %v5350_v32 = vld [vmem:[#allocation14_spill] sm:$0xff] }
 0x1b6   : > { %v2362_v55 = vpop.f32.mrf.mxu1 }
 0x1b7   : > { %2942 = vmatmul.bf16.gmra.mxu0 %v5346_v31  ;;  %v2363_v62 = vadd.f32 %v2362_v55, %v5349_v3 }
 0x1b8   : > { %v2446_v44 = vpop.f32.mrf.mxu2 }
 0x1b9   : > { %v2447_v6 = vadd.f32 %v2446_v44, %v2358_v36 }
 0x1ba   : > { %v2535_v25 = vpop.f32.mrf.mxu3 }
 0x1bb   : > { %v2536_v51 = vadd.f32 %v2535_v25, %v2447_v6  ;;  %v3780_v6 = vld [vmem:[#allocation2 + $0x48] sm:$0xff] }
 0x1bc   : > { %v2629_v39 = vpop.f32.mrf.mxu0 }
 0x1bd   : > { %2764 = vmatmul.bf16.gmra.mxu2 %v3779_v54  ;;  %v5098_v2 = vadd.f32 %v2624_v59, %v2536_v51  ;;  %v5351_v51 = vld [vmem:[#allocation7_spill] sm:$0xff] }
 0x1be   : > { %v2365_v33 = vpop.f32.mrf.mxu1 }
 0x1bf   : > { %2853 = vmatmul.bf16.gmra.mxu3 %v5348_v16  ;;  %v2366_v54 = vadd.f32 %v2365_v33, %v5351_v51  ;;  %v5355_v51 = vld [vmem:[#allocation11_spill] sm:$0xff] }
 0x1c0   : > { %v2449_v17 = vpop.f32.mrf.mxu2 }
 0x1c1   : > { %v2450_v21 = vadd.f32 %v2449_v17, %v2361_v41  ;;  %2680 = vmatmul.bf16.gmra.mxu1 %v5346_v31 }
 0x1c2   : > { %v2538_v24 = vpop.f32.mrf.mxu3 }
 0x1c3   : > { %v2539_v46 = vadd.f32 %v2538_v24, %v2450_v21 }
 0x1c4   : > { %v2632_v27 = vpop.f32.mrf.mxu0 }
 0x1c5   : > { %v5103_v57 = vadd.f32 %v2627_v12, %v2539_v46  ;;  %v5353_v46 = vld [vmem:[#allocation10_spill] sm:$0xff] }
 0x1c6   : > { %v2367_v34 = vpop.f32.mrf.mxu1 }
 0x1c7   : > { %2947 = vmatmul.bf16.gmra.mxu0 %v5350_v32  ;;  %v2368_v3 = vadd.f32 %v2367_v34, %v5353_v46 }
 0x1c8   : > { %v2451_v59 = vpop.f32.mrf.mxu2 }
 0x1c9   : > { %v2452_v15 = vadd.f32 %v2451_v59, %v2363_v62  ;;  %v5354_v62 = vld [vmem:[#allocation20_spill] sm:$0xff] }
 0x1ca   : > { %v2540_v36 = vpop.f32.mrf.mxu3 }
 0x1cb   : > { %v2541_v40 = vadd.f32 %v2540_v36, %v2452_v15 }
 0x1cc   : > { %v2634_v44 = vpop.f32.mrf.mxu0 }
 0x1cd   : > { %2769 = vmatmul.bf16.gmra.mxu2 %v3780_v6  ;;  %v5107_v25 = vadd.f32 %v2629_v39, %v2541_v40  ;;  %v3781_v40 = vld [vmem:[#allocation2 + $0x54] sm:$0xff] }
 0x1ce   : > { %v2370_v31 = vpop.f32.mrf.mxu1 }
 0x1cf   : > { %2858 = vmatmul.bf16.gmra.mxu3 %v5352_v7  ;;  %v5356_v7 = vld [vmem:[#allocation12_spill] sm:$0xff] }
 0x1d0   : > { %v2454_v12 = vpop.f32.mrf.mxu2 }
 0x1d1   : > { %v2455_v41 = vadd.f32 %v2454_v12, %v2366_v54  ;;  %2685 = vmatmul.bf16.gmra.mxu1 %v5350_v32  ;;  %v2371_v54 = vadd.f32 %v2370_v31, %v5355_v51  ;;  %v3782_v51 = vld [vmem:[#allocation2 + $0x60] sm:$0xff] }
 0x1d2   : > { %v2543_v55 = vpop.f32.mrf.mxu3 }
 0x1d3   : > { %v2544_v16 = vadd.f32 %v2543_v55, %v2455_v41 }
 0x1d4   : > { %v2637_v17 = vpop.f32.mrf.mxu0 }
 0x1d5   : > { %v5112_v21 = vadd.f32 %v2632_v27, %v2544_v16 }
 0x1d6   : > { %v2372_v24 = vpop.f32.mrf.mxu1 }
 0x1d7   : > { %2952 = vmatmul.bf16.gmra.mxu0 %v5354_v62 }
 0x1d8   : > { %v2456_v39 = vpop.f32.mrf.mxu2 }
 0x1d9   : > { %v2457_v59 = vadd.f32 %v2456_v39, %v2368_v3  ;;  %v5357_v3 = vld [vmem:[#allocation15_spill] sm:$0xff] }
 0x1da   : > { %v2545_v15 = vpop.f32.mrf.mxu3  ;;  %v2373_v39 = vadd.f32 %v2372_v24, %v5357_v3 }
 0x1db   : > { %v2546_v33 = vadd.f32 %v2545_v15, %v2457_v59  ;;  %v5358_v59 = vld [vmem:[#allocation25_spill] sm:$0xff] }
 0x1dc   : > { %v2639_v36 = vpop.f32.mrf.mxu0 }
 0x1dd   : > { %2774 = vmatmul.bf16.gmra.mxu2 %v3781_v40  ;;  %v5116_v6 = vadd.f32 %v2634_v44, %v2546_v33 }
 0x1de   : > { %v2375_v32 = vpop.f32.mrf.mxu1 }
 0x1df   : > { %2863 = vmatmul.bf16.gmra.mxu3 %v5356_v7  ;;  %v5359_v7 = vld [vmem:[#allocation17_spill] sm:$0xff] }
 0x1e0   : > { %v2459_v27 = vpop.f32.mrf.mxu2 }
 0x1e1   : > { %v2460_v12 = vadd.f32 %v2459_v27, %v2371_v54  ;;  %2690 = vmatmul.bf16.gmra.mxu1 %v5354_v62  ;;  %v2376_v27 = vadd.f32 %v2375_v32, %v5359_v7 }
 0x1e2   : > { %v2548_v34 = vpop.f32.mrf.mxu3 }
 0x1e3   : > { %v2549_v41 = vadd.f32 %v2548_v34, %v2460_v12  ;;  %v5360_v12 = vld [vmem:[#allocation18_spill] sm:$0xff] }
 0x1e4   : > { %v2642_v55 = vpop.f32.mrf.mxu0 }
 0x1e5   : > { %v5121_v16 = vadd.f32 %v2637_v17, %v2549_v41 }
 0x1e6   : > { %v2377_v46 = vpop.f32.mrf.mxu1 }
 0x1e7   : > { %2957 = vmatmul.bf16.gmra.mxu0 %v5358_v59 }
 0x1e8   : > { %v2461_v44 = vpop.f32.mrf.mxu2 }
 0x1e9   : > { %v2462_v15 = vadd.f32 %v2461_v44, %v2373_v39 }
 0x1ea   : > { %v2550_v33 = vpop.f32.mrf.mxu3 }
 0x1eb   : > { %v2551_v31 = vadd.f32 %v2550_v33, %v2462_v15  ;;  %v5361_v15 = vld [vmem:[#allocation21_spill] sm:$0xff] }
 0x1ec   : > { %v2644_v40 = vpop.f32.mrf.mxu0  ;;  %v2378_v33 = vadd.f32 %v2377_v46, %v5361_v15 }
 0x1ed   : > { %2779 = vmatmul.bf16.gmra.mxu2 %v3782_v51  ;;  %v5125_v54 = vadd.f32 %v2639_v36, %v2551_v31 }
 0x1ee   : > { %v2380_v62 = vpop.f32.mrf.mxu1 }
 0x1ef   : > { %2868 = vmatmul.bf16.gmra.mxu3 %v5360_v12  ;;  %v3783_v12 = vld [vmem:[#allocation2 + $0x6c] sm:$0xff] }
 0x1f0   : > { %v2464_v17 = vpop.f32.mrf.mxu2 }
 0x1f1   : > { %v2465_v34 = vadd.f32 %v2464_v17, %v2376_v27  ;;  %2695 = vmatmul.bf16.gmra.mxu1 %v5358_v59  ;;  %v5363_v17 = vld [vmem:[#allocation23_spill] sm:$0xff] }
 0x1f2   : > { %v2553_v24 = vpop.f32.mrf.mxu3 }
 0x1f3   : > { %v2554_v41 = vadd.f32 %v2553_v24, %v2465_v34  ;;  %v2381_v34 = vadd.f32 %v2380_v62, %v5363_v17 }
 0x1f4   : > { %v2647_v3 = vpop.f32.mrf.mxu0 }
 0x1f5   : > { %v5130_v39 = vadd.f32 %v2642_v55, %v2554_v41 }
 0x1f6   : > { %v2382_v44 = vpop.f32.mrf.mxu1 }
 0x1f7   : > { %2962 = vmatmul.bf16.gmra.mxu0 %v4764_v52 }
 0x1f8   : > { %v2466_v36 = vpop.f32.mrf.mxu2 }
 0x1f9   : > { %v2467_v31 = vadd.f32 %v2466_v36, %v2378_v33 }
 0x1fa   : > { %v2555_v51 = vpop.f32.mrf.mxu3 }
 0x1fb   : > { %v2556_v32 = vadd.f32 %v2555_v51, %v2467_v31  ;;  %v5365_v31 = vld [vmem:[#allocation26_spill] sm:$0xff] }
 0x1fc   : > { %v2649_v7 = vpop.f32.mrf.mxu0  ;;  %v2383_v51 = vadd.f32 %v2382_v44, %v5365_v31  ;;  %v5369_v31 = vld [vmem:[#allocation35_spill] sm:$0xff] }
 0x1fd   : > { %2784 = vmatmul.bf16.gmra.mxu2 %v3783_v12  ;;  %v5134_v27 = vadd.f32 %v2644_v40, %v2556_v32 }
 0x1fe   : > { %v2661_v59 = vpop.f32.mrf.mxu1 }
 0x1ff   : > { %5362 = vst [vmem:[#allocation3_spill] sm:$0xff] %v5134_v27  ;;  %2873 = vmatmul.bf16.gmra.mxu3 %v4692_v50 }
 0x200   : > { %v2469_v55 = vpop.f32.mrf.mxu2 }
 0x201   : > { %v2470_v24 = vadd.f32 %v2469_v55, %v2381_v34  ;;  %2700 = vmatmul.bf16.gmra.mxu1 %v4764_v52  ;;  %v2662_v34 = vadd.f32 %v2661_v59, %v4755_v8  ;;  %v5368_v8 = vld [vmem:[#allocation28_spill] sm:$0xff] }
 0x202   : > { %v2558_v46 = vpop.f32.mrf.mxu3 }
 0x203   : > { %v2559_v41 = vadd.f32 %v2558_v46, %v2470_v24 }
 0x204   : > { %v2928_v15 = vpop.f32.mrf.mxu0 }
 0x205   : > { %v5139_v33 = vadd.f32 %v2647_v3, %v2559_v41  ;;  %v5367_v3 = vld [vmem:[#allocation27_spill] sm:$0xff] }
 0x206   : > { %v2663_v36 = vpop.f32.mrf.mxu1 }
 0x207   : > { %5364 = vst [vmem:[#allocation13_spill] sm:$0xff] %v5139_v33  ;;  %2967 = vmatmul.bf16.gmra.mxu0 %v4809_v35  ;;  %v2664_v59 = vadd.f32 %v2663_v36, %v5368_v8 }
 0x208   : > { %v2471_v40 = vpop.f32.mrf.mxu2 }
 0x209   : > { %v2472_v32 = vadd.f32 %v2471_v40, %v2383_v51 }
 0x20a   : > { %v2560_v62 = vpop.f32.mrf.mxu3 }
 0x20b   : > { %v2561_v12 = vadd.f32 %v2560_v62, %v2472_v32 }
 0x20c   : > { %v2930_v50 = vpop.f32.mrf.mxu0 }
 0x20d   : > { %2789 = vmatmul.bf16.gmra.mxu2 %v4782_v9  ;;  %v5144_v17 = vadd.f32 %v2649_v7, %v2561_v12 }
 0x20e   : > { %v2666_v52 = vpop.f32.mrf.mxu1 }
 0x20f   : > { %5366 = vst [vmem:[#allocation6_spill] sm:$0xff] %v5144_v17  ;;  %2878 = vmatmul.bf16.gmra.mxu3 %v5367_v3  ;;  %v5371_v3 = vld [vmem:[#allocation30_spill] sm:$0xff]  ;;  %v5372_v17 = vld [vmem:[#allocation29_spill] sm:$0xff] }
 0x210   : > { %v2750_v55 = vpop.f32.mrf.mxu2 }
 0x211   : > { %v2751_v24 = vadd.f32 %v2750_v55, %v2662_v34  ;;  %2705 = vmatmul.bf16.gmra.mxu1 %v4809_v35  ;;  %v5370_v34 = vld [vmem:[#allocation32_spill] sm:$0xff]  ;;  %v2667_v55 = vadd.f32 %v2666_v52, %v5371_v3 }
 0x212   : > { %v2839_v44 = vpop.f32.mrf.mxu3 }
 0x213   : > { %v2840_v46 = vadd.f32 %v2839_v44, %v2751_v24 }
 0x214   : > { %v2933_v9 = vpop.f32.mrf.mxu0 }
 0x215   : > { %v2929_v7 = vadd.f32 %v2928_v15, %v2840_v46 }
 0x216   : > { %v2668_v41 = vpop.f32.mrf.mxu1 }
 0x217   : > { %3008 = vst [vmem:[%s5153_s29] sm:$0xff] %v2929_v7  ;;  %2972 = vmatmul.bf16.gmra.mxu0 %v5369_v31  ;;  %v3078_v44 = vmul.f32 %v2929_v7, %v2929_v7 }
 0x218   : > { %v2752_v51 = vpop.f32.mrf.mxu2 }
 0x219   : > { %v2753_v40 = vadd.f32 %v2752_v51, %v2664_v59 }
 0x21a   : > { %v2841_v35 = vpop.f32.mrf.mxu3 }
 0x21b   : > { %v2842_v32 = vadd.f32 %v2841_v35, %v2753_v40 }
 0x21c   : > { %v2935_v62 = vpop.f32.mrf.mxu0 }
 0x21d   : > { %v2931_v12 = vadd.f32 %v2930_v50, %v2842_v32  ;;  %2794 = vmatmul.bf16.gmra.mxu2 %v5370_v34  ;;  %v5373_v34 = vld [vmem:[#allocation31_spill] sm:$0xff] }
 0x21e   : > { %v2671_v24 = vpop.f32.mrf.mxu1  ;;  %v2669_v3 = vadd.f32 %v2668_v41, %v5373_v34 }
 0x21f   : > { %3009 = vst [vmem:[%s5153_s29 + $0x8] sm:$0xff] %v2931_v12  ;;  %v3040_v15 = vadd.f32 %v2931_v12, %v2929_v7  ;;  %v3079_v46 = vmul.f32 %v2931_v12, %v2931_v12  ;;  %2883 = vmatmul.bf16.gmra.mxu3 %v5372_v17 }
 0x220   : > { %v2755_v36 = vpop.f32.mrf.mxu2 }
 0x221   : > { %v3110_v8 = vadd.f32 %v3079_v46, %v3078_v44  ;;  %v2756_v33 = vadd.f32 %v2755_v36, %v2667_v55  ;;  %2710 = vmatmul.bf16.gmra.mxu1 %v5369_v31  ;;  %v5374_v36 = vld [vmem:[#allocation37_spill] sm:$0xff] }
 0x222   : > { %v2844_v59 = vpop.f32.mrf.mxu3 }
 0x223   : > { %v2845_v51 = vadd.f32 %v2844_v59, %v2756_v33 }
 0x224   : > { %v2938_v50 = vpop.f32.mrf.mxu0 }
 0x225   : > { %v2934_v40 = vadd.f32 %v2933_v9, %v2845_v51 }
 0x226   : > { %v2673_v35 = vpop.f32.mrf.mxu1 }
 0x227   : > { %3010 = vst [vmem:[%s5153_s29 + $0x10] sm:$0xff] %v2934_v40  ;;  %v3041_v52 = vadd.f32 %v3040_v15, %v2934_v40  ;;  %v3080_v32 = vmul.f32 %v2934_v40, %v2934_v40  ;;  %2977 = vmatmul.bf16.gmra.mxu0 %v4930_v45  ;;  %v5375_v15 = vld [vmem:[#allocation34_spill] sm:$0xff]  ;;  %v5376_v40 = vld [vmem:[#allocation33_spill] sm:$0xff] }
 0x228   : > { %v2757_v7 = vpop.f32.mrf.mxu2  ;;  %v2672_v51 = vadd.f32 %v2671_v24, %v5375_v15 }
 0x229   : > { %v3111_v17 = vadd.f32 %v3110_v8, %v3080_v32  ;;  %v2758_v12 = vadd.f32 %v2757_v7, %v2669_v3 }
 0x22a   : > { %v2846_v44 = vpop.f32.mrf.mxu3 }
 0x22b   : > { %v2847_v55 = vadd.f32 %v2846_v44, %v2758_v12 }
 0x22c   : > { %v2940_v46 = vpop.f32.mrf.mxu0 }
 0x22d   : > { %v2936_v31 = vadd.f32 %v2935_v62, %v2847_v55  ;;  %2799 = vmatmul.bf16.gmra.mxu2 %v5374_v36 }
 0x22e   : > { %v2676_v33 = vpop.f32.mrf.mxu1 }
 0x22f   : > { %3011 = vst [vmem:[%s5153_s29 + $0x18] sm:$0xff] %v2936_v31  ;;  %v3042_v9 = vadd.f32 %v3041_v52, %v2936_v31  ;;  %v3081_v59 = vmul.f32 %v2936_v31, %v2936_v31  ;;  %2888 = vmatmul.bf16.gmra.mxu3 %v5376_v40  ;;  %v5377_v52 = vld [vmem:[#allocation36_spill] sm:$0xff] }
 0x230   : > { %v2760_v41 = vpop.f32.mrf.mxu2  ;;  %v2674_v55 = vadd.f32 %v2673_v35, %v5377_v52 }
 0x231   : > { %v3112_v34 = vadd.f32 %v3111_v17, %v3081_v59  ;;  %v2761_v27 = vadd.f32 %v2760_v41, %v2672_v51  ;;  %2715 = vmatmul.bf16.gmra.mxu1 %v4930_v45 }
 0x232   : > { %v2849_v8 = vpop.f32.mrf.mxu3 }
 0x233   : > { %v2850_v32 = vadd.f32 %v2849_v8, %v2761_v27 }
 0x234   : > { %v2943_v3 = vpop.f32.mrf.mxu0 }
 0x235   : > { %v2939_v62 = vadd.f32 %v2938_v50, %v2850_v32 }
 0x236   : > { %v2678_v7 = vpop.f32.mrf.mxu1 }
 0x237   : > { %3012 = vst [vmem:[%s5153_s29 + $0x20] sm:$0xff] %v2939_v62  ;;  %v3043_v12 = vadd.f32 %v3042_v9, %v2939_v62  ;;  %v3082_v44 = vmul.f32 %v2939_v62, %v2939_v62  ;;  %2982 = vmatmul.bf16.gmra.mxu0 %v4990_v18  ;;  %v5378_v9 = vld [vmem:[#allocation38_spill] sm:$0xff] }
 0x238   : > { %v2762_v24 = vpop.f32.mrf.mxu2  ;;  %v2677_v40 = vadd.f32 %v2676_v33, %v5378_v9 }
 0x239   : > { %v3113_v31 = vadd.f32 %v3112_v34, %v3082_v44  ;;  %v2763_v36 = vadd.f32 %v2762_v24, %v2674_v55 }
 0x23a   : > { %v2851_v17 = vpop.f32.mrf.mxu3 }
 0x23b   : > { %v2852_v59 = vadd.f32 %v2851_v17, %v2763_v36 }
 0x23c   : > { %v2945_v15 = vpop.f32.mrf.mxu0 }
 0x23d   : > { %v2941_v45 = vadd.f32 %v2940_v46, %v2852_v59  ;;  %2804 = vmatmul.bf16.gmra.mxu2 %v4955_v26 }
 0x23e   : > { %v2681_v27 = vpop.f32.mrf.mxu1 }
 0x23f   : > { %3013 = vst [vmem:[%s5153_s29 + $0x28] sm:$0xff] %v2941_v45  ;;  %v3044_v50 = vadd.f32 %v3043_v12, %v2941_v45  ;;  %v3083_v51 = vmul.f32 %v2941_v45, %v2941_v45  ;;  %2893 = vmatmul.bf16.gmra.mxu3 %v4913_v61  ;;  %v2679_v12 = vadd.f32 %v2678_v7, %v4949_v5 }
 0x240   : > { %v2765_v35 = vpop.f32.mrf.mxu2  ;;  %v2682_v45 = vadd.f32 %v2681_v27, %v4985_v1 }
 0x241   : > { %v3114_v41 = vadd.f32 %v3113_v31, %v3083_v51  ;;  %v2766_v8 = vadd.f32 %v2765_v35, %v2677_v40  ;;  %2720 = vmatmul.bf16.gmra.mxu1 %v4990_v18 }
 0x242   : > { %v2854_v34 = vpop.f32.mrf.mxu3 }
 0x243   : > { %v2855_v32 = vadd.f32 %v2854_v34, %v2766_v8 }
 0x244   : > { %v2948_v62 = vpop.f32.mrf.mxu0 }
 0x245   : > { %v2944_v46 = vadd.f32 %v2943_v3, %v2855_v32 }
 0x246   : > { %v2683_v26 = vpop.f32.mrf.mxu1 }
 0x247   : > { %3014 = vst [vmem:[%s5153_s29 + $0x30] sm:$0xff] %v2944_v46  ;;  %v3045_v44 = vadd.f32 %v3044_v50, %v2944_v46  ;;  %v3084_v52 = vmul.f32 %v2944_v46, %v2944_v46  ;;  %2987 = vmatmul.bf16.gmra.mxu0 %v5030_v10  ;;  %v2684_v34 = vadd.f32 %v2683_v26, %v5007_v56 }
 0x248   : > { %v2767_v33 = vpop.f32.mrf.mxu2 }
 0x249   : > { %v3115_v61 = vadd.f32 %v3114_v41, %v3084_v52  ;;  %v2768_v55 = vadd.f32 %v2767_v33, %v2679_v12 }
 0x24a   : > { %v2856_v24 = vpop.f32.mrf.mxu3 }
 0x24b   : > { %v2857_v31 = vadd.f32 %v2856_v24, %v2768_v55  ;;  %v794_v24 = vld [vmem:[#allocation2 + $0xcc] sm:$0xf] }
 0x24c   : > { %v2950_v36 = vpop.f32.mrf.mxu0 }
 0x24d   : > { %v2946_v18 = vadd.f32 %v2945_v15, %v2857_v31  ;;  %2809 = vmatmul.bf16.gmra.mxu2 %v5013_v47  ;;  %v1376_v15 = vrot.slane %v4995_v53, 5 }
 0x24e   : > { %v2686_v17 = vpop.f32.mrf.mxu1 }
 0x24f   : > { %3015 = vst [vmem:[%s5153_s29 + $0x38] sm:$0xff] %v2946_v18  ;;  %v3046_v3 = vadd.f32 %v3045_v44, %v2946_v18  ;;  %v3085_v59 = vmul.f32 %v2946_v18, %v2946_v18  ;;  %2898 = vmatmul.bf16.gmra.mxu3 %v4971_v22  ;;  %v3278_v22 = vrot.slane %v4992_v23, 9  ;;  %v1378_v27 = vrot.slane %v1376_v15, 4 }
 0x250   : > { %v2770_v5 = vpop.f32.mrf.mxu2 }
 0x251   : > { %v3116_v7 = vadd.f32 %v3115_v61, %v3085_v59  ;;  %v2771_v50 = vadd.f32 %v2770_v5, %v2682_v45  ;;  %2725 = vmatmul.bf16.gmra.mxu1 %v5030_v10  ;;  %v1379_v10 = vrot.slane %v5017_v30, 5  ;;  %v2687_v30 = vadd.f32 %v2686_v17, %v5026_v20 }
 0x252   : > { %v2859_v51 = vpop.f32.mrf.mxu3  ;;  %v1385_v45 = vshll.u32 %v794_v24, 16 }
 0x253   : > { %v2860_v9 = vadd.f32 %v2859_v51, %v2771_v50  ;;  %v1380_v56 = vsel %vm4317_vm13, %v1378_v27, %v1379_v10 }
 0x254   : > { %v2953_v40 = vpop.f32.mrf.mxu0  ;;  %v1616_v55 = vunpack.c.l.b16 %v1380_v56 }
 0x255   : > { %v2949_v47 = vadd.f32 %v2948_v62, %v2860_v9  ;;  %v1377_v62 = vsel %vm4317_vm13, %v3278_v22, %v1376_v15  ;;  %v3279_v22 = vrot.slane %v794_v24, 9 }
 0x256   : > { %v2688_v35 = vpop.f32.mrf.mxu1  ;;  %v1615_v23 = vunpack.c.l.b16 %v1377_v62 }
 0x257   : > { %3016 = vst [vmem:[%s5153_s29 + $0x40] sm:$0xff] %v2949_v47  ;;  %v3047_v41 = vadd.f32 %v3046_v3, %v2949_v47  ;;  %v3086_v8 = vmul.f32 %v2949_v47, %v2949_v47  ;;  %2992 = vmatmul.bf16.gmra.mxu0 %v5057_v13  ;;  %v1387_v47 = vrot.slane %v1385_v45, 5 }
 0x258   : > { %v2772_v1 = vpop.f32.mrf.mxu2 }
 0x259   : > { %v3117_v32 = vadd.f32 %v3116_v7, %v3086_v8  ;;  %v2773_v46 = vadd.f32 %v2772_v1, %v2684_v34  ;;  %v1617_v7 = vpack.c.b16 %v1616_v55, %v1615_v23  ;;  %v2689_v34 = vadd.f32 %v2688_v35, %v5038_v28 }
 0x25a   : > { %v2861_v44 = vpop.f32.mrf.mxu3 }
 0x25b   : > { %v2862_v53 = vadd.f32 %v2861_v44, %v2773_v46 }
 0x25c   : > { %v2955_v52 = vpop.f32.mrf.mxu0 }
 0x25d   : > { %v2951_v26 = vadd.f32 %v2950_v36, %v2862_v53  ;;  %2814 = vmatmul.bf16.gmra.mxu2 %v5043_v14  ;;  %v795_v36 = vld [vmem:[#allocation2 + $0xd0] sm:$0xf]  ;;  %v1382_v14 = vshrl.u32 %v794_v24, 16 }
 0x25e   : > { %v2691_v12 = vpop.f32.mrf.mxu1  ;;  %v1391_v51 = vshll.u32 %v795_v36, 16  ;;  %v1395_v9 = vshrl.u32 %v795_v36, 16  ;;  %v1410_v20 = vrot.slane %v795_v36, 5 }
 0x25f   : > { %3017 = vst [vmem:[%s5153_s29 + $0x48] sm:$0xff] %v2951_v26  ;;  %v3048_v33 = vadd.f32 %v3047_v41, %v2951_v26  ;;  %v3087_v61 = vmul.f32 %v2951_v26, %v2951_v26  ;;  %2903 = vmatmul.bf16.gmra.mxu3 %v5023_v43  ;;  %v1384_v15 = vrot.slane %v1382_v14, 4 }
 0x260   : > { %v2775_v31 = vpop.f32.mrf.mxu2  ;;  %v1393_v27 = vrot.slane %v1391_v51, 5  ;;  %v1397_v10 = vrot.slane %v1395_v9, 4  ;;  %v1411_v26 = vsel %vm4317_vm13, %v3279_v22, %v1410_v20  ;;  %v3661_v22 = vld [vmem:[#allocation2 + $0xcc] sm:$0xff] }
 0x261   : > { %v3118_v18 = vadd.f32 %v3117_v32, %v3087_v61  ;;  %v2776_v3 = vadd.f32 %v2775_v31, %v2687_v30  ;;  %2730 = vmatmul.bf16.gmra.mxu1 %v5057_v13  ;;  %v796_v13 = vld [vmem:[#allocation2 + $0xd4] sm:$0x1]  ;;  %v1412_v32 = vrot.slane %v1410_v20, 4  ;;  %v1388_v62 = vor.u32 %v1387_v47, %v1384_v15 }
 0x262   : > { %v2864_v59 = vpop.f32.mrf.mxu3  ;;  %v1413_v46 = vrot.slane %v796_v13, 5  ;;  %v1401_v28 = vshll.u32 %v796_v13, 16  ;;  %v1627_v24 = vunpack.c.l.b16 %v1411_v26 }
 0x263   : > { %v2865_v5 = vadd.f32 %v2864_v59, %v2776_v3  ;;  %v1389_v55 = vrot.slane %v1388_v62, 4  ;;  %v2692_v3 = vadd.f32 %v2691_v12, %v5053_v42 }
 0x264   : > { %v2958_v50 = vpop.f32.mrf.mxu0  ;;  %v1414_v35 = vsel %vm4317_vm13, %v1412_v32, %v1413_v46  ;;  %v1403_v45 = vrot.slane %v1401_v28, 5 }
 0x265   : > { %v2954_v17 = vadd.f32 %v2953_v40, %v2865_v5  ;;  %v1628_v36 = vunpack.c.l.b16 %v1414_v35  ;;  %v1394_v51 = vsel %vm4290_vm10, %v1389_v55, %v1393_v27 }
 0x266   : > { %v2693_v43 = vpop.f32.mrf.mxu1 }
 0x267   : > { %3018 = vst [vmem:[%s5153_s29 + $0x50] sm:$0xff] %v2954_v17  ;;  %v3049_v41 = vadd.f32 %v3048_v33, %v2954_v17  ;;  %v3088_v8 = vmul.f32 %v2954_v17, %v2954_v17  ;;  %2997 = vmatmul.bf16.gmra.mxu0 %v1617_v7  ;;  %v1398_v33 = vor.u32 %v1397_v10, %v1393_v27 }
 0x268   : > { %v2777_v1 = vpop.f32.mrf.mxu2  ;;  %v1629_v9 = vpack.c.b16 %v1628_v36, %v1627_v24 }
 0x269   : > { %v3119_v44 = vadd.f32 %v3118_v18, %v3088_v8  ;;  %v2778_v53 = vadd.f32 %v2777_v1, %v2689_v34  ;;  %v1399_v14 = vrot.slane %v1398_v33, 4 }
 0x26a   : > { %v2866_v40 = vpop.f32.mrf.mxu3 }
 0x26b   : > { %v2867_v56 = vadd.f32 %v2866_v40, %v2778_v53  ;;  %v1404_v42 = vsel %vm4290_vm10, %v1399_v14, %v1403_v45 }
 0x26c   : > { %v2960_v23 = vpop.f32.mrf.mxu0 }
 0x26d   : > { %v2956_v61 = vadd.f32 %v2955_v52, %v2867_v56  ;;  %2819 = vmatmul.bf16.gmra.mxu2 %v5059_v38 }
 0x26e   : > { %v2696_v30 = vpop.f32.mrf.mxu1 }
 0x26f   : > { %3019 = vst [vmem:[%s5153_s29 + $0x58] sm:$0xff] %v2956_v61  ;;  %v3050_v31 = vadd.f32 %v3049_v41, %v2956_v61  ;;  %v3089_v18 = vmul.f32 %v2956_v61, %v2956_v61  ;;  %2908 = vmatmul.bf16.gmra.mxu3 %v5051_v48  ;;  %v1623_v48 = vunpack.c.l.b16 %v1394_v51  ;;  %v2694_v41 = vadd.f32 %v2693_v43, %v5062_v58 }
 0x270   : > { %v2780_v59 = vpop.f32.mrf.mxu2  ;;  %v2697_v53 = vadd.f32 %v2696_v30, %v5067_v0 }
 0x271   : > { %v3120_v29 = vadd.f32 %v3119_v44, %v3089_v18  ;;  %v2781_v5 = vadd.f32 %v2780_v59, %v2692_v3  ;;  %2735 = vmatmul.bf16.gmra.mxu1 %v1617_v7  ;;  %v1624_v7 = vunpack.c.l.b16 %v1404_v42 }
 0x272   : > { %v2869_v52 = vpop.f32.mrf.mxu3 }
 0x273   : > { %v2870_v38 = vadd.f32 %v2869_v52, %v2781_v5  ;;  %v1625_v10 = vpack.c.b16 %v1624_v7, %v1623_v48 }
 0x274   : > { %v2963_v20 = vpop.f32.mrf.mxu0 }
 0x275   : > { %v2959_v12 = vadd.f32 %v2958_v50, %v2870_v38 }
 0x276   : > { %v2698_v17 = vpop.f32.mrf.mxu1 }
 0x277   : > { %3020 = vst [vmem:[%s5153_s29 + $0x60] sm:$0xff] %v2959_v12  ;;  %v3051_v15 = vadd.f32 %v3050_v31, %v2959_v12  ;;  %v3090_v47 = vmul.f32 %v2959_v12, %v2959_v12  ;;  %3002 = vmatmul.bf16.gmra.mxu0 %v1629_v9  ;;  %v2699_v61 = vadd.f32 %v2698_v17, %v5071_v19 }
 0x278   : > { %v2782_v8 = vpop.f32.mrf.mxu2 }
 0x279   : > { %v3121_v34 = vadd.f32 %v3120_v29, %v3090_v47  ;;  %v2783_v13 = vadd.f32 %v2782_v8, %v2694_v41 }
 0x27a   : > { %v2871_v1 = vpop.f32.mrf.mxu3 }
 0x27b   : > { %v2872_v27 = vadd.f32 %v2871_v1, %v2783_v13 }
 0x27c   : > { %v2965_v49 = vpop.f32.mrf.mxu0 }
 0x27d   : > { %v2961_v32 = vadd.f32 %v2960_v23, %v2872_v27  ;;  %2824 = vmatmul.bf16.gmra.mxu2 %v3661_v22 }
 0x27e   : > { %v2701_v50 = vpop.f32.mrf.mxu1 }
 0x27f   : > { %3021 = vst [vmem:[%s5153_s29 + $0x68] sm:$0xff] %v2961_v32  ;;  %v3052_v46 = vadd.f32 %v3051_v15, %v2961_v32  ;;  %v3091_v44 = vmul.f32 %v2961_v32, %v2961_v32  ;;  %2913 = vmatmul.bf16.gmra.mxu3 %v1625_v10  ;;  %v2702_v45 = vadd.f32 %v2701_v50, %v5076_v63 }
 0x280   : > { %v2785_v58 = vpop.f32.mrf.mxu2 }
 0x281   : > { %v3122_v43 = vadd.f32 %v3121_v34, %v3091_v44  ;;  %v2786_v40 = vadd.f32 %v2785_v58, %v2697_v53 }
 0x282   : > { %v2874_v62 = vpop.f32.mrf.mxu3 }
 0x283   : > { %v2875_v56 = vadd.f32 %v2874_v62, %v2786_v40 }
 0x284   : > { %v2968_v26 = vpop.f32.mrf.mxu0 }
 0x285   : > { %v2964_v33 = vadd.f32 %v2963_v20, %v2875_v56 }
 0x286   : > { %v2703_v28 = vpop.f32.mrf.mxu1 }
 0x287   : > { %3022 = vst [vmem:[%s5153_s29 + $0x70] sm:$0xff] %v2964_v33  ;;  %v3053_v23 = vadd.f32 %v3052_v46, %v2964_v33  ;;  %v3092_v35 = vmul.f32 %v2964_v33, %v2964_v33  ;;  %v2704_v48 = vadd.f32 %v2703_v28, %v5080_v60 }
 0x288   : > { %v2787_v55 = vpop.f32.mrf.mxu2 }
 0x289   : > { %v3123_v24 = vadd.f32 %v3122_v43, %v3092_v35  ;;  %v2788_v31 = vadd.f32 %v2787_v55, %v2699_v61 }
 0x28a   : > { %v2876_v18 = vpop.f32.mrf.mxu3 }
 0x28b   : > { %v2877_v0 = vadd.f32 %v2876_v18, %v2788_v31 }
 0x28c   : > { %v2970_v30 = vpop.f32.mrf.mxu0 }
 0x28d   : > { %v2966_v3 = vadd.f32 %v2965_v49, %v2877_v0 }
 0x28e   : > { %v2706_v36 = vpop.f32.mrf.mxu1 }
 0x28f   : > { %3023 = vst [vmem:[%s5153_s29 + $0x78] sm:$0xff] %v2966_v3  ;;  %v3054_v59 = vadd.f32 %v3053_v23, %v2966_v3  ;;  %v3093_v14 = vmul.f32 %v2966_v3, %v2966_v3  ;;  %v2707_v1 = vadd.f32 %v2706_v36, %v5085_v4 }
 0x290   : > { %v2790_v29 = vpop.f32.mrf.mxu2 }
 0x291   : > { %v3124_v5 = vadd.f32 %v3123_v24, %v3093_v14  ;;  %v2791_v52 = vadd.f32 %v2790_v29, %v2702_v45 }
 0x292   : > { %v2879_v38 = vpop.f32.mrf.mxu3 }
 0x293   : > { %v2880_v51 = vadd.f32 %v2879_v38, %v2791_v52 }
 0x294   : > { %v2973_v19 = vpop.f32.mrf.mxu0 }
 0x295   : > { %v2969_v9 = vadd.f32 %v2968_v26, %v2880_v51 }
 0x296   : > { %v2708_v20 = vpop.f32.mrf.mxu1 }
 0x297   : > { %3024 = vst [vmem:[%s5153_s29 + $0x80] sm:$0xff] %v2969_v9  ;;  %v3055_v42 = vadd.f32 %v3054_v59, %v2969_v9  ;;  %v3094_v12 = vmul.f32 %v2969_v9, %v2969_v9  ;;  %v2709_v43 = vadd.f32 %v2708_v20, %v5089_v37 }
 0x298   : > { %v2792_v17 = vpop.f32.mrf.mxu2 }
 0x299   : > { %v3125_v15 = vadd.f32 %v3124_v5, %v3094_v12  ;;  %v2793_v47 = vadd.f32 %v2792_v17, %v2704_v48 }
 0x29a   : > { %v2881_v41 = vpop.f32.mrf.mxu3 }
 0x29b   : > { %v2882_v7 = vadd.f32 %v2881_v41, %v2793_v47 }
 0x29c   : > { %v2975_v63 = vpop.f32.mrf.mxu0 }
 0x29d   : > { %v2971_v8 = vadd.f32 %v2970_v30, %v2882_v7 }
 0x29e   : > { %v2711_v34 = vpop.f32.mrf.mxu1 }
 0x29f   : > { %3025 = vst [vmem:[%s5153_s29 + $0x88] sm:$0xff] %v2971_v8  ;;  %v3056_v13 = vadd.f32 %v3055_v42, %v2971_v8  ;;  %v3095_v22 = vmul.f32 %v2971_v8, %v2971_v8  ;;  %v2712_v55 = vadd.f32 %v2711_v34, %v5094_v11 }
 0x2a0   : > { %v2795_v27 = vpop.f32.mrf.mxu2 }
 0x2a1   : > { %v3126_v10 = vadd.f32 %v3125_v15, %v3095_v22  ;;  %v2796_v49 = vadd.f32 %v2795_v27, %v2707_v1 }
 0x2a2   : > { %v2884_v32 = vpop.f32.mrf.mxu3 }
 0x2a3   : > { %v2885_v50 = vadd.f32 %v2884_v32, %v2796_v49 }
 0x2a4   : > { %v2978_v60 = vpop.f32.mrf.mxu0 }
 0x2a5   : > { %v2974_v46 = vadd.f32 %v2973_v19, %v2885_v50 }
 0x2a6   : > { %v2713_v44 = vpop.f32.mrf.mxu1 }
 0x2a7   : > { %3026 = vst [vmem:[%s5153_s29 + $0x90] sm:$0xff] %v2974_v46  ;;  %v3057_v53 = vadd.f32 %v3056_v13, %v2974_v46  ;;  %v3096_v58 = vmul.f32 %v2974_v46, %v2974_v46  ;;  %v2714_v45 = vadd.f32 %v2713_v44, %v5098_v2 }
 0x2a8   : > { %v2797_v40 = vpop.f32.mrf.mxu2 }
 0x2a9   : > { %v3127_v62 = vadd.f32 %v3126_v10, %v3096_v58  ;;  %v2798_v56 = vadd.f32 %v2797_v40, %v2709_v43 }
 0x2aa   : > { %v2886_v26 = vpop.f32.mrf.mxu3 }
 0x2ab   : > { %v2887_v33 = vadd.f32 %v2886_v26, %v2798_v56 }
 0x2ac   : > { %v2980_v4 = vpop.f32.mrf.mxu0 }
 0x2ad   : > { %v2976_v28 = vadd.f32 %v2975_v63, %v2887_v33 }
 0x2ae   : > { %v2716_v23 = vpop.f32.mrf.mxu1 }
 0x2af   : > { %3027 = vst [vmem:[%s5153_s29 + $0x98] sm:$0xff] %v2976_v28  ;;  %v3058_v35 = vadd.f32 %v3057_v53, %v2976_v28  ;;  %v3097_v61 = vmul.f32 %v2976_v28, %v2976_v28  ;;  %v2717_v12 = vadd.f32 %v2716_v23, %v5103_v57 }
 0x2b0   : > { %v2800_v24 = vpop.f32.mrf.mxu2 }
 0x2b1   : > { %v3128_v31 = vadd.f32 %v3127_v62, %v3097_v61  ;;  %v2801_v18 = vadd.f32 %v2800_v24, %v2712_v55 }
 0x2b2   : > { %v2889_v0 = vpop.f32.mrf.mxu3 }
 0x2b3   : > { %v2890_v30 = vadd.f32 %v2889_v0, %v2801_v18 }
 0x2b4   : > { %v2983_v37 = vpop.f32.mrf.mxu0 }
 0x2b5   : > { %v2979_v3 = vadd.f32 %v2978_v60, %v2890_v30 }
 0x2b6   : > { %v2718_v36 = vpop.f32.mrf.mxu1 }
 0x2b7   : > { %3028 = vst [vmem:[%s5153_s29 + $0xa0] sm:$0xff] %v2979_v3  ;;  %v3059_v59 = vadd.f32 %v3058_v35, %v2979_v3  ;;  %v3098_v14 = vmul.f32 %v2979_v3, %v2979_v3  ;;  %v2719_v34 = vadd.f32 %v2718_v36, %v5107_v25 }
 0x2b8   : > { %v2802_v29 = vpop.f32.mrf.mxu2 }
 0x2b9   : > { %v3129_v5 = vadd.f32 %v3128_v31, %v3098_v14  ;;  %v2803_v52 = vadd.f32 %v2802_v29, %v2714_v45 }
 0x2ba   : > { %v2891_v38 = vpop.f32.mrf.mxu3 }
 0x2bb   : > { %v2892_v11 = vadd.f32 %v2891_v38, %v2803_v52 }
 0x2bc   : > { %v2985_v51 = vpop.f32.mrf.mxu0 }
 0x2bd   : > { %v2981_v19 = vadd.f32 %v2980_v4, %v2892_v11 }
 0x2be   : > { %v2721_v9 = vpop.f32.mrf.mxu1 }
 0x2bf   : > { %3029 = vst [vmem:[%s5153_s29 + $0xa8] sm:$0xff] %v2981_v19  ;;  %v3060_v20 = vadd.f32 %v3059_v59, %v2981_v19  ;;  %v3099_v42 = vmul.f32 %v2981_v19, %v2981_v19  ;;  %v2722_v60 = vadd.f32 %v2721_v9, %v5112_v21 }
 0x2c0   : > { %v2805_v48 = vpop.f32.mrf.mxu2 }
 0x2c1   : > { %v3130_v17 = vadd.f32 %v3129_v5, %v3099_v42  ;;  %v2806_v15 = vadd.f32 %v2805_v48, %v2717_v12 }
 0x2c2   : > { %v2894_v47 = vpop.f32.mrf.mxu3 }
 0x2c3   : > { %v2895_v2 = vadd.f32 %v2894_v47, %v2806_v15 }
 0x2c4   : > { %v2988_v7 = vpop.f32.mrf.mxu0 }
 0x2c5   : > { %v2984_v41 = vadd.f32 %v2983_v37, %v2895_v2 }
 0x2c6   : > { %v2723_v22 = vpop.f32.mrf.mxu1 }
 0x2c7   : > { %3030 = vst [vmem:[%s5153_s29 + $0xb0] sm:$0xff] %v2984_v41  ;;  %v3061_v63 = vadd.f32 %v3060_v20, %v2984_v41  ;;  %v3100_v8 = vmul.f32 %v2984_v41, %v2984_v41  ;;  %v2724_v33 = vadd.f32 %v2723_v22, %v5116_v6 }
 0x2c8   : > { %v2807_v13 = vpop.f32.mrf.mxu2 }
 0x2c9   : > { %v3131_v1 = vadd.f32 %v3130_v17, %v3100_v8  ;;  %v2808_v27 = vadd.f32 %v2807_v13, %v2719_v34  ;;  %v5379_v34 = vld [vmem:[#allocation3_spill] sm:$0xff] }
 0x2ca   : > { %v2896_v10 = vpop.f32.mrf.mxu3 }
 0x2cb   : > { %v2897_v57 = vadd.f32 %v2896_v10, %v2808_v27 }
 0x2cc   : > { %v2990_v44 = vpop.f32.mrf.mxu0 }
 0x2cd   : > { %v2986_v49 = vadd.f32 %v2985_v51, %v2897_v57 }
 0x2ce   : > { %v2726_v25 = vpop.f32.mrf.mxu1 }
 0x2cf   : > { %3031 = vst [vmem:[%s5153_s29 + $0xb8] sm:$0xff] %v2986_v49  ;;  %v3062_v32 = vadd.f32 %v3061_v63, %v2986_v49  ;;  %v3101_v50 = vmul.f32 %v2986_v49, %v2986_v49  ;;  %v2727_v0 = vadd.f32 %v2726_v25, %v5121_v16 }
 0x2d0   : > { %v2810_v46 = vpop.f32.mrf.mxu2 }
 0x2d1   : > { %v3132_v53 = vadd.f32 %v3131_v1, %v3101_v50  ;;  %v2811_v58 = vadd.f32 %v2810_v46, %v2722_v60  ;;  %v5380_v46 = vld [vmem:[#allocation13_spill] sm:$0xff] }
 0x2d2   : > { %v2899_v43 = vpop.f32.mrf.mxu3 }
 0x2d3   : > { %v2900_v40 = vadd.f32 %v2899_v43, %v2811_v58 }
 0x2d4   : > { %v2993_v61 = vpop.f32.mrf.mxu0 }
 0x2d5   : > { %v2989_v62 = vadd.f32 %v2988_v7, %v2900_v40 }
 0x2d6   : > { %v2728_v55 = vpop.f32.mrf.mxu1 }
 0x2d7   : > { %3032 = vst [vmem:[%s5153_s29 + $0xc0] sm:$0xff] %v2989_v62  ;;  %v3063_v56 = vadd.f32 %v3062_v32, %v2989_v62  ;;  %v3102_v26 = vmul.f32 %v2989_v62, %v2989_v62  ;;  %v2729_v52 = vadd.f32 %v2728_v55, %v5125_v54 }
 0x2d8   : > { %v2812_v4 = vpop.f32.mrf.mxu2 }
 0x2d9   : > { %v3133_v28 = vadd.f32 %v3132_v53, %v3102_v26  ;;  %v2813_v23 = vadd.f32 %v2812_v4, %v2724_v33 }
 0x2da   : > { %v2901_v35 = vpop.f32.mrf.mxu3 }
 0x2db   : > { %v2902_v21 = vadd.f32 %v2901_v35, %v2813_v23 }
 0x2dc   : > { %v2995_v59 = vpop.f32.mrf.mxu0 }
 0x2dd   : > { %v2991_v24 = vadd.f32 %v2990_v44, %v2902_v21 }
 0x2de   : > { %v2731_v45 = vpop.f32.mrf.mxu1 }
 0x2df   : > { %3033 = vst [vmem:[%s5153_s29 + $0xc8] sm:$0xff] %v2991_v24  ;;  %v3064_v31 = vadd.f32 %v3063_v56, %v2991_v24  ;;  %v3103_v18 = vmul.f32 %v2991_v24, %v2991_v24  ;;  %v2732_v48 = vadd.f32 %v2731_v45, %v5130_v39 }
 0x2e0   : > { %v2815_v30 = vpop.f32.mrf.mxu2 }
 0x2e1   : > { %v3134_v37 = vadd.f32 %v3133_v28, %v3103_v18  ;;  %v2816_v3 = vadd.f32 %v2815_v30, %v2727_v0  ;;  %v5381_v28 = vld [vmem:[#allocation6_spill] sm:$0xff] }
 0x2e2   : > { %v2904_v36 = vpop.f32.mrf.mxu3 }
 0x2e3   : > { %v2905_v6 = vadd.f32 %v2904_v36, %v2816_v3 }
 0x2e4   : > { %v2998_v20 = vpop.f32.mrf.mxu0 }
 0x2e5   : > { %v2994_v14 = vadd.f32 %v2993_v61, %v2905_v6 }
 0x2e6   : > { %v2733_v15 = vpop.f32.mrf.mxu1 }
 0x2e7   : > { %3034 = vst [vmem:[%s5153_s29 + $0xd0] sm:$0xff] %v2994_v14  ;;  %v3065_v29 = vadd.f32 %v3064_v31, %v2994_v14  ;;  %v3104_v5 = vmul.f32 %v2994_v14, %v2994_v14  ;;  %v2734_v13 = vadd.f32 %v2733_v15, %v5379_v34 }
 0x2e8   : > { %v2817_v38 = vpop.f32.mrf.mxu2 }
 0x2e9   : > { %v3135_v11 = vadd.f32 %v3134_v37, %v3104_v5  ;;  %v2818_v51 = vadd.f32 %v2817_v38, %v2729_v52 }
 0x2ea   : > { %v2906_v19 = vpop.f32.mrf.mxu3 }
 0x2eb   : > { %v2907_v16 = vadd.f32 %v2906_v19, %v2818_v51 }
 0x2ec   : > { %v3000_v22 = vpop.f32.mrf.mxu0 }
 0x2ed   : > { %v2996_v9 = vadd.f32 %v2995_v59, %v2907_v16 }
 0x2ee   : > { %v2736_v39 = vpop.f32.mrf.mxu1 }
 0x2ef   : > { %3035 = vst [vmem:[%s5153_s29 + $0xd8] sm:$0xff] %v2996_v9  ;;  %v3066_v42 = vadd.f32 %v3065_v29, %v2996_v9  ;;  %v3105_v12 = vmul.f32 %v2996_v9, %v2996_v9  ;;  %v2737_v44 = vadd.f32 %v2736_v39, %v5380_v46 }
 0x2f0   : > { %v2820_v17 = vpop.f32.mrf.mxu2 }
 0x2f1   : > { %v3136_v47 = vadd.f32 %v3135_v11, %v3105_v12  ;;  %v2821_v2 = vadd.f32 %v2820_v17, %v2732_v48 }
 0x2f2   : > { %v2909_v41 = vpop.f32.mrf.mxu3 }
 0x2f3   : > { %v2910_v54 = vadd.f32 %v2909_v41, %v2821_v2 }
 0x2f4   : > { %v3003_v25 = vpop.f32.mrf.mxu0 }
 0x2f5   : > { %v2999_v7 = vadd.f32 %v2998_v20, %v2910_v54 }
 0x2f6   : > { %v2738_v56 = vpop.f32.mrf.mxu1 }
 0x2f7   : > { %3036 = vst [vmem:[%s5153_s29 + $0xe0] sm:$0xff] %v2999_v7  ;;  %v3067_v63 = vadd.f32 %v3066_v42, %v2999_v7  ;;  %v3106_v8 = vmul.f32 %v2999_v7, %v2999_v7  ;;  %v2739_v23 = vadd.f32 %v2738_v56, %v5381_v28 }
 0x2f8   : > { %v2822_v1 = vpop.f32.mrf.mxu2 }
 0x2f9   : > { %v3137_v27 = vadd.f32 %v3136_v47, %v3106_v8  ;;  %v2823_v10 = vadd.f32 %v2822_v1, %v2734_v13 }
 0x2fa   : > { %v2911_v57 = vpop.f32.mrf.mxu3 }
 0x2fb   : > { %v2912_v49 = vadd.f32 %v2911_v57, %v2823_v10 }
 0x2fc   : > { %v3005_v31 = vpop.f32.mrf.mxu0 }
 0x2fd   : > { %v3001_v32 = vadd.f32 %v3000_v22, %v2912_v49 }
 0x2ff   : > { %3037 = vst [vmem:[%s5153_s29 + $0xe8] sm:$0xff] %v3001_v32  ;;  %v3068_v50 = vadd.f32 %v3067_v63, %v3001_v32  ;;  %v3107_v60 = vmul.f32 %v3001_v32, %v3001_v32 }
 0x300   : > { %v2825_v53 = vpop.f32.mrf.mxu2 }
 0x301   : > { %v3138_v58 = vadd.f32 %v3137_v27, %v3107_v60  ;;  %v2826_v43 = vadd.f32 %v2825_v53, %v2737_v44 }
 0x302   : > { %v2914_v40 = vpop.f32.mrf.mxu3 }
 0x303   : > { %v2915_v62 = vadd.f32 %v2914_v40, %v2826_v43 }
 0x305   : > { %v3004_v26 = vadd.f32 %v3003_v25, %v2915_v62 }
 0x307   : > { %3038 = vst [vmem:[%s5153_s29 + $0xf0] sm:$0xff] %v3004_v26  ;;  %v3069_v33 = vadd.f32 %v3068_v50, %v3004_v26  ;;  %v3108_v4 = vmul.f32 %v3004_v26, %v3004_v26 }
 0x308   : > { %v2827_v35 = vpop.f32.mrf.mxu2 }
 0x309   : > { %v3139_v61 = vadd.f32 %v3138_v58, %v3108_v4  ;;  %v2828_v21 = vadd.f32 %v2827_v35, %v2739_v23 }
 0x30a   : > { %v2916_v55 = vpop.f32.mrf.mxu3 }
 0x30b   : > { %v2917_v24 = vadd.f32 %v2916_v55, %v2828_v21 }
 0x30d   : > { %v3006_v18 = vadd.f32 %v3005_v31, %v2917_v24 }
 0x30f   : > { %3039 = vst [vmem:[%s5153_s29 + $0xf8] sm:$0xff] %v3006_v18  ;;  %v3070_v0 = vadd.f32 %v3069_v33, %v3006_v18  ;;  %v3109_v30 = vmul.f32 %v3006_v18, %v3006_v18 }
 0x311   : > { %v3071_v37 = vrot.slane %v3070_v0, 4  ;;  %v3140_v3 = vadd.f32 %v3139_v61, %v3109_v30 }
 0x313   : > { %v3072_v36 = vadd.f32 %v3071_v37, %v3070_v0  ;;  %v3141_v6 = vrot.slane %v3140_v3, 4 }
 0x315   : > { %v3073_v59 = vrot.slane %v3072_v36, 2  ;;  %v3142_v14 = vadd.f32 %v3141_v6, %v3140_v3 }
 0x317   : > { %v3074_v45 = vadd.f32 %v3073_v59, %v3072_v36  ;;  %v3143_v29 = vrot.slane %v3142_v14, 2 }
 0x319   : > { %v3075_v5 = vrot.slane %v3074_v45, 1  ;;  %v3144_v52 = vadd.f32 %v3143_v29, %v3142_v14 }
 0x31b   : > { %v3076_v38 = vadd.f32 %v3075_v5, %v3074_v45  ;;  %v3145_v11 = vrot.slane %v3144_v52, 1 }
 0x31d   : > { %3077 = vst [vmem:[%s211_s6] sm:$0x1] %v3076_v38  ;;  %v3146_v51 = vadd.f32 %v3145_v11, %v3144_v52 }
 0x31f   : > { %3147 = vst [vmem:[%s214_s9] sm:$0x1] %v3146_v51 }
 0x320 PF: > { %s15_s15 = sadd.s32 1, %s3790_s15  }
 0x321   : > { %p12_p4 = scmp.ge.s32.totalorder %s15_s15, 4  }
 0x323   :  { %14 = sbr.rel (!%p12_p4) target bundleno = 1 (0x1), region = 83 }

// kernel: residual_block.4
= control target key start
LH: loop header
LB: loop body
LE: loop exit
PB: predicated region body
PF: predicated region fallthrough
CT: control target
= control target key end

     0   :  { %s4022_s21 = smov 0   ;;  %s5602_s0 = inlined_call_operand.vmem [shape: f32[2,16,16,128], index: 0, kind: input, shape index: {}]   ;;  %s5603_s1 = inlined_call_operand.vmem [shape: bf16[1152,128], index: 1, kind: input, shape index: {}]   ;;  %s5604_s2 = inlined_call_operand.vmem [shape: f32[1,128], index: 2, kind: input, shape index: {}]   ;;  %s5605_s3 = inlined_call_operand.vmem [shape: f32[1,128], index: 3, kind: input, shape index: {}]   ;;  %s5606_s4 = inlined_call_operand.vmem [shape: f32[2,16,16,128], index: 4, kind: output, shape index: {0}]   ;;  %s5607_s5 = inlined_call_operand.vmem [shape: f32[2,1,128], index: 5, kind: output, shape index: {1}]   ;;  %s5608_s6 = inlined_call_operand.vmem [shape: f32[2,1,128], index: 6, kind: output, shape index: {2}]  }
   0x1 LB: > { %s3443_s22 = sadd.s32 4294967295, %s3984_s21   ;;  %p3447_p0 = scmp.ge.s32.totalorder %s3984_s21, 1  ;;  %s3984_s21 = sphi %s4022_s21, %s17_s21  }
   0x2   : > { %p217_p1 = scmp.lt.s32.totalorder %s3984_s21, 3 }
   0x4   : > { %p218_p2 = pnand %p3447_p0, %p217_p1 }
   0x6   : > { %221 = sbr.rel (%p218_p2) target bundleno = 800 (0x320), region = 36 }
   0xb   : > { %v3859_v0 = vld [vmem:[%s5603_s1 + $0x38] sm:$0xff]  ;;  %p253_p3 = scmp.lt.s32.totalorder %s3443_s22, 1  ;;  %v3986_v1 = vmov 0   ;;  %v3858_v2 = vld [vmem:[%s5603_s1 + $0x30] sm:$0xff]  ;;  %v4042_v3 = vld [vmem:[%s5604_s2] ss:$0 sm:$0xff] }
   0xc   : > { %418 = vst [vmem:[#allocation2 + $0x30] sm:$0xf] %v3986_v1  ;;  %3924 = vmatpush.bf16.msra.mxu1 %v3859_v0  ;;  %3925 = vmatpush.bf16.msra.mxu2 %v3859_v0  ;;  %v4056_v4 = vld [vmem:[%s5605_s3] ss:$0 sm:$0xff]  ;;  %v3857_v5 = vld [vmem:[%s5603_s1 + $0x28] sm:$0xff]  ;;  %vm816_vm2 = vcmask 1043456  }
   0xd   : > { %s5717_s22 = smov (!%p253_p3, %s3443_s22), 1  ;;  %3926 = vmatpush.bf16.msra.mxu3 %v3859_v0  ;;  %2397 = vmatpush.bf16.msra.mxu0 %v3859_v0  ;;  %419 = vst [vmem:[#allocation2 + $0x34] sm:$0xf] %v3986_v1  ;;  %v3856_v14 = vld [vmem:[%s5603_s1 + $0x20] sm:$0xff]  ;;  %vm492_vm0 = vsmask.f32 256 }
   0xe   : > { %s3832_s29 = sshll.u32 %s5717_s22, 8  ;;  %406 = vst [vmem:[#allocation2] sm:$0xf] %v3986_v1  ;;  %vm493_vm1 = vsmask.f32 4368  ;;  %v3855_v22 = vld [vmem:[%s5603_s1 + $0x18] sm:$0xff]  ;;  %s265_s18 = scalar_lea.vmem %s5607_s5, %s5717_s22 }
   0xf   : > { %s4051_s8 = scalar_lea.vmem %s5602_s0, %s3832_s29  ;;  %407 = vst [vmem:[#allocation2 + $0x4] sm:$0xf] %v3986_v1  ;;  %vm817_vm3 = vsmask.f32 7938  ;;  %vm4096_vm4 = vmor %vm492_vm0, %vm493_vm1  ;;  %v3854_v34 = vld [vmem:[%s5603_s1 + $0x10] sm:$0xff]  ;;  %v3853_v46 = vld [vmem:[%s5603_s1 + $0x8] sm:$0xff]  ;;  %s5489_s16 = scalar_lea.vmem %s5606_s4, %s3832_s29 }
  0x10   : > { %3927 = vmatpush.bf16.msra.mxu1 %v3858_v2  ;;  %3928 = vmatpush.bf16.msra.mxu2 %v3858_v2  ;;  %v276_v6 = vld [vmem:[%s4051_s8 + $0x30] sm:$0xff]  ;;  %v277_v7 = vld [vmem:[%s4051_s8 + $0x38] sm:$0xff]  ;;  %408 = vst [vmem:[#allocation2 + $0x8] sm:$0x1] %v3986_v1  ;;  %vm4108_vm5 = vmand %vm816_vm2, %vm817_vm3  ;;  %vm823_vm6 = vcmask 1040384   ;;  %vm1422_vm11 = vcmask 1042432   ;;  %s268_s23 = scalar_lea.vmem %s5608_s6, %s5717_s22 }
  0x11   : > { %3929 = vmatpush.bf16.msra.mxu3 %v3858_v2  ;;  %2398 = vmatpush.bf16.msra.mxu0 %v3858_v2  ;;  %v312_v8 = vmul.f32 %v4042_v3, %v276_v6  ;;  %v313_v9 = vmul.f32 %v4042_v3, %v277_v7  ;;  %v284_v10 = vld [vmem:[%s4051_s8 + $0x70] sm:$0xff]  ;;  %v285_v11 = vld [vmem:[%s4051_s8 + $0x78] sm:$0xff]  ;;  %409 = vst [vmem:[#allocation2 + $0xc] sm:$0xf] %v3986_v1  ;;  %v3852_v51 = vld [vmem:[%s5603_s1] sm:$0xff]  ;;  %vm1423_vm12 = vcmask 1046532  }
  0x12   : > { %410 = vst [vmem:[#allocation2 + $0x10] sm:$0xf] %v3986_v1  ;;  %v320_v15 = vmul.f32 %v4042_v3, %v284_v10  ;;  %v321_v16 = vmul.f32 %v4042_v3, %v285_v11  ;;  %v292_v21 = vld [vmem:[%s4051_s8 + $0xb0] sm:$0xff]  ;;  %v293_v25 = vld [vmem:[%s4051_s8 + $0xb8] sm:$0xff]  ;;  %v278_v60 = vld [vmem:[%s4051_s8 + $0x40] sm:$0xff] }
  0x13   : > { %v348_v12 = vadd.f32 %v4056_v4, %v312_v8  ;;  %v349_v13 = vadd.f32 %v4056_v4, %v313_v9  ;;  %411 = vst [vmem:[#allocation2 + $0x14] sm:$0x1] %v3986_v1  ;;  %v328_v30 = vmul.f32 %v4042_v3, %v292_v21  ;;  %v842_v36 = vld [vmem:[#allocation2 + $0x30] sm:$0xf]  ;;  %v329_v38 = vmul.f32 %v4042_v3, %v293_v25  ;;  %v279_v61 = vld [vmem:[%s4051_s8 + $0x48] sm:$0xff]  ;;  %v286_v2 = vld [vmem:[%s4051_s8 + $0x80] sm:$0xff] }
  0x14   : > { %3930 = vmatpush.bf16.msra.mxu1 %v3857_v5  ;;  %3931 = vmatpush.bf16.msra.mxu2 %v3857_v5  ;;  %412 = vst [vmem:[#allocation2 + $0x18] sm:$0xf] %v3986_v1  ;;  %v356_v23 = vadd.f32 %v4056_v4, %v320_v15  ;;  %v357_v24 = vadd.f32 %v4056_v4, %v321_v16  ;;  %v294_v6 = vld [vmem:[%s4051_s8 + $0xc0] sm:$0xff]  ;;  %v295_v10 = vld [vmem:[%s4051_s8 + $0xc8] sm:$0xff]  ;;  %vm4503_vm7 = vmand %vm823_vm6, %vm492_vm0  ;;  %vm987_vm8 = vsmask.f32 3328 }
  0x15   : > { %3932 = vmatpush.bf16.msra.mxu3 %v3857_v5  ;;  %2399 = vmatpush.bf16.msra.mxu0 %v3857_v5  ;;  %v380_v17 = vmax.f32 %v348_v12, 0.0  ;;  %v381_v18 = vmax.f32 %v349_v13, 0.0  ;;  %413 = vst [vmem:[#allocation2 + $0x1c] sm:$0xf] %v3986_v1  ;;  %v364_v43 = vadd.f32 %v4056_v4, %v328_v30  ;;  %v365_v48 = vadd.f32 %v4056_v4, %v329_v38  ;;  %v287_v5 = vld [vmem:[%s4051_s8 + $0x88] sm:$0xff]  ;;  %vm4635_vm13 = vmor %vm1422_vm11, %vm1423_vm12 }
  0x16   : > { %414 = vst [vmem:[#allocation2 + $0x20] sm:$0x1] %v3986_v1  ;;  %v388_v37 = vmax.f32 %v356_v23, 0.0  ;;  %v389_v42 = vmax.f32 %v357_v24, 0.0  ;;  %v314_v63 = vmul.f32 %v4042_v3, %v278_v60  ;;  %v315_v0 = vmul.f32 %v4042_v3, %v279_v61  ;;  %v3866_v60 = vld [vmem:[%s5603_s1 + $0x70] sm:$0xff] }
  0x17   : > { %v466_v19 = vpack.c.bf16 %v380_v17, %v380_v17  ;;  %v467_v20 = vpack.c.bf16 %v381_v18, %v381_v18  ;;  %415 = vst [vmem:[#allocation2 + $0x24] sm:$0xf] %v3986_v1  ;;  %v396_v50 = vmax.f32 %v364_v43, 0.0  ;;  %v397_v53 = vmax.f32 %v365_v48, 0.0  ;;  %v3883_v43 = vld [vmem:[%s5603_s1 + $0xf8] sm:$0xff] }
  0x18   : > { %3933 = vmatpush.bf16.msra.mxu1 %v3856_v14  ;;  %3934 = vmatpush.bf16.msra.mxu2 %v3856_v14  ;;  %416 = vst [vmem:[#allocation2 + $0x28] sm:$0xf] %v3986_v1  ;;  %v4126_v47 = vpack.c.bf16 %v388_v37, %v388_v37  ;;  %v475_v49 = vpack.c.bf16 %v389_v42, %v389_v42  ;;  %v3834_v42 = vld [vmem:[#allocation2] sm:$0xff]  ;;  %vm988_vm9 = vsmask.f32 7440 }
  0x19   : > { %3935 = vmatpush.bf16.msra.mxu3 %v3856_v14  ;;  %2400 = vmatpush.bf16.msra.mxu0 %v3856_v14  ;;  %v547_v26 = vshrl.u32 %v466_v19, 16  ;;  %v550_v27 = vshll.u32 %v466_v19, 16  ;;  %v555_v28 = vshrl.u32 %v467_v20, 16  ;;  %v558_v29 = vshll.u32 %v467_v20, 16  ;;  %417 = vst [vmem:[#allocation2 + $0x2c] sm:$0x1] %v3986_v1  ;;  %vm4602_vm10 = vmor %vm987_vm8, %vm988_vm9 }
  0x1a   : > { %420 = vst [vmem:[#allocation2 + $0x38] sm:$0x1] %v3986_v1  ;;  %v615_v52 = vshrl.u32 %v4126_v47, 16  ;;  %v623_v54 = vshrl.u32 %v475_v49, 16  ;;  %v4138_v55 = vpack.c.bf16 %v396_v50, %v396_v50  ;;  %v626_v56 = vshll.u32 %v475_v49, 16 }
  0x1b   : > { %v549_v32 = vrot.slane %v547_v26, 7  ;;  %v4100_v33 = vrot.slane %v555_v28, 7  ;;  %421 = vst [vmem:[#allocation2 + $0x3c] sm:$0xf] %v3986_v1  ;;  %v4144_v59 = vpack.c.bf16 %v397_v53, %v397_v53  ;;  %v322_v8 = vmul.f32 %v4042_v3, %v286_v2  ;;  %v270_v28 = vld [vmem:[%s4051_s8] sm:$0xff]  ;;  %v3891_v53 = vld [vmem:[%s5603_s1 + $0x138] sm:$0xff] }
  0x1c   : > { %3936 = vmatpush.bf16.msra.mxu1 %v3855_v22  ;;  %3937 = vmatpush.bf16.msra.mxu2 %v3855_v22  ;;  %422 = vst [vmem:[#allocation2 + $0x40] sm:$0xf] %v3986_v1  ;;  %v4142_v58 = vrot.slane %v615_v52, 7  ;;  %v4149_v62 = vrot.slane %v623_v54, 7  ;;  %v683_v7 = vshrl.u32 %v4138_v55, 16  ;;  %v323_v9 = vmul.f32 %v4042_v3, %v287_v5  ;;  %v3874_v52 = vld [vmem:[%s5603_s1 + $0xb0] sm:$0xff] }
  0x1d   : > { %3938 = vmatpush.bf16.msra.mxu3 %v3855_v22  ;;  %2401 = vmatpush.bf16.msra.mxu0 %v3855_v22  ;;  %v552_v39 = vor.u32 %v550_v27, %v549_v32  ;;  %v553_v40 = vrot.slane %v549_v32, 4  ;;  %v560_v41 = vor.u32 %v558_v29, %v4100_v33  ;;  %423 = vst [vmem:[#allocation2 + $0x44] sm:$0x1] %v3986_v1  ;;  %v618_v12 = vshll.u32 %v4126_v47, 16  ;;  %v3867_v47 = vld [vmem:[%s5603_s1 + $0x78] sm:$0xff] }
  0x1e   : > { %424 = vst [vmem:[#allocation2 + $0x48] sm:$0xf] %v3986_v1  ;;  %v330_v11 = vmul.f32 %v4042_v3, %v294_v6  ;;  %v350_v13 = vadd.f32 %v4056_v4, %v314_v63  ;;  %v351_v14 = vadd.f32 %v4056_v4, %v315_v0  ;;  %v331_v15 = vmul.f32 %v4042_v3, %v295_v10 }
  0x1f   : > { %v561_v44 = vsel %vm4096_vm4, %v553_v40, %v560_v41  ;;  %v843_v45 = vsel %vm4108_vm5, %v552_v39, %v842_v36  ;;  %425 = vst [vmem:[#allocation2 + $0x4c] sm:$0xf] %v3986_v1  ;;  %v691_v16 = vshrl.u32 %v4144_v59, 16  ;;  %v358_v17 = vadd.f32 %v4056_v4, %v322_v8  ;;  %v271_v40 = vld [vmem:[%s4051_s8 + $0x8] sm:$0xff]  ;;  %v3875_v41 = vld [vmem:[%s5603_s1 + $0xb8] sm:$0xff] }
  0x20   : > { %3939 = vmatpush.bf16.msra.mxu1 %v3854_v34  ;;  %3940 = vmatpush.bf16.msra.mxu2 %v3854_v34  ;;  %844 = vst [vmem:[#allocation2 + $0x30] sm:$0xf] %v843_v45  ;;  %v359_v18 = vadd.f32 %v4056_v4, %v323_v9  ;;  %v366_v19 = vadd.f32 %v4056_v4, %v330_v11  ;;  %v621_v20 = vrot.slane %v4142_v58, 4  ;;  %v382_v21 = vmax.f32 %v350_v13, 0.0 }
  0x21   : > { %3941 = vmatpush.bf16.msra.mxu3 %v3854_v34  ;;  %2402 = vmatpush.bf16.msra.mxu0 %v3854_v34  ;;  %845 = vst [vmem:[#allocation2 + $0x34] sm:$0xf] %v561_v44  ;;  %v383_v22 = vmax.f32 %v351_v14, 0.0  ;;  %v367_v23 = vadd.f32 %v4056_v4, %v331_v15  ;;  %v628_v24 = vor.u32 %v626_v56, %v4149_v62  ;;  %v4177_v25 = vrot.slane %v683_v7, 7 }
  0x22   : > { %426 = vst [vmem:[#allocation2 + $0x50] sm:$0x1] %v3986_v1  ;;  %v390_v26 = vmax.f32 %v358_v17, 0.0  ;;  %v391_v27 = vmax.f32 %v359_v18, 0.0  ;;  %v686_v29 = vshll.u32 %v4138_v55, 16  ;;  %v694_v30 = vshll.u32 %v4144_v59, 16 }
  0x23   : > { %427 = vst [vmem:[#allocation2 + $0x54] sm:$0xf] %v3986_v1  ;;  %v468_v32 = vpack.c.bf16 %v382_v21, %v382_v21  ;;  %v469_v34 = vpack.c.bf16 %v383_v22, %v383_v22  ;;  %v4184_v36 = vrot.slane %v691_v16, 7  ;;  %v398_v38 = vmax.f32 %v366_v19, 0.0  ;;  %v3882_v59 = vld [vmem:[%s5603_s1 + $0xf0] sm:$0xff] }
  0x24   : > { %3942 = vmatpush.bf16.msra.mxu1 %v3853_v46  ;;  %3943 = vmatpush.bf16.msra.mxu2 %v3853_v46  ;;  %428 = vst [vmem:[#allocation2 + $0x58] sm:$0xf] %v3986_v1  ;;  %v476_v37 = vpack.c.bf16 %v390_v26, %v390_v26  ;;  %v399_v39 = vmax.f32 %v367_v23, 0.0  ;;  %v306_v45 = vmul.f32 %v4042_v3, %v270_v28  ;;  %v4242_v14 = vld [vmem:[#allocation2 + $0x3c] sm:$0xf]  ;;  %v280_v26 = vld [vmem:[%s4051_s8 + $0x50] sm:$0xff] }
  0x25   : > { %3944 = vmatpush.bf16.msra.mxu3 %v3853_v46  ;;  %2403 = vmatpush.bf16.msra.mxu0 %v3853_v46  ;;  %429 = vst [vmem:[#allocation2 + $0x5c] sm:$0x1] %v3986_v1  ;;  %v564_v44 = vshrl.u32 %v468_v32, 16  ;;  %v689_v46 = vrot.slane %v4177_v25, 4  ;;  %v567_v48 = vshll.u32 %v468_v32, 16  ;;  %v4200_v49 = vpack.c.bf16 %v391_v27, %v391_v27  ;;  %v281_v27 = vld [vmem:[%s4051_s8 + $0x58] sm:$0xff] }
  0x26   : > { %430 = vst [vmem:[#allocation2 + $0x60] sm:$0xf] %v3986_v1  ;;  %v4202_v50 = vpack.c.bf16 %v398_v38, %v398_v38  ;;  %v572_v55 = vshrl.u32 %v469_v34, 16  ;;  %v307_v56 = vmul.f32 %v4042_v3, %v271_v40  ;;  %v575_v61 = vshll.u32 %v469_v34, 16  ;;  %v288_v34 = vld [vmem:[%s4051_s8 + $0x90] sm:$0xff] }
  0x27   : > { %431 = vst [vmem:[#allocation2 + $0x64] sm:$0xf] %v3986_v1  ;;  %v566_v54 = vrot.slane %v564_v44, 7  ;;  %v632_v63 = vshrl.u32 %v476_v37, 16  ;;  %v635_v5 = vshll.u32 %v476_v37, 16  ;;  %v485_v6 = vpack.c.bf16 %v399_v39, %v399_v39 }
  0x28   : > { %3945 = vmatpush.bf16.msra.mxu1 %v3852_v51  ;;  %3946 = vmatpush.bf16.msra.mxu2 %v3852_v51  ;;  %v3838_v57 = vld [vmem:[#allocation2 + $0x30] sm:$0xff]  ;;  %432 = vst [vmem:[#allocation2 + $0x68] sm:$0x1] %v3986_v1  ;;  %v4230_v2 = vrot.slane %v572_v55, 7  ;;  %v342_v7 = vadd.f32 %v4056_v4, %v306_v45  ;;  %v640_v10 = vshrl.u32 %v4200_v49, 16  ;;  %v700_v11 = vshrl.u32 %v4202_v50, 16 }
  0x29   : > { %3947 = vmatpush.bf16.msra.mxu3 %v3852_v51  ;;  %2404 = vmatpush.bf16.msra.mxu0 %v3852_v51  ;;  %433 = vst [vmem:[#allocation2 + $0x6c] sm:$0xf] %v3986_v1  ;;  %v4206_v51 = vor.u32 %v618_v12, %v4142_v58  ;;  %v696_v58 = vor.u32 %v694_v30, %v4184_v36  ;;  %v4236_v9 = vrot.slane %v632_v63, 7  ;;  %v570_v12 = vrot.slane %v566_v54, 4 }
  0x2a   : > { %434 = vst [vmem:[#allocation2 + $0x70] sm:$0xf] %v3986_v1  ;;  %v4234_v8 = vor.u32 %v567_v48, %v566_v54  ;;  %v577_v13 = vor.u32 %v575_v61, %v4230_v2  ;;  %v643_v15 = vshll.u32 %v4200_v49, 16  ;;  %v343_v16 = vadd.f32 %v4056_v4, %v307_v56 }
  0x2b   : > { %2425 = vmatmul.bf16.vlgmr.msra.gmra.mxu1 %v3838_v57  ;;  %435 = vst [vmem:[#allocation2 + $0x74] sm:$0x1] %v3986_v1  ;;  %v4218_v57 = vsel %vm4096_vm4, %v621_v20, %v628_v24  ;;  %v4248_v17 = vor.u32 %v686_v29, %v4177_v25  ;;  %v4251_v18 = vor.u32 %v635_v5, %v4236_v9  ;;  %v4253_v19 = vrot.slane %v640_v10, 7 }
  0x2c   : > { %436 = vst [vmem:[#allocation2 + $0x78] sm:$0xf] %v3986_v1  ;;  %2575 = vmatpush.bf16.msrb.mxu2 %v3875_v41  ;;  %2405 = vmatmul.bf16.vlgmr.msra.gmra.mxu0 %v3834_v42  ;;  %v702_v21 = vrot.slane %v700_v11, 7  ;;  %v4264_v23 = vsel %vm4096_vm4, %v689_v46, %v696_v58  ;;  %v708_v24 = vshrl.u32 %v485_v6, 16  ;;  %v374_v25 = vmax.f32 %v342_v7, 0.0  ;;  %v289_v41 = vld [vmem:[%s4051_s8 + $0x98] sm:$0xff] }
  0x2d   : > { %437 = vst [vmem:[#allocation2 + $0x7c] sm:$0xf] %v3986_v1  ;;  %2664 = vmatpush.bf16.msrb.mxu3 %v3883_v43  ;;  %2486 = vmatpush.bf16.msrb.mxu1 %v3867_v47  ;;  %v4228_v0 = vld [vmem:[#allocation2 + $0x60] sm:$0xf]  ;;  %v850_v28 = vsel %vm4108_vm5, %v4234_v8, %v4242_v14  ;;  %v638_v29 = vrot.slane %v4236_v9, 4  ;;  %v703_v30 = vshll.u32 %v4202_v50, 16  ;;  %v4279_v37 = vsel %vm4096_vm4, %v570_v12, %v577_v13 }
  0x2e   : > { %438 = vst [vmem:[#allocation2 + $0x80] sm:$0x1] %v3986_v1  ;;  %2753 = vmatpush.bf16.msrb.mxu0 %v3891_v53  ;;  %v871_v22 = vsel %vm4108_vm5, %v4206_v51, %v4228_v0  ;;  %v711_v32 = vshll.u32 %v485_v6, 16  ;;  %v645_v38 = vor.u32 %v643_v15, %v4253_v19  ;;  %v4282_v39 = vrot.slane %v708_v24, 7  ;;  %v272_v11 = vld [vmem:[%s4051_s8 + $0x10] sm:$0xff]  ;;  %v3873_v12 = vld [vmem:[%s5603_s1 + $0xa8] sm:$0xff] }
  0x2f   : > { %439 = vst [vmem:[#allocation2 + $0x84] sm:$0xf] %v3986_v1  ;;  %v375_v40 = vmax.f32 %v343_v16, 0.0  ;;  %v460_v44 = vpack.c.bf16 %v374_v25, %v374_v25  ;;  %v316_v45 = vmul.f32 %v4042_v3, %v280_v26  ;;  %v317_v46 = vmul.f32 %v4042_v3, %v281_v27  ;;  %v3881_v15 = vld [vmem:[%s5603_s1 + $0xe8] sm:$0xff]  ;;  %v3890_v16 = vld [vmem:[%s5603_s1 + $0x130] sm:$0xff] }
  0x30   : > { %440 = vst [vmem:[#allocation2 + $0x88] sm:$0xf] %v3986_v1  ;;  %2576 = vmatpush.bf16.msrb.mxu2 %v3874_v52  ;;  %v4255_v20 = vld [vmem:[#allocation2 + $0x6c] sm:$0xf]  ;;  %v706_v47 = vrot.slane %v702_v21, 4  ;;  %v324_v49 = vmul.f32 %v4042_v3, %v288_v34  ;;  %v325_v50 = vmul.f32 %v4042_v3, %v289_v41  ;;  %v296_v52 = vld [vmem:[%s4051_s8 + $0xd0] sm:$0xff]  ;;  %v4299_v53 = vor.u32 %v703_v30, %v702_v21 }
  0x31   : > { %441 = vst [vmem:[#allocation2 + $0x8c] sm:$0x1] %v3986_v1  ;;  %2665 = vmatpush.bf16.msrb.mxu3 %v3882_v59  ;;  %2487 = vmatpush.bf16.msrb.mxu1 %v3866_v60  ;;  %v878_v43 = vsel %vm4108_vm5, %v4251_v18, %v4255_v20  ;;  %v461_v48 = vpack.c.bf16 %v375_v40, %v375_v40  ;;  %v496_v56 = vshrl.u32 %v460_v44, 16  ;;  %v297_v59 = vld [vmem:[%s4051_s8 + $0xd8] sm:$0xff]  ;;  %v499_v61 = vshll.u32 %v460_v44, 16  ;;  %v3865_v30 = vld [vmem:[%s5603_s1 + $0x68] sm:$0xff] }
  0x32   : > { %442 = vst [vmem:[#allocation2 + $0x90] sm:$0xf] %v3986_v1  ;;  %v713_v54 = vor.u32 %v711_v32, %v4282_v39  ;;  %v352_v58 = vadd.f32 %v4056_v4, %v316_v45  ;;  %v353_v7 = vadd.f32 %v4056_v4, %v317_v46  ;;  %v360_v10 = vadd.f32 %v4056_v4, %v324_v49  ;;  %v4352_v34 = vld [vmem:[#allocation2 + $0xc] sm:$0xf]  ;;  %v3880_v40 = vld [vmem:[%s5603_s1 + $0xe0] sm:$0xff] }
  0x33   : > { %443 = vst [vmem:[#allocation2 + $0x94] sm:$0xf] %v3986_v1  ;;  %v504_v63 = vshrl.u32 %v461_v48, 16  ;;  %v507_v5 = vshll.u32 %v461_v48, 16  ;;  %v4312_v6 = vrot.slane %v496_v56, 7  ;;  %v332_v21 = vmul.f32 %v4042_v3, %v296_v52  ;;  %2754 = vmatpush.bf16.msrb.mxu0 %v3890_v16  ;;  %v3889_v45 = vld [vmem:[%s5603_s1 + $0x128] sm:$0xff] }
  0x34   : > { %444 = vst [vmem:[#allocation2 + $0x98] sm:$0x1] %v3986_v1  ;;  %v384_v9 = vmax.f32 %v352_v58, 0.0  ;;  %v333_v24 = vmul.f32 %v4042_v3, %v297_v59  ;;  %v4335_v25 = vsel %vm4096_vm4, %v638_v29, %v645_v38  ;;  %v4339_v26 = vsel %vm4096_vm4, %v706_v47, %v713_v54  ;;  %2577 = vmatpush.bf16.msrb.mxu2 %v3873_v12  ;;  %v3872_v38 = vld [vmem:[%s5603_s1 + $0xa0] sm:$0xff]  ;;  %v273_v56 = vld [vmem:[%s4051_s8 + $0x18] sm:$0xff] }
  0x35   : > { %445 = vst [vmem:[#allocation2 + $0x9c] sm:$0xf] %v3986_v1  ;;  %v4321_v13 = vrot.slane %v504_v63, 7  ;;  %v4350_v29 = vor.u32 %v499_v61, %v4312_v6  ;;  %2666 = vmatpush.bf16.msrb.mxu3 %v3881_v15  ;;  %v385_v41 = vmax.f32 %v353_v7, 0.0  ;;  %v502_v44 = vrot.slane %v4312_v6, 4  ;;  %2488 = vmatpush.bf16.msrb.mxu1 %v3865_v30  ;;  %v3864_v46 = vld [vmem:[%s5603_s1 + $0x60] sm:$0xff] }
  0x36   : > { %446 = vst [vmem:[#allocation2 + $0xa0] sm:$0xf] %v3986_v1  ;;  %v470_v32 = vpack.c.bf16 %v384_v9, %v384_v9  ;;  %v369_v48 = vadd.f32 %v4056_v4, %v333_v24  ;;  %v4371_v49 = vmul.f32 %v4042_v3, %v272_v11  ;;  %v392_v52 = vmax.f32 %v360_v10, 0.0  ;;  %v856_v12 = vld [vmem:[#allocation2 + $0x48] sm:$0xf] }
  0x37   : > { %447 = vst [vmem:[#allocation2 + $0xa4] sm:$0x1] %v3986_v1  ;;  %v820_v0 = vsel %vm4108_vm5, %v4350_v29, %v4352_v34  ;;  %2755 = vmatpush.bf16.msrb.mxu0 %v3889_v45  ;;  %v884_v24 = vld [vmem:[#allocation2 + $0x78] sm:$0xf] }
  0x38   : > { %448 = vst [vmem:[#allocation2 + $0xa8] sm:$0xf] %v3986_v1  ;;  %v581_v47 = vshrl.u32 %v470_v32, 16  ;;  %v584_v59 = vshll.u32 %v470_v32, 16  ;;  %v401_v63 = vmax.f32 %v369_v48, 0.0  ;;  %2578 = vmatpush.bf16.msrb.mxu2 %v3872_v38  ;;  %v478_v9 = vpack.c.bf16 %v392_v52, %v392_v52  ;;  %v291_v48 = vld [vmem:[%s4051_s8 + $0xa8] sm:$0xff] }
  0x39   : > { %449 = vst [vmem:[#allocation2 + $0xac] sm:$0xf] %v3986_v1  ;;  %v4286_v42 = vld [vmem:[#allocation2 + $0x90] sm:$0xf]  ;;  %2667 = vmatpush.bf16.msrb.mxu3 %v3880_v40  ;;  %2489 = vmatpush.bf16.msrb.mxu1 %v3864_v46  ;;  %v282_v40 = vld [vmem:[%s4051_s8 + $0x60] sm:$0xff] }
  0x3a   : > { %450 = vst [vmem:[#allocation2 + $0xb0] sm:$0x1] %v3986_v1  ;;  %v899_v60 = vsel %vm4108_vm5, %v4248_v17, %v4286_v42  ;;  %v361_v17 = vadd.f32 %v4056_v4, %v325_v50  ;;  %v368_v42 = vadd.f32 %v4056_v4, %v332_v21  ;;  %v471_v50 = vpack.c.bf16 %v385_v41, %v385_v41 }
  0x3b   : > { %451 = vst [vmem:[#allocation2 + $0xb4] sm:$0xf] %v3986_v1  ;;  %v583_v58 = vrot.slane %v581_v47, 7  ;;  %v487_v16 = vpack.c.bf16 %v401_v63, %v401_v63  ;;  %v318_v63 = vmul.f32 %v4042_v3, %v282_v40 }
  0x3c   : > { %452 = vst [vmem:[#allocation2 + $0xb8] sm:$0xf] %v3986_v1  ;;  %v4302_v55 = vld [vmem:[#allocation2 + $0x9c] sm:$0xf]  ;;  %v393_v54 = vmax.f32 %v361_v17, 0.0  ;;  %v400_v61 = vmax.f32 %v368_v42, 0.0 }
  0x3d   : > { %453 = vst [vmem:[#allocation2 + $0xbc] sm:$0x1] %v3986_v1  ;;  %v906_v27 = vsel %vm4108_vm5, %v4299_v53, %v4302_v55  ;;  %v589_v6 = vshrl.u32 %v471_v50, 16  ;;  %v592_v7 = vshll.u32 %v471_v50, 16  ;;  %v586_v11 = vor.u32 %v584_v59, %v583_v58  ;;  %v283_v53 = vld [vmem:[%s4051_s8 + $0x68] sm:$0xff]  ;;  %v290_v55 = vld [vmem:[%s4051_s8 + $0xa0] sm:$0xff] }
  0x3e   : > { %454 = vst [vmem:[#allocation2 + $0xc0] sm:$0xf] %v3986_v1  ;;  %v479_v51 = vpack.c.bf16 %v393_v54, %v393_v54  ;;  %v587_v8 = vrot.slane %v583_v58, 4  ;;  %v725_v29 = vshrl.u32 %v487_v16, 16  ;;  %v728_v34 = vshll.u32 %v487_v16, 16 }
  0x3f   : > { %455 = vst [vmem:[#allocation2 + $0xc4] sm:$0xf] %v3986_v1  ;;  %v857_v41 = vsel %vm4108_vm5, %v586_v11, %v856_v12  ;;  %v3870_v11 = vld [vmem:[%s5603_s1 + $0x90] sm:$0xff]  ;;  %v354_v12 = vadd.f32 %v4056_v4, %v318_v63 }
  0x40   : > { %456 = vst [vmem:[#allocation2 + $0xc8] sm:$0x1] %v3986_v1  ;;  %v657_v10 = vshrl.u32 %v479_v51, 16  ;;  %v660_v15 = vshll.u32 %v479_v51, 16  ;;  %v4418_v46 = vrot.slane %v725_v29, 7 }
  0x41   : > { %457 = vst [vmem:[#allocation2 + $0xcc] sm:$0xf] %v3986_v1 }
  0x42   : > { %458 = vst [vmem:[#allocation2 + $0xd0] sm:$0xf] %v3986_v1  ;;  %v4401_v21 = vrot.slane %v657_v10, 7  ;;  %v730_v52 = vor.u32 %v728_v34, %v4418_v46 }
  0x43   : > { %459 = vst [vmem:[#allocation2 + $0xd4] sm:$0x1] %v3986_v1  ;;  %v509_v1 = vor.u32 %v507_v5, %v4321_v13  ;;  %v649_v5 = vshrl.u32 %v478_v9, 16 }
  0x44   : > { %872 = vst [vmem:[#allocation2 + $0x60] sm:$0xf] %v871_v22  ;;  %v309_v22 = vmul.f32 %v4042_v3, %v273_v56 }
  0x45   : > { %873 = vst [vmem:[#allocation2 + $0x64] sm:$0xf] %v4218_v57  ;;  %v486_v57 = vpack.c.bf16 %v400_v61, %v400_v61  ;;  %v510_v20 = vsel %vm4096_vm4, %v502_v44, %v509_v1  ;;  %v298_v1 = vld [vmem:[%s4051_s8 + $0xe0] sm:$0xff]  ;;  %v3879_v61 = vld [vmem:[%s5603_s1 + $0xd8] sm:$0xff] }
  0x46   : > { %900 = vst [vmem:[#allocation2 + $0x90] sm:$0xf] %v899_v60  ;;  %v4392_v60 = vrot.slane %v589_v6, 7  ;;  %v345_v56 = vadd.f32 %v4056_v4, %v309_v22  ;;  %v319_v6 = vmul.f32 %v4042_v3, %v283_v53  ;;  %v327_v22 = vmul.f32 %v4042_v3, %v291_v48  ;;  %2668 = vmatpush.bf16.msrb.mxu3 %v3879_v61  ;;  %v863_v61 = vld [vmem:[#allocation2 + $0x54] sm:$0xf] }
  0x47   : > { %901 = vst [vmem:[#allocation2 + $0x94] sm:$0xf] %v4264_v23  ;;  %v652_v23 = vshll.u32 %v478_v9, 16  ;;  %v717_v17 = vshrl.u32 %v486_v57, 16  ;;  %v720_v32 = vshll.u32 %v486_v57, 16  ;;  %v3863_v57 = vld [vmem:[%s5603_s1 + $0x58] sm:$0xff] }
  0x48   : > { %851 = vst [vmem:[#allocation2 + $0x3c] sm:$0xf] %v850_v28  ;;  %v594_v14 = vor.u32 %v592_v7, %v4392_v60  ;;  %v651_v28 = vrot.slane %v649_v5, 7  ;;  %v326_v7 = vmul.f32 %v4042_v3, %v290_v55  ;;  %v377_v51 = vmax.f32 %v345_v56, 0.0  ;;  %v299_v5 = vld [vmem:[%s4051_s8 + $0xe8] sm:$0xff]  ;;  %2490 = vmatpush.bf16.msrb.mxu1 %v3863_v57  ;;  %v274_v57 = vld [vmem:[%s4051_s8 + $0x20] sm:$0xff] }
  0x49   : > { %852 = vst [vmem:[#allocation2 + $0x40] sm:$0xf] %v4279_v37  ;;  %v4403_v37 = vld [vmem:[#allocation2 + $0xa8] sm:$0xf]  ;;  %v719_v30 = vrot.slane %v717_v17, 7  ;;  %v3878_v17 = vld [vmem:[%s5603_s1 + $0xd0] sm:$0xff]  ;;  %v335_v29 = vmul.f32 %v4042_v3, %v299_v5 }
  0x4a   : > { %879 = vst [vmem:[#allocation2 + $0x6c] sm:$0xf] %v878_v43  ;;  %v654_v43 = vor.u32 %v652_v23, %v651_v28  ;;  %v655_v38 = vrot.slane %v651_v28, 4  ;;  %v595_v44 = vsel %vm4096_vm4, %v587_v8, %v594_v14  ;;  %v334_v23 = vmul.f32 %v4042_v3, %v298_v1  ;;  %v3887_v8 = vld [vmem:[%s5603_s1 + $0x118] sm:$0xff]  ;;  %2669 = vmatpush.bf16.msrb.mxu3 %v3878_v17  ;;  %v891_v17 = vld [vmem:[#allocation2 + $0x84] sm:$0xf] }
  0x4b   : > { %880 = vst [vmem:[#allocation2 + $0x70] sm:$0xf] %v4335_v25  ;;  %v662_v25 = vor.u32 %v660_v15, %v4401_v21  ;;  %v722_v42 = vor.u32 %v720_v32, %v719_v30  ;;  %v723_v45 = vrot.slane %v719_v30, 4  ;;  %v355_v15 = vadd.f32 %v4056_v4, %v319_v6  ;;  %v3862_v30 = vld [vmem:[%s5603_s1 + $0x50] sm:$0xff] }
  0x4c   : > { %v3842_v18 = vld [vmem:[#allocation2 + $0x60] sm:$0xff]  ;;  %907 = vst [vmem:[#allocation2 + $0x9c] sm:$0xf] %v906_v27  ;;  %v885_v50 = vsel %vm4108_vm5, %v654_v43, %v884_v24  ;;  %v463_v16 = vpack.c.bf16 %v377_v51, %v377_v51  ;;  %v362_v14 = vadd.f32 %v4056_v4, %v326_v7  ;;  %v363_v28 = vadd.f32 %v4056_v4, %v327_v22 }
  0x4d   : > { %908 = vst [vmem:[#allocation2 + $0xa0] sm:$0xf] %v4339_v26  ;;  %2445 = vmatmul.bf16.vlgmr.msra.gmra.mxu2 %v3842_v18  ;;  %v663_v47 = vsel %vm4096_vm4, %v655_v38, %v662_v25  ;;  %v344_v26 = vadd.f32 %v4056_v4, %v4371_v49  ;;  %v913_v54 = vsel %vm4108_vm5, %v722_v42, %v4403_v37  ;;  %v3871_v49 = vld [vmem:[%s5603_s1 + $0x98] sm:$0xff]  ;;  %v386_v32 = vmax.f32 %v354_v12, 0.0 }
  0x4e   : > { %v3846_v27 = vld [vmem:[#allocation2 + $0x90] sm:$0xff]  ;;  %821 = vst [vmem:[#allocation2 + $0xc] sm:$0xf] %v820_v0  ;;  %v731_v9 = vsel %vm4096_vm4, %v723_v45, %v730_v52  ;;  %v3888_v0 = vld [vmem:[%s5603_s1 + $0x120] sm:$0xff]  ;;  %2579 = vmatpush.bf16.msrb.mxu2 %v3871_v49  ;;  %v521_v34 = vshrl.u32 %v463_v16, 16  ;;  %v524_v18 = vshll.u32 %v463_v16, 16  ;;  %2491 = vmatpush.bf16.msrb.mxu1 %v3862_v30 }
  0x4f   : > { %822 = vst [vmem:[#allocation2 + $0x10] sm:$0xf] %v510_v20  ;;  %2465 = vmatmul.bf16.vlgmr.msra.gmra.mxu3 %v3846_v27  ;;  %v376_v59 = vmax.f32 %v344_v26, 0.0  ;;  %2756 = vmatpush.bf16.msrb.mxu0 %v3888_v0  ;;  %v387_v20 = vmax.f32 %v355_v15, 0.0  ;;  %v394_v43 = vmax.f32 %v362_v14, 0.0  ;;  %v472_v40 = vpack.c.bf16 %v386_v32, %v386_v32  ;;  %v275_v14 = vld [vmem:[%s4051_s8 + $0x28] sm:$0xff] }
  0x50   : > { %v4437_v58 = vld [vmem:[#allocation2 + $0x3c] sm:$0xff]  ;;  %858 = vst [vmem:[#allocation2 + $0x48] sm:$0xf] %v857_v41  ;;  %v395_v41 = vmax.f32 %v363_v28, 0.0  ;;  %v4479_v42 = vrot.slane %v521_v34, 7  ;;  %v370_v27 = vadd.f32 %v4056_v4, %v334_v23  ;;  %v511_v12 = vrot.slane %v4321_v13, 4 }
  0x51   : > { %859 = vst [vmem:[#allocation2 + $0x4c] sm:$0xf] %v595_v44  ;;  %2430 = vmatmul.bf16.gmra.mxu1 %v4437_v58  ;;  %v462_v10 = vpack.c.bf16 %v376_v59, %v376_v59  ;;  %v828_v45 = vld [vmem:[#allocation2 + $0x18] sm:$0xf]  ;;  %v473_v53 = vpack.c.bf16 %v387_v20, %v387_v20  ;;  %v480_v55 = vpack.c.bf16 %v394_v43, %v394_v43  ;;  %v598_v26 = vshrl.u32 %v472_v40, 16 }
  0x52   : > { %886 = vst [vmem:[#allocation2 + $0x78] sm:$0xf] %v885_v50  ;;  %2580 = vmatpush.bf16.msrb.mxu2 %v3870_v11  ;;  %v601_v48 = vshll.u32 %v472_v40, 16  ;;  %v526_v1 = vor.u32 %v524_v18, %v4479_v42  ;;  %v3843_v56 = vld [vmem:[#allocation2 + $0x6c] sm:$0xff]  ;;  %v481_v63 = vpack.c.bf16 %v395_v41, %v395_v41  ;;  %v402_v0 = vmax.f32 %v370_v27, 0.0 }
  0x53   : > { %887 = vst [vmem:[#allocation2 + $0x7c] sm:$0xf] %v663_v47  ;;  %v513_v24 = vshrl.u32 %v462_v10, 16  ;;  %v516_v37 = vshll.u32 %v462_v10, 16  ;;  %2757 = vmatpush.bf16.msrb.mxu0 %v3887_v8  ;;  %v606_v50 = vshrl.u32 %v473_v53, 16  ;;  %v609_v52 = vshll.u32 %v473_v53, 16 }
  0x54   : > { %914 = vst [vmem:[#allocation2 + $0xa8] sm:$0xf] %v913_v54  ;;  %v371_v54 = vadd.f32 %v4056_v4, %v335_v29  ;;  %v600_v59 = vrot.slane %v598_v26, 7  ;;  %v666_v6 = vshrl.u32 %v480_v55, 16  ;;  %v669_v51 = vshll.u32 %v480_v55, 16  ;;  %v3847_v22 = vld [vmem:[#allocation2 + $0x9c] sm:$0xff] }
  0x55   : > { %915 = vst [vmem:[#allocation2 + $0xac] sm:$0xf] %v731_v9  ;;  %v515_v25 = vrot.slane %v513_v24, 7  ;;  %v4489_v9 = vrot.slane %v606_v50, 7  ;;  %v674_v11 = vshrl.u32 %v481_v63, 16  ;;  %v677_v16 = vshll.u32 %v481_v63, 16 }
  0x56   : > { %v4477_v38 = vld [vmem:[#allocation2 + $0xc] sm:$0xff]  ;;  %v603_v5 = vor.u32 %v601_v48, %v600_v59  ;;  %v604_v23 = vrot.slane %v600_v59, 4  ;;  %v668_v10 = vrot.slane %v666_v6, 7  ;;  %v403_v8 = vmax.f32 %v371_v54, 0.0  ;;  %v825_v43 = vld [vmem:[#allocation2 + $0x14] sm:$0x1] }
  0x57   : > { %2410 = vmatmul.bf16.gmra.mxu0 %v4477_v38  ;;  %v518_v44 = vor.u32 %v516_v37, %v515_v25  ;;  %v519_v47 = vrot.slane %v515_v25, 4  ;;  %v611_v15 = vor.u32 %v609_v52, %v4489_v9  ;;  %v4499_v32 = vrot.slane %v674_v11, 7  ;;  %v3869_v41 = vld [vmem:[%s5603_s1 + $0x88] sm:$0xff]  ;;  %v3886_v55 = vld [vmem:[%s5603_s1 + $0x110] sm:$0xff]  ;;  %v3868_v54 = vld [vmem:[%s5603_s1 + $0x80] sm:$0xff] }
  0x58   : > { %v4495_v28 = vld [vmem:[#allocation2 + $0x48] sm:$0xff]  ;;  %v864_v24 = vsel %vm4108_vm5, %v603_v5, %v863_v61  ;;  %v671_v37 = vor.u32 %v669_v51, %v668_v10  ;;  %v672_v30 = vrot.slane %v668_v10, 4  ;;  %v488_v34 = vpack.c.bf16 %v402_v0, %v402_v0  ;;  %2581 = vmatpush.bf16.msrb.mxu2 %v3869_v41  ;;  %2758 = vmatpush.bf16.msrb.mxu0 %v3886_v55  ;;  %v3876_v59 = vld [vmem:[%s5603_s1 + $0xc0] sm:$0xff] }
  0x59   : > { %v829_v49 = vsel %vm4108_vm5, %v518_v44, %v828_v45  ;;  %v527_v7 = vsel %vm4096_vm4, %v519_v47, %v526_v1  ;;  %v612_v29 = vsel %vm4096_vm4, %v604_v23, %v611_v15  ;;  %865 = vst [vmem:[#allocation2 + $0x54] sm:$0xf] %v864_v24  ;;  %v489_v18 = vpack.c.bf16 %v403_v8, %v403_v8  ;;  %v3877_v53 = vld [vmem:[%s5603_s1 + $0xc8] sm:$0xff]  ;;  %v919_v1 = vld [vmem:[#allocation2 + $0xb4] sm:$0xf]  ;;  %v3860_v51 = vld [vmem:[%s5603_s1 + $0x40] sm:$0xff] }
  0x5a   : > { %830 = vst [vmem:[#allocation2 + $0x18] sm:$0xf] %v829_v49  ;;  %v310_v20 = vmul.f32 %v4042_v3, %v274_v57  ;;  %v679_v25 = vor.u32 %v677_v16, %v4499_v32  ;;  %v892_v40 = vsel %vm4108_vm5, %v671_v37, %v891_v17  ;;  %v311_v45 = vmul.f32 %v4042_v3, %v275_v14  ;;  %v3861_v52 = vld [vmem:[%s5603_s1 + $0x48] sm:$0xff]  ;;  %v4549_v0 = vld [vmem:[#allocation2] sm:$0xf] }
  0x5b   : > { %831 = vst [vmem:[#allocation2 + $0x1c] sm:$0xf] %v527_v7  ;;  %v734_v27 = vshrl.u32 %v488_v34, 16  ;;  %v737_v44 = vshll.u32 %v488_v34, 16  ;;  %v742_v47 = vshrl.u32 %v489_v18, 16  ;;  %v745_v26 = vshll.u32 %v489_v18, 16  ;;  %2670 = vmatpush.bf16.msrb.mxu3 %v3877_v53  ;;  %2492 = vmatpush.bf16.msrb.mxu1 %v3861_v52 }
  0x5c   : > { %866 = vst [vmem:[#allocation2 + $0x58] sm:$0xf] %v612_v29  ;;  %v680_v48 = vsel %vm4096_vm4, %v672_v30, %v679_v25  ;;  %v346_v3 = vadd.f32 %v4056_v4, %v310_v20  ;;  %v347_v50 = vadd.f32 %v4056_v4, %v311_v45  ;;  %v3885_v4 = vld [vmem:[%s5603_s1 + $0x108] sm:$0xff]  ;;  %v826_v61 = vsel %vm4503_vm7, %v511_v12, %v825_v43  ;;  %v4552_v23 = vld [vmem:[#allocation2 + $0x4] sm:$0xf] }
  0x5d   : > { %2450 = vmatmul.bf16.gmra.mxu2 %v3843_v56  ;;  %893 = vst [vmem:[#allocation2 + $0x84] sm:$0xf] %v892_v40  ;;  %v736_v56 = vrot.slane %v734_v27, 7  ;;  %v4534_v49 = vrot.slane %v742_v47, 7  ;;  %v991_v12 = vshrl.u32 %v4549_v0, 16  ;;  %2759 = vmatpush.bf16.msrb.mxu0 %v3885_v4  ;;  %v3884_v17 = vld [vmem:[%s5603_s1 + $0x100] sm:$0xff] }
  0x5e   : > { %894 = vst [vmem:[#allocation2 + $0x88] sm:$0xf] %v680_v48  ;;  %v378_v6 = vmax.f32 %v346_v3, 0.0  ;;  %v379_v7 = vmax.f32 %v347_v50, 0.0  ;;  %2582 = vmatpush.bf16.msrb.mxu2 %v3868_v54  ;;  %v4562_v8 = vld [vmem:[#allocation2 + $0x8] sm:$0x1] }
  0x5f   : > { %2470 = vmatmul.bf16.gmra.mxu3 %v3847_v22  ;;  %v739_v57 = vor.u32 %v737_v44, %v736_v56  ;;  %v740_v22 = vrot.slane %v736_v56, 4  ;;  %v747_v5 = vor.u32 %v745_v26, %v4534_v49  ;;  %827 = vst [vmem:[#allocation2 + $0x14] sm:$0x1] %v826_v61  ;;  %v994_v14 = vshll.u32 %v4549_v0, 16  ;;  %2493 = vmatpush.bf16.msrb.mxu1 %v3860_v51  ;;  %v3844_v40 = vld [vmem:[#allocation2 + $0x78] sm:$0xff]  ;;  %v3848_v47 = vld [vmem:[#allocation2 + $0xa8] sm:$0xff] }
  0x60   : > { %v464_v10 = vpack.c.bf16 %v378_v6, %v378_v6  ;;  %v465_v11 = vpack.c.bf16 %v379_v7, %v379_v7  ;;  %2671 = vmatpush.bf16.msrb.mxu3 %v3876_v59  ;;  %v1000_v24 = vshll.u32 %v4552_v23, 16  ;;  %v993_v18 = vrot.slane %v991_v12, 4  ;;  %v835_v53 = vld [vmem:[#allocation2 + $0x24] sm:$0xf]  ;;  %v4571_v44 = vld [vmem:[#allocation2 + $0xc] sm:$0xf] }
  0x61   : > { %2435 = vmatmul.bf16.gmra.mxu1 %v4495_v28  ;;  %v748_v15 = vsel %vm4096_vm4, %v740_v22, %v747_v5  ;;  %v920_v16 = vsel %vm4108_vm5, %v739_v57, %v919_v1  ;;  %v996_v20 = vrot.slane %v994_v14, 5  ;;  %v1004_v25 = vshrl.u32 %v4552_v23, 16  ;;  %2760 = vmatpush.bf16.msrb.mxu0 %v3884_v17  ;;  %v4580_v59 = vld [vmem:[#allocation2 + $0x10] sm:$0xf]  ;;  %v3907_v7 = vld [vmem:[%s5603_s1 + $0x1b8] sm:$0xff] }
  0x62   : > { %v4544_v63 = vld [vmem:[#allocation2 + $0x18] sm:$0xff]  ;;  %921 = vst [vmem:[#allocation2 + $0xb4] sm:$0xf] %v920_v16  ;;  %v530_v37 = vshrl.u32 %v464_v10, 16  ;;  %v533_v30 = vshll.u32 %v464_v10, 16  ;;  %v538_v29 = vshrl.u32 %v465_v11, 16  ;;  %2931 = vmatpush.bf16.msra.mxu2 %v3907_v7 }
  0x63   : > { %v541_v34 = vshll.u32 %v465_v11, 16  ;;  %922 = vst [vmem:[#allocation2 + $0xb8] sm:$0xf] %v748_v15  ;;  %v1002_v43 = vrot.slane %v1000_v24, 5  ;;  %v1006_v55 = vrot.slane %v1004_v25, 4  ;;  %v1010_v27 = vshll.u32 %v4562_v8, 16 }
  0x64   : > { %v532_v41 = vrot.slane %v530_v37, 7  ;;  %v4568_v45 = vrot.slane %v538_v29, 7  ;;  %v997_v3 = vor.u32 %v996_v20, %v993_v18  ;;  %v4574_v52 = vld [vmem:[#allocation2 + $0x54] sm:$0xff]  ;;  %v1015_v4 = vshrl.u32 %v4571_v44, 16  ;;  %v832_v29 = vld [vmem:[#allocation2 + $0x20] sm:$0x1] }
  0x65   : > { %v1007_v50 = vor.u32 %v1006_v55, %v1002_v43  ;;  %v1012_v6 = vrot.slane %v1010_v27, 5  ;;  %v1018_v51 = vshll.u32 %v4571_v44, 16  ;;  %v1024_v22 = vshll.u32 %v4580_v59, 16  ;;  %v3915_v10 = vld [vmem:[%s5603_s1 + $0x1f8] sm:$0xff]  ;;  %v3845_v27 = vld [vmem:[#allocation2 + $0x84] sm:$0xff] }
  0x66   : > { %v535_v26 = vor.u32 %v533_v30, %v532_v41  ;;  %v536_v48 = vrot.slane %v532_v41, 4  ;;  %v543_v1 = vor.u32 %v541_v34, %v4568_v45  ;;  %v998_v61 = vrot.slane %v997_v3, 4  ;;  %v3899_v11 = vld [vmem:[%s5603_s1 + $0x178] sm:$0xff]  ;;  %v4606_v24 = vld [vmem:[#allocation2 + $0x14] sm:$0x1]  ;;  %3020 = vmatpush.bf16.msra.mxu3 %v3915_v10 }
  0x67   : > { %2415 = vmatmul.bf16.gmra.mxu0 %v4544_v63  ;;  %v1008_v57 = vrot.slane %v1007_v50, 4  ;;  %v1028_v5 = vshrl.u32 %v4580_v59, 16  ;;  %v3923_v12 = vld [vmem:[%s5603_s1 + $0x238] sm:$0xff]  ;;  %v528_v15 = vrot.slane %v4479_v42, 4  ;;  %v1017_v17 = vrot.slane %v1015_v4, 4  ;;  %2842 = vmatpush.bf16.msra.mxu1 %v3899_v11 }
  0x68   : > { %v544_v54 = vsel %vm4096_vm4, %v536_v48, %v543_v1  ;;  %v836_v56 = vsel %vm4108_vm5, %v535_v26, %v835_v53  ;;  %v1020_v14 = vrot.slane %v1018_v51, 5  ;;  %v1026_v37 = vrot.slane %v1024_v22, 5  ;;  %3109 = vmatpush.bf16.msra.mxu0 %v3923_v12  ;;  %v4618_v48 = vld [vmem:[#allocation2 + $0x18] sm:$0xf]  ;;  %v4621_v3 = vld [vmem:[#allocation2 + $0x1c] sm:$0xf] }
  0x69   : > { %837 = vst [vmem:[#allocation2 + $0x24] sm:$0xf] %v836_v56  ;;  %v1030_v30 = vrot.slane %v1028_v5, 4  ;;  %v1003_v42 = vsel %vm4602_vm10, %v998_v61, %v1002_v43  ;;  %v1013_v34 = vsel %vm4602_vm10, %v1008_v57, %v1012_v6  ;;  %v1034_v25 = vshll.u32 %v4606_v24, 16  ;;  %v839_v5 = vld [vmem:[#allocation2 + $0x2c] sm:$0x1] }
  0x6a   : > { %838 = vst [vmem:[#allocation2 + $0x28] sm:$0xf] %v544_v54  ;;  %v1021_v18 = vor.u32 %v1020_v14, %v1017_v17  ;;  %v1669_v53 = vunpack.c.l.b16 %v1003_v42  ;;  %v1670_v55 = vunpack.c.l.b16 %v1013_v34  ;;  %v1427_v1 = vrot.slane %v4552_v23, 5  ;;  %v3849_v50 = vld [vmem:[#allocation2 + $0xb4] sm:$0xff] }
  0x6b   : > { %v1031_v20 = vor.u32 %v1030_v30, %v1026_v37  ;;  %v1036_v26 = vrot.slane %v1034_v25, 5  ;;  %v545_v54 = vrot.slane %v4568_v45, 4  ;;  %v1039_v4 = vshrl.u32 %v4618_v48, 16 }
  0x6c   : > { %v1701_v56 = vpack.c.b16 %v1670_v55, %v1669_v53  ;;  %v1042_v61 = vshll.u32 %v4618_v48, 16  ;;  %v1048_v23 = vshll.u32 %v4621_v3, 16  ;;  %v1052_v51 = vshrl.u32 %v4621_v3, 16 }
  0x6d   : > { %2455 = vmatmul.bf16.gmra.mxu2 %v3844_v40  ;;  %v833_v40 = vsel %vm4503_vm7, %v528_v15, %v832_v29  ;;  %v1032_v43 = vrot.slane %v1031_v20, 4  ;;  %v3452_v45 = vrot.slane %v4549_v0, 9  ;;  %v1429_v57 = vrot.slane %v1427_v1, 4 }
  0x6e   : > { %834 = vst [vmem:[#allocation2 + $0x20] sm:$0x1] %v833_v40  ;;  %v1430_v22 = vrot.slane %v4562_v8, 5  ;;  %v840_v11 = vsel %vm4503_vm7, %v545_v54, %v839_v5  ;;  %v1041_v17 = vrot.slane %v1039_v4, 4  ;;  %v1044_v14 = vrot.slane %v1042_v61, 5  ;;  %v3914_v5 = vld [vmem:[%s5603_s1 + $0x1f0] sm:$0xff] }
  0x6f   : > { %2475 = vmatmul.bf16.gmra.mxu3 %v3848_v47  ;;  %v1022_v47 = vrot.slane %v1021_v18, 4  ;;  %v1037_v7 = vsel %vm4602_vm10, %v1032_v43, %v1036_v26  ;;  %841 = vst [vmem:[#allocation2 + $0x2c] sm:$0x1] %v840_v11  ;;  %v1050_v0 = vrot.slane %v1048_v23, 5  ;;  %v1428_v8 = vsel %vm4635_vm13, %v3452_v45, %v1427_v1 }
  0x70   : > { %v1672_v15 = vunpack.c.l.b16 %v1037_v7  ;;  %v1431_v30 = vsel %vm4635_vm13, %v1429_v57, %v1430_v22  ;;  %v1045_v34 = vor.u32 %v1044_v14, %v1041_v17  ;;  %v1733_v18 = vunpack.c.l.b16 %v1428_v8  ;;  %v4648_v55 = vld [vmem:[#allocation2 + $0x24] sm:$0xf]  ;;  %v3906_v57 = vld [vmem:[%s5603_s1 + $0x1b0] sm:$0xff]  ;;  %3021 = vmatpush.bf16.msra.mxu3 %v3914_v5 }
  0x71   : > { %2440 = vmatmul.bf16.gmra.mxu1 %v4574_v52  ;;  %v4615_v41 = vld [vmem:[#allocation2 + $0x24] sm:$0xff]  ;;  %v1027_v6 = vsel %vm4602_vm10, %v1022_v47, %v1026_v37  ;;  %v1054_v37 = vrot.slane %v1052_v51, 4  ;;  %v1734_v20 = vunpack.c.l.b16 %v1431_v30  ;;  %v1434_v1 = vrot.slane %v4580_v59, 5  ;;  %v846_v51 = vld [vmem:[#allocation2 + $0x38] sm:$0x1]  ;;  %v3922_v17 = vld [vmem:[%s5603_s1 + $0x230] sm:$0xff]  ;;  %2932 = vmatpush.bf16.msra.mxu2 %v3906_v57 }
  0x72   : > { %v1671_v12 = vunpack.c.l.b16 %v1027_v6  ;;  %v1046_v53 = vrot.slane %v1045_v34, 4  ;;  %v4650_v26 = vld [vmem:[#allocation2 + $0x28] sm:$0xf]  ;;  %v1063_v54 = vshrl.u32 %v4648_v55, 16  ;;  %v1066_v4 = vshll.u32 %v4648_v55, 16  ;;  %3110 = vmatpush.bf16.msra.mxu0 %v3922_v17 }
  0x73   : > { %v1055_v25 = vor.u32 %v1054_v37, %v1050_v0  ;;  %v1072_v61 = vshll.u32 %v4650_v26, 16  ;;  %v1076_v6 = vshrl.u32 %v4650_v26, 16  ;;  %v3453_v23 = vrot.slane %v4571_v44, 9  ;;  %v3898_v44 = vld [vmem:[%s5603_s1 + $0x170] sm:$0xff] }
  0x74   : > { %v1702_v42 = vpack.c.b16 %v1672_v15, %v1671_v12  ;;  %v1436_v59 = vrot.slane %v1434_v1, 4  ;;  %v1065_v22 = vrot.slane %v1063_v54, 4  ;;  %v1068_v12 = vrot.slane %v1066_v4, 5  ;;  %2843 = vmatpush.bf16.msra.mxu1 %v3898_v44 }
  0x75   : > { %v4645_v29 = vld [vmem:[#allocation2 + $0x20] sm:$0x1]  ;;  %v1056_v47 = vrot.slane %v1055_v25, 4  ;;  %v1078_v15 = vrot.slane %v1076_v6, 4  ;;  %v3454_v54 = vrot.slane %v4618_v48, 9 }
  0x76   : > { %v1058_v40 = vshll.u32 %v4645_v29, 16  ;;  %v4679_v14 = vld [vmem:[#allocation2 + $0x2c] sm:$0x1]  ;;  %v1069_v30 = vor.u32 %v1068_v12, %v1065_v22  ;;  %v853_v48 = vld [vmem:[#allocation2 + $0x44] sm:$0x1] }
  0x77   : > { %2420 = vmatmul.bf16.gmra.mxu0 %v4615_v41 }
  0x78   : > { %v1060_v43 = vrot.slane %v1058_v40, 5  ;;  %v1070_v25 = vrot.slane %v1069_v30, 4 }
  0x7a   : > { %v1061_v7 = vsel %vm4602_vm10, %v1056_v47, %v1060_v43  ;;  %v1441_v47 = vrot.slane %v4621_v3, 5  ;;  %v4692_v43 = vld [vmem:[#allocation2 + $0x30] sm:$0xf] }
  0x7b   : > { %v1674_v11 = vunpack.c.l.b16 %v1061_v7  ;;  %v1090_v3 = vshll.u32 %v4692_v43, 16 }
  0x7d   : > { %2460 = vmatmul.bf16.gmra.mxu2 %v3845_v27  ;;  %v1765_v27 = vpack.c.b16 %v1734_v20, %v1733_v18  ;;  %v1082_v18 = vshll.u32 %v4679_v14, 16  ;;  %v1092_v22 = vrot.slane %v1090_v3, 5  ;;  %v860_v3 = vld [vmem:[#allocation2 + $0x50] sm:$0x1] }
  0x7f   : > { %2480 = vmatmul.bf16.gmra.mxu3 %v3849_v50  ;;  %v562_v50 = vrot.slane %v4100_v33, 4  ;;  %v1437_v33 = vrot.slane %v4606_v24, 5 }
  0x81   : > { %2494 = vmatmul.bf16.vlgmr.msrb.gmra.mxu1 %v1701_v56  ;;  %v1051_v56 = vsel %vm4602_vm10, %v1046_v53, %v1050_v0  ;;  %v847_v24 = vsel %vm4503_vm7, %v562_v50, %v846_v51  ;;  %v1435_v0 = vsel %vm4635_vm13, %v3453_v23, %v1434_v1  ;;  %v1438_v37 = vsel %vm4635_vm13, %v1436_v59, %v1437_v33  ;;  %v4694_v1 = vld [vmem:[#allocation2 + $0x34] sm:$0xf] }
  0x82   : > { %v1673_v45 = vunpack.c.l.b16 %v1051_v56  ;;  %848 = vst [vmem:[#allocation2 + $0x38] sm:$0x1] %v847_v24  ;;  %v1735_v20 = vunpack.c.l.b16 %v1435_v0  ;;  %v1084_v53 = vrot.slane %v1082_v18, 5  ;;  %v579_v50 = vrot.slane %v4230_v2, 4  ;;  %v4721_v0 = vld [vmem:[#allocation2 + $0x3c] sm:$0xf] }
  0x83   : > { %v1096_v6 = vshll.u32 %v4694_v1, 16  ;;  %v1100_v7 = vshrl.u32 %v4694_v1, 16  ;;  %v1443_v23 = vrot.slane %v1441_v47, 4  ;;  %v1444_v2 = vrot.slane %v4645_v29, 5 }
  0x84   : > { %v4685_v8 = vpack.c.b16 %v1674_v11, %v1673_v45  ;;  %v854_v59 = vsel %vm4503_vm7, %v579_v50, %v853_v48  ;;  %v1442_v33 = vsel %vm4635_vm13, %v3454_v54, %v1441_v47  ;;  %v3913_v48 = vld [vmem:[%s5603_s1 + $0x1e8] sm:$0xff] }
  0x85   : > { %855 = vst [vmem:[#allocation2 + $0x44] sm:$0x1] %v854_v59  ;;  %v1098_v5 = vrot.slane %v1096_v6, 5  ;;  %v1102_v44 = vrot.slane %v1100_v7, 4  ;;  %v1445_v29 = vsel %vm4635_vm13, %v1443_v23, %v1444_v2  ;;  %v3905_v6 = vld [vmem:[%s5603_s1 + $0x1a8] sm:$0xff]  ;;  %3022 = vmatpush.bf16.msra.mxu3 %v3913_v48 }
  0x86   : > { %v1738_v12 = vunpack.c.l.b16 %v1445_v29  ;;  %2933 = vmatpush.bf16.msra.mxu2 %v3905_v6 }
  0x87   : > { %2761 = vmatmul.bf16.vlgmr.msrb.gmra.mxu0 %v1702_v42 }
  0x89   : > { %v4716_v24 = vld [vmem:[#allocation2 + $0x38] sm:$0x1] }
  0x8a   : > { %v1106_v17 = vshll.u32 %v4716_v24, 16 }
  0x8d   : > { %2583 = vmatmul.bf16.vlgmr.msrb.gmra.mxu2 %v1765_v27 }
  0x8f   : > { %2672 = vmatmul.bf16.vlgmr.msrb.gmra.mxu3 %v4477_v38  ;;  %v1074_v38 = vrot.slane %v1072_v61, 5  ;;  %v1087_v61 = vshrl.u32 %v4692_v43, 16 }
  0x91   : > { %2499 = vmatmul.bf16.gmra.mxu1 %v1702_v42  ;;  %v1079_v34 = vor.u32 %v1078_v15, %v1074_v38  ;;  %v1736_v42 = vunpack.c.l.b16 %v1438_v37  ;;  %v1075_v56 = vsel %vm4602_vm10, %v1070_v25, %v1074_v38  ;;  %v1089_v57 = vrot.slane %v1087_v61, 4  ;;  %v4724_v37 = vld [vmem:[#allocation2 + $0x40] sm:$0xf] }
  0x92   : > { %v1675_v51 = vunpack.c.l.b16 %v1075_v56  ;;  %v1103_v15 = vor.u32 %v1102_v44, %v1098_v5  ;;  %v1111_v25 = vshrl.u32 %v4721_v0, 16  ;;  %v1120_v47 = vshll.u32 %v4724_v37, 16 }
  0x93   : > { %v1080_v40 = vrot.slane %v1079_v34, 4  ;;  %v4689_v27 = vpack.c.b16 %v1736_v42, %v1735_v20  ;;  %v1093_v38 = vor.u32 %v1092_v22, %v1089_v57  ;;  %v1108_v20 = vrot.slane %v1106_v17, 5  ;;  %v3921_v57 = vld [vmem:[%s5603_s1 + $0x228] sm:$0xff] }
  0x94   : > { %v1104_v18 = vrot.slane %v1103_v15, 4  ;;  %v1448_v42 = vrot.slane %v4650_v26, 5  ;;  %v1124_v50 = vshrl.u32 %v4724_v37, 16  ;;  %v3455_v26 = vrot.slane %v4648_v55, 9  ;;  %3111 = vmatpush.bf16.msra.mxu0 %v3921_v57 }
  0x95   : > { %v1085_v4 = vsel %vm4602_vm10, %v1080_v40, %v1084_v53  ;;  %v1094_v34 = vrot.slane %v1093_v38, 4  ;;  %v596_v40 = vrot.slane %v4392_v60, 4  ;;  %v1114_v53 = vshll.u32 %v4721_v0, 16 }
  0x96   : > { %v1676_v45 = vunpack.c.l.b16 %v1085_v4  ;;  %v1109_v56 = vsel %vm4602_vm10, %v1104_v18, %v1108_v20  ;;  %v1450_v4 = vrot.slane %v1448_v42, 4  ;;  %v1451_v61 = vrot.slane %v4679_v14, 5  ;;  %v4769_v18 = vld [vmem:[#allocation2 + $0x48] sm:$0xf]  ;;  %v4771_v20 = vld [vmem:[#allocation2 + $0x4c] sm:$0xf] }
  0x97   : > { %2766 = vmatmul.bf16.gmra.mxu0 %v4685_v8  ;;  %v1099_v54 = vsel %vm4602_vm10, %v1094_v34, %v1098_v5  ;;  %v1113_v60 = vrot.slane %v1111_v25, 4  ;;  %v1116_v7 = vrot.slane %v1114_v53, 5  ;;  %v1122_v23 = vrot.slane %v1120_v47, 5 }
  0x98   : > { %v4718_v11 = vpack.c.b16 %v1676_v45, %v1675_v51  ;;  %v1126_v2 = vrot.slane %v1124_v50, 4  ;;  %v861_v55 = vsel %vm4503_vm7, %v596_v40, %v860_v3  ;;  %v1677_v59 = vunpack.c.l.b16 %v1099_v54  ;;  %v3897_v45 = vld [vmem:[%s5603_s1 + $0x168] sm:$0xff] }
  0x99   : > { %v1678_v14 = vunpack.c.l.b16 %v1109_v56  ;;  %862 = vst [vmem:[#allocation2 + $0x50] sm:$0x1] %v861_v55  ;;  %v1452_v51 = vsel %vm4635_vm13, %v1450_v4, %v1451_v61  ;;  %v1117_v22 = vor.u32 %v1116_v7, %v1113_v60  ;;  %2844 = vmatpush.bf16.msra.mxu1 %v3897_v45  ;;  %v1455_v25 = vrot.slane %v4694_v1, 5  ;;  %v867_v61 = vld [vmem:[#allocation2 + $0x5c] sm:$0x1]  ;;  %v3959_v60 = vld [vmem:[#allocation2 + $0x30] sm:$0xff] }
  0x9a   : > { %5640 = vst [vmem:[#allocation3_spill] sm:$0xff] %v4718_v11  ;;  %v1127_v5 = vor.u32 %v1126_v2, %v1122_v23  ;;  %v613_v40 = vrot.slane %v4489_v9, 4  ;;  %v1135_v50 = vshrl.u32 %v4769_v18, 16  ;;  %v1138_v54 = vshll.u32 %v4769_v18, 16 }
  0x9b   : > { %v4764_v29 = vpack.c.b16 %v1678_v14, %v1677_v59  ;;  %v1118_v38 = vrot.slane %v1117_v22, 4  ;;  %v1144_v56 = vshll.u32 %v4771_v20, 16  ;;  %v3456_v1 = vrot.slane %v4692_v43, 9 }
  0x9c   : > { %v1128_v15 = vrot.slane %v1127_v5, 4  ;;  %v1457_v4 = vrot.slane %v1455_v25, 4  ;;  %v1458_v9 = vrot.slane %v4716_v24, 5  ;;  %v868_v7 = vsel %vm4503_vm7, %v613_v40, %v867_v61  ;;  %v4810_v40 = vld [vmem:[#allocation2 + $0x54] sm:$0xf] }
  0x9d   : > { %2588 = vmatmul.bf16.gmra.mxu2 %v4689_v27  ;;  %5641 = vst [vmem:[#allocation4_spill] sm:$0xff] %v4764_v29  ;;  %v1123_v53 = vsel %vm4602_vm10, %v1118_v38, %v1122_v23  ;;  %v1137_v2 = vrot.slane %v1135_v50, 4  ;;  %v1140_v48 = vrot.slane %v1138_v54, 5  ;;  %v1146_v55 = vrot.slane %v1144_v56, 5  ;;  %v874_v61 = vld [vmem:[#allocation2 + $0x68] sm:$0x1] }
  0x9e   : > { %v1679_v3 = vunpack.c.l.b16 %v1123_v53  ;;  %869 = vst [vmem:[#allocation2 + $0x5c] sm:$0x1] %v868_v7  ;;  %v1456_v24 = vsel %vm4635_vm13, %v3456_v1, %v1455_v25  ;;  %v1459_v14 = vsel %vm4635_vm13, %v1457_v4, %v1458_v9  ;;  %v1462_v25 = vrot.slane %v4724_v37, 5  ;;  %v4812_v53 = vld [vmem:[#allocation2 + $0x58] sm:$0xf] }
  0x9f   : > { %2677 = vmatmul.bf16.gmra.mxu3 %v4544_v63  ;;  %v1737_v63 = vunpack.c.l.b16 %v1442_v33  ;;  %v4750_v33 = vld [vmem:[#allocation2 + $0x44] sm:$0x1]  ;;  %v1141_v45 = vor.u32 %v1140_v48, %v1137_v2  ;;  %v1741_v5 = vunpack.c.l.b16 %v1456_v24  ;;  %v3457_v50 = vrot.slane %v4721_v0, 9 }
  0xa0   : > { %v1130_v44 = vshll.u32 %v4750_v33, 16  ;;  %v4793_v43 = vld [vmem:[#allocation2 + $0x50] sm:$0x1]  ;;  %v1162_v37 = vshll.u32 %v4810_v40, 16  ;;  %v1168_v1 = vshll.u32 %v4812_v53, 16  ;;  %v1172_v4 = vshrl.u32 %v4812_v53, 16 }
  0xa1   : > { %2504 = vmatmul.bf16.gmra.mxu1 %v4685_v8  ;;  %v4726_v30 = vpack.c.b16 %v1738_v12, %v1737_v63  ;;  %v1740_v12 = vunpack.c.l.b16 %v1452_v51  ;;  %v1154_v22 = vshll.u32 %v4793_v43, 16  ;;  %v1465_v0 = vrot.slane %v4750_v33, 5 }
  0xa2   : > { %v1132_v17 = vrot.slane %v1130_v44, 5  ;;  %v1742_v44 = vunpack.c.l.b16 %v1459_v14  ;;  %v1463_v2 = vsel %vm4635_vm13, %v3457_v50, %v1462_v25  ;;  %v1174_v24 = vrot.slane %v1172_v4, 4 }
  0xa3   : > { %v1156_v38 = vrot.slane %v1154_v22, 5  ;;  %v3896_v22 = vld [vmem:[%s5603_s1 + $0x160] sm:$0xff] }
  0xa4   : > { %v1133_v47 = vsel %vm4602_vm10, %v1128_v15, %v1132_v17  ;;  %v4805_v15 = vpack.c.b16 %v1742_v44, %v1741_v5  ;;  %v3920_v5 = vld [vmem:[%s5603_s1 + $0x220] sm:$0xff]  ;;  %2845 = vmatpush.bf16.msra.mxu1 %v3896_v22  ;;  %v1472_v22 = vrot.slane %v4793_v43, 5 }
  0xa5   : > { %v1680_v6 = vunpack.c.l.b16 %v1133_v47  ;;  %v630_v47 = vrot.slane %v4149_v62, 4  ;;  %v1464_v62 = vrot.slane %v1462_v25, 4  ;;  %3112 = vmatpush.bf16.msra.mxu0 %v3920_v5 }
  0xa6   : > { %5643 = vst [vmem:[#allocation6_spill] sm:$0xff] %v4805_v15 }
  0xa7   : > { %2771 = vmatmul.bf16.gmra.mxu0 %v4718_v11 }
  0xa9   : > { %v4790_v23 = vpop.f32.mrf.mxu0 }
  0xad   : > { %2593 = vmatmul.bf16.gmra.mxu2 %v4726_v30 }
  0xaf   : > { %2682 = vmatmul.bf16.gmra.mxu3 %v4615_v41  ;;  %v1449_v41 = vsel %vm4635_vm13, %v3455_v26, %v1448_v42  ;;  %v4773_v42 = vpop.f32.mrf.mxu1  ;;  %v1148_v26 = vshrl.u32 %v4771_v20, 16 }
  0xb0   : > { %v1739_v63 = vunpack.c.l.b16 %v1449_v41  ;;  %v4799_v41 = vpack.c.b16 %v1680_v6, %v1679_v3  ;;  %v3912_v3 = vld [vmem:[%s5603_s1 + $0x1e0] sm:$0xff]  ;;  %v875_v6 = vsel %vm4503_vm7, %v630_v47, %v874_v61 }
  0xb1   : > { %2509 = vmatmul.bf16.gmra.mxu1 %v4718_v11  ;;  %v1150_v59 = vrot.slane %v1148_v26, 4  ;;  %v4807_v17 = vpop.f32.mrf.mxu0  ;;  %v1159_v26 = vshrl.u32 %v4810_v40, 16  ;;  %876 = vst [vmem:[#allocation2 + $0x68] sm:$0x1] %v875_v6  ;;  %3023 = vmatpush.bf16.msra.mxu3 %v3912_v3  ;;  %v647_v6 = vrot.slane %v4253_v19, 4  ;;  %v3458_v19 = vrot.slane %v4769_v18, 9 }
  0xb2   : > { %v4767_v34 = vpack.c.b16 %v1740_v12, %v1739_v63  ;;  %5642 = vst [vmem:[#allocation5_spill] sm:$0xff] %v4799_v41  ;;  %v1142_v63 = vrot.slane %v1141_v45, 4  ;;  %v1466_v45 = vsel %vm4635_vm13, %v1464_v62, %v1465_v0 }
  0xb3   : > { %v1151_v57 = vor.u32 %v1150_v59, %v1146_v55  ;;  %v1170_v59 = vrot.slane %v1168_v1, 5 }
  0xb4   : > { %v1147_v54 = vsel %vm4602_vm10, %v1142_v63, %v1146_v55  ;;  %v1164_v55 = vrot.slane %v1162_v37, 5  ;;  %v1743_v63 = vunpack.c.l.b16 %v1463_v2  ;;  %v4866_v37 = vld [vmem:[#allocation2 + $0x64] sm:$0xf] }
  0xb5   : > { %v1152_v12 = vrot.slane %v1151_v57, 4  ;;  %v1681_v33 = vunpack.c.l.b16 %v1147_v54  ;;  %v4846_v57 = vld [vmem:[#allocation2 + $0x5c] sm:$0x1]  ;;  %v1175_v47 = vor.u32 %v1174_v24, %v1170_v59 }
  0xb6   : > { %v1178_v50 = vshll.u32 %v4846_v57, 16 }
  0xb7   : > { %2776 = vmatmul.bf16.gmra.mxu0 %v4764_v29  ;;  %v4801_v51 = vpop.f32.mrf.mxu1  ;;  %v1157_v56 = vsel %vm4602_vm10, %v1152_v12, %v1156_v38  ;;  %v1744_v38 = vunpack.c.l.b16 %v1466_v45  ;;  %v1176_v62 = vrot.slane %v1175_v47, 4 }
  0xb8   : > { %v1682_v48 = vunpack.c.l.b16 %v1157_v56  ;;  %v4861_v56 = vld [vmem:[#allocation2 + $0x60] sm:$0xf]  ;;  %v1180_v0 = vrot.slane %v1178_v50, 5 }
  0xb9   : > { %v4868_v1 = vpack.c.b16 %v1744_v38, %v1743_v63  ;;  %v1183_v3 = vshrl.u32 %v4861_v56, 16  ;;  %v1186_v2 = vshll.u32 %v4861_v56, 16  ;;  %v881_v63 = vld [vmem:[#allocation2 + $0x74] sm:$0x1] }
  0xba   : > { %v4856_v12 = vpack.c.b16 %v1682_v48, %v1681_v33  ;;  %v1192_v33 = vshll.u32 %v4866_v37, 16  ;;  %v1196_v48 = vshrl.u32 %v4866_v37, 16 }
  0xbb   : > { %5646 = vst [vmem:[#allocation9_spill] sm:$0xff] %v4868_v1  ;;  %v1185_v5 = vrot.slane %v1183_v3, 4  ;;  %v1188_v38 = vrot.slane %v1186_v2, 5 }
  0xbc   : > { %5645 = vst [vmem:[#allocation8_spill] sm:$0xff] %v4856_v12  ;;  %v1198_v47 = vrot.slane %v1196_v48, 4 }
  0xbd   : > { %2598 = vmatmul.bf16.gmra.mxu2 %v4767_v34  ;;  %v1189_v3 = vor.u32 %v1188_v38, %v1185_v5  ;;  %v1476_v5 = vrot.slane %v4812_v53, 5  ;;  %v664_v38 = vrot.slane %v4401_v21, 4  ;;  %v3459_v21 = vrot.slane %v4810_v40, 9 }
  0xbf   : > { %2687 = vmatmul.bf16.gmra.mxu3 %v3959_v60  ;;  %v3904_v60 = vld [vmem:[%s5603_s1 + $0x1a0] sm:$0xff] }
  0xc0   : > { %2934 = vmatpush.bf16.msra.mxu2 %v3904_v60  ;;  %v1469_v60 = vrot.slane %v4771_v20, 5  ;;  %v1181_v20 = vsel %vm4602_vm10, %v1176_v62, %v1180_v0  ;;  %v4894_v0 = vld [vmem:[#allocation2 + $0x68] sm:$0x1] }
  0xc1   : > { %2514 = vmatmul.bf16.gmra.mxu1 %v4764_v29  ;;  %v1684_v62 = vunpack.c.l.b16 %v1181_v20 }
  0xc2   : > { %v1471_v45 = vrot.slane %v1469_v60, 4 }
  0xc4   : > { %v1473_v43 = vsel %vm4635_vm13, %v1471_v45, %v1472_v22  ;;  %v4917_v45 = vld [vmem:[#allocation2 + $0x70] sm:$0xf] }
  0xc5   : > { %v1746_v20 = vunpack.c.l.b16 %v1473_v43 }
  0xc7   : > { %2781 = vmatmul.bf16.gmra.mxu0 %v4799_v41 }
  0xcd   : > { %2603 = vmatmul.bf16.gmra.mxu2 %v4805_v15 }
  0xce   : > { %v4825_v9 = vpop.f32.mrf.mxu1 }
  0xcf   : > { %2692 = vmatmul.bf16.gmra.mxu3 %v4437_v58  ;;  %v1161_v58 = vrot.slane %v1159_v26, 4 }
  0xd0   : > { %v4837_v7 = vpop.f32.mrf.mxu2 }
  0xd1   : > { %2519 = vmatmul.bf16.gmra.mxu1 %v4799_v41  ;;  %v1165_v25 = vor.u32 %v1164_v55, %v1161_v58 }
  0xd2   : > { %v4842_v14 = vpop.f32.mrf.mxu3 }
  0xd3   : > { %5644 = vst [vmem:[#allocation7_spill] sm:$0xff] %v4842_v14  ;;  %v1166_v4 = vrot.slane %v1165_v25, 4  ;;  %v1194_v25 = vrot.slane %v1192_v33, 5 }
  0xd4   : > { %v4854_v44 = vpop.f32.mrf.mxu0 }
  0xd5   : > { %v1171_v55 = vsel %vm4602_vm10, %v1166_v4, %v1170_v59  ;;  %v882_v59 = vsel %vm4503_vm7, %v647_v6, %v881_v63  ;;  %v1199_v2 = vor.u32 %v1198_v47, %v1194_v25  ;;  %v1202_v6 = vshll.u32 %v4894_v0, 16 }
  0xd6   : > { %v4859_v54 = vpop.f32.mrf.mxu1  ;;  %v1683_v4 = vunpack.c.l.b16 %v1171_v55  ;;  %883 = vst [vmem:[#allocation2 + $0x74] sm:$0x1] %v882_v59  ;;  %v1190_v59 = vrot.slane %v1189_v3, 4  ;;  %v1216_v3 = vshll.u32 %v4917_v45, 16 }
  0xd7   : > { %2786 = vmatmul.bf16.gmra.mxu0 %v4856_v12 }
  0xd8   : > { %v4863_v26 = vpop.f32.mrf.mxu2  ;;  %v4906_v48 = vpack.c.b16 %v1684_v62, %v1683_v4  ;;  %v1195_v47 = vsel %vm4602_vm10, %v1190_v59, %v1194_v25  ;;  %v1478_v25 = vrot.slane %v1476_v5, 4  ;;  %v3911_v59 = vld [vmem:[%s5603_s1 + $0x1d8] sm:$0xff] }
  0xd9   : > { %3024 = vmatpush.bf16.msra.mxu3 %v3911_v59  ;;  %v1483_v59 = vrot.slane %v4866_v37, 5 }
  0xda   : > { %v4870_v61 = vpop.f32.mrf.mxu3  ;;  %5649 = vst [vmem:[#allocation12_spill] sm:$0xff] %v4906_v48 }
  0xdb   : > { %5647 = vst [vmem:[#allocation10_spill] sm:$0xff] %v4870_v61  ;;  %v1204_v61 = vrot.slane %v1202_v6, 5  ;;  %v1479_v6 = vrot.slane %v4846_v57, 5 }
  0xdc   : > { %v4878_v58 = vpop.f32.mrf.mxu0 }
  0xdd   : > { %2608 = vmatmul.bf16.gmra.mxu2 %v4868_v1 }
  0xde   : > { %v4885_v24 = vpop.f32.mrf.mxu1 }
  0xdf   : > { %2697 = vmatmul.bf16.gmra.mxu3 %v4495_v28  ;;  %v1470_v28 = vsel %vm4635_vm13, %v3458_v19, %v1469_v60  ;;  %v4915_v19 = vld [vmem:[#allocation2 + $0x6c] sm:$0xf] }
  0xe0   : > { %v4892_v50 = vpop.f32.mrf.mxu2  ;;  %v1745_v55 = vunpack.c.l.b16 %v1470_v28  ;;  %v1207_v28 = vshrl.u32 %v4915_v19, 16  ;;  %v1210_v43 = vshll.u32 %v4915_v19, 16 }
  0xe1   : > { %2524 = vmatmul.bf16.gmra.mxu1 %v4856_v12 }
  0xe2   : > { %v4897_v18 = vpop.f32.mrf.mxu3  ;;  %v4913_v60 = vpack.c.b16 %v1746_v20, %v1745_v55  ;;  %v3903_v20 = vld [vmem:[%s5603_s1 + $0x198] sm:$0xff]  ;;  %v1209_v14 = vrot.slane %v1207_v28, 4  ;;  %v1212_v57 = vrot.slane %v1210_v43, 5 }
  0xe3   : > { %5648 = vst [vmem:[#allocation11_spill] sm:$0xff] %v4897_v18  ;;  %v1200_v18 = vrot.slane %v1199_v2, 4  ;;  %v1220_v2 = vshrl.u32 %v4917_v45, 16  ;;  %2935 = vmatpush.bf16.msra.mxu2 %v3903_v20  ;;  %v3895_v28 = vld [vmem:[%s5603_s1 + $0x158] sm:$0xff] }
  0xe4   : > { %v4904_v33 = vpop.f32.mrf.mxu0  ;;  %5651 = vst [vmem:[#allocation14_spill] sm:$0xff] %v4913_v60  ;;  %2846 = vmatpush.bf16.msra.mxu1 %v3895_v28  ;;  %v3460_v28 = vrot.slane %v4861_v56, 9 }
  0xe5   : > { %v1205_v4 = vsel %vm4602_vm10, %v1200_v18, %v1204_v61  ;;  %v888_v61 = vld [vmem:[#allocation2 + $0x80] sm:$0x1]  ;;  %v1685_v18 = vunpack.c.l.b16 %v1195_v47  ;;  %v1222_v41 = vrot.slane %v1220_v2, 4 }
  0xe6   : > { %v4908_v63 = vpop.f32.mrf.mxu1  ;;  %v1686_v55 = vunpack.c.l.b16 %v1205_v4  ;;  %v1477_v4 = vsel %vm4635_vm13, %v3459_v21, %v1476_v5 }
  0xe7   : > { %2791 = vmatmul.bf16.gmra.mxu0 %v4906_v48  ;;  %v1747_v5 = vunpack.c.l.b16 %v1477_v4  ;;  %v4981_v4 = vld [vmem:[#allocation2 + $0x7c] sm:$0xf] }
  0xe8   : > { %v4910_v12 = vpop.f32.mrf.mxu2  ;;  %v4964_v43 = vpack.c.b16 %v1686_v55, %v1685_v18  ;;  %v1244_v56 = vshrl.u32 %v4981_v4, 16 }
  0xe9   : > { %5650 = vst [vmem:[#allocation13_spill] sm:$0xff] %v4910_v12 }
  0xea   : > { %v4919_v22 = vpop.f32.mrf.mxu3  ;;  %5655 = vst [vmem:[#allocation18_spill] sm:$0xff] %v4964_v43 }
  0xeb   : > { %5652 = vst [vmem:[#allocation15_spill] sm:$0xff] %v4919_v22  ;;  %v889_v22 = vsel %vm4503_vm7, %v664_v38, %v888_v61  ;;  %v1480_v38 = vsel %vm4635_vm13, %v1478_v25, %v1479_v6 }
  0xec   : > { %v4927_v62 = vpop.f32.mrf.mxu0  ;;  %890 = vst [vmem:[#allocation2 + $0x80] sm:$0x1] %v889_v22  ;;  %v3919_v22 = vld [vmem:[%s5603_s1 + $0x218] sm:$0xff]  ;;  %v1748_v21 = vunpack.c.l.b16 %v1480_v38  ;;  %v681_v38 = vrot.slane %v4499_v32, 4  ;;  %v1240_v32 = vshll.u32 %v4981_v4, 16 }
  0xed   : > { %2613 = vmatmul.bf16.gmra.mxu2 %v4913_v60  ;;  %v1218_v60 = vrot.slane %v1216_v3, 5  ;;  %v1213_v3 = vor.u32 %v1212_v57, %v1209_v14  ;;  %3113 = vmatpush.bf16.msra.mxu0 %v3919_v22  ;;  %v1485_v22 = vrot.slane %v1483_v59, 4 }
  0xee   : > { %v4934_v53 = vpop.f32.mrf.mxu1 }
  0xef   : > { %2702 = vmatmul.bf16.gmra.mxu3 %v4574_v52  ;;  %v4950_v52 = vld [vmem:[#allocation2 + $0x74] sm:$0x1]  ;;  %v1223_v2 = vor.u32 %v1222_v41, %v1218_v60  ;;  %v1214_v18 = vrot.slane %v1213_v3, 4  ;;  %v4975_v41 = vpack.c.b16 %v1748_v21, %v1747_v5 }
  0xf0   : > { %v4947_v40 = vpop.f32.mrf.mxu2  ;;  %v1226_v61 = vshll.u32 %v4950_v52, 16 }
  0xf1   : > { %5653 = vst [vmem:[#allocation16_spill] sm:$0xff] %v4947_v40  ;;  %2529 = vmatmul.bf16.gmra.mxu1 %v4906_v48  ;;  %v1224_v55 = vrot.slane %v1223_v2, 4  ;;  %v1486_v48 = vrot.slane %v4894_v0, 5  ;;  %v1219_v37 = vsel %vm4602_vm10, %v1214_v18, %v1218_v60  ;;  %v895_v0 = vld [vmem:[#allocation2 + $0x8c] sm:$0x1]  ;;  %v1242_v40 = vrot.slane %v1240_v32, 5 }
  0xf2   : > { %v4952_v47 = vpop.f32.mrf.mxu3  ;;  %v1228_v14 = vrot.slane %v1226_v61, 5  ;;  %5657 = vst [vmem:[#allocation20_spill] sm:$0xff] %v4975_v41  ;;  %v896_v60 = vsel %vm4503_vm7, %v681_v38, %v895_v0 }
  0xf3   : > { %5654 = vst [vmem:[#allocation17_spill] sm:$0xff] %v4952_v47  ;;  %v4979_v47 = vld [vmem:[#allocation2 + $0x78] sm:$0xf]  ;;  %v5008_v38 = vld [vmem:[#allocation2 + $0x80] sm:$0x1] }
  0xf4   : > { %v4967_v20 = vpop.f32.mrf.mxu0  ;;  %v1229_v3 = vsel %vm4602_vm10, %v1224_v55, %v1228_v14  ;;  %v1231_v61 = vshrl.u32 %v4979_v47, 16  ;;  %v1234_v5 = vshll.u32 %v4979_v47, 16  ;;  %v1484_v55 = vsel %vm4635_vm13, %v3460_v28, %v1483_v59  ;;  %897 = vst [vmem:[#allocation2 + $0x8c] sm:$0x1] %v896_v60 }
  0xf5   : > { %v1487_v14 = vsel %vm4635_vm13, %v1485_v22, %v1486_v48  ;;  %v1688_v1 = vunpack.c.l.b16 %v1229_v3  ;;  %v1749_v0 = vunpack.c.l.b16 %v1484_v55  ;;  %v1250_v22 = vshll.u32 %v5008_v38, 16 }
  0xf6   : > { %v4969_v25 = vpop.f32.mrf.mxu1  ;;  %v1236_v29 = vrot.slane %v1234_v5, 5 }
  0xf7   : > { %2796 = vmatmul.bf16.gmra.mxu0 %v4964_v43 }
  0xf8   : > { %v4971_v6 = vpop.f32.mrf.mxu2 }
  0xf9   : > { %5656 = vst [vmem:[#allocation19_spill] sm:$0xff] %v4971_v6  ;;  %v1233_v6 = vrot.slane %v1231_v61, 4  ;;  %v5018_v61 = vld [vmem:[#allocation2 + $0x84] sm:$0xf] }
  0xfa   : > { %v4977_v57 = vpop.f32.mrf.mxu3  ;;  %v1258_v55 = vshll.u32 %v5018_v61, 16 }
  0xfb   : > { %5658 = vst [vmem:[#allocation21_spill] sm:$0xff] %v4977_v57  ;;  %v3960_v57 = vld [vmem:[#allocation2 + $0x60] sm:$0xff]  ;;  %v1237_v48 = vor.u32 %v1236_v29, %v1233_v6 }
  0xfc   : > { %v4991_v2 = vpop.f32.mrf.mxu0 }
  0xfd   : > { %2618 = vmatmul.bf16.gmra.mxu2 %v4975_v41  ;;  %v1687_v41 = vunpack.c.l.b16 %v1219_v37  ;;  %v1238_v29 = vrot.slane %v1237_v48, 4 }
  0xfe   : > { %v2495_v21 = vpop.f32.mrf.mxu1 }
  0xff   : > { %2707 = vmatmul.bf16.gmra.mxu3 %v3960_v57  ;;  %v1246_v57 = vrot.slane %v1244_v56, 4  ;;  %v5010_v12 = vpack.c.b16 %v1688_v1, %v1687_v41  ;;  %v5025_v1 = vld [vmem:[#allocation2 + $0x88] sm:$0xf]  ;;  %v1490_v41 = vrot.slane %v4917_v45, 5  ;;  %v1252_v56 = vrot.slane %v1250_v22, 5 }
 0x100   : > { %v4999_v18 = vpop.f32.mrf.mxu2  ;;  %v3461_v45 = vrot.slane %v4915_v19, 9  ;;  %v3902_v19 = vld [vmem:[%s5603_s1 + $0x190] sm:$0xff] }
 0x101   : > { %5659 = vst [vmem:[#allocation22_spill] sm:$0xff] %v4999_v18  ;;  %2534 = vmatmul.bf16.gmra.mxu1 %v4964_v43  ;;  %v1750_v18 = vunpack.c.l.b16 %v1487_v14  ;;  %v1247_v28 = vor.u32 %v1246_v57, %v1242_v40  ;;  %v698_v14 = vrot.slane %v4184_v36, 4  ;;  %v1268_v57 = vshrl.u32 %v5025_v1, 16  ;;  %2936 = vmatpush.bf16.msra.mxu2 %v3902_v19 }
 0x102   : > { %v5006_v15 = vpop.f32.mrf.mxu3  ;;  %v1492_v48 = vrot.slane %v1490_v41, 4  ;;  %v1260_v43 = vrot.slane %v1258_v55, 5  ;;  %v1491_v55 = vsel %vm4635_vm13, %v3461_v45, %v1490_v41 }
 0x103   : > { %5660 = vst [vmem:[#allocation23_spill] sm:$0xff] %v5006_v15  ;;  %v5022_v32 = vpack.c.b16 %v1750_v18, %v1749_v0  ;;  %v1248_v6 = vrot.slane %v1247_v28, 4  ;;  %v1264_v18 = vshll.u32 %v5025_v1, 16  ;;  %v1243_v28 = vsel %vm4602_vm10, %v1238_v29, %v1242_v40 }
 0x104   : > { %v5012_v59 = vpop.f32.mrf.mxu0  ;;  %v1270_v29 = vrot.slane %v1268_v57, 4  ;;  %v1751_v45 = vunpack.c.l.b16 %v1491_v55 }
 0x105   : > { %5662 = vst [vmem:[#allocation25_spill] sm:$0xff] %v5022_v32  ;;  %v1253_v22 = vsel %vm4602_vm10, %v1248_v6, %v1252_v56  ;;  %v1266_v40 = vrot.slane %v1264_v18, 5  ;;  %v1689_v6 = vunpack.c.l.b16 %v1243_v28 }
 0x106   : > { %v2497_v37 = vpop.f32.mrf.mxu1  ;;  %v1690_v56 = vunpack.c.l.b16 %v1253_v22  ;;  %v3894_v22 = vld [vmem:[%s5603_s1 + $0x150] sm:$0xff] }
 0x107   : > { %v5016_v3 = vadd.f32 %v2497_v37, %v4807_v17  ;;  %2801 = vmatmul.bf16.gmra.mxu0 %v5010_v12  ;;  %v1255_v17 = vshrl.u32 %v5018_v61, 16  ;;  %v2496_v37 = vadd.f32 %v2495_v21, %v4790_v23  ;;  %v3910_v23 = vld [vmem:[%s5603_s1 + $0x1d0] sm:$0xff]  ;;  %2847 = vmatpush.bf16.msra.mxu1 %v3894_v22 }
 0x108   : > { %v5020_v5 = vpop.f32.mrf.mxu2  ;;  %3025 = vmatpush.bf16.msra.mxu3 %v3910_v23 }
 0x109   : > { %5661 = vst [vmem:[#allocation24_spill] sm:$0xff] %v5020_v5  ;;  %v1257_v15 = vrot.slane %v1255_v17, 4  ;;  %v902_v5 = vld [vmem:[#allocation2 + $0x98] sm:$0x1] }
 0x10a   : > { %v5028_v60 = vpop.f32.mrf.mxu3 }
 0x10b   : > { %5663 = vst [vmem:[#allocation26_spill] sm:$0xff] %v5028_v60  ;;  %v1493_v60 = vrot.slane %v4950_v52, 5  ;;  %v903_v52 = vsel %vm4503_vm7, %v698_v14, %v902_v5  ;;  %v1261_v5 = vor.u32 %v1260_v43, %v1257_v15  ;;  %v1271_v14 = vor.u32 %v1270_v29, %v1266_v40 }
 0x10c   : > { %v5036_v0 = vpop.f32.mrf.mxu0  ;;  %904 = vst [vmem:[#allocation2 + $0x98] sm:$0x1] %v903_v52 }
 0x10d   : > { %2623 = vmatmul.bf16.gmra.mxu2 %v5022_v32  ;;  %v3961_v32 = vld [vmem:[#allocation2 + $0x6c] sm:$0xff]  ;;  %v1494_v18 = vsel %vm4635_vm13, %v1492_v48, %v1493_v60  ;;  %v1262_v48 = vrot.slane %v1261_v5, 4  ;;  %v1272_v29 = vrot.slane %v1271_v14, 4 }
 0x10e   : > { %v2500_v36 = vpop.f32.mrf.mxu1  ;;  %v1752_v19 = vunpack.c.l.b16 %v1494_v18 }
 0x10f   : > { %2712 = vmatmul.bf16.gmra.mxu3 %v3961_v32  ;;  %v5046_v11 = vadd.f32 %v2500_v36, %v4854_v44  ;;  %v5056_v32 = vld [vmem:[#allocation2 + $0x8c] sm:$0x1]  ;;  %v5070_v36 = vpack.c.b16 %v1690_v56, %v1689_v6  ;;  %v5082_v56 = vld [vmem:[#allocation2 + $0x90] sm:$0xf]  ;;  %v1267_v18 = vsel %vm4602_vm10, %v1262_v48, %v1266_v40  ;;  %v3462_v40 = vrot.slane %v4979_v47, 9 }
 0x110   : > { %v2584_v21 = vpop.f32.mrf.mxu2  ;;  %v1274_v28 = vshll.u32 %v5056_v32, 16  ;;  %v5080_v6 = vpack.c.b16 %v1752_v19, %v1751_v45  ;;  %v1282_v5 = vshll.u32 %v5082_v56, 16  ;;  %v1500_v45 = vrot.slane %v5008_v38, 5  ;;  %v909_v19 = vld [vmem:[#allocation2 + $0xa4] sm:$0x1] }
 0x111   : > { %v2585_v44 = vadd.f32 %v2584_v21, %v2496_v37  ;;  %2539 = vmatmul.bf16.gmra.mxu1 %v5010_v12  ;;  %v3918_v37 = vld [vmem:[%s5603_s1 + $0x210] sm:$0xff] }
 0x112   : > { %v2673_v17 = vpop.f32.mrf.mxu3  ;;  %3114 = vmatpush.bf16.msra.mxu0 %v3918_v37  ;;  %v1276_v23 = vrot.slane %v1274_v28, 5 }
 0x113   : > { %v2674_v57 = vadd.f32 %v2673_v17, %v2585_v44  ;;  %v5084_v44 = vld [vmem:[#allocation2 + $0x94] sm:$0xf]  ;;  %v1497_v17 = vrot.slane %v4981_v4, 5 }
 0x114   : > { %v2767_v41 = vpop.f32.mrf.mxu0  ;;  %v1288_v14 = vshll.u32 %v5084_v44, 16  ;;  %v1292_v28 = vshrl.u32 %v5084_v44, 16 }
 0x115   : > { %v5073_v15 = vadd.f32 %v5012_v59, %v2674_v57  ;;  %v1277_v57 = vsel %vm4602_vm10, %v1272_v29, %v1276_v23  ;;  %v1499_v37 = vrot.slane %v1497_v17, 4  ;;  %v1691_v29 = vunpack.c.l.b16 %v1267_v18 }
 0x116   : > { %v2502_v43 = vpop.f32.mrf.mxu1  ;;  %v1692_v23 = vunpack.c.l.b16 %v1277_v57  ;;  %v1290_v47 = vrot.slane %v1288_v14, 5 }
 0x117   : > { %5664 = vst [vmem:[#allocation27_spill] sm:$0xff] %v5073_v15  ;;  %v5076_v60 = vadd.f32 %v2502_v43, %v4878_v58  ;;  %2806 = vmatmul.bf16.gmra.mxu0 %v5070_v36  ;;  %v715_v58 = vrot.slane %v4282_v39, 4  ;;  %v5102_v43 = vld [vmem:[#allocation2 + $0x78] sm:$0xff]  ;;  %v1501_v18 = vsel %vm4635_vm13, %v1499_v37, %v1500_v45 }
 0x118   : > { %v2586_v52 = vpop.f32.mrf.mxu2  ;;  %v5118_v57 = vpack.c.b16 %v1692_v23, %v1691_v29 }
 0x119   : > { %v2587_v21 = vadd.f32 %v2586_v52, %v5016_v3  ;;  %v1279_v3 = vshrl.u32 %v5082_v56, 16 }
 0x11a   : > { %v2675_v59 = vpop.f32.mrf.mxu3  ;;  %5666 = vst [vmem:[#allocation29_spill] sm:$0xff] %v5118_v57 }
 0x11b   : > { %v2676_v55 = vadd.f32 %v2675_v59, %v2587_v21  ;;  %v1281_v21 = vrot.slane %v1279_v3, 4  ;;  %v1284_v59 = vrot.slane %v1282_v5, 5 }
 0x11c   : > { %v2769_v4 = vpop.f32.mrf.mxu0 }
 0x11d   : > { %2628 = vmatmul.bf16.gmra.mxu2 %v5080_v6  ;;  %v5098_v39 = vadd.f32 %v5036_v0, %v2676_v55  ;;  %v910_v0 = vsel %vm4503_vm7, %v715_v58, %v909_v19  ;;  %v1294_v55 = vrot.slane %v1292_v28, 4  ;;  %v1285_v3 = vor.u32 %v1284_v59, %v1281_v21  ;;  %v5133_v21 = vld [vmem:[#allocation2 + $0x9c] sm:$0xf]  ;;  %v5135_v59 = vld [vmem:[#allocation2 + $0xa0] sm:$0xf] }
 0x11e   : > { %v2505_v22 = vpop.f32.mrf.mxu1  ;;  %911 = vst [vmem:[#allocation2 + $0xa4] sm:$0x1] %v910_v0 }
 0x11f   : > { %5665 = vst [vmem:[#allocation28_spill] sm:$0xff] %v5098_v39  ;;  %2717 = vmatmul.bf16.gmra.mxu3 %v5102_v43  ;;  %v5106_v48 = vadd.f32 %v2505_v22, %v4904_v33  ;;  %v5112_v39 = vld [vmem:[#allocation2 + $0x98] sm:$0x1]  ;;  %v1498_v33 = vsel %vm4635_vm13, %v3462_v40, %v1497_v17  ;;  %v1295_v5 = vor.u32 %v1294_v55, %v1290_v47  ;;  %v1754_v22 = vunpack.c.l.b16 %v1501_v18 }
 0x120   : > { %v2589_v52 = vpop.f32.mrf.mxu2  ;;  %v1298_v14 = vshll.u32 %v5112_v39, 16  ;;  %v1504_v17 = vrot.slane %v5025_v1, 5  ;;  %v3463_v1 = vrot.slane %v5018_v61, 9  ;;  %v1316_v61 = vshrl.u32 %v5135_v59, 16 }
 0x121   : > { %v2590_v38 = vadd.f32 %v2589_v52, %v5046_v11  ;;  %2544 = vmatmul.bf16.gmra.mxu1 %v5070_v36  ;;  %v1753_v11 = vunpack.c.l.b16 %v1498_v33  ;;  %v1296_v37 = vrot.slane %v1295_v5, 4  ;;  %v1507_v33 = vrot.slane %v5056_v32, 5 }
 0x122   : > { %v2678_v15 = vpop.f32.mrf.mxu3  ;;  %v1300_v45 = vrot.slane %v1298_v14, 5  ;;  %v1312_v5 = vshll.u32 %v5135_v59, 16 }
 0x123   : > { %v2679_v58 = vadd.f32 %v2678_v15, %v2590_v38  ;;  %v1286_v15 = vrot.slane %v1285_v3, 4  ;;  %v5131_v23 = vpack.c.b16 %v1754_v22, %v1753_v11  ;;  %v1506_v38 = vrot.slane %v1504_v17, 4  ;;  %v916_v11 = vld [vmem:[#allocation2 + $0xb0] sm:$0x1] }
 0x124   : > { %v5121_v28 = vpop.f32.mrf.mxu0 }
 0x125   : > { %v5123_v19 = vadd.f32 %v2767_v41, %v2679_v58  ;;  %v1291_v18 = vsel %vm4602_vm10, %v1286_v15, %v1290_v47  ;;  %v1303_v58 = vshrl.u32 %v5133_v21, 16  ;;  %v5153_v47 = vld [vmem:[#allocation2 + $0x84] sm:$0xff] }
 0x126   : > { %v2507_v0 = vpop.f32.mrf.mxu1  ;;  %5669 = vst [vmem:[#allocation32_spill] sm:$0xff] %v5153_v47 }
 0x127   : > { %5667 = vst [vmem:[#allocation30_spill] sm:$0xff] %v5123_v19  ;;  %v5126_v52 = vadd.f32 %v2507_v0, %v4927_v62  ;;  %2811 = vmatmul.bf16.gmra.mxu0 %v5118_v57  ;;  %v732_v62 = vrot.slane %v4418_v46, 4  ;;  %v1306_v46 = vshll.u32 %v5133_v21, 16  ;;  %v1505_v0 = vsel %vm4635_vm13, %v3463_v1, %v1504_v17  ;;  %v5173_v19 = vld [vmem:[#allocation2 + $0xa4] sm:$0x1] }
 0x128   : > { %v2591_v40 = vpop.f32.mrf.mxu2  ;;  %v1314_v1 = vrot.slane %v1312_v5, 5 }
 0x129   : > { %v2592_v29 = vadd.f32 %v2591_v40, %v5076_v60  ;;  %v1301_v60 = vsel %vm4602_vm10, %v1296_v37, %v1300_v45  ;;  %v3901_v40 = vld [vmem:[%s5603_s1 + $0x188] sm:$0xff]  ;;  %v917_v15 = vsel %vm4503_vm7, %v732_v62, %v916_v11  ;;  %v1508_v45 = vsel %vm4635_vm13, %v1506_v38, %v1507_v33 }
 0x12a   : > { %v2680_v41 = vpop.f32.mrf.mxu3  ;;  %918 = vst [vmem:[#allocation2 + $0xb0] sm:$0x1] %v917_v15  ;;  %2937 = vmatpush.bf16.msra.mxu2 %v3901_v40  ;;  %v3893_v38 = vld [vmem:[%s5603_s1 + $0x148] sm:$0xff] }
 0x12b   : > { %v2681_v55 = vadd.f32 %v2680_v41, %v2592_v29  ;;  %v1694_v29 = vunpack.c.l.b16 %v1301_v60  ;;  %v1305_v41 = vrot.slane %v1303_v58, 4  ;;  %v3917_v33 = vld [vmem:[%s5603_s1 + $0x208] sm:$0xff]  ;;  %2848 = vmatpush.bf16.msra.mxu1 %v3893_v38 }
 0x12c   : > { %v5146_v3 = vpop.f32.mrf.mxu0  ;;  %3115 = vmatpush.bf16.msra.mxu0 %v3917_v33  ;;  %v3464_v33 = vrot.slane %v5082_v56, 9 }
 0x12d   : > { %2633 = vmatmul.bf16.gmra.mxu2 %v5131_v23  ;;  %v5151_v14 = vadd.f32 %v2769_v4, %v2681_v55  ;;  %v3909_v4 = vld [vmem:[%s5603_s1 + $0x1c8] sm:$0xff]  ;;  %v1308_v55 = vrot.slane %v1306_v46, 5 }
 0x12e   : > { %v2510_v32 = vpop.f32.mrf.mxu1  ;;  %3026 = vmatpush.bf16.msra.mxu3 %v3909_v4  ;;  %v5192_v4 = vld [vmem:[#allocation2 + $0xa8] sm:$0xf] }
 0x12f   : > { %5668 = vst [vmem:[#allocation31_spill] sm:$0xff] %v5151_v14  ;;  %2722 = vmatmul.bf16.gmra.mxu3 %v5153_v47  ;;  %v5157_v22 = vadd.f32 %v2510_v32, %v4967_v20  ;;  %v1693_v20 = vunpack.c.l.b16 %v1291_v18  ;;  %v1318_v32 = vrot.slane %v1316_v61, 4  ;;  %v1756_v18 = vunpack.c.l.b16 %v1508_v45  ;;  %v5198_v45 = vld [vmem:[#allocation2 + $0xac] sm:$0xf] }
 0x130   : > { %v2594_v37 = vpop.f32.mrf.mxu2  ;;  %v1309_v46 = vor.u32 %v1308_v55, %v1305_v41  ;;  %v1322_v61 = vshll.u32 %v5173_v19, 16  ;;  %v1330_v55 = vshll.u32 %v5192_v4, 16  ;;  %v1336_v38 = vshll.u32 %v5198_v45, 16 }
 0x131   : > { %v2595_v17 = vadd.f32 %v2594_v37, %v5106_v48  ;;  %2549 = vmatmul.bf16.gmra.mxu1 %v5118_v57  ;;  %v1755_v48 = vunpack.c.l.b16 %v1505_v0  ;;  %v5181_v60 = vpack.c.b16 %v1694_v29, %v1693_v20  ;;  %v1319_v5 = vor.u32 %v1318_v32, %v1314_v1  ;;  %v923_v57 = vld [vmem:[#allocation2 + $0xbc] sm:$0x1] }
 0x132   : > { %v2683_v14 = vpop.f32.mrf.mxu3  ;;  %v1511_v37 = vrot.slane %v5084_v44, 5  ;;  %v1310_v20 = vrot.slane %v1309_v46, 4  ;;  %v1324_v41 = vrot.slane %v1322_v61, 5  ;;  %v749_v32 = vrot.slane %v4534_v49, 4  ;;  %v3964_v61 = vld [vmem:[%s5604_s2] ss:$0 sm:$0xff] }
 0x133   : > { %v2684_v62 = vadd.f32 %v2683_v14, %v2595_v17  ;;  %5670 = vst [vmem:[#allocation33_spill] sm:$0xff] %v5181_v60  ;;  %v5194_v15 = vpack.c.b16 %v1756_v18, %v1755_v48  ;;  %v1320_v29 = vrot.slane %v1319_v5, 4  ;;  %v1327_v17 = vshrl.u32 %v5192_v4, 16  ;;  %v300_v18 = vld [vmem:[%s4051_s8 + $0xf0] sm:$0xff] }
 0x134   : > { %v5183_v58 = vpop.f32.mrf.mxu0  ;;  %v1340_v44 = vshrl.u32 %v5198_v45, 16  ;;  %v1513_v48 = vrot.slane %v1511_v37, 4  ;;  %v1315_v5 = vsel %vm4602_vm10, %v1310_v20, %v1314_v1  ;;  %v5225_v1 = vld [vmem:[#allocation2 + $0x90] sm:$0xff]  ;;  %v5228_v20 = vrot.slane %v1336_v38, 5 }
 0x135   : > { %v5187_v14 = vadd.f32 %v5121_v28, %v2684_v62  ;;  %v1325_v49 = vsel %vm4602_vm10, %v1320_v29, %v1324_v41  ;;  %5673 = vst [vmem:[#allocation36_spill] sm:$0xff] %v5225_v1  ;;  %v924_v41 = vsel %vm4503_vm7, %v749_v32, %v923_v57  ;;  %v1512_v57 = vsel %vm4635_vm13, %v3464_v33, %v1511_v37 }
 0x136   : > { %v2512_v11 = vpop.f32.mrf.mxu1  ;;  %v1342_v29 = vrot.slane %v1340_v44, 4  ;;  %925 = vst [vmem:[#allocation2 + $0xbc] sm:$0x1] %v924_v41 }
 0x137   : > { %5671 = vst [vmem:[#allocation34_spill] sm:$0xff] %v5187_v14  ;;  %v5190_v40 = vadd.f32 %v2512_v11, %v4991_v2  ;;  %2816 = vmatmul.bf16.gmra.mxu0 %v5181_v60  ;;  %v336_v11 = vmul.f32 %v3964_v61, %v300_v18  ;;  %v1332_v14 = vrot.slane %v1330_v55, 5  ;;  %v1695_v18 = vunpack.c.l.b16 %v1315_v5 }
 0x138   : > { %v2596_v0 = vpop.f32.mrf.mxu2  ;;  %v1343_v5 = vor.u32 %v1342_v29, %v5228_v20 }
 0x139   : > { %v2597_v28 = vadd.f32 %v2596_v0, %v5126_v52  ;;  %v301_v52 = vld [vmem:[%s4051_s8 + $0xf8] sm:$0xff] }
 0x13a   : > { %v2685_v2 = vpop.f32.mrf.mxu3  ;;  %v337_v0 = vmul.f32 %v3964_v61, %v301_v52  ;;  %v1696_v52 = vunpack.c.l.b16 %v1325_v49 }
 0x13b   : > { %v2686_v62 = vadd.f32 %v2685_v2, %v2597_v28  ;;  %v1514_v28 = vrot.slane %v5112_v39, 5  ;;  %v1329_v2 = vrot.slane %v1327_v17, 4  ;;  %v3966_v39 = vld [vmem:[%s5605_s3] ss:$0 sm:$0xff] }
 0x13c   : > { %v5210_v46 = vpop.f32.mrf.mxu0  ;;  %v372_v17 = vadd.f32 %v3966_v39, %v336_v11 }
 0x13d   : > { %2638 = vmatmul.bf16.gmra.mxu2 %v5194_v15  ;;  %v5223_v47 = vadd.f32 %v5146_v3, %v2686_v62  ;;  %v5235_v3 = vld [vmem:[#allocation2 + $0xb0] sm:$0x1]  ;;  %v373_v62 = vadd.f32 %v3966_v39, %v337_v0  ;;  %v1515_v32 = vsel %vm4635_vm13, %v1513_v48, %v1514_v28  ;;  %v1333_v11 = vor.u32 %v1332_v14, %v1329_v2 }
 0x13e   : > { %v5219_v56 = vpop.f32.mrf.mxu1  ;;  %v404_v38 = vmax.f32 %v372_v17, 0.0  ;;  %v1346_v49 = vshll.u32 %v5235_v3, 16  ;;  %v5245_v0 = vpack.c.b16 %v1696_v52, %v1695_v18  ;;  %v1757_v17 = vunpack.c.l.b16 %v1512_v57  ;;  %v5255_v18 = vld [vmem:[#allocation2 + $0xb4] sm:$0xf] }
 0x13f   : > { %5672 = vst [vmem:[#allocation35_spill] sm:$0xff] %v5223_v47  ;;  %2727 = vmatmul.bf16.gmra.mxu3 %v5225_v1  ;;  %v1334_v14 = vrot.slane %v1333_v11, 4  ;;  %v1344_v48 = vrot.slane %v1343_v5, 4  ;;  %v5286_v1 = vld [vmem:[#allocation2 + $0x9c] sm:$0xff] }
 0x140   : > { %v2599_v55 = vpop.f32.mrf.mxu2  ;;  %v490_v41 = vpack.c.bf16 %v404_v38, %v404_v38  ;;  %v1348_v28 = vrot.slane %v1346_v49, 5  ;;  %v1351_v49 = vshrl.u32 %v5255_v18, 16 }
 0x141   : > { %v2600_v61 = vadd.f32 %v2599_v55, %v5157_v22  ;;  %2554 = vmatmul.bf16.gmra.mxu1 %v5181_v60  ;;  %v405_v22 = vmax.f32 %v373_v62, 0.0  ;;  %v1758_v55 = vunpack.c.l.b16 %v1515_v32  ;;  %v926_v32 = vld [vmem:[#allocation2 + $0xc0] sm:$0xf] }
 0x142   : > { %v2688_v44 = vpop.f32.mrf.mxu3  ;;  %v751_v60 = vshrl.u32 %v490_v41, 16  ;;  %v754_v29 = vshll.u32 %v490_v41, 16  ;;  %v1349_v5 = vsel %vm4602_vm10, %v1344_v48, %v1348_v28 }
 0x143   : > { %v2689_v47 = vadd.f32 %v2688_v44, %v2600_v61  ;;  %v491_v52 = vpack.c.bf16 %v405_v22, %v405_v22  ;;  %v5258_v38 = vpack.c.b16 %v1758_v55, %v1757_v17  ;;  %v1698_v35 = vunpack.c.l.b16 %v1349_v5  ;;  %v5298_v5 = vld [vmem:[#allocation2 + $0xbc] sm:$0x1] }
 0x144   : > { %v5247_v39 = vpop.f32.mrf.mxu0  ;;  %v753_v2 = vrot.slane %v751_v60, 7  ;;  %v1339_v60 = vsel %vm4602_vm10, %v1334_v14, %v5228_v20  ;;  %v3465_v20 = vrot.slane %v5133_v21, 9  ;;  %v3900_v21 = vld [vmem:[%s5603_s1 + $0x180] sm:$0xff]  ;;  %v1370_v31 = vshll.u32 %v5298_v5, 16 }
 0x145   : > { %v5250_v37 = vadd.f32 %v5183_v58, %v2689_v47  ;;  %v1518_v47 = vrot.slane %v5135_v59, 5  ;;  %v5261_v58 = vld [vmem:[#allocation2 + $0xb8] sm:$0xf]  ;;  %v759_v22 = vshrl.u32 %v491_v52, 16  ;;  %v762_v17 = vshll.u32 %v491_v52, 16  ;;  %2938 = vmatpush.bf16.msra.mxu2 %v3900_v21 }
 0x146   : > { %v5252_v33 = vpop.f32.mrf.mxu1  ;;  %v756_v44 = vor.u32 %v754_v29, %v753_v2  ;;  %v1360_v41 = vshll.u32 %v5261_v58, 16  ;;  %v1364_v59 = vshrl.u32 %v5261_v58, 16 }
 0x147   : > { %5674 = vst [vmem:[#allocation37_spill] sm:$0xff] %v5250_v37  ;;  %2821 = vmatmul.bf16.gmra.mxu0 %v5245_v0  ;;  %v1520_v14 = vrot.slane %v1518_v47, 4  ;;  %v761_v52 = vrot.slane %v759_v22, 7  ;;  %v2516_v37 = vadd.f32 %v5219_v56, %v4773_v42 }
 0x148   : > { %v2601_v61 = vpop.f32.mrf.mxu2  ;;  %v927_v48 = vsel %vm4108_vm5, %v756_v44, %v926_v32  ;;  %v5295_v32 = vrot.slane %v1360_v41, 5  ;;  %v1366_v42 = vrot.slane %v1364_v59, 4 }
 0x149   : > { %v2602_v62 = vadd.f32 %v2601_v61, %v5190_v40  ;;  %v1354_v40 = vshll.u32 %v5255_v18, 16  ;;  %v1521_v61 = vrot.slane %v5173_v19, 5  ;;  %928 = vst [vmem:[#allocation2 + $0xc0] sm:$0xf] %v927_v48  ;;  %v3908_v19 = vld [vmem:[%s5603_s1 + $0x1c0] sm:$0xff]  ;;  %v764_v56 = vor.u32 %v762_v17, %v761_v52 }
 0x14a   : > { %v2690_v57 = vpop.f32.mrf.mxu3  ;;  %3027 = vmatpush.bf16.msra.mxu3 %v3908_v19  ;;  %v3892_v17 = vld [vmem:[%s5603_s1 + $0x140] sm:$0xff] }
 0x14b   : > { %v2691_v11 = vadd.f32 %v2690_v57, %v2602_v62  ;;  %v1697_v62 = vunpack.c.l.b16 %v1339_v60  ;;  %v757_v57 = vrot.slane %v753_v2, 4  ;;  %v1356_v44 = vrot.slane %v1354_v40, 5  ;;  %v930_v2 = vld [vmem:[#allocation2 + $0xc8] sm:$0x1]  ;;  %2849 = vmatpush.bf16.msra.mxu1 %v3892_v17 }
 0x14c   : > { %v5273_v55 = vpop.f32.mrf.mxu0  ;;  %v1522_v40 = vsel %vm4635_vm13, %v1520_v14, %v1521_v61  ;;  %v1367_v14 = vor.u32 %v1366_v42, %v5295_v32 }
 0x14d   : > { %2643 = vmatmul.bf16.gmra.mxu2 %v5258_v38  ;;  %v5279_v28 = vadd.f32 %v5210_v46, %v2691_v11  ;;  %v1353_v46 = vrot.slane %v1351_v49, 4  ;;  %v766_v11 = vrot.slane %v761_v52, 4  ;;  %v1519_v49 = vsel %vm4635_vm13, %v3465_v20, %v1518_v47  ;;  %v3916_v52 = vld [vmem:[%s5603_s1 + $0x200] sm:$0xff] }
 0x14e   : > { %v5281_v29 = vpop.f32.mrf.mxu1  ;;  %v765_v41 = vsel %vm4096_vm4, %v757_v57, %v764_v56  ;;  %v5314_v47 = vpack.c.b16 %v1698_v35, %v1697_v62  ;;  %v1759_v61 = vunpack.c.l.b16 %v1519_v49  ;;  %v1760_v57 = vunpack.c.l.b16 %v1522_v40  ;;  %3116 = vmatpush.bf16.msra.mxu0 %v3916_v52 }
 0x14f   : > { %2732 = vmatmul.bf16.gmra.mxu3 %v5286_v1  ;;  %v931_v59 = vsel %vm4503_vm7, %v766_v11, %v930_v2  ;;  %929 = vst [vmem:[#allocation2 + $0xc4] sm:$0xf] %v765_v41  ;;  %v1357_v20 = vor.u32 %v1356_v44, %v1353_v46  ;;  %v2518_v2 = vadd.f32 %v5252_v33, %v4801_v51  ;;  %v1525_v62 = vrot.slane %v5198_v45, 5 }
 0x150   : > { %v2604_v60 = vpop.f32.mrf.mxu2  ;;  %932 = vst [vmem:[#allocation2 + $0xc8] sm:$0x1] %v931_v59  ;;  %v1368_v44 = vrot.slane %v1367_v14, 4  ;;  %v5325_v56 = vpack.c.b16 %v1760_v57, %v1759_v61  ;;  %v5327_v11 = vld [vmem:[#allocation2 + $0xc0] sm:$0xf]  ;;  %v3466_v49 = vrot.slane %v5192_v4, 9 }
 0x151   : > { %v2605_v22 = vadd.f32 %v2604_v60, %v2516_v37  ;;  %2559 = vmatmul.bf16.gmra.mxu1 %v5245_v0  ;;  %v1358_v46 = vrot.slane %v1357_v20, 4  ;;  %v1372_v60 = vrot.slane %v1370_v31, 5  ;;  %5675 = vst [vmem:[#allocation38_spill] sm:$0xff] %v5327_v11  ;;  %v1527_v51 = vrot.slane %v1525_v62, 4  ;;  %v5348_v20 = vld [vmem:[#allocation2 + $0xa8] sm:$0xff] }
 0x152   : > { %v2693_v48 = vpop.f32.mrf.mxu3  ;;  %v1528_v45 = vrot.slane %v5235_v3, 5  ;;  %v1538_v41 = vshrl.u32 %v5327_v11, 16  ;;  %v1526_v14 = vsel %vm4635_vm13, %v3466_v49, %v1525_v62 }
 0x153   : > { %v2694_v37 = vadd.f32 %v2693_v48, %v2605_v22  ;;  %v1363_v33 = vsel %vm4602_vm10, %v1358_v46, %v5295_v32  ;;  %v1373_v40 = vsel %vm4602_vm10, %v1368_v44, %v1372_v60  ;;  %v2521_v32 = vadd.f32 %v5281_v29, %v4825_v9 }
 0x154   : > { %v2787_v13 = vpop.f32.mrf.mxu0  ;;  %v1529_v61 = vsel %vm4635_vm13, %v1527_v51, %v1528_v45  ;;  %v1699_v57 = vunpack.c.l.b16 %v1363_v33 }
 0x155   : > { %v5319_v21 = vadd.f32 %v5247_v39, %v2694_v37  ;;  %v1541_v37 = vshll.u32 %v5327_v11, 16 }
 0x156   : > { %v2522_v19 = vpop.f32.mrf.mxu1  ;;  %v5329_v39 = vld [vmem:[#allocation2 + $0xc4] sm:$0xf] }
 0x157   : > { %2826 = vmatmul.bf16.gmra.mxu0 %v5314_v47  ;;  %v1547_v17 = vshll.u32 %v5329_v39, 16  ;;  %v1551_v4 = vshrl.u32 %v5329_v39, 16  ;;  %v1543_v46 = vrot.slane %v1541_v37, 5  ;;  %v5356_v60 = vld [vmem:[#allocation2 + $0xc8] sm:$0x1] }
 0x158   : > { %v2606_v35 = vpop.f32.mrf.mxu2  ;;  %v1557_v45 = vshll.u32 %v5356_v60, 16 }
 0x159   : > { %v2607_v42 = vadd.f32 %v2606_v35, %v2518_v2  ;;  %v1700_v2 = vunpack.c.l.b16 %v1373_v40  ;;  %v1540_v35 = vrot.slane %v1538_v41, 4  ;;  %v1549_v44 = vrot.slane %v1547_v17, 5 }
 0x15a   : > { %v2695_v22 = vpop.f32.mrf.mxu3  ;;  %v1553_v9 = vrot.slane %v1551_v4, 4  ;;  %v2523_v41 = vadd.f32 %v2522_v19, %v4859_v54 }
 0x15b   : > { %v2696_v48 = vadd.f32 %v2695_v22, %v2607_v42  ;;  %v1761_v22 = vunpack.c.l.b16 %v1526_v14  ;;  %v5358_v62 = vpack.c.b16 %v1700_v2, %v1699_v57  ;;  %v1544_v11 = vor.u32 %v1543_v46, %v1540_v35 }
 0x15c   : > { %v2789_v59 = vpop.f32.mrf.mxu0  ;;  %v1554_v51 = vor.u32 %v1553_v9, %v1549_v44  ;;  %v1532_v57 = vrot.slane %v5261_v58, 5  ;;  %v1535_v9 = vrot.slane %v5298_v5, 5 }
 0x15d   : > { %2648 = vmatmul.bf16.gmra.mxu2 %v5325_v56  ;;  %v5344_v3 = vadd.f32 %v5273_v55, %v2696_v48  ;;  %v1762_v48 = vunpack.c.l.b16 %v1529_v61 }
 0x15e   : > { %v2525_v52 = vpop.f32.mrf.mxu1  ;;  %v1555_v14 = vrot.slane %v1554_v51, 4  ;;  %v1534_v46 = vrot.slane %v1532_v57, 4 }
 0x15f   : > { %2737 = vmatmul.bf16.gmra.mxu3 %v5348_v20  ;;  %v5364_v17 = vpack.c.b16 %v1762_v48, %v1761_v22  ;;  %v2526_v58 = vadd.f32 %v2525_v52, %v4885_v24 }
 0x160   : > { %v2609_v31 = vpop.f32.mrf.mxu2 }
 0x161   : > { %v2610_v55 = vadd.f32 %v2609_v31, %v2521_v32  ;;  %2564 = vmatmul.bf16.gmra.mxu1 %v5314_v47  ;;  %v1545_v32 = vrot.slane %v1544_v11, 4  ;;  %v1559_v31 = vrot.slane %v1557_v45, 5  ;;  %v3467_v11 = vrot.slane %v5255_v18, 9 }
 0x162   : > { %v2698_v29 = vpop.f32.mrf.mxu3  ;;  %v1536_v18 = vsel %vm4635_vm13, %v1534_v46, %v1535_v9 }
 0x163   : > { %v2699_v42 = vadd.f32 %v2698_v29, %v2610_v55  ;;  %v1550_v35 = vsel %vm4602_vm10, %v1545_v32, %v1549_v44  ;;  %v1560_v54 = vsel %vm4602_vm10, %v1555_v14, %v1559_v31  ;;  %v5378_v29 = vld [vmem:[#allocation2 + $0xb4] sm:$0xff]  ;;  %v1533_v51 = vsel %vm4635_vm13, %v3467_v11, %v1532_v57 }
 0x164   : > { %v2792_v49 = vpop.f32.mrf.mxu0  ;;  %v1801_v22 = vunpack.c.l.b16 %v1550_v35  ;;  %v1802_v44 = vunpack.c.l.b16 %v1560_v54  ;;  %v1763_v52 = vunpack.c.l.b16 %v1533_v51  ;;  %v5394_v35 = vld [vmem:[#allocation2 + $0xc0] sm:$0xff] }
 0x165   : > { %v5361_v33 = vadd.f32 %v2787_v13, %v2699_v42 }
 0x166   : > { %v2527_v40 = vpop.f32.mrf.mxu1  ;;  %v5386_v45 = vpack.c.b16 %v1802_v44, %v1801_v22 }
 0x167   : > { %2831 = vmatmul.bf16.gmra.mxu0 %v5358_v62  ;;  %v2528_v32 = vadd.f32 %v2527_v40, %v4908_v63 }
 0x168   : > { %v2611_v37 = vpop.f32.mrf.mxu2 }
 0x169   : > { %v2612_v4 = vadd.f32 %v2611_v37, %v2523_v41  ;;  %v1764_v41 = vunpack.c.l.b16 %v1536_v18 }
 0x16a   : > { %v2700_v61 = vpop.f32.mrf.mxu3 }
 0x16b   : > { %v2701_v2 = vadd.f32 %v2700_v61, %v2612_v4  ;;  %v5392_v61 = vpack.c.b16 %v1764_v41, %v1763_v52 }
 0x16c   : > { %v2794_v13 = vpop.f32.mrf.mxu0 }
 0x16d   : > { %2653 = vmatmul.bf16.gmra.mxu2 %v5364_v17  ;;  %v5373_v19 = vadd.f32 %v2789_v59, %v2701_v2 }
 0x16e   : > { %v2530_v55 = vpop.f32.mrf.mxu1 }
 0x16f   : > { %2742 = vmatmul.bf16.gmra.mxu3 %v5378_v29  ;;  %v2531_v46 = vadd.f32 %v2530_v55, %v4934_v53  ;;  %v3970_v55 = vld [vmem:[#allocation2 + $0x18] sm:$0xff] }
 0x170   : > { %v2614_v42 = vpop.f32.mrf.mxu2 }
 0x171   : > { %v2615_v48 = vadd.f32 %v2614_v42, %v2526_v58  ;;  %2569 = vmatmul.bf16.gmra.mxu1 %v5358_v62 }
 0x172   : > { %v2703_v59 = vpop.f32.mrf.mxu3 }
 0x173   : > { %v2704_v5 = vadd.f32 %v2703_v59, %v2615_v48 }
 0x174   : > { %v2797_v24 = vpop.f32.mrf.mxu0 }
 0x175   : > { %v5388_v37 = vadd.f32 %v2792_v49, %v2704_v5 }
 0x176   : > { %v2532_v4 = vpop.f32.mrf.mxu1 }
 0x177   : > { %2836 = vmatmul.bf16.gmra.mxu0 %v5386_v45  ;;  %v2533_v48 = vadd.f32 %v2532_v4, %v4969_v25 }
 0x178   : > { %v2616_v14 = vpop.f32.mrf.mxu2 }
 0x179   : > { %v2617_v31 = vadd.f32 %v2616_v14, %v2528_v32 }
 0x17a   : > { %v2705_v57 = vpop.f32.mrf.mxu3 }
 0x17b   : > { %v2706_v2 = vadd.f32 %v2705_v57, %v2617_v31 }
 0x17c   : > { %v2799_v54 = vpop.f32.mrf.mxu0 }
 0x17d   : > { %2658 = vmatmul.bf16.gmra.mxu2 %v5392_v61  ;;  %v5397_v11 = vadd.f32 %v2794_v13, %v2706_v2 }
 0x17e   : > { %v2535_v49 = vpop.f32.mrf.mxu1 }
 0x17f   : > { %2747 = vmatmul.bf16.gmra.mxu3 %v5394_v35  ;;  %v2536_v52 = vadd.f32 %v2535_v49, %v4837_v7  ;;  %v3971_v49 = vld [vmem:[#allocation2 + $0x24] sm:$0xff] }
 0x180   : > { %v2619_v63 = vpop.f32.mrf.mxu2 }
 0x181   : > { %v2620_v40 = vadd.f32 %v2619_v63, %v2531_v46  ;;  %2850 = vmatmul.bf16.vlgmr.msra.gmra.mxu1 %v4689_v27 }
 0x182   : > { %v2708_v9 = vpop.f32.mrf.mxu3 }
 0x183   : > { %v2709_v58 = vadd.f32 %v2708_v9, %v2620_v40  ;;  %v5676_v9 = vld [vmem:[#allocation3_spill] sm:$0xff] }
 0x184   : > { %v2802_v42 = vpop.f32.mrf.mxu0 }
 0x185   : > { %v5402_v22 = vadd.f32 %v2797_v24, %v2709_v58 }
 0x186   : > { %v2537_v44 = vpop.f32.mrf.mxu1 }
 0x187   : > { %3117 = vmatmul.bf16.vlgmr.msra.gmra.mxu0 %v4726_v30  ;;  %v2538_v57 = vadd.f32 %v2537_v44, %v4863_v26 }
 0x188   : > { %v2621_v59 = vpop.f32.mrf.mxu2 }
 0x189   : > { %v2622_v13 = vadd.f32 %v2621_v59, %v2533_v48 }
 0x18a   : > { %v2710_v51 = vpop.f32.mrf.mxu3 }
 0x18b   : > { %v2711_v53 = vadd.f32 %v2710_v51, %v2622_v13  ;;  %v5677_v51 = vld [vmem:[#allocation13_spill] sm:$0xff] }
 0x18c   : > { %v2804_v18 = vpop.f32.mrf.mxu0 }
 0x18d   : > { %2939 = vmatmul.bf16.vlgmr.msra.gmra.mxu2 %v3970_v55  ;;  %v5406_v5 = vadd.f32 %v2799_v54, %v2711_v53 }
 0x18e   : > { %v2540_v27 = vpop.f32.mrf.mxu1 }
 0x18f   : > { %3028 = vmatmul.bf16.vlgmr.msra.gmra.mxu3 %v4685_v8  ;;  %v2541_v40 = vadd.f32 %v2540_v27, %v4892_v50  ;;  %v3972_v27 = vld [vmem:[#allocation2 + $0x30] sm:$0xff] }
 0x190   : > { %v2624_v24 = vpop.f32.mrf.mxu2 }
 0x191   : > { %v2625_v41 = vadd.f32 %v2624_v24, %v2536_v52  ;;  %2855 = vmatmul.bf16.gmra.mxu1 %v4726_v30 }
 0x192   : > { %v2713_v25 = vpop.f32.mrf.mxu3 }
 0x193   : > { %v2714_v4 = vadd.f32 %v2713_v25, %v2625_v41 }
 0x194   : > { %v2807_v32 = vpop.f32.mrf.mxu0 }
 0x195   : > { %v5411_v14 = vadd.f32 %v2802_v42, %v2714_v4  ;;  %v5679_v4 = vld [vmem:[#allocation16_spill] sm:$0xff] }
 0x196   : > { %v2542_v31 = vpop.f32.mrf.mxu1 }
 0x197   : > { %3122 = vmatmul.bf16.gmra.mxu0 %v4767_v34  ;;  %v2543_v53 = vadd.f32 %v2542_v31, %v5677_v51  ;;  %v3973_v51 = vld [vmem:[#allocation2 + $0x3c] sm:$0xff] }
 0x198   : > { %v2626_v2 = vpop.f32.mrf.mxu2 }
 0x199   : > { %v2627_v54 = vadd.f32 %v2626_v2, %v2538_v57  ;;  %v5680_v2 = vld [vmem:[#allocation4_spill] sm:$0xff] }
 0x19a   : > { %v2715_v46 = vpop.f32.mrf.mxu3 }
 0x19b   : > { %v2716_v7 = vadd.f32 %v2715_v46, %v2627_v54 }
 0x19c   : > { %v2809_v8 = vpop.f32.mrf.mxu0 }
 0x19d   : > { %2944 = vmatmul.bf16.gmra.mxu2 %v3971_v49  ;;  %v5415_v63 = vadd.f32 %v2804_v18, %v2716_v7  ;;  %v5678_v18 = vld [vmem:[#allocation6_spill] sm:$0xff] }
 0x19e   : > { %v2545_v30 = vpop.f32.mrf.mxu1 }
 0x19f   : > { %3033 = vmatmul.bf16.gmra.mxu3 %v5676_v9  ;;  %v2546_v57 = vadd.f32 %v2545_v30, %v5679_v4  ;;  %v5681_v9 = vld [vmem:[#allocation19_spill] sm:$0xff] }
 0x1a0   : > { %v2629_v58 = vpop.f32.mrf.mxu2 }
 0x1a1   : > { %v2630_v42 = vadd.f32 %v2629_v58, %v2541_v40  ;;  %2860 = vmatmul.bf16.gmra.mxu1 %v4767_v34 }
 0x1a2   : > { %v2718_v26 = vpop.f32.mrf.mxu3 }
 0x1a3   : > { %v2719_v44 = vadd.f32 %v2718_v26, %v2630_v42 }
 0x1a4   : > { %v2812_v48 = vpop.f32.mrf.mxu0 }
 0x1a5   : > { %v5420_v59 = vadd.f32 %v2807_v32, %v2719_v44 }
 0x1a6   : > { %v2547_v13 = vpop.f32.mrf.mxu1 }
 0x1a7   : > { %3127 = vmatmul.bf16.gmra.mxu0 %v5678_v18  ;;  %v2548_v58 = vadd.f32 %v2547_v13, %v5681_v9 }
 0x1a8   : > { %v2631_v55 = vpop.f32.mrf.mxu2 }
 0x1a9   : > { %v2632_v52 = vadd.f32 %v2631_v55, %v2543_v53 }
 0x1aa   : > { %v2720_v24 = vpop.f32.mrf.mxu3 }
 0x1ab   : > { %v2721_v50 = vadd.f32 %v2720_v24, %v2632_v52  ;;  %v5683_v52 = vld [vmem:[#allocation22_spill] sm:$0xff] }
 0x1ac   : > { %v2814_v41 = vpop.f32.mrf.mxu0 }
 0x1ad   : > { %2949 = vmatmul.bf16.gmra.mxu2 %v3972_v27  ;;  %v5424_v25 = vadd.f32 %v2809_v8, %v2721_v50  ;;  %v5682_v8 = vld [vmem:[#allocation9_spill] sm:$0xff] }
 0x1ae   : > { %v2550_v34 = vpop.f32.mrf.mxu1  ;;  %v5684_v50 = vld [vmem:[#allocation5_spill] sm:$0xff] }
 0x1af   : > { %3038 = vmatmul.bf16.gmra.mxu3 %v5680_v2  ;;  %v2551_v24 = vadd.f32 %v2550_v34, %v5683_v52  ;;  %v5688_v52 = vld [vmem:[#allocation8_spill] sm:$0xff] }
 0x1b0   : > { %v2634_v32 = vpop.f32.mrf.mxu2 }
 0x1b1   : > { %v2635_v54 = vadd.f32 %v2634_v32, %v2546_v57  ;;  %2865 = vmatmul.bf16.gmra.mxu1 %v5678_v18 }
 0x1b2   : > { %v2723_v31 = vpop.f32.mrf.mxu3 }
 0x1b3   : > { %v2724_v46 = vadd.f32 %v2723_v31, %v2635_v54  ;;  %v5685_v54 = vld [vmem:[#allocation24_spill] sm:$0xff] }
 0x1b4   : > { %v2817_v7 = vpop.f32.mrf.mxu0 }
 0x1b5   : > { %v5429_v49 = vadd.f32 %v2812_v48, %v2724_v46 }
 0x1b6   : > { %v2552_v40 = vpop.f32.mrf.mxu1 }
 0x1b7   : > { %3132 = vmatmul.bf16.gmra.mxu0 %v5682_v8  ;;  %v2553_v31 = vadd.f32 %v2552_v40, %v5685_v54 }
 0x1b8   : > { %v2636_v42 = vpop.f32.mrf.mxu2 }
 0x1b9   : > { %v2637_v26 = vadd.f32 %v2636_v42, %v2548_v58  ;;  %v3974_v42 = vld [vmem:[#allocation2 + $0x48] sm:$0xff] }
 0x1ba   : > { %v2725_v44 = vpop.f32.mrf.mxu3 }
 0x1bb   : > { %v2726_v30 = vadd.f32 %v2725_v44, %v2637_v26 }
 0x1bc   : > { %v2819_v53 = vpop.f32.mrf.mxu0 }
 0x1bd   : > { %2954 = vmatmul.bf16.gmra.mxu2 %v3973_v51  ;;  %v5433_v55 = vadd.f32 %v2814_v41, %v2726_v30  ;;  %v5686_v41 = vld [vmem:[#allocation14_spill] sm:$0xff]  ;;  %v5687_v30 = vld [vmem:[#allocation7_spill] sm:$0xff] }
 0x1be   : > { %v2555_v18 = vpop.f32.mrf.mxu1 }
 0x1bf   : > { %3043 = vmatmul.bf16.gmra.mxu3 %v5684_v50  ;;  %v2556_v51 = vadd.f32 %v2555_v18, %v5687_v30  ;;  %v5691_v30 = vld [vmem:[#allocation11_spill] sm:$0xff] }
 0x1c0   : > { %v2639_v48 = vpop.f32.mrf.mxu2 }
 0x1c1   : > { %v2640_v27 = vadd.f32 %v2639_v48, %v2551_v24  ;;  %2870 = vmatmul.bf16.gmra.mxu1 %v5682_v8 }
 0x1c2   : > { %v2728_v13 = vpop.f32.mrf.mxu3 }
 0x1c3   : > { %v2729_v4 = vadd.f32 %v2728_v13, %v2640_v27 }
 0x1c4   : > { %v2822_v57 = vpop.f32.mrf.mxu0 }
 0x1c5   : > { %v5438_v2 = vadd.f32 %v2817_v7, %v2729_v4  ;;  %v5689_v4 = vld [vmem:[#allocation10_spill] sm:$0xff] }
 0x1c6   : > { %v2557_v32 = vpop.f32.mrf.mxu1 }
 0x1c7   : > { %3137 = vmatmul.bf16.gmra.mxu0 %v5686_v41  ;;  %v2558_v54 = vadd.f32 %v2557_v32, %v5689_v4 }
 0x1c8   : > { %v2641_v46 = vpop.f32.mrf.mxu2 }
 0x1c9   : > { %v2642_v9 = vadd.f32 %v2641_v46, %v2553_v31 }
 0x1ca   : > { %v2730_v58 = vpop.f32.mrf.mxu3 }
 0x1cb   : > { %v2731_v34 = vadd.f32 %v2730_v58, %v2642_v9  ;;  %v3975_v58 = vld [vmem:[#allocation2 + $0x54] sm:$0xff] }
 0x1cc   : > { %v2824_v26 = vpop.f32.mrf.mxu0 }
 0x1cd   : > { %2959 = vmatmul.bf16.gmra.mxu2 %v3974_v42  ;;  %v5442_v44 = vadd.f32 %v2819_v53, %v2731_v34  ;;  %v5690_v53 = vld [vmem:[#allocation20_spill] sm:$0xff] }
 0x1ce   : > { %v2560_v8 = vpop.f32.mrf.mxu1 }
 0x1cf   : > { %3048 = vmatmul.bf16.gmra.mxu3 %v5688_v52  ;;  %v5692_v52 = vld [vmem:[#allocation12_spill] sm:$0xff] }
 0x1d0   : > { %v2644_v7 = vpop.f32.mrf.mxu2 }
 0x1d1   : > { %v2645_v24 = vadd.f32 %v2644_v7, %v2556_v51  ;;  %2875 = vmatmul.bf16.gmra.mxu1 %v5686_v41  ;;  %v2561_v51 = vadd.f32 %v2560_v8, %v5691_v30 }
 0x1d2   : > { %v2733_v40 = vpop.f32.mrf.mxu3 }
 0x1d3   : > { %v2734_v50 = vadd.f32 %v2733_v40, %v2645_v24 }
 0x1d4   : > { %v2827_v48 = vpop.f32.mrf.mxu0 }
 0x1d5   : > { %v5447_v27 = vadd.f32 %v2822_v57, %v2734_v50 }
 0x1d6   : > { %v2562_v13 = vpop.f32.mrf.mxu1 }
 0x1d7   : > { %3142 = vmatmul.bf16.gmra.mxu0 %v5690_v53 }
 0x1d8   : > { %v2646_v31 = vpop.f32.mrf.mxu2 }
 0x1d9   : > { %v2647_v46 = vadd.f32 %v2646_v31, %v2558_v54  ;;  %v5693_v54 = vld [vmem:[#allocation15_spill] sm:$0xff] }
 0x1da   : > { %v2735_v9 = vpop.f32.mrf.mxu3  ;;  %v2563_v31 = vadd.f32 %v2562_v13, %v5693_v54 }
 0x1db   : > { %v2736_v18 = vadd.f32 %v2735_v9, %v2647_v46 }
 0x1dc   : > { %v2829_v34 = vpop.f32.mrf.mxu0 }
 0x1dd   : > { %2964 = vmatmul.bf16.gmra.mxu2 %v3975_v58  ;;  %v5451_v42 = vadd.f32 %v2824_v26, %v2736_v18  ;;  %v5694_v26 = vld [vmem:[#allocation25_spill] sm:$0xff]  ;;  %v3976_v58 = vld [vmem:[#allocation2 + $0x60] sm:$0xff] }
 0x1de   : > { %v2565_v41 = vpop.f32.mrf.mxu1 }
 0x1df   : > { %3053 = vmatmul.bf16.gmra.mxu3 %v5692_v52  ;;  %v5695_v52 = vld [vmem:[#allocation17_spill] sm:$0xff] }
 0x1e0   : > { %v2649_v57 = vpop.f32.mrf.mxu2 }
 0x1e1   : > { %v2650_v7 = vadd.f32 %v2649_v57, %v2561_v51  ;;  %2880 = vmatmul.bf16.gmra.mxu1 %v5690_v53  ;;  %v2566_v57 = vadd.f32 %v2565_v41, %v5695_v52  ;;  %v3977_v52 = vld [vmem:[#allocation2 + $0x6c] sm:$0xff] }
 0x1e2   : > { %v2738_v32 = vpop.f32.mrf.mxu3 }
 0x1e3   : > { %v2739_v24 = vadd.f32 %v2738_v32, %v2650_v7  ;;  %v5696_v7 = vld [vmem:[#allocation18_spill] sm:$0xff] }
 0x1e4   : > { %v2832_v40 = vpop.f32.mrf.mxu0 }
 0x1e5   : > { %v5456_v50 = vadd.f32 %v2827_v48, %v2739_v24 }
 0x1e6   : > { %v2567_v4 = vpop.f32.mrf.mxu1 }
 0x1e7   : > { %3147 = vmatmul.bf16.gmra.mxu0 %v5694_v26 }
 0x1e8   : > { %v2651_v46 = vpop.f32.mrf.mxu2 }
 0x1e9   : > { %v2652_v9 = vadd.f32 %v2651_v46, %v2563_v31 }
 0x1ea   : > { %v2740_v18 = vpop.f32.mrf.mxu3 }
 0x1eb   : > { %v2741_v8 = vadd.f32 %v2740_v18, %v2652_v9  ;;  %v5697_v9 = vld [vmem:[#allocation21_spill] sm:$0xff] }
 0x1ec   : > { %v2834_v30 = vpop.f32.mrf.mxu0  ;;  %v2568_v18 = vadd.f32 %v2567_v4, %v5697_v9 }
 0x1ed   : > { %2969 = vmatmul.bf16.gmra.mxu2 %v3976_v58  ;;  %v5460_v51 = vadd.f32 %v2829_v34, %v2741_v8 }
 0x1ee   : > { %v2570_v53 = vpop.f32.mrf.mxu1 }
 0x1ef   : > { %3058 = vmatmul.bf16.gmra.mxu3 %v5696_v7 }
 0x1f0   : > { %v2654_v48 = vpop.f32.mrf.mxu2 }
 0x1f1   : > { %v2655_v32 = vadd.f32 %v2654_v48, %v2566_v57  ;;  %2885 = vmatmul.bf16.gmra.mxu1 %v5694_v26  ;;  %v5698_v48 = vld [vmem:[#allocation23_spill] sm:$0xff] }
 0x1f2   : > { %v2743_v13 = vpop.f32.mrf.mxu3 }
 0x1f3   : > { %v2744_v24 = vadd.f32 %v2743_v13, %v2655_v32  ;;  %v2571_v32 = vadd.f32 %v2570_v53, %v5698_v48 }
 0x1f4   : > { %v2837_v54 = vpop.f32.mrf.mxu0 }
 0x1f5   : > { %v5465_v31 = vadd.f32 %v2832_v40, %v2744_v24 }
 0x1f6   : > { %v2572_v46 = vpop.f32.mrf.mxu1 }
 0x1f7   : > { %3152 = vmatmul.bf16.gmra.mxu0 %v5080_v6 }
 0x1f8   : > { %v2656_v58 = vpop.f32.mrf.mxu2 }
 0x1f9   : > { %v2657_v34 = vadd.f32 %v2656_v58, %v2568_v18 }
 0x1fa   : > { %v2745_v8 = vpop.f32.mrf.mxu3 }
 0x1fb   : > { %v2746_v41 = vadd.f32 %v2745_v8, %v2657_v34  ;;  %v5700_v34 = vld [vmem:[#allocation26_spill] sm:$0xff] }
 0x1fc   : > { %v2839_v7 = vpop.f32.mrf.mxu0  ;;  %v2573_v8 = vadd.f32 %v2572_v46, %v5700_v34 }
 0x1fd   : > { %2974 = vmatmul.bf16.gmra.mxu2 %v3977_v52  ;;  %v5469_v57 = vadd.f32 %v2834_v30, %v2746_v41 }
 0x1fe   : > { %v2851_v26 = vpop.f32.mrf.mxu1 }
 0x1ff   : > { %3063 = vmatmul.bf16.gmra.mxu3 %v5010_v12 }
 0x200   : > { %v2659_v40 = vpop.f32.mrf.mxu2 }
 0x201   : > { %v2660_v13 = vadd.f32 %v2659_v40, %v2571_v32  ;;  %2890 = vmatmul.bf16.gmra.mxu1 %v5080_v6  ;;  %v5702_v32 = vld [vmem:[#allocation27_spill] sm:$0xff] }
 0x202   : > { %v2748_v4 = vpop.f32.mrf.mxu3  ;;  %v2852_v40 = vadd.f32 %v2851_v26, %v5702_v32  ;;  %v5703_v26 = vld [vmem:[#allocation28_spill] sm:$0xff]  ;;  %v5705_v32 = vld [vmem:[#allocation30_spill] sm:$0xff] }
 0x203   : > { %v2749_v24 = vadd.f32 %v2748_v4, %v2660_v13 }
 0x204   : > { %v3118_v9 = vpop.f32.mrf.mxu0 }
 0x205   : > { %v5474_v18 = vadd.f32 %v2837_v54, %v2749_v24 }
 0x206   : > { %v2853_v58 = vpop.f32.mrf.mxu1 }
 0x207   : > { %5699 = vst [vmem:[#allocation3_spill] sm:$0xff] %v5474_v18  ;;  %3157 = vmatmul.bf16.gmra.mxu0 %v5131_v23 }
 0x208   : > { %v2661_v52 = vpop.f32.mrf.mxu2 }
 0x209   : > { %v2662_v30 = vadd.f32 %v2661_v52, %v2573_v8 }
 0x20a   : > { %v2750_v53 = vpop.f32.mrf.mxu3 }
 0x20b   : > { %v2751_v41 = vadd.f32 %v2750_v53, %v2662_v30  ;;  %v5704_v53 = vld [vmem:[#allocation32_spill] sm:$0xff] }
 0x20c   : > { %v3120_v12 = vpop.f32.mrf.mxu0 }
 0x20d   : > { %2979 = vmatmul.bf16.gmra.mxu2 %v5102_v43  ;;  %v5479_v48 = vadd.f32 %v2839_v7, %v2751_v41 }
 0x20e   : > { %v2856_v6 = vpop.f32.mrf.mxu1 }
 0x20f   : > { %5701 = vst [vmem:[#allocation13_spill] sm:$0xff] %v5479_v48  ;;  %3068 = vmatmul.bf16.gmra.mxu3 %v5070_v36  ;;  %v2854_v36 = vadd.f32 %v2853_v58, %v5703_v26 }
 0x210   : > { %v2940_v54 = vpop.f32.mrf.mxu2 }
 0x211   : > { %v2941_v13 = vadd.f32 %v2940_v54, %v2852_v40  ;;  %2895 = vmatmul.bf16.gmra.mxu1 %v5131_v23  ;;  %v2857_v40 = vadd.f32 %v2856_v6, %v5705_v32 }
 0x212   : > { %v3029_v46 = vpop.f32.mrf.mxu3 }
 0x213   : > { %v3030_v4 = vadd.f32 %v3029_v46, %v2941_v13 }
 0x214   : > { %v3123_v7 = vpop.f32.mrf.mxu0 }
 0x215   : > { %v3119_v43 = vadd.f32 %v3118_v9, %v3030_v4  ;;  %v5706_v4 = vld [vmem:[#allocation29_spill] sm:$0xff] }
 0x216   : > { %v2858_v24 = vpop.f32.mrf.mxu1 }
 0x217   : > { %3198 = vst [vmem:[%s5489_s16] sm:$0xff] %v3119_v43  ;;  %3162 = vmatmul.bf16.gmra.mxu0 %v5194_v15  ;;  %v3268_v54 = vmul.f32 %v3119_v43, %v3119_v43 }
 0x218   : > { %v2942_v34 = vpop.f32.mrf.mxu2 }
 0x219   : > { %v2943_v23 = vadd.f32 %v2942_v34, %v2854_v36 }
 0x21a   : > { %v3031_v8 = vpop.f32.mrf.mxu3 }
 0x21b   : > { %v3032_v52 = vadd.f32 %v3031_v8, %v2943_v23 }
 0x21c   : > { %v3125_v41 = vpop.f32.mrf.mxu0 }
 0x21d   : > { %v3121_v30 = vadd.f32 %v3120_v12, %v3032_v52  ;;  %2984 = vmatmul.bf16.gmra.mxu2 %v5704_v53  ;;  %v5707_v53 = vld [vmem:[#allocation31_spill] sm:$0xff] }
 0x21e   : > { %v2861_v9 = vpop.f32.mrf.mxu1  ;;  %v2859_v32 = vadd.f32 %v2858_v24, %v5707_v53 }
 0x21f   : > { %3199 = vst [vmem:[%s5489_s16 + $0x8] sm:$0xff] %v3121_v30  ;;  %v3230_v13 = vadd.f32 %v3121_v30, %v3119_v43  ;;  %v3269_v46 = vmul.f32 %v3121_v30, %v3121_v30  ;;  %3073 = vmatmul.bf16.gmra.mxu3 %v5706_v4 }
 0x220   : > { %v2945_v58 = vpop.f32.mrf.mxu2 }
 0x221   : > { %v3300_v26 = vadd.f32 %v3269_v46, %v3268_v54  ;;  %v2946_v48 = vadd.f32 %v2945_v58, %v2857_v40  ;;  %2900 = vmatmul.bf16.gmra.mxu1 %v5194_v15  ;;  %v5708_v15 = vld [vmem:[#allocation36_spill] sm:$0xff] }
 0x222   : > { %v3034_v36 = vpop.f32.mrf.mxu3 }
 0x223   : > { %v3035_v12 = vadd.f32 %v3034_v36, %v2946_v48 }
 0x224   : > { %v3128_v23 = vpop.f32.mrf.mxu0 }
 0x225   : > { %v3124_v34 = vadd.f32 %v3123_v7, %v3035_v12 }
 0x226   : > { %v2863_v8 = vpop.f32.mrf.mxu1 }
 0x227   : > { %3200 = vst [vmem:[%s5489_s16 + $0x10] sm:$0xff] %v3124_v34  ;;  %v3231_v6 = vadd.f32 %v3230_v13, %v3124_v34  ;;  %v3270_v52 = vmul.f32 %v3124_v34, %v3124_v34  ;;  %3167 = vmatmul.bf16.gmra.mxu0 %v5258_v38  ;;  %v5709_v13 = vld [vmem:[#allocation34_spill] sm:$0xff]  ;;  %v5710_v34 = vld [vmem:[#allocation33_spill] sm:$0xff] }
 0x228   : > { %v2947_v43 = vpop.f32.mrf.mxu2  ;;  %v2862_v12 = vadd.f32 %v2861_v9, %v5709_v13 }
 0x229   : > { %v3301_v30 = vadd.f32 %v3300_v26, %v3270_v52  ;;  %v2948_v4 = vadd.f32 %v2947_v43, %v2859_v32 }
 0x22a   : > { %v3036_v54 = vpop.f32.mrf.mxu3 }
 0x22b   : > { %v3037_v40 = vadd.f32 %v3036_v54, %v2948_v4 }
 0x22c   : > { %v3130_v48 = vpop.f32.mrf.mxu0 }
 0x22d   : > { %v3126_v46 = vadd.f32 %v3125_v41, %v3037_v40  ;;  %2989 = vmatmul.bf16.gmra.mxu2 %v5708_v15 }
 0x22e   : > { %v2866_v7 = vpop.f32.mrf.mxu1 }
 0x22f   : > { %3201 = vst [vmem:[%s5489_s16 + $0x18] sm:$0xff] %v3126_v46  ;;  %v3232_v58 = vadd.f32 %v3231_v6, %v3126_v46  ;;  %v3271_v36 = vmul.f32 %v3126_v46, %v3126_v46  ;;  %3078 = vmatmul.bf16.gmra.mxu3 %v5710_v34  ;;  %v5711_v6 = vld [vmem:[#allocation35_spill] sm:$0xff] }
 0x230   : > { %v2950_v24 = vpop.f32.mrf.mxu2  ;;  %v2864_v40 = vadd.f32 %v2863_v8, %v5711_v6 }
 0x231   : > { %v3302_v53 = vadd.f32 %v3301_v30, %v3271_v36  ;;  %v2951_v18 = vadd.f32 %v2950_v24, %v2862_v12  ;;  %2905 = vmatmul.bf16.gmra.mxu1 %v5258_v38 }
 0x232   : > { %v3039_v26 = vpop.f32.mrf.mxu3 }
 0x233   : > { %v3040_v52 = vadd.f32 %v3039_v26, %v2951_v18 }
 0x234   : > { %v3133_v32 = vpop.f32.mrf.mxu0 }
 0x235   : > { %v3129_v41 = vadd.f32 %v3128_v23, %v3040_v52 }
 0x236   : > { %v2868_v43 = vpop.f32.mrf.mxu1 }
 0x237   : > { %3202 = vst [vmem:[%s5489_s16 + $0x20] sm:$0xff] %v3129_v41  ;;  %v3233_v4 = vadd.f32 %v3232_v58, %v3129_v41  ;;  %v3272_v54 = vmul.f32 %v3129_v41, %v3129_v41  ;;  %3172 = vmatmul.bf16.gmra.mxu0 %v5325_v56  ;;  %v5712_v58 = vld [vmem:[#allocation37_spill] sm:$0xff] }
 0x238   : > { %v2952_v46 = vpop.f32.mrf.mxu2  ;;  %v2867_v34 = vadd.f32 %v2866_v7, %v5712_v58 }
 0x239   : > { %v3303_v9 = vadd.f32 %v3302_v53, %v3272_v54  ;;  %v2953_v15 = vadd.f32 %v2952_v46, %v2864_v40 }
 0x23a   : > { %v3041_v30 = vpop.f32.mrf.mxu3 }
 0x23b   : > { %v3042_v36 = vadd.f32 %v3041_v30, %v2953_v15 }
 0x23c   : > { %v3135_v38 = vpop.f32.mrf.mxu0 }
 0x23d   : > { %v3131_v13 = vadd.f32 %v3130_v48, %v3042_v36  ;;  %2994 = vmatmul.bf16.gmra.mxu2 %v5286_v1 }
 0x23e   : > { %v2871_v18 = vpop.f32.mrf.mxu1 }
 0x23f   : > { %3203 = vst [vmem:[%s5489_s16 + $0x28] sm:$0xff] %v3131_v13  ;;  %v3234_v23 = vadd.f32 %v3233_v4, %v3131_v13  ;;  %v3273_v12 = vmul.f32 %v3131_v13, %v3131_v13  ;;  %3083 = vmatmul.bf16.gmra.mxu3 %v5245_v0  ;;  %v2869_v4 = vadd.f32 %v2868_v43, %v5279_v28 }
 0x240   : > { %v2955_v8 = vpop.f32.mrf.mxu2  ;;  %v2872_v13 = vadd.f32 %v2871_v18, %v5319_v21 }
 0x241   : > { %v3304_v24 = vadd.f32 %v3303_v9, %v3273_v12  ;;  %v2956_v26 = vadd.f32 %v2955_v8, %v2867_v34  ;;  %2910 = vmatmul.bf16.gmra.mxu1 %v5325_v56 }
 0x242   : > { %v3044_v53 = vpop.f32.mrf.mxu3 }
 0x243   : > { %v3045_v52 = vadd.f32 %v3044_v53, %v2956_v26 }
 0x244   : > { %v3138_v41 = vpop.f32.mrf.mxu0 }
 0x245   : > { %v3134_v48 = vadd.f32 %v3133_v32, %v3045_v52 }
 0x246   : > { %v2873_v1 = vpop.f32.mrf.mxu1 }
 0x247   : > { %3204 = vst [vmem:[%s5489_s16 + $0x30] sm:$0xff] %v3134_v48  ;;  %v3235_v54 = vadd.f32 %v3234_v23, %v3134_v48  ;;  %v3274_v6 = vmul.f32 %v3134_v48, %v3134_v48  ;;  %3177 = vmatmul.bf16.gmra.mxu0 %v5364_v17  ;;  %v2874_v53 = vadd.f32 %v2873_v1, %v5344_v3 }
 0x248   : > { %v2957_v40 = vpop.f32.mrf.mxu2 }
 0x249   : > { %v3305_v0 = vadd.f32 %v3304_v24, %v3274_v6  ;;  %v2958_v7 = vadd.f32 %v2957_v40, %v2869_v4 }
 0x24a   : > { %v3046_v46 = vpop.f32.mrf.mxu3 }
 0x24b   : > { %v3047_v9 = vadd.f32 %v3046_v46, %v2958_v7 }
 0x24c   : > { %v3140_v56 = vpop.f32.mrf.mxu0 }
 0x24d   : > { %v3136_v15 = vadd.f32 %v3135_v38, %v3047_v9  ;;  %2999 = vmatmul.bf16.gmra.mxu2 %v5348_v20  ;;  %v1566_v20 = vrot.slane %v5329_v39, 5 }
 0x24e   : > { %v2876_v32 = vpop.f32.mrf.mxu1 }
 0x24f   : > { %3205 = vst [vmem:[%s5489_s16 + $0x38] sm:$0xff] %v3136_v15  ;;  %v3236_v30 = vadd.f32 %v3235_v54, %v3136_v15  ;;  %v3275_v36 = vmul.f32 %v3136_v15, %v3136_v15  ;;  %3088 = vmatmul.bf16.gmra.mxu3 %v5314_v47  ;;  %v5713_v47 = vld [vmem:[#allocation38_spill] sm:$0xff]  ;;  %v1568_v48 = vrot.slane %v1566_v20, 4  ;;  %v2877_v46 = vadd.f32 %v2876_v32, %v5361_v33 }
 0x250   : > { %v2960_v28 = vpop.f32.mrf.mxu2  ;;  %v3468_v18 = vrot.slane %v5713_v47, 9 }
 0x251   : > { %v3306_v43 = vadd.f32 %v3305_v0, %v3275_v36  ;;  %v2961_v23 = vadd.f32 %v2960_v28, %v2872_v13  ;;  %2915 = vmatmul.bf16.gmra.mxu1 %v5364_v17  ;;  %v985_v36 = vld [vmem:[#allocation2 + $0xd0] sm:$0xf] }
 0x252   : > { %v3049_v12 = vpop.f32.mrf.mxu3  ;;  %v1567_v3 = vsel %vm4635_vm13, %v3468_v18, %v1566_v20  ;;  %v986_v18 = vld [vmem:[#allocation2 + $0xd4] sm:$0x1] }
 0x253   : > { %v3050_v58 = vadd.f32 %v3049_v12, %v2961_v23  ;;  %v1805_v15 = vunpack.c.l.b16 %v1567_v3 }
 0x254   : > { %v3143_v34 = vpop.f32.mrf.mxu0 }
 0x255   : > { %v3139_v38 = vadd.f32 %v3138_v41, %v3050_v58  ;;  %v1569_v41 = vrot.slane %v5356_v60, 5  ;;  %v984_v60 = vld [vmem:[#allocation2 + $0xcc] sm:$0xf]  ;;  %v1581_v58 = vshll.u32 %v985_v36, 16 }
 0x256   : > { %v2878_v8 = vpop.f32.mrf.mxu1  ;;  %v1572_v28 = vshrl.u32 %v984_v60, 16  ;;  %v1575_v23 = vshll.u32 %v984_v60, 16 }
 0x257   : > { %3206 = vst [vmem:[%s5489_s16 + $0x40] sm:$0xff] %v3139_v38  ;;  %v3237_v24 = vadd.f32 %v3236_v30, %v3139_v38  ;;  %v3276_v26 = vmul.f32 %v3139_v38, %v3139_v38  ;;  %3182 = vmatmul.bf16.gmra.mxu0 %v5392_v61  ;;  %v1570_v1 = vsel %vm4635_vm13, %v1568_v48, %v1569_v41  ;;  %v1585_v38 = vshrl.u32 %v985_v36, 16 }
 0x258   : > { %v2962_v21 = vpop.f32.mrf.mxu2  ;;  %v1577_v47 = vrot.slane %v1575_v23, 5  ;;  %v3469_v48 = vrot.slane %v984_v60, 9 }
 0x259   : > { %v3307_v52 = vadd.f32 %v3306_v43, %v3276_v26  ;;  %v2963_v17 = vadd.f32 %v2962_v21, %v2874_v53  ;;  %v2879_v21 = vadd.f32 %v2878_v8, %v5373_v19 }
 0x25a   : > { %v3051_v54 = vpop.f32.mrf.mxu3 }
 0x25b   : > { %v3052_v6 = vadd.f32 %v3051_v54, %v2963_v17  ;;  %v1587_v17 = vrot.slane %v1585_v38, 4 }
 0x25c   : > { %v3145_v4 = vpop.f32.mrf.mxu0 }
 0x25d   : > { %v3141_v39 = vadd.f32 %v3140_v56, %v3052_v6  ;;  %3004 = vmatmul.bf16.gmra.mxu2 %v5378_v29  ;;  %v1806_v56 = vunpack.c.l.b16 %v1570_v1  ;;  %v1603_v6 = vrot.slane %v986_v18, 5 }
 0x25e   : > { %v2881_v40 = vpop.f32.mrf.mxu1 }
 0x25f   : > { %3207 = vst [vmem:[%s5489_s16 + $0x48] sm:$0xff] %v3141_v39  ;;  %v3238_v0 = vadd.f32 %v3237_v24, %v3141_v39  ;;  %v3277_v7 = vmul.f32 %v3141_v39, %v3141_v39  ;;  %3093 = vmatmul.bf16.gmra.mxu3 %v5358_v62  ;;  %v1807_v12 = vpack.c.b16 %v1806_v56, %v1805_v15  ;;  %v1600_v62 = vrot.slane %v985_v36, 5 }
 0x260   : > { %v2965_v9 = vpop.f32.mrf.mxu2  ;;  %v1574_v24 = vrot.slane %v1572_v28, 4 }
 0x261   : > { %v3308_v29 = vadd.f32 %v3307_v52, %v3277_v7  ;;  %v2966_v30 = vadd.f32 %v2965_v9, %v2877_v46  ;;  %2920 = vmatmul.bf16.gmra.mxu1 %v5392_v61  ;;  %v1583_v52 = vrot.slane %v1581_v58, 5  ;;  %v1601_v8 = vsel %vm4635_vm13, %v3469_v48, %v1600_v62 }
 0x262   : > { %v3054_v13 = vpop.f32.mrf.mxu3  ;;  %v1578_v1 = vor.u32 %v1577_v47, %v1574_v24 }
 0x263   : > { %v3055_v43 = vadd.f32 %v3054_v13, %v2966_v30  ;;  %v1588_v7 = vor.u32 %v1587_v17, %v1583_v52  ;;  %v1817_v13 = vunpack.c.l.b16 %v1601_v8 }
 0x264   : > { %v3148_v32 = vpop.f32.mrf.mxu0  ;;  %v1579_v30 = vrot.slane %v1578_v1, 4 }
 0x265   : > { %v3144_v33 = vadd.f32 %v3143_v34, %v3055_v43  ;;  %v1602_v34 = vrot.slane %v1600_v62, 4 }
 0x266   : > { %v2883_v20 = vpop.f32.mrf.mxu1  ;;  %v1584_v38 = vsel %vm4602_vm10, %v1579_v30, %v1583_v52  ;;  %v3851_v52 = vld [vmem:[#allocation2 + $0xcc] sm:$0xff] }
 0x267   : > { %3208 = vst [vmem:[%s5489_s16 + $0x50] sm:$0xff] %v3144_v33  ;;  %v3239_v26 = vadd.f32 %v3238_v0, %v3144_v33  ;;  %v3278_v53 = vmul.f32 %v3144_v33, %v3144_v33  ;;  %3187 = vmatmul.bf16.gmra.mxu0 %v1807_v12  ;;  %v1591_v0 = vshll.u32 %v986_v18, 16  ;;  %v1604_v60 = vsel %vm4635_vm13, %v1602_v34, %v1603_v6 }
 0x268   : > { %v2967_v61 = vpop.f32.mrf.mxu2  ;;  %v1818_v28 = vunpack.c.l.b16 %v1604_v60  ;;  %v1813_v62 = vunpack.c.l.b16 %v1584_v38 }
 0x269   : > { %v3309_v41 = vadd.f32 %v3308_v29, %v3278_v53  ;;  %v2968_v54 = vadd.f32 %v2967_v61, %v2879_v21  ;;  %v2882_v29 = vadd.f32 %v2881_v40, %v5388_v37  ;;  %v2884_v21 = vadd.f32 %v2883_v20, %v5397_v11 }
 0x26a   : > { %v3056_v39 = vpop.f32.mrf.mxu3  ;;  %v1819_v40 = vpack.c.b16 %v1818_v28, %v1817_v13 }
 0x26b   : > { %v3057_v3 = vadd.f32 %v3056_v39, %v2968_v54 }
 0x26c   : > { %v3150_v19 = vpop.f32.mrf.mxu0 }
 0x26d   : > { %v3146_v46 = vadd.f32 %v3145_v4, %v3057_v3  ;;  %3009 = vmatmul.bf16.gmra.mxu2 %v5394_v35  ;;  %v1589_v4 = vrot.slane %v1588_v7, 4  ;;  %v1593_v35 = vrot.slane %v1591_v0, 5 }
 0x26e   : > { %v2886_v9 = vpop.f32.mrf.mxu1 }
 0x26f   : > { %3209 = vst [vmem:[%s5489_s16 + $0x58] sm:$0xff] %v3146_v46  ;;  %v3240_v15 = vadd.f32 %v3239_v26, %v3146_v46  ;;  %v3279_v56 = vmul.f32 %v3146_v46, %v3146_v46  ;;  %3098 = vmatmul.bf16.gmra.mxu3 %v5386_v45  ;;  %v1594_v37 = vsel %vm4602_vm10, %v1589_v4, %v1593_v35 }
 0x270   : > { %v2970_v36 = vpop.f32.mrf.mxu2  ;;  %v2887_v39 = vadd.f32 %v2886_v9, %v5402_v22 }
 0x271   : > { %v3310_v43 = vadd.f32 %v3309_v41, %v3279_v56  ;;  %v2971_v23 = vadd.f32 %v2970_v36, %v2882_v29  ;;  %2925 = vmatmul.bf16.gmra.mxu1 %v1807_v12  ;;  %v1814_v12 = vunpack.c.l.b16 %v1594_v37 }
 0x272   : > { %v3059_v10 = vpop.f32.mrf.mxu3 }
 0x273   : > { %v3060_v58 = vadd.f32 %v3059_v10, %v2971_v23  ;;  %v1815_v48 = vpack.c.b16 %v1814_v12, %v1813_v62 }
 0x274   : > { %v3153_v33 = vpop.f32.mrf.mxu0 }
 0x275   : > { %v3149_v45 = vadd.f32 %v3148_v32, %v3060_v58 }
 0x276   : > { %v2888_v24 = vpop.f32.mrf.mxu1 }
 0x277   : > { %3210 = vst [vmem:[%s5489_s16 + $0x60] sm:$0xff] %v3149_v45  ;;  %v3241_v26 = vadd.f32 %v3240_v15, %v3149_v45  ;;  %v3280_v53 = vmul.f32 %v3149_v45, %v3149_v45  ;;  %3192 = vmatmul.bf16.gmra.mxu0 %v1819_v40  ;;  %v2889_v15 = vadd.f32 %v2888_v24, %v5406_v5 }
 0x278   : > { %v2972_v47 = vpop.f32.mrf.mxu2 }
 0x279   : > { %v3311_v61 = vadd.f32 %v3310_v43, %v3280_v53  ;;  %v2973_v18 = vadd.f32 %v2972_v47, %v2884_v21 }
 0x27a   : > { %v3061_v17 = vpop.f32.mrf.mxu3 }
 0x27b   : > { %v3062_v16 = vadd.f32 %v3061_v17, %v2973_v18 }
 0x27c   : > { %v3155_v32 = vpop.f32.mrf.mxu0 }
 0x27d   : > { %v3151_v41 = vadd.f32 %v3150_v19, %v3062_v16  ;;  %3014 = vmatmul.bf16.gmra.mxu2 %v3851_v52 }
 0x27e   : > { %v2891_v54 = vpop.f32.mrf.mxu1 }
 0x27f   : > { %3211 = vst [vmem:[%s5489_s16 + $0x68] sm:$0xff] %v3151_v41  ;;  %v3242_v34 = vadd.f32 %v3241_v26, %v3151_v41  ;;  %v3281_v6 = vmul.f32 %v3151_v41, %v3151_v41  ;;  %3103 = vmatmul.bf16.gmra.mxu3 %v1815_v48  ;;  %v2892_v43 = vadd.f32 %v2891_v54, %v5411_v14 }
 0x280   : > { %v2975_v11 = vpop.f32.mrf.mxu2 }
 0x281   : > { %v3312_v20 = vadd.f32 %v3311_v61, %v3281_v6  ;;  %v2976_v3 = vadd.f32 %v2975_v11, %v2887_v39 }
 0x282   : > { %v3064_v1 = vpop.f32.mrf.mxu3 }
 0x283   : > { %v3065_v7 = vadd.f32 %v3064_v1, %v2976_v3 }
 0x284   : > { %v3158_v46 = vpop.f32.mrf.mxu0 }
 0x285   : > { %v3154_v0 = vadd.f32 %v3153_v33, %v3065_v7 }
 0x286   : > { %v2893_v8 = vpop.f32.mrf.mxu1 }
 0x287   : > { %3212 = vst [vmem:[%s5489_s16 + $0x70] sm:$0xff] %v3154_v0  ;;  %v3243_v19 = vadd.f32 %v3242_v34, %v3154_v0  ;;  %v3282_v60 = vmul.f32 %v3154_v0, %v3154_v0  ;;  %v2894_v24 = vadd.f32 %v2893_v8, %v5415_v63 }
 0x288   : > { %v2977_v56 = vpop.f32.mrf.mxu2 }
 0x289   : > { %v3313_v29 = vadd.f32 %v3312_v20, %v3282_v60  ;;  %v2978_v30 = vadd.f32 %v2977_v56, %v2889_v15 }
 0x28a   : > { %v3066_v36 = vpop.f32.mrf.mxu3 }
 0x28b   : > { %v3067_v22 = vadd.f32 %v3066_v36, %v2978_v30 }
 0x28c   : > { %v3160_v4 = vpop.f32.mrf.mxu0 }
 0x28d   : > { %v3156_v9 = vadd.f32 %v3155_v32, %v3067_v22 }
 0x28e   : > { %v2896_v35 = vpop.f32.mrf.mxu1 }
 0x28f   : > { %3213 = vst [vmem:[%s5489_s16 + $0x78] sm:$0xff] %v3156_v9  ;;  %v3244_v13 = vadd.f32 %v3243_v19, %v3156_v9  ;;  %v3283_v28 = vmul.f32 %v3156_v9, %v3156_v9  ;;  %v2897_v16 = vadd.f32 %v2896_v35, %v5420_v59 }
 0x290   : > { %v2980_v23 = vpop.f32.mrf.mxu2 }
 0x291   : > { %v3314_v10 = vadd.f32 %v3313_v29, %v3283_v28  ;;  %v2981_v58 = vadd.f32 %v2980_v23, %v2892_v43 }
 0x292   : > { %v3069_v38 = vpop.f32.mrf.mxu3 }
 0x293   : > { %v3070_v37 = vadd.f32 %v3069_v38, %v2981_v58 }
 0x294   : > { %v3163_v40 = vpop.f32.mrf.mxu0 }
 0x295   : > { %v3159_v5 = vadd.f32 %v3158_v46, %v3070_v37 }
 0x296   : > { %v2898_v45 = vpop.f32.mrf.mxu1 }
 0x297   : > { %3214 = vst [vmem:[%s5489_s16 + $0x80] sm:$0xff] %v3159_v5  ;;  %v3245_v33 = vadd.f32 %v3244_v13, %v3159_v5  ;;  %v3284_v62 = vmul.f32 %v3159_v5, %v3159_v5  ;;  %v2899_v3 = vadd.f32 %v2898_v45, %v5424_v25 }
 0x298   : > { %v2982_v26 = vpop.f32.mrf.mxu2 }
 0x299   : > { %v3315_v53 = vadd.f32 %v3314_v10, %v3284_v62  ;;  %v2983_v21 = vadd.f32 %v2982_v26, %v2894_v24 }
 0x29a   : > { %v3071_v12 = vpop.f32.mrf.mxu3 }
 0x29b   : > { %v3072_v47 = vadd.f32 %v3071_v12, %v2983_v21 }
 0x29c   : > { %v3165_v61 = vpop.f32.mrf.mxu0 }
 0x29d   : > { %v3161_v14 = vadd.f32 %v3160_v4, %v3072_v47 }
 0x29e   : > { %v2901_v18 = vpop.f32.mrf.mxu1 }
 0x29f   : > { %3215 = vst [vmem:[%s5489_s16 + $0x88] sm:$0xff] %v3161_v14  ;;  %v3246_v52 = vadd.f32 %v3245_v33, %v3161_v14  ;;  %v3285_v17 = vmul.f32 %v3161_v14, %v3161_v14  ;;  %v2902_v29 = vadd.f32 %v2901_v18, %v5429_v49 }
 0x2a0   : > { %v2985_v48 = vpop.f32.mrf.mxu2 }
 0x2a1   : > { %v3316_v41 = vadd.f32 %v3315_v53, %v3285_v17  ;;  %v2986_v32 = vadd.f32 %v2985_v48, %v2897_v16 }
 0x2a2   : > { %v3074_v54 = vpop.f32.mrf.mxu3 }
 0x2a3   : > { %v3075_v34 = vadd.f32 %v3074_v54, %v2986_v32 }
 0x2a4   : > { %v3168_v6 = vpop.f32.mrf.mxu0 }
 0x2a5   : > { %v3164_v63 = vadd.f32 %v3163_v40, %v3075_v34 }
 0x2a6   : > { %v2903_v39 = vpop.f32.mrf.mxu1 }
 0x2a7   : > { %3216 = vst [vmem:[%s5489_s16 + $0x90] sm:$0xff] %v3164_v63  ;;  %v3247_v11 = vadd.f32 %v3246_v52, %v3164_v63  ;;  %v3286_v20 = vmul.f32 %v3164_v63, %v3164_v63  ;;  %v2904_v23 = vadd.f32 %v2903_v39, %v5433_v55 }
 0x2a8   : > { %v2987_v1 = vpop.f32.mrf.mxu2 }
 0x2a9   : > { %v3317_v7 = vadd.f32 %v3316_v41, %v3286_v20  ;;  %v2988_v0 = vadd.f32 %v2987_v1, %v2899_v3 }
 0x2aa   : > { %v3076_v46 = vpop.f32.mrf.mxu3 }
 0x2ab   : > { %v3077_v8 = vadd.f32 %v3076_v46, %v2988_v0 }
 0x2ac   : > { %v3170_v19 = vpop.f32.mrf.mxu0 }
 0x2ad   : > { %v3166_v59 = vadd.f32 %v3165_v61, %v3077_v8 }
 0x2ae   : > { %v2906_v60 = vpop.f32.mrf.mxu1 }
 0x2af   : > { %3217 = vst [vmem:[%s5489_s16 + $0x98] sm:$0xff] %v3166_v59  ;;  %v3248_v15 = vadd.f32 %v3247_v11, %v3166_v59  ;;  %v3287_v56 = vmul.f32 %v3166_v59, %v3166_v59  ;;  %v2907_v24 = vadd.f32 %v2906_v60, %v5438_v2 }
 0x2b0   : > { %v2990_v30 = vpop.f32.mrf.mxu2 }
 0x2b1   : > { %v3318_v36 = vadd.f32 %v3317_v7, %v3287_v56  ;;  %v2991_v22 = vadd.f32 %v2990_v30, %v2902_v29 }
 0x2b2   : > { %v3079_v9 = vpop.f32.mrf.mxu3 }
 0x2b3   : > { %v3080_v4 = vadd.f32 %v3079_v9, %v2991_v22 }
 0x2b4   : > { %v3173_v35 = vpop.f32.mrf.mxu0 }
 0x2b5   : > { %v3169_v25 = vadd.f32 %v3168_v6, %v3080_v4 }
 0x2b6   : > { %v2908_v13 = vpop.f32.mrf.mxu1 }
 0x2b7   : > { %3218 = vst [vmem:[%s5489_s16 + $0xa0] sm:$0xff] %v3169_v25  ;;  %v3249_v28 = vadd.f32 %v3248_v15, %v3169_v25  ;;  %v3288_v43 = vmul.f32 %v3169_v25, %v3169_v25  ;;  %v2909_v52 = vadd.f32 %v2908_v13, %v5442_v44 }
 0x2b8   : > { %v2992_v10 = vpop.f32.mrf.mxu2 }
 0x2b9   : > { %v3319_v58 = vadd.f32 %v3318_v36, %v3288_v43  ;;  %v2993_v38 = vadd.f32 %v2992_v10, %v2904_v23 }
 0x2ba   : > { %v3081_v37 = vpop.f32.mrf.mxu3 }
 0x2bb   : > { %v3082_v49 = vadd.f32 %v3081_v37, %v2993_v38 }
 0x2bc   : > { %v3175_v40 = vpop.f32.mrf.mxu0 }
 0x2bd   : > { %v3171_v5 = vadd.f32 %v3170_v19, %v3082_v49 }
 0x2be   : > { %v2911_v45 = vpop.f32.mrf.mxu1 }
 0x2bf   : > { %3219 = vst [vmem:[%s5489_s16 + $0xa8] sm:$0xff] %v3171_v5  ;;  %v3250_v33 = vadd.f32 %v3249_v28, %v3171_v5  ;;  %v3289_v62 = vmul.f32 %v3171_v5, %v3171_v5  ;;  %v2912_v6 = vadd.f32 %v2911_v45, %v5447_v27 }
 0x2c0   : > { %v2995_v26 = vpop.f32.mrf.mxu2 }
 0x2c1   : > { %v3320_v53 = vadd.f32 %v3319_v58, %v3289_v62  ;;  %v2996_v21 = vadd.f32 %v2995_v26, %v2907_v24 }
 0x2c2   : > { %v3084_v12 = vpop.f32.mrf.mxu3 }
 0x2c3   : > { %v3085_v55 = vadd.f32 %v3084_v12, %v2996_v21 }
 0x2c4   : > { %v3178_v14 = vpop.f32.mrf.mxu0 }
 0x2c5   : > { %v3174_v47 = vadd.f32 %v3173_v35, %v3085_v55 }
 0x2c6   : > { %v2913_v16 = vpop.f32.mrf.mxu1 }
 0x2c7   : > { %3220 = vst [vmem:[%s5489_s16 + $0xb0] sm:$0xff] %v3174_v47  ;;  %v3251_v61 = vadd.f32 %v3250_v33, %v3174_v47  ;;  %v3290_v18 = vmul.f32 %v3174_v47, %v3174_v47  ;;  %v2914_v59 = vadd.f32 %v2913_v16, %v5451_v42 }
 0x2c8   : > { %v2997_v17 = vpop.f32.mrf.mxu2 }
 0x2c9   : > { %v3321_v48 = vadd.f32 %v3320_v53, %v3290_v18  ;;  %v2998_v41 = vadd.f32 %v2997_v17, %v2909_v52 }
 0x2ca   : > { %v3086_v32 = vpop.f32.mrf.mxu3 }
 0x2cb   : > { %v3087_v2 = vadd.f32 %v3086_v32, %v2998_v41 }
 0x2cc   : > { %v3180_v11 = vpop.f32.mrf.mxu0 }
 0x2cd   : > { %v3176_v54 = vadd.f32 %v3175_v40, %v3087_v2 }
 0x2ce   : > { %v2916_v44 = vpop.f32.mrf.mxu1 }
 0x2cf   : > { %3221 = vst [vmem:[%s5489_s16 + $0xb8] sm:$0xff] %v3176_v54  ;;  %v3252_v34 = vadd.f32 %v3251_v61, %v3176_v54  ;;  %v3291_v63 = vmul.f32 %v3176_v54, %v3176_v54  ;;  %v2917_v4 = vadd.f32 %v2916_v44, %v5456_v50 }
 0x2d0   : > { %v3000_v39 = vpop.f32.mrf.mxu2 }
 0x2d1   : > { %v3322_v20 = vadd.f32 %v3321_v48, %v3291_v63  ;;  %v3001_v3 = vadd.f32 %v3000_v39, %v2912_v6  ;;  %v5714_v39 = vld [vmem:[#allocation3_spill] sm:$0xff] }
 0x2d2   : > { %v3089_v1 = vpop.f32.mrf.mxu3 }
 0x2d3   : > { %v3090_v7 = vadd.f32 %v3089_v1, %v3001_v3 }
 0x2d4   : > { %v3183_v29 = vpop.f32.mrf.mxu0 }
 0x2d5   : > { %v3179_v0 = vadd.f32 %v3178_v14, %v3090_v7 }
 0x2d6   : > { %v2918_v30 = vpop.f32.mrf.mxu1 }
 0x2d7   : > { %3222 = vst [vmem:[%s5489_s16 + $0xc0] sm:$0xff] %v3179_v0  ;;  %v3253_v46 = vadd.f32 %v3252_v34, %v3179_v0  ;;  %v3292_v8 = vmul.f32 %v3179_v0, %v3179_v0  ;;  %v2919_v37 = vadd.f32 %v2918_v30, %v5460_v51 }
 0x2d8   : > { %v3002_v19 = vpop.f32.mrf.mxu2 }
 0x2d9   : > { %v3323_v60 = vadd.f32 %v3322_v20, %v3292_v8  ;;  %v3003_v15 = vadd.f32 %v3002_v19, %v2914_v59  ;;  %v5715_v19 = vld [vmem:[#allocation13_spill] sm:$0xff] }
 0x2da   : > { %v3091_v56 = vpop.f32.mrf.mxu3 }
 0x2db   : > { %v3092_v27 = vadd.f32 %v3091_v56, %v3003_v15 }
 0x2dc   : > { %v3185_v43 = vpop.f32.mrf.mxu0 }
 0x2dd   : > { %v3181_v36 = vadd.f32 %v3180_v11, %v3092_v27 }
 0x2de   : > { %v2921_v10 = vpop.f32.mrf.mxu1 }
 0x2df   : > { %3223 = vst [vmem:[%s5489_s16 + $0xc8] sm:$0xff] %v3181_v36  ;;  %v3254_v22 = vadd.f32 %v3253_v46, %v3181_v36  ;;  %v3293_v9 = vmul.f32 %v3181_v36, %v3181_v36  ;;  %v2922_v53 = vadd.f32 %v2921_v10, %v5465_v31 }
 0x2e0   : > { %v3005_v25 = vpop.f32.mrf.mxu2 }
 0x2e1   : > { %v3324_v35 = vadd.f32 %v3323_v60, %v3293_v9  ;;  %v3006_v13 = vadd.f32 %v3005_v25, %v2917_v4 }
 0x2e2   : > { %v3094_v28 = vpop.f32.mrf.mxu3 }
 0x2e3   : > { %v3095_v42 = vadd.f32 %v3094_v28, %v3006_v13 }
 0x2e4   : > { %v3188_v62 = vpop.f32.mrf.mxu0 }
 0x2e5   : > { %v3184_v23 = vadd.f32 %v3183_v29, %v3095_v42 }
 0x2e6   : > { %v2923_v12 = vpop.f32.mrf.mxu1 }
 0x2e7   : > { %3224 = vst [vmem:[%s5489_s16 + $0xd0] sm:$0xff] %v3184_v23  ;;  %v3255_v58 = vadd.f32 %v3254_v22, %v3184_v23  ;;  %v3294_v38 = vmul.f32 %v3184_v23, %v3184_v23  ;;  %v2924_v17 = vadd.f32 %v2923_v12, %v5469_v57 }
 0x2e8   : > { %v3007_v49 = vpop.f32.mrf.mxu2 }
 0x2e9   : > { %v3325_v5 = vadd.f32 %v3324_v35, %v3294_v38  ;;  %v3008_v40 = vadd.f32 %v3007_v49, %v2919_v37 }
 0x2ea   : > { %v3096_v45 = vpop.f32.mrf.mxu3 }
 0x2eb   : > { %v3097_v50 = vadd.f32 %v3096_v45, %v3008_v40 }
 0x2ec   : > { %v3190_v16 = vpop.f32.mrf.mxu0 }
 0x2ed   : > { %v3186_v33 = vadd.f32 %v3185_v43, %v3097_v50 }
 0x2ee   : > { %v2926_v31 = vpop.f32.mrf.mxu1 }
 0x2ef   : > { %3225 = vst [vmem:[%s5489_s16 + $0xd8] sm:$0xff] %v3186_v33  ;;  %v3256_v24 = vadd.f32 %v3255_v58, %v3186_v33  ;;  %v3295_v26 = vmul.f32 %v3186_v33, %v3186_v33  ;;  %v2927_v11 = vadd.f32 %v2926_v31, %v5714_v39 }
 0x2f0   : > { %v3010_v21 = vpop.f32.mrf.mxu2 }
 0x2f1   : > { %v3326_v55 = vadd.f32 %v3325_v5, %v3295_v26  ;;  %v3011_v47 = vadd.f32 %v3010_v21, %v2922_v53 }
 0x2f2   : > { %v3099_v14 = vpop.f32.mrf.mxu3 }
 0x2f3   : > { %v3100_v51 = vadd.f32 %v3099_v14, %v3011_v47 }
 0x2f4   : > { %v3193_v44 = vpop.f32.mrf.mxu0 }
 0x2f5   : > { %v3189_v61 = vadd.f32 %v3188_v62, %v3100_v51 }
 0x2f6   : > { %v2928_v0 = vpop.f32.mrf.mxu1 }
 0x2f7   : > { %3226 = vst [vmem:[%s5489_s16 + $0xe0] sm:$0xff] %v3189_v61  ;;  %v3257_v18 = vadd.f32 %v3256_v24, %v3189_v61  ;;  %v3296_v52 = vmul.f32 %v3189_v61, %v3189_v61  ;;  %v2929_v60 = vadd.f32 %v2928_v0, %v5715_v19 }
 0x2f8   : > { %v3012_v48 = vpop.f32.mrf.mxu2 }
 0x2f9   : > { %v3327_v41 = vadd.f32 %v3326_v55, %v3296_v52  ;;  %v3013_v32 = vadd.f32 %v3012_v48, %v2924_v17 }
 0x2fa   : > { %v3101_v2 = vpop.f32.mrf.mxu3 }
 0x2fb   : > { %v3102_v54 = vadd.f32 %v3101_v2, %v3013_v32 }
 0x2fc   : > { %v3195_v36 = vpop.f32.mrf.mxu0 }
 0x2fd   : > { %v3191_v34 = vadd.f32 %v3190_v16, %v3102_v54 }
 0x2ff   : > { %3227 = vst [vmem:[%s5489_s16 + $0xe8] sm:$0xff] %v3191_v34  ;;  %v3258_v63 = vadd.f32 %v3257_v18, %v3191_v34  ;;  %v3297_v6 = vmul.f32 %v3191_v34, %v3191_v34 }
 0x300   : > { %v3015_v20 = vpop.f32.mrf.mxu2 }
 0x301   : > { %v3328_v3 = vadd.f32 %v3327_v41, %v3297_v6  ;;  %v3016_v1 = vadd.f32 %v3015_v20, %v2927_v11 }
 0x302   : > { %v3104_v57 = vpop.f32.mrf.mxu3 }
 0x303   : > { %v3105_v7 = vadd.f32 %v3104_v57, %v3016_v1 }
 0x305   : > { %v3194_v46 = vadd.f32 %v3193_v44, %v3105_v7 }
 0x307   : > { %3228 = vst [vmem:[%s5489_s16 + $0xf0] sm:$0xff] %v3194_v46  ;;  %v3259_v8 = vadd.f32 %v3258_v63, %v3194_v46  ;;  %v3298_v59 = vmul.f32 %v3194_v46, %v3194_v46 }
 0x308   : > { %v3017_v15 = vpop.f32.mrf.mxu2 }
 0x309   : > { %v3329_v56 = vadd.f32 %v3328_v3, %v3298_v59  ;;  %v3018_v29 = vadd.f32 %v3017_v15, %v2929_v60 }
 0x30a   : > { %v3106_v27 = vpop.f32.mrf.mxu3 }
 0x30b   : > { %v3107_v30 = vadd.f32 %v3106_v27, %v3018_v29 }
 0x30d   : > { %v3196_v22 = vadd.f32 %v3195_v36, %v3107_v30 }
 0x30f   : > { %3229 = vst [vmem:[%s5489_s16 + $0xf8] sm:$0xff] %v3196_v22  ;;  %v3260_v9 = vadd.f32 %v3259_v8, %v3196_v22  ;;  %v3299_v4 = vmul.f32 %v3196_v22, %v3196_v22 }
 0x311   : > { %v3261_v25 = vrot.slane %v3260_v9, 4  ;;  %v3330_v35 = vadd.f32 %v3329_v56, %v3299_v4 }
 0x313   : > { %v3262_v13 = vadd.f32 %v3261_v25, %v3260_v9  ;;  %v3331_v28 = vrot.slane %v3330_v35, 4 }
 0x315   : > { %v3263_v42 = vrot.slane %v3262_v13, 2  ;;  %v3332_v43 = vadd.f32 %v3331_v28, %v3330_v35 }
 0x317   : > { %v3264_v23 = vadd.f32 %v3263_v42, %v3262_v13  ;;  %v3333_v10 = vrot.slane %v3332_v43, 2 }
 0x319   : > { %v3265_v58 = vrot.slane %v3264_v23, 1  ;;  %v3334_v38 = vadd.f32 %v3333_v10, %v3332_v43 }
 0x31b   : > { %v3266_v37 = vadd.f32 %v3265_v58, %v3264_v23  ;;  %v3335_v49 = vrot.slane %v3334_v38, 1 }
 0x31d   : > { %3267 = vst [vmem:[%s265_s18] sm:$0x1] %v3266_v37  ;;  %v3336_v5 = vadd.f32 %v3335_v49, %v3334_v38 }
 0x31f   : > { %3337 = vst [vmem:[%s268_s23] sm:$0x1] %v3336_v5 }
 0x320 PF: > { %s17_s21 = sadd.s32 1, %s3984_s21  }
 0x321   : > { %p14_p4 = scmp.ge.s32.totalorder %s17_s21, 4  }
 0x323   :  { %16 = sbr.rel (!%p14_p4) target bundleno = 1 (0x1), region = 91 }

</bundles_post_ra>
